<compile_context>
chip_gen: v7x
topology: tpu7x:2x2x1
jax: 0.10.0
libtpu: 0.0.40
codegen_flags: <defaults>
</compile_context>

<pallas_src>
import functools

import jax
import jax.numpy as jnp
from jax.experimental import pallas as pl
from jax.experimental.pallas import tpu as pltpu

ACT_DTYPE = jnp.bfloat16          # HBM activations & matmul operands
VMEM_LIMIT = 32 * 1024 * 1024     # explicit scoped-VMEM limit (safe on v5e/v6e/v7x)
BN_EPS = 1e-5                     # nn.BatchNorm2d default


# ----------------------------------------------------------------------------
# Fused encoder block:  Conv2d(3x3, pad=1, bias=False) -> BatchNorm2d -> ReLU
# Activation layout: 2-D, rows = n*H + h, lanes = w*C + c  (lane-dense, W*C=128).
# ----------------------------------------------------------------------------
def _encoder_block_kernel(x_ref, w_ref, fold_ref, unfold_ref, g_ref, b_ref,
                          o_ref, pad_ref, *, n_img, h, w, c_in, c_out, eps):
    hp = h + 2
    wcin = w * c_in
    wcout = w * c_out

    # ---- in-kernel zero padding of the input into the 2-D padded scratch ----
    pad_ref[...] = jnp.zeros_like(pad_ref)
    for n in range(n_img):
        pad_ref[n * hp + 1:n * hp + 1 + h, c_in:c_in + wcin] = (
            x_ref[n * h:(n + 1) * h, :].astype(jnp.float32))

    # ---- conv: 9 shifted-window bf16 matmuls per image, f32 accumulation ----
    accs = []
    s1 = jnp.zeros((1, wcout), jnp.float32)
    s2 = jnp.zeros((1, wcout), jnp.float32)
    for n in range(n_img):
        acc = jnp.zeros((h, wcout), jnp.float32)
        for dy in range(3):
            for dx in range(3):
                src = pad_ref[n * hp + dy:n * hp + dy + h,
                              dx * c_in:dx * c_in + wcin]
                acc = acc + jnp.dot(src.astype(ACT_DTYPE), w_ref[dy * 3 + dx],
                                    preferred_element_type=jnp.float32)
        accs.append(acc)
        s1 = s1 + jnp.sum(acc, axis=0, keepdims=True)
        s2 = s2 + jnp.sum(acc * acc, axis=0, keepdims=True)

    # ---- BatchNorm2d batch statistics (training mode, biased variance) ----
    # fold: (W*Cout, Cout) sums the W spatial copies of each channel; unfold = fold.T
    m = float(n_img * h * w)
    sum_c = jnp.dot(s1, fold_ref[...], preferred_element_type=jnp.float32)
    sumsq_c = jnp.dot(s2, fold_ref[...], preferred_element_type=jnp.float32)
    mean_c = sum_c * (1.0 / m)
    var_c = jnp.maximum(sumsq_c * (1.0 / m) - mean_c * mean_c, 0.0)
    scale_c = g_ref[...] * jax.lax.rsqrt(var_c + eps)
    shift_c = b_ref[...] - mean_c * scale_c
    scale_l = jnp.dot(scale_c, unfold_ref[...], preferred_element_type=jnp.float32)
    shift_l = jnp.dot(shift_c, unfold_ref[...], preferred_element_type=jnp.float32)

    # ---- fused BN-apply + ReLU + lane-dense store ----
    for n in range(n_img):
        y = jnp.maximum(accs[n] * scale_l + shift_l, 0.0)
        o_ref[n * h:(n + 1) * h, :] = y.astype(o_ref.dtype)


def encoder_block(x2d, lp, *, n_img, h, w, c_in, c_out):
    kernel = functools.partial(_encoder_block_kernel, n_img=n_img, h=h, w=w,
                               c_in=c_in, c_out=c_out, eps=BN_EPS)
    return pl.pallas_call(
        kernel,
        out_shape=jax.ShapeDtypeStruct((n_img * h, w * c_out), ACT_DTYPE),
        scratch_shapes=[pltpu.VMEM((n_img * (h + 2), (w + 2) * c_in),
                                   jnp.float32)],
        compiler_params=pltpu.CompilerParams(vmem_limit_bytes=VMEM_LIMIT),
    )(x2d, lp["wbd"], lp["fold"], lp["unfold"], lp["gamma"], lp["beta"])


# ----------------------------------------------------------------------------
# Fused FC head: Linear(fc_dim,512)+ReLU -> Linear(512,256)+ReLU -> Linear(256,C)
# ----------------------------------------------------------------------------
def _fc_head_kernel(x_ref, w1_ref, b1_ref, w2_ref, b2_ref, w3_ref, b3_ref,
                    o_ref, acc_ref):
    k = pl.program_id(0)

    @pl.when(k == 0)
    def _():
        acc_ref[...] = jnp.zeros_like(acc_ref)

    acc_ref[...] += jnp.dot(x_ref[...], w1_ref[...],
                            preferred_element_type=jnp.float32)

    @pl.when(k == pl.num_programs(0) - 1)
    def _():
        a1 = jnp.maximum(acc_ref[...] + b1_ref[...], 0.0)
        a2 = jnp.dot(a1.astype(ACT_DTYPE), w2_ref[...],
                     preferred_element_type=jnp.float32)
        a2 = jnp.maximum(a2 + b2_ref[...], 0.0)
        out = jnp.dot(a2.astype(ACT_DTYPE), w3_ref[...],
                      preferred_element_type=jnp.float32) + b3_ref[...]
        o_ref[...] = out.astype(o_ref.dtype)


def fc_head(flat, fc_params):
    (w1, b1), (w2, b2), (w3, b3) = fc_params
    bsz, k_dim = flat.shape
    n1 = w1.shape[1]
    n2 = w2.shape[1]
    n_cls = w3.shape[1]
    # K-tile fc1 so the largest weight never needs to be fully VMEM-resident
    # (matters for large fc_dim on v7x's 64 MiB VMEM); single step at these shapes.
    kt = 2048 if (k_dim > 2048 and k_dim % 2048 == 0) else k_dim
    nk = k_dim // kt
    return pl.pallas_call(
        _fc_head_kernel,
        out_shape=jax.ShapeDtypeStruct((bsz, n_cls), jnp.float32),
        grid_spec=pltpu.PrefetchScalarGridSpec(
            num_scalar_prefetch=0,
            grid=(nk,),
            in_specs=[
                pl.BlockSpec((bsz, kt), lambda k: (0, k)),
                pl.BlockSpec((kt, n1), lambda k: (k, 0)),
                pl.BlockSpec((1, n1), lambda k: (0, 0)),
                pl.BlockSpec((n1, n2), lambda k: (0, 0)),
                pl.BlockSpec((1, n2), lambda k: (0, 0)),
                pl.BlockSpec((n2, n_cls), lambda k: (0, 0)),
                pl.BlockSpec((1, n_cls), lambda k: (0, 0)),
            ],
            out_specs=pl.BlockSpec((bsz, n_cls), lambda k: (0, 0)),
            scratch_shapes=[pltpu.VMEM((bsz, n1), jnp.float32)],
        ),
        compiler_params=pltpu.CompilerParams(
            dimension_semantics=("arbitrary",),
            vmem_limit_bytes=VMEM_LIMIT),
    )(flat, w1, b1, w2, b2, w3, b3)


# ----------------------------------------------------------------------------
# Plain-JAX glue: 2x2 max-pool on the lane-dense 2-D activation.
# ----------------------------------------------------------------------------
def maxpool2x2(x2d, n_img, h, w, c):
    x = x2d.reshape(n_img, h, w, c)
    x = jnp.max(x.reshape(n_img, h // 2, 2, w // 2, 2, c), axis=(2, 4))
    return x.reshape(n_img * (h // 2), (w // 2) * c)


# ----------------------------------------------------------------------------
# Parameter init (deterministic, synthetic — shapes match the PyTorch module).
# All layout preparation (tap ordering, width-block-diagonal expansion, FC
# transposes / NHWC row permutation) happens once here, never in the forward.
# ----------------------------------------------------------------------------
def init_params(key, class_num, enc_dim, in_w, in_h):
    assert in_w % 8 == 0 and in_h % 8 == 0
    fc_dim = enc_dim * 4 * (in_h // 8) * (in_w // 8)
    layer_cfg = (
        (3, enc_dim, in_h, in_w),
        (enc_dim, enc_dim, in_h, in_w),
        (enc_dim, enc_dim * 2, in_h // 2, in_w // 2),
        (enc_dim * 2, enc_dim * 2, in_h // 2, in_w // 2),
        (enc_dim * 2, enc_dim * 4, in_h // 4, in_w // 4),
        (enc_dim * 4, enc_dim * 4, in_h // 4, in_w // 4),
    )
    keys = jax.random.split(key, 9)

    enc_params = []
    for i, (cin, cout, _, w) in enumerate(layer_cfg):
        w_oihw = 0.1 * jax.random.normal(keys[i], (cout, cin, 3, 3), jnp.float32)
        taps = jnp.transpose(w_oihw, (2, 3, 1, 0)).reshape(9, cin, cout)
        # width-block-diagonal weight: wbd[k, x*cin+ci, y*cout+co] = (x==y)*taps[k,ci,co]
        wbd = jnp.einsum("xy,kio->kxiyo", jnp.eye(w, dtype=jnp.float32),
                         taps).reshape(9, w * cin, w * cout)
        fold = jnp.tile(jnp.eye(cout, dtype=jnp.float32), (w, 1))   # (w*cout, cout)
        enc_params.append({
            "wbd": wbd.astype(ACT_DTYPE),
            "fold": fold,
            "unfold": jnp.transpose(fold),
            "gamma": jnp.ones((1, cout), jnp.float32),   # BatchNorm2d default init
            "beta": jnp.zeros((1, cout), jnp.float32),
        })

    h8, w8, c8 = in_h // 8, in_w // 8, enc_dim * 4
    # fc1 generated in PyTorch layout (512, fc_dim) with fc_dim indexed NCHW-flat,
    # then its rows are re-ordered to the NHWC-flat order the encoder produces and
    # transposed once: identical numerics to `out.view(-1, fc_dim)` + nn.Linear.
    w1_t = 0.05 * jax.random.normal(keys[6], (512, fc_dim), jnp.float32)
    w1 = jnp.transpose(w1_t.reshape(512, c8, h8, w8), (2, 3, 1, 0)).reshape(fc_dim, 512)
    w2 = jnp.transpose(0.05 * jax.random.normal(keys[7], (256, 512), jnp.float32))
    w3 = jnp.transpose(0.05 * jax.random.normal(keys[8], (class_num, 256),
                                                jnp.float32))
    fc_params = [
        (w1.astype(ACT_DTYPE), jnp.zeros((1, 512), jnp.float32)),
        (w2.astype(ACT_DTYPE), jnp.zeros((1, 256), jnp.float32)),
        (w3.astype(ACT_DTYPE), jnp.zeros((1, class_num), jnp.float32)),
    ]
    params = {"enc": enc_params, "fc": fc_params}
    cfg = (layer_cfg, fc_dim)          # static python ints (hashable)
    return params, cfg


# ----------------------------------------------------------------------------
# Forward pass (Classifier.forward)
# ----------------------------------------------------------------------------
@functools.partial(jax.jit, static_argnums=2)
def classifier_forward(params, x_nchw, cfg):
    layer_cfg, fc_dim = cfg
    n_img = x_nchw.shape[0]
    cin0, _, h0, w0 = layer_cfg[0]
    # NCHW -> NHWC -> lane-dense 2-D layout (rows = n*h + h_idx, lanes = w*c + c_idx)
    x = jnp.transpose(x_nchw, (0, 2, 3, 1)).astype(ACT_DTYPE)
    x = x.reshape(n_img * h0, w0 * cin0)
    for i, ((cin, cout, lh, lw), lp) in enumerate(zip(layer_cfg, params["enc"])):
        x = encoder_block(x, lp, n_img=n_img, h=lh, w=lw, c_in=cin, c_out=cout)
        if i in (1, 3, 5):                           # nn.MaxPool2d(2) positions
            x = maxpool2x2(x, n_img, lh, lw, cout)
    flat = x.reshape(n_img, fc_dim)                  # NHWC-flat; fc1 rows pre-permuted
    return fc_head(flat, params["fc"])


if __name__ == "__main__":
    class_num, enc_dim, in_w, in_h = 5, 8, 16, 16
    batch = 2

    key = jax.random.PRNGKey(0)
    k_param, k_input = jax.random.split(key)
    params, cfg = init_params(k_param, class_num, enc_dim, in_w, in_h)
    x = jax.random.normal(k_input, (batch, 3, in_h, in_w), dtype=jnp.float32)

    logits = classifier_forward(params, x, cfg)
    logits = jax.block_until_ready(logits)
    assert logits.shape == (batch, class_num), logits.shape
    assert jnp.all(jnp.isfinite(logits))
    print("KERNEL_OK")
</pallas_src>

<mosaic_0001>
module attributes {stable_mosaic.version = 11 : i64} {
  func.func @_encoder_block_kernel(%arg0: memref<32x128xbf16, #tpu.memory_space<vmem>>, %arg1: memref<9x128x128xbf16, #tpu.memory_space<vmem>>, %arg2: memref<128x8xf32, #tpu.memory_space<vmem>>, %arg3: memref<8x128xf32, #tpu.memory_space<vmem>>, %arg4: memref<1x8xf32, #tpu.memory_space<vmem>>, %arg5: memref<1x8xf32, #tpu.memory_space<vmem>>, %arg6: memref<32x128xbf16, #tpu.memory_space<vmem>>, %arg7: memref<36x144xf32, #tpu.memory_space<vmem>>) attributes {dimension_semantics = [], scalar_prefetch = 0 : i64, scratch_operands = 1 : i64, tpu.core_type = #tpu.core_type<tc>} {
    %cst = arith.constant 0.000000e+00 : f32
    %0 = vector.broadcast %cst : f32 to vector<36x144xf32>
    %c0 = arith.constant 0 : index
    %c0_0 = arith.constant 0 : index
    %1 = vector.load %arg7[%c0, %c0_0] : memref<36x144xf32, #tpu.memory_space<vmem>>, vector<36x144xf32>
    tpu.vector_store %arg7[%c0, %c0_0], %0 {strides = array<i32>} : memref<36x144xf32, #tpu.memory_space<vmem>>, vector<36x144xf32>,
    %c0_1 = arith.constant 0 : index
    %c0_2 = arith.constant 0 : index
    %2 = vector.load %arg0[%c0_1, %c0_2] : memref<32x128xbf16, #tpu.memory_space<vmem>>, vector<16x128xbf16>
    %3 = arith.extf %2 : vector<16x128xbf16> to vector<16x128xf32>
    %c1 = arith.constant 1 : index
    %c8 = arith.constant 8 : index
    %4 = vector.load %arg7[%c1, %c8] : memref<36x144xf32, #tpu.memory_space<vmem>>, vector<16x128xf32>
    tpu.vector_store %arg7[%c1, %c8], %3 {strides = array<i32>} : memref<36x144xf32, #tpu.memory_space<vmem>>, vector<16x128xf32>,
    %c16 = arith.constant 16 : index
    %c0_3 = arith.constant 0 : index
    %5 = vector.load %arg0[%c16, %c0_3] : memref<32x128xbf16, #tpu.memory_space<vmem>>, vector<16x128xbf16>
    %6 = arith.extf %5 : vector<16x128xbf16> to vector<16x128xf32>
    %c19 = arith.constant 19 : index
    %c8_4 = arith.constant 8 : index
    %7 = vector.load %arg7[%c19, %c8_4] : memref<36x144xf32, #tpu.memory_space<vmem>>, vector<16x128xf32>
    tpu.vector_store %arg7[%c19, %c8_4], %6 {strides = array<i32>} : memref<36x144xf32, #tpu.memory_space<vmem>>, vector<16x128xf32>,
    %cst_5 = arith.constant 0.000000e+00 : f32
    %8 = vector.broadcast %cst_5 : f32 to vector<1x128xf32>
    %cst_6 = arith.constant 0.000000e+00 : f32
    %9 = vector.broadcast %cst_6 : f32 to vector<1x128xf32>
    %cst_7 = arith.constant 0.000000e+00 : f32
    %10 = vector.broadcast %cst_7 : f32 to vector<16x128xf32>
    %c0_8 = arith.constant 0 : index
    %c0_9 = arith.constant 0 : index
    %11 = vector.load %arg7[%c0_8, %c0_9] : memref<36x144xf32, #tpu.memory_space<vmem>>, vector<16x128xf32>
    %12 = arith.truncf %11 : vector<16x128xf32> to vector<16x128xbf16>
    %c0_10 = arith.constant 0 : index
    %c0_11 = arith.constant 0 : index
    %c0_12 = arith.constant 0 : index
    %13 = vector.load %arg1[%c0_10, %c0_11, %c0_12] : memref<9x128x128xbf16, #tpu.memory_space<vmem>>, vector<1x128x128xbf16>
    %14 = vector.shape_cast %13 : vector<1x128x128xbf16> to vector<128x128xbf16>
    %cst_13 = arith.constant dense<0.000000e+00> : vector<16x128xf32>
    %15 = tpu.matmul %12, %14, %cst_13 {dimension_numbers = #tpu.dot_dimension_numbers<[1], [0], [0], [1], [0, 0, 1, 1], [], []>} : vector<16x128xbf16>, vector<128x128xbf16>, vector<16x128xf32> -> vector<16x128xf32>
    %16 = arith.addf %10, %15 : vector<16x128xf32>
    %c0_14 = arith.constant 0 : index
    %c8_15 = arith.constant 8 : index
    %17 = vector.load %arg7[%c0_14, %c8_15] : memref<36x144xf32, #tpu.memory_space<vmem>>, vector<16x128xf32>
    %18 = arith.truncf %17 : vector<16x128xf32> to vector<16x128xbf16>
    %c1_16 = arith.constant 1 : index
    %c0_17 = arith.constant 0 : index
    %c0_18 = arith.constant 0 : index
    %19 = vector.load %arg1[%c1_16, %c0_17, %c0_18] : memref<9x128x128xbf16, #tpu.memory_space<vmem>>, vector<1x128x128xbf16>
    %20 = vector.shape_cast %19 : vector<1x128x128xbf16> to vector<128x128xbf16>
    %cst_19 = arith.constant dense<0.000000e+00> : vector<16x128xf32>
    %21 = tpu.matmul %18, %20, %cst_19 {dimension_numbers = #tpu.dot_dimension_numbers<[1], [0], [0], [1], [0, 0, 1, 1], [], []>} : vector<16x128xbf16>, vector<128x128xbf16>, vector<16x128xf32> -> vector<16x128xf32>
    %22 = arith.addf %16, %21 : vector<16x128xf32>
    %c0_20 = arith.constant 0 : index
    %c16_21 = arith.constant 16 : index
    %23 = vector.load %arg7[%c0_20, %c16_21] : memref<36x144xf32, #tpu.memory_space<vmem>>, vector<16x128xf32>
    %24 = arith.truncf %23 : vector<16x128xf32> to vector<16x128xbf16>
    %c2 = arith.constant 2 : index
    %c0_22 = arith.constant 0 : index
    %c0_23 = arith.constant 0 : index
    %25 = vector.load %arg1[%c2, %c0_22, %c0_23] : memref<9x128x128xbf16, #tpu.memory_space<vmem>>, vector<1x128x128xbf16>
    %26 = vector.shape_cast %25 : vector<1x128x128xbf16> to vector<128x128xbf16>
    %cst_24 = arith.constant dense<0.000000e+00> : vector<16x128xf32>
    %27 = tpu.matmul %24, %26, %cst_24 {dimension_numbers = #tpu.dot_dimension_numbers<[1], [0], [0], [1], [0, 0, 1, 1], [], []>} : vector<16x128xbf16>, vector<128x128xbf16>, vector<16x128xf32> -> vector<16x128xf32>
    %28 = arith.addf %22, %27 : vector<16x128xf32>
    %c1_25 = arith.constant 1 : index
    %c0_26 = arith.constant 0 : index
    %29 = vector.load %arg7[%c1_25, %c0_26] : memref<36x144xf32, #tpu.memory_space<vmem>>, vector<16x128xf32>
    %30 = arith.truncf %29 : vector<16x128xf32> to vector<16x128xbf16>
    %c3 = arith.constant 3 : index
    %c0_27 = arith.constant 0 : index
    %c0_28 = arith.constant 0 : index
    %31 = vector.load %arg1[%c3, %c0_27, %c0_28] : memref<9x128x128xbf16, #tpu.memory_space<vmem>>, vector<1x128x128xbf16>
    %32 = vector.shape_cast %31 : vector<1x128x128xbf16> to vector<128x128xbf16>
    %cst_29 = arith.constant dense<0.000000e+00> : vector<16x128xf32>
    %33 = tpu.matmul %30, %32, %cst_29 {dimension_numbers = #tpu.dot_dimension_numbers<[1], [0], [0], [1], [0, 0, 1, 1], [], []>} : vector<16x128xbf16>, vector<128x128xbf16>, vector<16x128xf32> -> vector<16x128xf32>
    %34 = arith.addf %28, %33 : vector<16x128xf32>
    %c1_30 = arith.constant 1 : index
    %c8_31 = arith.constant 8 : index
    %35 = vector.load %arg7[%c1_30, %c8_31] : memref<36x144xf32, #tpu.memory_space<vmem>>, vector<16x128xf32>
    %36 = arith.truncf %35 : vector<16x128xf32> to vector<16x128xbf16>
    %c4 = arith.constant 4 : index
    %c0_32 = arith.constant 0 : index
    %c0_33 = arith.constant 0 : index
    %37 = vector.load %arg1[%c4, %c0_32, %c0_33] : memref<9x128x128xbf16, #tpu.memory_space<vmem>>, vector<1x128x128xbf16>
    %38 = vector.shape_cast %37 : vector<1x128x128xbf16> to vector<128x128xbf16>
    %cst_34 = arith.constant dense<0.000000e+00> : vector<16x128xf32>
    %39 = tpu.matmul %36, %38, %cst_34 {dimension_numbers = #tpu.dot_dimension_numbers<[1], [0], [0], [1], [0, 0, 1, 1], [], []>} : vector<16x128xbf16>, vector<128x128xbf16>, vector<16x128xf32> -> vector<16x128xf32>
    %40 = arith.addf %34, %39 : vector<16x128xf32>
    %c1_35 = arith.constant 1 : index
    %c16_36 = arith.constant 16 : index
    %41 = vector.load %arg7[%c1_35, %c16_36] : memref<36x144xf32, #tpu.memory_space<vmem>>, vector<16x128xf32>
    %42 = arith.truncf %41 : vector<16x128xf32> to vector<16x128xbf16>
    %c5 = arith.constant 5 : index
    %c0_37 = arith.constant 0 : index
    %c0_38 = arith.constant 0 : index
    %43 = vector.load %arg1[%c5, %c0_37, %c0_38] : memref<9x128x128xbf16, #tpu.memory_space<vmem>>, vector<1x128x128xbf16>
    %44 = vector.shape_cast %43 : vector<1x128x128xbf16> to vector<128x128xbf16>
    %cst_39 = arith.constant dense<0.000000e+00> : vector<16x128xf32>
    %45 = tpu.matmul %42, %44, %cst_39 {dimension_numbers = #tpu.dot_dimension_numbers<[1], [0], [0], [1], [0, 0, 1, 1], [], []>} : vector<16x128xbf16>, vector<128x128xbf16>, vector<16x128xf32> -> vector<16x128xf32>
    %46 = arith.addf %40, %45 : vector<16x128xf32>
    %c2_40 = arith.constant 2 : index
    %c0_41 = arith.constant 0 : index
    %47 = vector.load %arg7[%c2_40, %c0_41] : memref<36x144xf32, #tpu.memory_space<vmem>>, vector<16x128xf32>
    %48 = arith.truncf %47 : vector<16x128xf32> to vector<16x128xbf16>
    %c6 = arith.constant 6 : index
    %c0_42 = arith.constant 0 : index
    %c0_43 = arith.constant 0 : index
    %49 = vector.load %arg1[%c6, %c0_42, %c0_43] : memref<9x128x128xbf16, #tpu.memory_space<vmem>>, vector<1x128x128xbf16>
    %50 = vector.shape_cast %49 : vector<1x128x128xbf16> to vector<128x128xbf16>
    %cst_44 = arith.constant dense<0.000000e+00> : vector<16x128xf32>
    %51 = tpu.matmul %48, %50, %cst_44 {dimension_numbers = #tpu.dot_dimension_numbers<[1], [0], [0], [1], [0, 0, 1, 1], [], []>} : vector<16x128xbf16>, vector<128x128xbf16>, vector<16x128xf32> -> vector<16x128xf32>
    %52 = arith.addf %46, %51 : vector<16x128xf32>
    %c2_45 = arith.constant 2 : index
    %c8_46 = arith.constant 8 : index
    %53 = vector.load %arg7[%c2_45, %c8_46] : memref<36x144xf32, #tpu.memory_space<vmem>>, vector<16x128xf32>
    %54 = arith.truncf %53 : vector<16x128xf32> to vector<16x128xbf16>
    %c7 = arith.constant 7 : index
    %c0_47 = arith.constant 0 : index
    %c0_48 = arith.constant 0 : index
    %55 = vector.load %arg1[%c7, %c0_47, %c0_48] : memref<9x128x128xbf16, #tpu.memory_space<vmem>>, vector<1x128x128xbf16>
    %56 = vector.shape_cast %55 : vector<1x128x128xbf16> to vector<128x128xbf16>
    %cst_49 = arith.constant dense<0.000000e+00> : vector<16x128xf32>
    %57 = tpu.matmul %54, %56, %cst_49 {dimension_numbers = #tpu.dot_dimension_numbers<[1], [0], [0], [1], [0, 0, 1, 1], [], []>} : vector<16x128xbf16>, vector<128x128xbf16>, vector<16x128xf32> -> vector<16x128xf32>
    %58 = arith.addf %52, %57 : vector<16x128xf32>
    %c2_50 = arith.constant 2 : index
    %c16_51 = arith.constant 16 : index
    %59 = vector.load %arg7[%c2_50, %c16_51] : memref<36x144xf32, #tpu.memory_space<vmem>>, vector<16x128xf32>
    %60 = arith.truncf %59 : vector<16x128xf32> to vector<16x128xbf16>
    %c8_52 = arith.constant 8 : index
    %c0_53 = arith.constant 0 : index
    %c0_54 = arith.constant 0 : index
    %61 = vector.load %arg1[%c8_52, %c0_53, %c0_54] : memref<9x128x128xbf16, #tpu.memory_space<vmem>>, vector<1x128x128xbf16>
    %62 = vector.shape_cast %61 : vector<1x128x128xbf16> to vector<128x128xbf16>
    %cst_55 = arith.constant dense<0.000000e+00> : vector<16x128xf32>
    %63 = tpu.matmul %60, %62, %cst_55 {dimension_numbers = #tpu.dot_dimension_numbers<[1], [0], [0], [1], [0, 0, 1, 1], [], []>} : vector<16x128xbf16>, vector<128x128xbf16>, vector<16x128xf32> -> vector<16x128xf32>
    %64 = arith.addf %58, %63 : vector<16x128xf32>
    %cst_56 = arith.constant dense<0.000000e+00> : vector<128xf32>
    %65 = vector.multi_reduction <add>, %64, %cst_56 [0] : vector<16x128xf32> to vector<128xf32>
    %66 = vector.shape_cast %65 : vector<128xf32> to vector<1x128xf32>
    %67 = arith.addf %8, %66 : vector<1x128xf32>
    %68 = arith.mulf %64, %64 : vector<16x128xf32>
    %cst_57 = arith.constant dense<0.000000e+00> : vector<128xf32>
    %69 = vector.multi_reduction <add>, %68, %cst_57 [0] : vector<16x128xf32> to vector<128xf32>
    %70 = vector.shape_cast %69 : vector<128xf32> to vector<1x128xf32>
    %71 = arith.addf %9, %70 : vector<1x128xf32>
    %cst_58 = arith.constant 0.000000e+00 : f32
    %72 = vector.broadcast %cst_58 : f32 to vector<16x128xf32>
    %c18 = arith.constant 18 : index
    %c0_59 = arith.constant 0 : index
    %73 = vector.load %arg7[%c18, %c0_59] : memref<36x144xf32, #tpu.memory_space<vmem>>, vector<16x128xf32>
    %74 = arith.truncf %73 : vector<16x128xf32> to vector<16x128xbf16>
    %c0_60 = arith.constant 0 : index
    %c0_61 = arith.constant 0 : index
    %c0_62 = arith.constant 0 : index
    %75 = vector.load %arg1[%c0_60, %c0_61, %c0_62] : memref<9x128x128xbf16, #tpu.memory_space<vmem>>, vector<1x128x128xbf16>
    %76 = vector.shape_cast %75 : vector<1x128x128xbf16> to vector<128x128xbf16>
    %cst_63 = arith.constant dense<0.000000e+00> : vector<16x128xf32>
    %77 = tpu.matmul %74, %76, %cst_63 {dimension_numbers = #tpu.dot_dimension_numbers<[1], [0], [0], [1], [0, 0, 1, 1], [], []>} : vector<16x128xbf16>, vector<128x128xbf16>, vector<16x128xf32> -> vector<16x128xf32>
    %78 = arith.addf %72, %77 : vector<16x128xf32>
    %c18_64 = arith.constant 18 : index
    %c8_65 = arith.constant 8 : index
    %79 = vector.load %arg7[%c18_64, %c8_65] : memref<36x144xf32, #tpu.memory_space<vmem>>, vector<16x128xf32>
    %80 = arith.truncf %79 : vector<16x128xf32> to vector<16x128xbf16>
    %c1_66 = arith.constant 1 : index
    %c0_67 = arith.constant 0 : index
    %c0_68 = arith.constant 0 : index
    %81 = vector.load %arg1[%c1_66, %c0_67, %c0_68] : memref<9x128x128xbf16, #tpu.memory_space<vmem>>, vector<1x128x128xbf16>
    %82 = vector.shape_cast %81 : vector<1x128x128xbf16> to vector<128x128xbf16>
    %cst_69 = arith.constant dense<0.000000e+00> : vector<16x128xf32>
    %83 = tpu.matmul %80, %82, %cst_69 {dimension_numbers = #tpu.dot_dimension_numbers<[1], [0], [0], [1], [0, 0, 1, 1], [], []>} : vector<16x128xbf16>, vector<128x128xbf16>, vector<16x128xf32> -> vector<16x128xf32>
    %84 = arith.addf %78, %83 : vector<16x128xf32>
    %c18_70 = arith.constant 18 : index
    %c16_71 = arith.constant 16 : index
    %85 = vector.load %arg7[%c18_70, %c16_71] : memref<36x144xf32, #tpu.memory_space<vmem>>, vector<16x128xf32>
    %86 = arith.truncf %85 : vector<16x128xf32> to vector<16x128xbf16>
    %c2_72 = arith.constant 2 : index
    %c0_73 = arith.constant 0 : index
    %c0_74 = arith.constant 0 : index
    %87 = vector.load %arg1[%c2_72, %c0_73, %c0_74] : memref<9x128x128xbf16, #tpu.memory_space<vmem>>, vector<1x128x128xbf16>
    %88 = vector.shape_cast %87 : vector<1x128x128xbf16> to vector<128x128xbf16>
    %cst_75 = arith.constant dense<0.000000e+00> : vector<16x128xf32>
    %89 = tpu.matmul %86, %88, %cst_75 {dimension_numbers = #tpu.dot_dimension_numbers<[1], [0], [0], [1], [0, 0, 1, 1], [], []>} : vector<16x128xbf16>, vector<128x128xbf16>, vector<16x128xf32> -> vector<16x128xf32>
    %90 = arith.addf %84, %89 : vector<16x128xf32>
    %c19_76 = arith.constant 19 : index
    %c0_77 = arith.constant 0 : index
    %91 = vector.load %arg7[%c19_76, %c0_77] : memref<36x144xf32, #tpu.memory_space<vmem>>, vector<16x128xf32>
    %92 = arith.truncf %91 : vector<16x128xf32> to vector<16x128xbf16>
    %c3_78 = arith.constant 3 : index
    %c0_79 = arith.constant 0 : index
    %c0_80 = arith.constant 0 : index
    %93 = vector.load %arg1[%c3_78, %c0_79, %c0_80] : memref<9x128x128xbf16, #tpu.memory_space<vmem>>, vector<1x128x128xbf16>
    %94 = vector.shape_cast %93 : vector<1x128x128xbf16> to vector<128x128xbf16>
    %cst_81 = arith.constant dense<0.000000e+00> : vector<16x128xf32>
    %95 = tpu.matmul %92, %94, %cst_81 {dimension_numbers = #tpu.dot_dimension_numbers<[1], [0], [0], [1], [0, 0, 1, 1], [], []>} : vector<16x128xbf16>, vector<128x128xbf16>, vector<16x128xf32> -> vector<16x128xf32>
    %96 = arith.addf %90, %95 : vector<16x128xf32>
    %c19_82 = arith.constant 19 : index
    %c8_83 = arith.constant 8 : index
    %97 = vector.load %arg7[%c19_82, %c8_83] : memref<36x144xf32, #tpu.memory_space<vmem>>, vector<16x128xf32>
    %98 = arith.truncf %97 : vector<16x128xf32> to vector<16x128xbf16>
    %c4_84 = arith.constant 4 : index
    %c0_85 = arith.constant 0 : index
    %c0_86 = arith.constant 0 : index
    %99 = vector.load %arg1[%c4_84, %c0_85, %c0_86] : memref<9x128x128xbf16, #tpu.memory_space<vmem>>, vector<1x128x128xbf16>
    %100 = vector.shape_cast %99 : vector<1x128x128xbf16> to vector<128x128xbf16>
    %cst_87 = arith.constant dense<0.000000e+00> : vector<16x128xf32>
    %101 = tpu.matmul %98, %100, %cst_87 {dimension_numbers = #tpu.dot_dimension_numbers<[1], [0], [0], [1], [0, 0, 1, 1], [], []>} : vector<16x128xbf16>, vector<128x128xbf16>, vector<16x128xf32> -> vector<16x128xf32>
    %102 = arith.addf %96, %101 : vector<16x128xf32>
    %c19_88 = arith.constant 19 : index
    %c16_89 = arith.constant 16 : index
    %103 = vector.load %arg7[%c19_88, %c16_89] : memref<36x144xf32, #tpu.memory_space<vmem>>, vector<16x128xf32>
    %104 = arith.truncf %103 : vector<16x128xf32> to vector<16x128xbf16>
    %c5_90 = arith.constant 5 : index
    %c0_91 = arith.constant 0 : index
    %c0_92 = arith.constant 0 : index
    %105 = vector.load %arg1[%c5_90, %c0_91, %c0_92] : memref<9x128x128xbf16, #tpu.memory_space<vmem>>, vector<1x128x128xbf16>
    %106 = vector.shape_cast %105 : vector<1x128x128xbf16> to vector<128x128xbf16>
    %cst_93 = arith.constant dense<0.000000e+00> : vector<16x128xf32>
    %107 = tpu.matmul %104, %106, %cst_93 {dimension_numbers = #tpu.dot_dimension_numbers<[1], [0], [0], [1], [0, 0, 1, 1], [], []>} : vector<16x128xbf16>, vector<128x128xbf16>, vector<16x128xf32> -> vector<16x128xf32>
    %108 = arith.addf %102, %107 : vector<16x128xf32>
    %c20 = arith.constant 20 : index
    %c0_94 = arith.constant 0 : index
    %109 = vector.load %arg7[%c20, %c0_94] : memref<36x144xf32, #tpu.memory_space<vmem>>, vector<16x128xf32>
    %110 = arith.truncf %109 : vector<16x128xf32> to vector<16x128xbf16>
    %c6_95 = arith.constant 6 : index
    %c0_96 = arith.constant 0 : index
    %c0_97 = arith.constant 0 : index
    %111 = vector.load %arg1[%c6_95, %c0_96, %c0_97] : memref<9x128x128xbf16, #tpu.memory_space<vmem>>, vector<1x128x128xbf16>
    %112 = vector.shape_cast %111 : vector<1x128x128xbf16> to vector<128x128xbf16>
    %cst_98 = arith.constant dense<0.000000e+00> : vector<16x128xf32>
    %113 = tpu.matmul %110, %112, %cst_98 {dimension_numbers = #tpu.dot_dimension_numbers<[1], [0], [0], [1], [0, 0, 1, 1], [], []>} : vector<16x128xbf16>, vector<128x128xbf16>, vector<16x128xf32> -> vector<16x128xf32>
    %114 = arith.addf %108, %113 : vector<16x128xf32>
    %c20_99 = arith.constant 20 : index
    %c8_100 = arith.constant 8 : index
    %115 = vector.load %arg7[%c20_99, %c8_100] : memref<36x144xf32, #tpu.memory_space<vmem>>, vector<16x128xf32>
    %116 = arith.truncf %115 : vector<16x128xf32> to vector<16x128xbf16>
    %c7_101 = arith.constant 7 : index
    %c0_102 = arith.constant 0 : index
    %c0_103 = arith.constant 0 : index
    %117 = vector.load %arg1[%c7_101, %c0_102, %c0_103] : memref<9x128x128xbf16, #tpu.memory_space<vmem>>, vector<1x128x128xbf16>
    %118 = vector.shape_cast %117 : vector<1x128x128xbf16> to vector<128x128xbf16>
    %cst_104 = arith.constant dense<0.000000e+00> : vector<16x128xf32>
    %119 = tpu.matmul %116, %118, %cst_104 {dimension_numbers = #tpu.dot_dimension_numbers<[1], [0], [0], [1], [0, 0, 1, 1], [], []>} : vector<16x128xbf16>, vector<128x128xbf16>, vector<16x128xf32> -> vector<16x128xf32>
    %120 = arith.addf %114, %119 : vector<16x128xf32>
    %c20_105 = arith.constant 20 : index
    %c16_106 = arith.constant 16 : index
    %121 = vector.load %arg7[%c20_105, %c16_106] : memref<36x144xf32, #tpu.memory_space<vmem>>, vector<16x128xf32>
    %122 = arith.truncf %121 : vector<16x128xf32> to vector<16x128xbf16>
    %c8_107 = arith.constant 8 : index
    %c0_108 = arith.constant 0 : index
    %c0_109 = arith.constant 0 : index
    %123 = vector.load %arg1[%c8_107, %c0_108, %c0_109] : memref<9x128x128xbf16, #tpu.memory_space<vmem>>, vector<1x128x128xbf16>
    %124 = vector.shape_cast %123 : vector<1x128x128xbf16> to vector<128x128xbf16>
    %cst_110 = arith.constant dense<0.000000e+00> : vector<16x128xf32>
    %125 = tpu.matmul %122, %124, %cst_110 {dimension_numbers = #tpu.dot_dimension_numbers<[1], [0], [0], [1], [0, 0, 1, 1], [], []>} : vector<16x128xbf16>, vector<128x128xbf16>, vector<16x128xf32> -> vector<16x128xf32>
    %126 = arith.addf %120, %125 : vector<16x128xf32>
    %cst_111 = arith.constant dense<0.000000e+00> : vector<128xf32>
    %127 = vector.multi_reduction <add>, %126, %cst_111 [0] : vector<16x128xf32> to vector<128xf32>
    %128 = vector.shape_cast %127 : vector<128xf32> to vector<1x128xf32>
    %129 = arith.addf %67, %128 : vector<1x128xf32>
    %130 = arith.mulf %126, %126 : vector<16x128xf32>
    %cst_112 = arith.constant dense<0.000000e+00> : vector<128xf32>
    %131 = vector.multi_reduction <add>, %130, %cst_112 [0] : vector<16x128xf32> to vector<128xf32>
    %132 = vector.shape_cast %131 : vector<128xf32> to vector<1x128xf32>
    %133 = arith.addf %71, %132 : vector<1x128xf32>
    %c0_113 = arith.constant 0 : index
    %c0_114 = arith.constant 0 : index
    %134 = vector.load %arg2[%c0_113, %c0_114] : memref<128x8xf32, #tpu.memory_space<vmem>>, vector<128x8xf32>
    %cst_115 = arith.constant dense<0.000000e+00> : vector<1x8xf32>
    %135 = tpu.matmul %129, %134, %cst_115 {dimension_numbers = #tpu.dot_dimension_numbers<[1], [0], [0], [1], [0, 0, 1, 1], [], []>} : vector<1x128xf32>, vector<128x8xf32>, vector<1x8xf32> -> vector<1x8xf32>
    %c0_116 = arith.constant 0 : index
    %c0_117 = arith.constant 0 : index
    %136 = vector.load %arg2[%c0_116, %c0_117] : memref<128x8xf32, #tpu.memory_space<vmem>>, vector<128x8xf32>
    %cst_118 = arith.constant dense<0.000000e+00> : vector<1x8xf32>
    %137 = tpu.matmul %133, %136, %cst_118 {dimension_numbers = #tpu.dot_dimension_numbers<[1], [0], [0], [1], [0, 0, 1, 1], [], []>} : vector<1x128xf32>, vector<128x8xf32>, vector<1x8xf32> -> vector<1x8xf32>
    %cst_119 = arith.constant 0.001953125 : f32
    %138 = vector.broadcast %cst_119 : f32 to vector<1x8xf32>
    %139 = arith.mulf %135, %138 : vector<1x8xf32>
    %cst_120 = arith.constant 0.001953125 : f32
    %140 = vector.broadcast %cst_120 : f32 to vector<1x8xf32>
    %141 = arith.mulf %137, %140 : vector<1x8xf32>
    %142 = arith.mulf %139, %139 : vector<1x8xf32>
    %143 = arith.subf %141, %142 : vector<1x8xf32>
    %cst_121 = arith.constant 0.000000e+00 : f32
    %144 = vector.broadcast %cst_121 : f32 to vector<1x8xf32>
    %145 = arith.maximumf %143, %144 : vector<1x8xf32>
    %c0_122 = arith.constant 0 : index
    %c0_123 = arith.constant 0 : index
    %146 = vector.load %arg4[%c0_122, %c0_123] : memref<1x8xf32, #tpu.memory_space<vmem>>, vector<1x8xf32>
    %cst_124 = arith.constant 9.99999974E-6 : f32
    %147 = vector.broadcast %cst_124 : f32 to vector<1x8xf32>
    %148 = arith.addf %145, %147 : vector<1x8xf32>
    %149 = math.rsqrt %148 : vector<1x8xf32>
    %150 = arith.mulf %146, %149 : vector<1x8xf32>
    %c0_125 = arith.constant 0 : index
    %c0_126 = arith.constant 0 : index
    %151 = vector.load %arg5[%c0_125, %c0_126] : memref<1x8xf32, #tpu.memory_space<vmem>>, vector<1x8xf32>
    %152 = arith.mulf %139, %150 : vector<1x8xf32>
    %153 = arith.subf %151, %152 : vector<1x8xf32>
    %c0_127 = arith.constant 0 : index
    %c0_128 = arith.constant 0 : index
    %154 = vector.load %arg3[%c0_127, %c0_128] : memref<8x128xf32, #tpu.memory_space<vmem>>, vector<8x128xf32>
    %cst_129 = arith.constant dense<0.000000e+00> : vector<1x128xf32>
    %155 = tpu.matmul %150, %154, %cst_129 {dimension_numbers = #tpu.dot_dimension_numbers<[1], [0], [0], [1], [0, 0, 1, 1], [], []>} : vector<1x8xf32>, vector<8x128xf32>, vector<1x128xf32> -> vector<1x128xf32>
    %c0_130 = arith.constant 0 : index
    %c0_131 = arith.constant 0 : index
    %156 = vector.load %arg3[%c0_130, %c0_131] : memref<8x128xf32, #tpu.memory_space<vmem>>, vector<8x128xf32>
    %cst_132 = arith.constant dense<0.000000e+00> : vector<1x128xf32>
    %157 = tpu.matmul %153, %156, %cst_132 {dimension_numbers = #tpu.dot_dimension_numbers<[1], [0], [0], [1], [0, 0, 1, 1], [], []>} : vector<1x8xf32>, vector<8x128xf32>, vector<1x128xf32> -> vector<1x128xf32>
    %158 = vector.broadcast %155 : vector<1x128xf32> to vector<16x128xf32>
    %159 = arith.mulf %64, %158 : vector<16x128xf32>
    %160 = vector.broadcast %157 : vector<1x128xf32> to vector<16x128xf32>
    %161 = arith.addf %159, %160 : vector<16x128xf32>
    %cst_133 = arith.constant 0.000000e+00 : f32
    %162 = vector.broadcast %cst_133 : f32 to vector<16x128xf32>
    %163 = arith.maximumf %161, %162 : vector<16x128xf32>
    %164 = arith.truncf %163 : vector<16x128xf32> to vector<16x128xbf16>
    %c0_134 = arith.constant 0 : index
    %c0_135 = arith.constant 0 : index
    %165 = vector.load %arg6[%c0_134, %c0_135] : memref<32x128xbf16, #tpu.memory_space<vmem>>, vector<16x128xbf16>
    tpu.vector_store %arg6[%c0_134, %c0_135], %164 {strides = array<i32>} : memref<32x128xbf16, #tpu.memory_space<vmem>>, vector<16x128xbf16>,
    %166 = vector.broadcast %155 : vector<1x128xf32> to vector<16x128xf32>
    %167 = arith.mulf %126, %166 : vector<16x128xf32>
    %168 = vector.broadcast %157 : vector<1x128xf32> to vector<16x128xf32>
    %169 = arith.addf %167, %168 : vector<16x128xf32>
    %cst_136 = arith.constant 0.000000e+00 : f32
    %170 = vector.broadcast %cst_136 : f32 to vector<16x128xf32>
    %171 = arith.maximumf %169, %170 : vector<16x128xf32>
    %172 = arith.truncf %171 : vector<16x128xf32> to vector<16x128xbf16>
    %c16_137 = arith.constant 16 : index
    %c0_138 = arith.constant 0 : index
    %173 = vector.load %arg6[%c16_137, %c0_138] : memref<32x128xbf16, #tpu.memory_space<vmem>>, vector<16x128xbf16>
    tpu.vector_store %arg6[%c16_137, %c0_138], %172 {strides = array<i32>} : memref<32x128xbf16, #tpu.memory_space<vmem>>, vector<16x128xbf16>,
    return
  }
}

module attributes {stable_mosaic.version = 11 : i64} {
  func.func @_encoder_block_kernel(%arg0: memref<32x48xbf16, #tpu.memory_space<vmem>>, %arg1: memref<9x48x128xbf16, #tpu.memory_space<vmem>>, %arg2: memref<128x8xf32, #tpu.memory_space<vmem>>, %arg3: memref<8x128xf32, #tpu.memory_space<vmem>>, %arg4: memref<1x8xf32, #tpu.memory_space<vmem>>, %arg5: memref<1x8xf32, #tpu.memory_space<vmem>>, %arg6: memref<32x128xbf16, #tpu.memory_space<vmem>>, %arg7: memref<36x54xf32, #tpu.memory_space<vmem>>) attributes {dimension_semantics = [], scalar_prefetch = 0 : i64, scratch_operands = 1 : i64, tpu.core_type = #tpu.core_type<tc>} {
    %cst = arith.constant 0.000000e+00 : f32
    %0 = vector.broadcast %cst : f32 to vector<36x54xf32>
    %c0 = arith.constant 0 : index
    %c0_0 = arith.constant 0 : index
    %1 = vector.load %arg7[%c0, %c0_0] : memref<36x54xf32, #tpu.memory_space<vmem>>, vector<36x54xf32>
    tpu.vector_store %arg7[%c0, %c0_0], %0 {strides = array<i32>} : memref<36x54xf32, #tpu.memory_space<vmem>>, vector<36x54xf32>,
    %c0_1 = arith.constant 0 : index
    %c0_2 = arith.constant 0 : index
    %2 = vector.load %arg0[%c0_1, %c0_2] : memref<32x48xbf16, #tpu.memory_space<vmem>>, vector<16x48xbf16>
    %3 = arith.extf %2 : vector<16x48xbf16> to vector<16x48xf32>
    %c1 = arith.constant 1 : index
    %c3 = arith.constant 3 : index
    %4 = vector.load %arg7[%c1, %c3] : memref<36x54xf32, #tpu.memory_space<vmem>>, vector<16x48xf32>
    tpu.vector_store %arg7[%c1, %c3], %3 {strides = array<i32>} : memref<36x54xf32, #tpu.memory_space<vmem>>, vector<16x48xf32>,
    %c16 = arith.constant 16 : index
    %c0_3 = arith.constant 0 : index
    %5 = vector.load %arg0[%c16, %c0_3] : memref<32x48xbf16, #tpu.memory_space<vmem>>, vector<16x48xbf16>
    %6 = arith.extf %5 : vector<16x48xbf16> to vector<16x48xf32>
    %c19 = arith.constant 19 : index
    %c3_4 = arith.constant 3 : index
    %7 = vector.load %arg7[%c19, %c3_4] : memref<36x54xf32, #tpu.memory_space<vmem>>, vector<16x48xf32>
    tpu.vector_store %arg7[%c19, %c3_4], %6 {strides = array<i32>} : memref<36x54xf32, #tpu.memory_space<vmem>>, vector<16x48xf32>,
    %cst_5 = arith.constant 0.000000e+00 : f32
    %8 = vector.broadcast %cst_5 : f32 to vector<1x128xf32>
    %cst_6 = arith.constant 0.000000e+00 : f32
    %9 = vector.broadcast %cst_6 : f32 to vector<1x128xf32>
    %cst_7 = arith.constant 0.000000e+00 : f32
    %10 = vector.broadcast %cst_7 : f32 to vector<16x128xf32>
    %c0_8 = arith.constant 0 : index
    %c0_9 = arith.constant 0 : index
    %11 = vector.load %arg7[%c0_8, %c0_9] : memref<36x54xf32, #tpu.memory_space<vmem>>, vector<16x48xf32>
    %12 = arith.truncf %11 : vector<16x48xf32> to vector<16x48xbf16>
    %c0_10 = arith.constant 0 : index
    %c0_11 = arith.constant 0 : index
    %c0_12 = arith.constant 0 : index
    %13 = vector.load %arg1[%c0_10, %c0_11, %c0_12] : memref<9x48x128xbf16, #tpu.memory_space<vmem>>, vector<1x48x128xbf16>
    %14 = vector.shape_cast %13 : vector<1x48x128xbf16> to vector<48x128xbf16>
    %cst_13 = arith.constant dense<0.000000e+00> : vector<16x128xf32>
    %15 = tpu.matmul %12, %14, %cst_13 {dimension_numbers = #tpu.dot_dimension_numbers<[1], [0], [0], [1], [0, 0, 1, 1], [], []>} : vector<16x48xbf16>, vector<48x128xbf16>, vector<16x128xf32> -> vector<16x128xf32>
    %16 = arith.addf %10, %15 : vector<16x128xf32>
    %c0_14 = arith.constant 0 : index
    %c3_15 = arith.constant 3 : index
    %17 = vector.load %arg7[%c0_14, %c3_15] : memref<36x54xf32, #tpu.memory_space<vmem>>, vector<16x48xf32>
    %18 = arith.truncf %17 : vector<16x48xf32> to vector<16x48xbf16>
    %c1_16 = arith.constant 1 : index
    %c0_17 = arith.constant 0 : index
    %c0_18 = arith.constant 0 : index
    %19 = vector.load %arg1[%c1_16, %c0_17, %c0_18] : memref<9x48x128xbf16, #tpu.memory_space<vmem>>, vector<1x48x128xbf16>
    %20 = vector.shape_cast %19 : vector<1x48x128xbf16> to vector<48x128xbf16>
    %cst_19 = arith.constant dense<0.000000e+00> : vector<16x128xf32>
    %21 = tpu.matmul %18, %20, %cst_19 {dimension_numbers = #tpu.dot_dimension_numbers<[1], [0], [0], [1], [0, 0, 1, 1], [], []>} : vector<16x48xbf16>, vector<48x128xbf16>, vector<16x128xf32> -> vector<16x128xf32>
    %22 = arith.addf %16, %21 : vector<16x128xf32>
    %c0_20 = arith.constant 0 : index
    %c6 = arith.constant 6 : index
    %23 = vector.load %arg7[%c0_20, %c6] : memref<36x54xf32, #tpu.memory_space<vmem>>, vector<16x48xf32>
    %24 = arith.truncf %23 : vector<16x48xf32> to vector<16x48xbf16>
    %c2 = arith.constant 2 : index
    %c0_21 = arith.constant 0 : index
    %c0_22 = arith.constant 0 : index
    %25 = vector.load %arg1[%c2, %c0_21, %c0_22] : memref<9x48x128xbf16, #tpu.memory_space<vmem>>, vector<1x48x128xbf16>
    %26 = vector.shape_cast %25 : vector<1x48x128xbf16> to vector<48x128xbf16>
    %cst_23 = arith.constant dense<0.000000e+00> : vector<16x128xf32>
    %27 = tpu.matmul %24, %26, %cst_23 {dimension_numbers = #tpu.dot_dimension_numbers<[1], [0], [0], [1], [0, 0, 1, 1], [], []>} : vector<16x48xbf16>, vector<48x128xbf16>, vector<16x128xf32> -> vector<16x128xf32>
    %28 = arith.addf %22, %27 : vector<16x128xf32>
    %c1_24 = arith.constant 1 : index
    %c0_25 = arith.constant 0 : index
    %29 = vector.load %arg7[%c1_24, %c0_25] : memref<36x54xf32, #tpu.memory_space<vmem>>, vector<16x48xf32>
    %30 = arith.truncf %29 : vector<16x48xf32> to vector<16x48xbf16>
    %c3_26 = arith.constant 3 : index
    %c0_27 = arith.constant 0 : index
    %c0_28 = arith.constant 0 : index
    %31 = vector.load %arg1[%c3_26, %c0_27, %c0_28] : memref<9x48x128xbf16, #tpu.memory_space<vmem>>, vector<1x48x128xbf16>
    %32 = vector.shape_cast %31 : vector<1x48x128xbf16> to vector<48x128xbf16>
    %cst_29 = arith.constant dense<0.000000e+00> : vector<16x128xf32>
    %33 = tpu.matmul %30, %32, %cst_29 {dimension_numbers = #tpu.dot_dimension_numbers<[1], [0], [0], [1], [0, 0, 1, 1], [], []>} : vector<16x48xbf16>, vector<48x128xbf16>, vector<16x128xf32> -> vector<16x128xf32>
    %34 = arith.addf %28, %33 : vector<16x128xf32>
    %c1_30 = arith.constant 1 : index
    %c3_31 = arith.constant 3 : index
    %35 = vector.load %arg7[%c1_30, %c3_31] : memref<36x54xf32, #tpu.memory_space<vmem>>, vector<16x48xf32>
    %36 = arith.truncf %35 : vector<16x48xf32> to vector<16x48xbf16>
    %c4 = arith.constant 4 : index
    %c0_32 = arith.constant 0 : index
    %c0_33 = arith.constant 0 : index
    %37 = vector.load %arg1[%c4, %c0_32, %c0_33] : memref<9x48x128xbf16, #tpu.memory_space<vmem>>, vector<1x48x128xbf16>
    %38 = vector.shape_cast %37 : vector<1x48x128xbf16> to vector<48x128xbf16>
    %cst_34 = arith.constant dense<0.000000e+00> : vector<16x128xf32>
    %39 = tpu.matmul %36, %38, %cst_34 {dimension_numbers = #tpu.dot_dimension_numbers<[1], [0], [0], [1], [0, 0, 1, 1], [], []>} : vector<16x48xbf16>, vector<48x128xbf16>, vector<16x128xf32> -> vector<16x128xf32>
    %40 = arith.addf %34, %39 : vector<16x128xf32>
    %c1_35 = arith.constant 1 : index
    %c6_36 = arith.constant 6 : index
    %41 = vector.load %arg7[%c1_35, %c6_36] : memref<36x54xf32, #tpu.memory_space<vmem>>, vector<16x48xf32>
    %42 = arith.truncf %41 : vector<16x48xf32> to vector<16x48xbf16>
    %c5 = arith.constant 5 : index
    %c0_37 = arith.constant 0 : index
    %c0_38 = arith.constant 0 : index
    %43 = vector.load %arg1[%c5, %c0_37, %c0_38] : memref<9x48x128xbf16, #tpu.memory_space<vmem>>, vector<1x48x128xbf16>
    %44 = vector.shape_cast %43 : vector<1x48x128xbf16> to vector<48x128xbf16>
    %cst_39 = arith.constant dense<0.000000e+00> : vector<16x128xf32>
    %45 = tpu.matmul %42, %44, %cst_39 {dimension_numbers = #tpu.dot_dimension_numbers<[1], [0], [0], [1], [0, 0, 1, 1], [], []>} : vector<16x48xbf16>, vector<48x128xbf16>, vector<16x128xf32> -> vector<16x128xf32>
    %46 = arith.addf %40, %45 : vector<16x128xf32>
    %c2_40 = arith.constant 2 : index
    %c0_41 = arith.constant 0 : index
    %47 = vector.load %arg7[%c2_40, %c0_41] : memref<36x54xf32, #tpu.memory_space<vmem>>, vector<16x48xf32>
    %48 = arith.truncf %47 : vector<16x48xf32> to vector<16x48xbf16>
    %c6_42 = arith.constant 6 : index
    %c0_43 = arith.constant 0 : index
    %c0_44 = arith.constant 0 : index
    %49 = vector.load %arg1[%c6_42, %c0_43, %c0_44] : memref<9x48x128xbf16, #tpu.memory_space<vmem>>, vector<1x48x128xbf16>
    %50 = vector.shape_cast %49 : vector<1x48x128xbf16> to vector<48x128xbf16>
    %cst_45 = arith.constant dense<0.000000e+00> : vector<16x128xf32>
    %51 = tpu.matmul %48, %50, %cst_45 {dimension_numbers = #tpu.dot_dimension_numbers<[1], [0], [0], [1], [0, 0, 1, 1], [], []>} : vector<16x48xbf16>, vector<48x128xbf16>, vector<16x128xf32> -> vector<16x128xf32>
    %52 = arith.addf %46, %51 : vector<16x128xf32>
    %c2_46 = arith.constant 2 : index
    %c3_47 = arith.constant 3 : index
    %53 = vector.load %arg7[%c2_46, %c3_47] : memref<36x54xf32, #tpu.memory_space<vmem>>, vector<16x48xf32>
    %54 = arith.truncf %53 : vector<16x48xf32> to vector<16x48xbf16>
    %c7 = arith.constant 7 : index
    %c0_48 = arith.constant 0 : index
    %c0_49 = arith.constant 0 : index
    %55 = vector.load %arg1[%c7, %c0_48, %c0_49] : memref<9x48x128xbf16, #tpu.memory_space<vmem>>, vector<1x48x128xbf16>
    %56 = vector.shape_cast %55 : vector<1x48x128xbf16> to vector<48x128xbf16>
    %cst_50 = arith.constant dense<0.000000e+00> : vector<16x128xf32>
    %57 = tpu.matmul %54, %56, %cst_50 {dimension_numbers = #tpu.dot_dimension_numbers<[1], [0], [0], [1], [0, 0, 1, 1], [], []>} : vector<16x48xbf16>, vector<48x128xbf16>, vector<16x128xf32> -> vector<16x128xf32>
    %58 = arith.addf %52, %57 : vector<16x128xf32>
    %c2_51 = arith.constant 2 : index
    %c6_52 = arith.constant 6 : index
    %59 = vector.load %arg7[%c2_51, %c6_52] : memref<36x54xf32, #tpu.memory_space<vmem>>, vector<16x48xf32>
    %60 = arith.truncf %59 : vector<16x48xf32> to vector<16x48xbf16>
    %c8 = arith.constant 8 : index
    %c0_53 = arith.constant 0 : index
    %c0_54 = arith.constant 0 : index
    %61 = vector.load %arg1[%c8, %c0_53, %c0_54] : memref<9x48x128xbf16, #tpu.memory_space<vmem>>, vector<1x48x128xbf16>
    %62 = vector.shape_cast %61 : vector<1x48x128xbf16> to vector<48x128xbf16>
    %cst_55 = arith.constant dense<0.000000e+00> : vector<16x128xf32>
    %63 = tpu.matmul %60, %62, %cst_55 {dimension_numbers = #tpu.dot_dimension_numbers<[1], [0], [0], [1], [0, 0, 1, 1], [], []>} : vector<16x48xbf16>, vector<48x128xbf16>, vector<16x128xf32> -> vector<16x128xf32>
    %64 = arith.addf %58, %63 : vector<16x128xf32>
    %cst_56 = arith.constant dense<0.000000e+00> : vector<128xf32>
    %65 = vector.multi_reduction <add>, %64, %cst_56 [0] : vector<16x128xf32> to vector<128xf32>
    %66 = vector.shape_cast %65 : vector<128xf32> to vector<1x128xf32>
    %67 = arith.addf %8, %66 : vector<1x128xf32>
    %68 = arith.mulf %64, %64 : vector<16x128xf32>
    %cst_57 = arith.constant dense<0.000000e+00> : vector<128xf32>
    %69 = vector.multi_reduction <add>, %68, %cst_57 [0] : vector<16x128xf32> to vector<128xf32>
    %70 = vector.shape_cast %69 : vector<128xf32> to vector<1x128xf32>
    %71 = arith.addf %9, %70 : vector<1x128xf32>
    %cst_58 = arith.constant 0.000000e+00 : f32
    %72 = vector.broadcast %cst_58 : f32 to vector<16x128xf32>
    %c18 = arith.constant 18 : index
    %c0_59 = arith.constant 0 : index
    %73 = vector.load %arg7[%c18, %c0_59] : memref<36x54xf32, #tpu.memory_space<vmem>>, vector<16x48xf32>
    %74 = arith.truncf %73 : vector<16x48xf32> to vector<16x48xbf16>
    %c0_60 = arith.constant 0 : index
    %c0_61 = arith.constant 0 : index
    %c0_62 = arith.constant 0 : index
    %75 = vector.load %arg1[%c0_60, %c0_61, %c0_62] : memref<9x48x128xbf16, #tpu.memory_space<vmem>>, vector<1x48x128xbf16>
    %76 = vector.shape_cast %75 : vector<1x48x128xbf16> to vector<48x128xbf16>
    %cst_63 = arith.constant dense<0.000000e+00> : vector<16x128xf32>
    %77 = tpu.matmul %74, %76, %cst_63 {dimension_numbers = #tpu.dot_dimension_numbers<[1], [0], [0], [1], [0, 0, 1, 1], [], []>} : vector<16x48xbf16>, vector<48x128xbf16>, vector<16x128xf32> -> vector<16x128xf32>
    %78 = arith.addf %72, %77 : vector<16x128xf32>
    %c18_64 = arith.constant 18 : index
    %c3_65 = arith.constant 3 : index
    %79 = vector.load %arg7[%c18_64, %c3_65] : memref<36x54xf32, #tpu.memory_space<vmem>>, vector<16x48xf32>
    %80 = arith.truncf %79 : vector<16x48xf32> to vector<16x48xbf16>
    %c1_66 = arith.constant 1 : index
    %c0_67 = arith.constant 0 : index
    %c0_68 = arith.constant 0 : index
    %81 = vector.load %arg1[%c1_66, %c0_67, %c0_68] : memref<9x48x128xbf16, #tpu.memory_space<vmem>>, vector<1x48x128xbf16>
    %82 = vector.shape_cast %81 : vector<1x48x128xbf16> to vector<48x128xbf16>
    %cst_69 = arith.constant dense<0.000000e+00> : vector<16x128xf32>
    %83 = tpu.matmul %80, %82, %cst_69 {dimension_numbers = #tpu.dot_dimension_numbers<[1], [0], [0], [1], [0, 0, 1, 1], [], []>} : vector<16x48xbf16>, vector<48x128xbf16>, vector<16x128xf32> -> vector<16x128xf32>
    %84 = arith.addf %78, %83 : vector<16x128xf32>
    %c18_70 = arith.constant 18 : index
    %c6_71 = arith.constant 6 : index
    %85 = vector.load %arg7[%c18_70, %c6_71] : memref<36x54xf32, #tpu.memory_space<vmem>>, vector<16x48xf32>
    %86 = arith.truncf %85 : vector<16x48xf32> to vector<16x48xbf16>
    %c2_72 = arith.constant 2 : index
    %c0_73 = arith.constant 0 : index
    %c0_74 = arith.constant 0 : index
    %87 = vector.load %arg1[%c2_72, %c0_73, %c0_74] : memref<9x48x128xbf16, #tpu.memory_space<vmem>>, vector<1x48x128xbf16>
    %88 = vector.shape_cast %87 : vector<1x48x128xbf16> to vector<48x128xbf16>
    %cst_75 = arith.constant dense<0.000000e+00> : vector<16x128xf32>
    %89 = tpu.matmul %86, %88, %cst_75 {dimension_numbers = #tpu.dot_dimension_numbers<[1], [0], [0], [1], [0, 0, 1, 1], [], []>} : vector<16x48xbf16>, vector<48x128xbf16>, vector<16x128xf32> -> vector<16x128xf32>
    %90 = arith.addf %84, %89 : vector<16x128xf32>
    %c19_76 = arith.constant 19 : index
    %c0_77 = arith.constant 0 : index
    %91 = vector.load %arg7[%c19_76, %c0_77] : memref<36x54xf32, #tpu.memory_space<vmem>>, vector<16x48xf32>
    %92 = arith.truncf %91 : vector<16x48xf32> to vector<16x48xbf16>
    %c3_78 = arith.constant 3 : index
    %c0_79 = arith.constant 0 : index
    %c0_80 = arith.constant 0 : index
    %93 = vector.load %arg1[%c3_78, %c0_79, %c0_80] : memref<9x48x128xbf16, #tpu.memory_space<vmem>>, vector<1x48x128xbf16>
    %94 = vector.shape_cast %93 : vector<1x48x128xbf16> to vector<48x128xbf16>
    %cst_81 = arith.constant dense<0.000000e+00> : vector<16x128xf32>
    %95 = tpu.matmul %92, %94, %cst_81 {dimension_numbers = #tpu.dot_dimension_numbers<[1], [0], [0], [1], [0, 0, 1, 1], [], []>} : vector<16x48xbf16>, vector<48x128xbf16>, vector<16x128xf32> -> vector<16x128xf32>
    %96 = arith.addf %90, %95 : vector<16x128xf32>
    %c19_82 = arith.constant 19 : index
    %c3_83 = arith.constant 3 : index
    %97 = vector.load %arg7[%c19_82, %c3_83] : memref<36x54xf32, #tpu.memory_space<vmem>>, vector<16x48xf32>
    %98 = arith.truncf %97 : vector<16x48xf32> to vector<16x48xbf16>
    %c4_84 = arith.constant 4 : index
    %c0_85 = arith.constant 0 : index
    %c0_86 = arith.constant 0 : index
    %99 = vector.load %arg1[%c4_84, %c0_85, %c0_86] : memref<9x48x128xbf16, #tpu.memory_space<vmem>>, vector<1x48x128xbf16>
    %100 = vector.shape_cast %99 : vector<1x48x128xbf16> to vector<48x128xbf16>
    %cst_87 = arith.constant dense<0.000000e+00> : vector<16x128xf32>
    %101 = tpu.matmul %98, %100, %cst_87 {dimension_numbers = #tpu.dot_dimension_numbers<[1], [0], [0], [1], [0, 0, 1, 1], [], []>} : vector<16x48xbf16>, vector<48x128xbf16>, vector<16x128xf32> -> vector<16x128xf32>
    %102 = arith.addf %96, %101 : vector<16x128xf32>
    %c19_88 = arith.constant 19 : index
    %c6_89 = arith.constant 6 : index
    %103 = vector.load %arg7[%c19_88, %c6_89] : memref<36x54xf32, #tpu.memory_space<vmem>>, vector<16x48xf32>
    %104 = arith.truncf %103 : vector<16x48xf32> to vector<16x48xbf16>
    %c5_90 = arith.constant 5 : index
    %c0_91 = arith.constant 0 : index
    %c0_92 = arith.constant 0 : index
    %105 = vector.load %arg1[%c5_90, %c0_91, %c0_92] : memref<9x48x128xbf16, #tpu.memory_space<vmem>>, vector<1x48x128xbf16>
    %106 = vector.shape_cast %105 : vector<1x48x128xbf16> to vector<48x128xbf16>
    %cst_93 = arith.constant dense<0.000000e+00> : vector<16x128xf32>
    %107 = tpu.matmul %104, %106, %cst_93 {dimension_numbers = #tpu.dot_dimension_numbers<[1], [0], [0], [1], [0, 0, 1, 1], [], []>} : vector<16x48xbf16>, vector<48x128xbf16>, vector<16x128xf32> -> vector<16x128xf32>
    %108 = arith.addf %102, %107 : vector<16x128xf32>
    %c20 = arith.constant 20 : index
    %c0_94 = arith.constant 0 : index
    %109 = vector.load %arg7[%c20, %c0_94] : memref<36x54xf32, #tpu.memory_space<vmem>>, vector<16x48xf32>
    %110 = arith.truncf %109 : vector<16x48xf32> to vector<16x48xbf16>
    %c6_95 = arith.constant 6 : index
    %c0_96 = arith.constant 0 : index
    %c0_97 = arith.constant 0 : index
    %111 = vector.load %arg1[%c6_95, %c0_96, %c0_97] : memref<9x48x128xbf16, #tpu.memory_space<vmem>>, vector<1x48x128xbf16>
    %112 = vector.shape_cast %111 : vector<1x48x128xbf16> to vector<48x128xbf16>
    %cst_98 = arith.constant dense<0.000000e+00> : vector<16x128xf32>
    %113 = tpu.matmul %110, %112, %cst_98 {dimension_numbers = #tpu.dot_dimension_numbers<[1], [0], [0], [1], [0, 0, 1, 1], [], []>} : vector<16x48xbf16>, vector<48x128xbf16>, vector<16x128xf32> -> vector<16x128xf32>
    %114 = arith.addf %108, %113 : vector<16x128xf32>
    %c20_99 = arith.constant 20 : index
    %c3_100 = arith.constant 3 : index
    %115 = vector.load %arg7[%c20_99, %c3_100] : memref<36x54xf32, #tpu.memory_space<vmem>>, vector<16x48xf32>
    %116 = arith.truncf %115 : vector<16x48xf32> to vector<16x48xbf16>
    %c7_101 = arith.constant 7 : index
    %c0_102 = arith.constant 0 : index
    %c0_103 = arith.constant 0 : index
    %117 = vector.load %arg1[%c7_101, %c0_102, %c0_103] : memref<9x48x128xbf16, #tpu.memory_space<vmem>>, vector<1x48x128xbf16>
    %118 = vector.shape_cast %117 : vector<1x48x128xbf16> to vector<48x128xbf16>
    %cst_104 = arith.constant dense<0.000000e+00> : vector<16x128xf32>
    %119 = tpu.matmul %116, %118, %cst_104 {dimension_numbers = #tpu.dot_dimension_numbers<[1], [0], [0], [1], [0, 0, 1, 1], [], []>} : vector<16x48xbf16>, vector<48x128xbf16>, vector<16x128xf32> -> vector<16x128xf32>
    %120 = arith.addf %114, %119 : vector<16x128xf32>
    %c20_105 = arith.constant 20 : index
    %c6_106 = arith.constant 6 : index
    %121 = vector.load %arg7[%c20_105, %c6_106] : memref<36x54xf32, #tpu.memory_space<vmem>>, vector<16x48xf32>
    %122 = arith.truncf %121 : vector<16x48xf32> to vector<16x48xbf16>
    %c8_107 = arith.constant 8 : index
    %c0_108 = arith.constant 0 : index
    %c0_109 = arith.constant 0 : index
    %123 = vector.load %arg1[%c8_107, %c0_108, %c0_109] : memref<9x48x128xbf16, #tpu.memory_space<vmem>>, vector<1x48x128xbf16>
    %124 = vector.shape_cast %123 : vector<1x48x128xbf16> to vector<48x128xbf16>
    %cst_110 = arith.constant dense<0.000000e+00> : vector<16x128xf32>
    %125 = tpu.matmul %122, %124, %cst_110 {dimension_numbers = #tpu.dot_dimension_numbers<[1], [0], [0], [1], [0, 0, 1, 1], [], []>} : vector<16x48xbf16>, vector<48x128xbf16>, vector<16x128xf32> -> vector<16x128xf32>
    %126 = arith.addf %120, %125 : vector<16x128xf32>
    %cst_111 = arith.constant dense<0.000000e+00> : vector<128xf32>
    %127 = vector.multi_reduction <add>, %126, %cst_111 [0] : vector<16x128xf32> to vector<128xf32>
    %128 = vector.shape_cast %127 : vector<128xf32> to vector<1x128xf32>
    %129 = arith.addf %67, %128 : vector<1x128xf32>
    %130 = arith.mulf %126, %126 : vector<16x128xf32>
    %cst_112 = arith.constant dense<0.000000e+00> : vector<128xf32>
    %131 = vector.multi_reduction <add>, %130, %cst_112 [0] : vector<16x128xf32> to vector<128xf32>
    %132 = vector.shape_cast %131 : vector<128xf32> to vector<1x128xf32>
    %133 = arith.addf %71, %132 : vector<1x128xf32>
    %c0_113 = arith.constant 0 : index
    %c0_114 = arith.constant 0 : index
    %134 = vector.load %arg2[%c0_113, %c0_114] : memref<128x8xf32, #tpu.memory_space<vmem>>, vector<128x8xf32>
    %cst_115 = arith.constant dense<0.000000e+00> : vector<1x8xf32>
    %135 = tpu.matmul %129, %134, %cst_115 {dimension_numbers = #tpu.dot_dimension_numbers<[1], [0], [0], [1], [0, 0, 1, 1], [], []>} : vector<1x128xf32>, vector<128x8xf32>, vector<1x8xf32> -> vector<1x8xf32>
    %c0_116 = arith.constant 0 : index
    %c0_117 = arith.constant 0 : index
    %136 = vector.load %arg2[%c0_116, %c0_117] : memref<128x8xf32, #tpu.memory_space<vmem>>, vector<128x8xf32>
    %cst_118 = arith.constant dense<0.000000e+00> : vector<1x8xf32>
    %137 = tpu.matmul %133, %136, %cst_118 {dimension_numbers = #tpu.dot_dimension_numbers<[1], [0], [0], [1], [0, 0, 1, 1], [], []>} : vector<1x128xf32>, vector<128x8xf32>, vector<1x8xf32> -> vector<1x8xf32>
    %cst_119 = arith.constant 0.001953125 : f32
    %138 = vector.broadcast %cst_119 : f32 to vector<1x8xf32>
    %139 = arith.mulf %135, %138 : vector<1x8xf32>
    %cst_120 = arith.constant 0.001953125 : f32
    %140 = vector.broadcast %cst_120 : f32 to vector<1x8xf32>
    %141 = arith.mulf %137, %140 : vector<1x8xf32>
    %142 = arith.mulf %139, %139 : vector<1x8xf32>
    %143 = arith.subf %141, %142 : vector<1x8xf32>
    %cst_121 = arith.constant 0.000000e+00 : f32
    %144 = vector.broadcast %cst_121 : f32 to vector<1x8xf32>
    %145 = arith.maximumf %143, %144 : vector<1x8xf32>
    %c0_122 = arith.constant 0 : index
    %c0_123 = arith.constant 0 : index
    %146 = vector.load %arg4[%c0_122, %c0_123] : memref<1x8xf32, #tpu.memory_space<vmem>>, vector<1x8xf32>
    %cst_124 = arith.constant 9.99999974E-6 : f32
    %147 = vector.broadcast %cst_124 : f32 to vector<1x8xf32>
    %148 = arith.addf %145, %147 : vector<1x8xf32>
    %149 = math.rsqrt %148 : vector<1x8xf32>
    %150 = arith.mulf %146, %149 : vector<1x8xf32>
    %c0_125 = arith.constant 0 : index
    %c0_126 = arith.constant 0 : index
    %151 = vector.load %arg5[%c0_125, %c0_126] : memref<1x8xf32, #tpu.memory_space<vmem>>, vector<1x8xf32>
    %152 = arith.mulf %139, %150 : vector<1x8xf32>
    %153 = arith.subf %151, %152 : vector<1x8xf32>
    %c0_127 = arith.constant 0 : index
    %c0_128 = arith.constant 0 : index
    %154 = vector.load %arg3[%c0_127, %c0_128] : memref<8x128xf32, #tpu.memory_space<vmem>>, vector<8x128xf32>
    %cst_129 = arith.constant dense<0.000000e+00> : vector<1x128xf32>
    %155 = tpu.matmul %150, %154, %cst_129 {dimension_numbers = #tpu.dot_dimension_numbers<[1], [0], [0], [1], [0, 0, 1, 1], [], []>} : vector<1x8xf32>, vector<8x128xf32>, vector<1x128xf32> -> vector<1x128xf32>
    %c0_130 = arith.constant 0 : index
    %c0_131 = arith.constant 0 : index
    %156 = vector.load %arg3[%c0_130, %c0_131] : memref<8x128xf32, #tpu.memory_space<vmem>>, vector<8x128xf32>
    %cst_132 = arith.constant dense<0.000000e+00> : vector<1x128xf32>
    %157 = tpu.matmul %153, %156, %cst_132 {dimension_numbers = #tpu.dot_dimension_numbers<[1], [0], [0], [1], [0, 0, 1, 1], [], []>} : vector<1x8xf32>, vector<8x128xf32>, vector<1x128xf32> -> vector<1x128xf32>
    %158 = vector.broadcast %155 : vector<1x128xf32> to vector<16x128xf32>
    %159 = arith.mulf %64, %158 : vector<16x128xf32>
    %160 = vector.broadcast %157 : vector<1x128xf32> to vector<16x128xf32>
    %161 = arith.addf %159, %160 : vector<16x128xf32>
    %cst_133 = arith.constant 0.000000e+00 : f32
    %162 = vector.broadcast %cst_133 : f32 to vector<16x128xf32>
    %163 = arith.maximumf %161, %162 : vector<16x128xf32>
    %164 = arith.truncf %163 : vector<16x128xf32> to vector<16x128xbf16>
    %c0_134 = arith.constant 0 : index
    %c0_135 = arith.constant 0 : index
    %165 = vector.load %arg6[%c0_134, %c0_135] : memref<32x128xbf16, #tpu.memory_space<vmem>>, vector<16x128xbf16>
    tpu.vector_store %arg6[%c0_134, %c0_135], %164 {strides = array<i32>} : memref<32x128xbf16, #tpu.memory_space<vmem>>, vector<16x128xbf16>,
    %166 = vector.broadcast %155 : vector<1x128xf32> to vector<16x128xf32>
    %167 = arith.mulf %126, %166 : vector<16x128xf32>
    %168 = vector.broadcast %157 : vector<1x128xf32> to vector<16x128xf32>
    %169 = arith.addf %167, %168 : vector<16x128xf32>
    %cst_136 = arith.constant 0.000000e+00 : f32
    %170 = vector.broadcast %cst_136 : f32 to vector<16x128xf32>
    %171 = arith.maximumf %169, %170 : vector<16x128xf32>
    %172 = arith.truncf %171 : vector<16x128xf32> to vector<16x128xbf16>
    %c16_137 = arith.constant 16 : index
    %c0_138 = arith.constant 0 : index
    %173 = vector.load %arg6[%c16_137, %c0_138] : memref<32x128xbf16, #tpu.memory_space<vmem>>, vector<16x128xbf16>
    tpu.vector_store %arg6[%c16_137, %c0_138], %172 {strides = array<i32>} : memref<32x128xbf16, #tpu.memory_space<vmem>>, vector<16x128xbf16>,
    return
  }
}

module attributes {stable_mosaic.version = 11 : i64} {
  func.func @_encoder_block_kernel(%arg0: memref<16x64xbf16, #tpu.memory_space<vmem>>, %arg1: memref<9x64x128xbf16, #tpu.memory_space<vmem>>, %arg2: memref<128x16xf32, #tpu.memory_space<vmem>>, %arg3: memref<16x128xf32, #tpu.memory_space<vmem>>, %arg4: memref<1x16xf32, #tpu.memory_space<vmem>>, %arg5: memref<1x16xf32, #tpu.memory_space<vmem>>, %arg6: memref<16x128xbf16, #tpu.memory_space<vmem>>, %arg7: memref<20x80xf32, #tpu.memory_space<vmem>>) attributes {dimension_semantics = [], scalar_prefetch = 0 : i64, scratch_operands = 1 : i64, tpu.core_type = #tpu.core_type<tc>} {
    %cst = arith.constant 0.000000e+00 : f32
    %0 = vector.broadcast %cst : f32 to vector<20x80xf32>
    %c0 = arith.constant 0 : index
    %c0_0 = arith.constant 0 : index
    %1 = vector.load %arg7[%c0, %c0_0] : memref<20x80xf32, #tpu.memory_space<vmem>>, vector<20x80xf32>
    tpu.vector_store %arg7[%c0, %c0_0], %0 {strides = array<i32>} : memref<20x80xf32, #tpu.memory_space<vmem>>, vector<20x80xf32>,
    %c0_1 = arith.constant 0 : index
    %c0_2 = arith.constant 0 : index
    %2 = vector.load %arg0[%c0_1, %c0_2] : memref<16x64xbf16, #tpu.memory_space<vmem>>, vector<8x64xbf16>
    %3 = arith.extf %2 : vector<8x64xbf16> to vector<8x64xf32>
    %c1 = arith.constant 1 : index
    %c8 = arith.constant 8 : index
    %4 = vector.load %arg7[%c1, %c8] : memref<20x80xf32, #tpu.memory_space<vmem>>, vector<8x64xf32>
    tpu.vector_store %arg7[%c1, %c8], %3 {strides = array<i32>} : memref<20x80xf32, #tpu.memory_space<vmem>>, vector<8x64xf32>,
    %c8_3 = arith.constant 8 : index
    %c0_4 = arith.constant 0 : index
    %5 = vector.load %arg0[%c8_3, %c0_4] : memref<16x64xbf16, #tpu.memory_space<vmem>>, vector<8x64xbf16>
    %6 = arith.extf %5 : vector<8x64xbf16> to vector<8x64xf32>
    %c11 = arith.constant 11 : index
    %c8_5 = arith.constant 8 : index
    %7 = vector.load %arg7[%c11, %c8_5] : memref<20x80xf32, #tpu.memory_space<vmem>>, vector<8x64xf32>
    tpu.vector_store %arg7[%c11, %c8_5], %6 {strides = array<i32>} : memref<20x80xf32, #tpu.memory_space<vmem>>, vector<8x64xf32>,
    %cst_6 = arith.constant 0.000000e+00 : f32
    %8 = vector.broadcast %cst_6 : f32 to vector<1x128xf32>
    %cst_7 = arith.constant 0.000000e+00 : f32
    %9 = vector.broadcast %cst_7 : f32 to vector<1x128xf32>
    %cst_8 = arith.constant 0.000000e+00 : f32
    %10 = vector.broadcast %cst_8 : f32 to vector<8x128xf32>
    %c0_9 = arith.constant 0 : index
    %c0_10 = arith.constant 0 : index
    %11 = vector.load %arg7[%c0_9, %c0_10] : memref<20x80xf32, #tpu.memory_space<vmem>>, vector<8x64xf32>
    %12 = arith.truncf %11 : vector<8x64xf32> to vector<8x64xbf16>
    %c0_11 = arith.constant 0 : index
    %c0_12 = arith.constant 0 : index
    %c0_13 = arith.constant 0 : index
    %13 = vector.load %arg1[%c0_11, %c0_12, %c0_13] : memref<9x64x128xbf16, #tpu.memory_space<vmem>>, vector<1x64x128xbf16>
    %14 = vector.shape_cast %13 : vector<1x64x128xbf16> to vector<64x128xbf16>
    %cst_14 = arith.constant dense<0.000000e+00> : vector<8x128xf32>
    %15 = tpu.matmul %12, %14, %cst_14 {dimension_numbers = #tpu.dot_dimension_numbers<[1], [0], [0], [1], [0, 0, 1, 1], [], []>} : vector<8x64xbf16>, vector<64x128xbf16>, vector<8x128xf32> -> vector<8x128xf32>
    %16 = arith.addf %10, %15 : vector<8x128xf32>
    %c0_15 = arith.constant 0 : index
    %c8_16 = arith.constant 8 : index
    %17 = vector.load %arg7[%c0_15, %c8_16] : memref<20x80xf32, #tpu.memory_space<vmem>>, vector<8x64xf32>
    %18 = arith.truncf %17 : vector<8x64xf32> to vector<8x64xbf16>
    %c1_17 = arith.constant 1 : index
    %c0_18 = arith.constant 0 : index
    %c0_19 = arith.constant 0 : index
    %19 = vector.load %arg1[%c1_17, %c0_18, %c0_19] : memref<9x64x128xbf16, #tpu.memory_space<vmem>>, vector<1x64x128xbf16>
    %20 = vector.shape_cast %19 : vector<1x64x128xbf16> to vector<64x128xbf16>
    %cst_20 = arith.constant dense<0.000000e+00> : vector<8x128xf32>
    %21 = tpu.matmul %18, %20, %cst_20 {dimension_numbers = #tpu.dot_dimension_numbers<[1], [0], [0], [1], [0, 0, 1, 1], [], []>} : vector<8x64xbf16>, vector<64x128xbf16>, vector<8x128xf32> -> vector<8x128xf32>
    %22 = arith.addf %16, %21 : vector<8x128xf32>
    %c0_21 = arith.constant 0 : index
    %c16 = arith.constant 16 : index
    %23 = vector.load %arg7[%c0_21, %c16] : memref<20x80xf32, #tpu.memory_space<vmem>>, vector<8x64xf32>
    %24 = arith.truncf %23 : vector<8x64xf32> to vector<8x64xbf16>
    %c2 = arith.constant 2 : index
    %c0_22 = arith.constant 0 : index
    %c0_23 = arith.constant 0 : index
    %25 = vector.load %arg1[%c2, %c0_22, %c0_23] : memref<9x64x128xbf16, #tpu.memory_space<vmem>>, vector<1x64x128xbf16>
    %26 = vector.shape_cast %25 : vector<1x64x128xbf16> to vector<64x128xbf16>
    %cst_24 = arith.constant dense<0.000000e+00> : vector<8x128xf32>
    %27 = tpu.matmul %24, %26, %cst_24 {dimension_numbers = #tpu.dot_dimension_numbers<[1], [0], [0], [1], [0, 0, 1, 1], [], []>} : vector<8x64xbf16>, vector<64x128xbf16>, vector<8x128xf32> -> vector<8x128xf32>
    %28 = arith.addf %22, %27 : vector<8x128xf32>
    %c1_25 = arith.constant 1 : index
    %c0_26 = arith.constant 0 : index
    %29 = vector.load %arg7[%c1_25, %c0_26] : memref<20x80xf32, #tpu.memory_space<vmem>>, vector<8x64xf32>
    %30 = arith.truncf %29 : vector<8x64xf32> to vector<8x64xbf16>
    %c3 = arith.constant 3 : index
    %c0_27 = arith.constant 0 : index
    %c0_28 = arith.constant 0 : index
    %31 = vector.load %arg1[%c3, %c0_27, %c0_28] : memref<9x64x128xbf16, #tpu.memory_space<vmem>>, vector<1x64x128xbf16>
    %32 = vector.shape_cast %31 : vector<1x64x128xbf16> to vector<64x128xbf16>
    %cst_29 = arith.constant dense<0.000000e+00> : vector<8x128xf32>
    %33 = tpu.matmul %30, %32, %cst_29 {dimension_numbers = #tpu.dot_dimension_numbers<[1], [0], [0], [1], [0, 0, 1, 1], [], []>} : vector<8x64xbf16>, vector<64x128xbf16>, vector<8x128xf32> -> vector<8x128xf32>
    %34 = arith.addf %28, %33 : vector<8x128xf32>
    %c1_30 = arith.constant 1 : index
    %c8_31 = arith.constant 8 : index
    %35 = vector.load %arg7[%c1_30, %c8_31] : memref<20x80xf32, #tpu.memory_space<vmem>>, vector<8x64xf32>
    %36 = arith.truncf %35 : vector<8x64xf32> to vector<8x64xbf16>
    %c4 = arith.constant 4 : index
    %c0_32 = arith.constant 0 : index
    %c0_33 = arith.constant 0 : index
    %37 = vector.load %arg1[%c4, %c0_32, %c0_33] : memref<9x64x128xbf16, #tpu.memory_space<vmem>>, vector<1x64x128xbf16>
    %38 = vector.shape_cast %37 : vector<1x64x128xbf16> to vector<64x128xbf16>
    %cst_34 = arith.constant dense<0.000000e+00> : vector<8x128xf32>
    %39 = tpu.matmul %36, %38, %cst_34 {dimension_numbers = #tpu.dot_dimension_numbers<[1], [0], [0], [1], [0, 0, 1, 1], [], []>} : vector<8x64xbf16>, vector<64x128xbf16>, vector<8x128xf32> -> vector<8x128xf32>
    %40 = arith.addf %34, %39 : vector<8x128xf32>
    %c1_35 = arith.constant 1 : index
    %c16_36 = arith.constant 16 : index
    %41 = vector.load %arg7[%c1_35, %c16_36] : memref<20x80xf32, #tpu.memory_space<vmem>>, vector<8x64xf32>
    %42 = arith.truncf %41 : vector<8x64xf32> to vector<8x64xbf16>
    %c5 = arith.constant 5 : index
    %c0_37 = arith.constant 0 : index
    %c0_38 = arith.constant 0 : index
    %43 = vector.load %arg1[%c5, %c0_37, %c0_38] : memref<9x64x128xbf16, #tpu.memory_space<vmem>>, vector<1x64x128xbf16>
    %44 = vector.shape_cast %43 : vector<1x64x128xbf16> to vector<64x128xbf16>
    %cst_39 = arith.constant dense<0.000000e+00> : vector<8x128xf32>
    %45 = tpu.matmul %42, %44, %cst_39 {dimension_numbers = #tpu.dot_dimension_numbers<[1], [0], [0], [1], [0, 0, 1, 1], [], []>} : vector<8x64xbf16>, vector<64x128xbf16>, vector<8x128xf32> -> vector<8x128xf32>
    %46 = arith.addf %40, %45 : vector<8x128xf32>
    %c2_40 = arith.constant 2 : index
    %c0_41 = arith.constant 0 : index
    %47 = vector.load %arg7[%c2_40, %c0_41] : memref<20x80xf32, #tpu.memory_space<vmem>>, vector<8x64xf32>
    %48 = arith.truncf %47 : vector<8x64xf32> to vector<8x64xbf16>
    %c6 = arith.constant 6 : index
    %c0_42 = arith.constant 0 : index
    %c0_43 = arith.constant 0 : index
    %49 = vector.load %arg1[%c6, %c0_42, %c0_43] : memref<9x64x128xbf16, #tpu.memory_space<vmem>>, vector<1x64x128xbf16>
    %50 = vector.shape_cast %49 : vector<1x64x128xbf16> to vector<64x128xbf16>
    %cst_44 = arith.constant dense<0.000000e+00> : vector<8x128xf32>
    %51 = tpu.matmul %48, %50, %cst_44 {dimension_numbers = #tpu.dot_dimension_numbers<[1], [0], [0], [1], [0, 0, 1, 1], [], []>} : vector<8x64xbf16>, vector<64x128xbf16>, vector<8x128xf32> -> vector<8x128xf32>
    %52 = arith.addf %46, %51 : vector<8x128xf32>
    %c2_45 = arith.constant 2 : index
    %c8_46 = arith.constant 8 : index
    %53 = vector.load %arg7[%c2_45, %c8_46] : memref<20x80xf32, #tpu.memory_space<vmem>>, vector<8x64xf32>
    %54 = arith.truncf %53 : vector<8x64xf32> to vector<8x64xbf16>
    %c7 = arith.constant 7 : index
    %c0_47 = arith.constant 0 : index
    %c0_48 = arith.constant 0 : index
    %55 = vector.load %arg1[%c7, %c0_47, %c0_48] : memref<9x64x128xbf16, #tpu.memory_space<vmem>>, vector<1x64x128xbf16>
    %56 = vector.shape_cast %55 : vector<1x64x128xbf16> to vector<64x128xbf16>
    %cst_49 = arith.constant dense<0.000000e+00> : vector<8x128xf32>
    %57 = tpu.matmul %54, %56, %cst_49 {dimension_numbers = #tpu.dot_dimension_numbers<[1], [0], [0], [1], [0, 0, 1, 1], [], []>} : vector<8x64xbf16>, vector<64x128xbf16>, vector<8x128xf32> -> vector<8x128xf32>
    %58 = arith.addf %52, %57 : vector<8x128xf32>
    %c2_50 = arith.constant 2 : index
    %c16_51 = arith.constant 16 : index
    %59 = vector.load %arg7[%c2_50, %c16_51] : memref<20x80xf32, #tpu.memory_space<vmem>>, vector<8x64xf32>
    %60 = arith.truncf %59 : vector<8x64xf32> to vector<8x64xbf16>
    %c8_52 = arith.constant 8 : index
    %c0_53 = arith.constant 0 : index
    %c0_54 = arith.constant 0 : index
    %61 = vector.load %arg1[%c8_52, %c0_53, %c0_54] : memref<9x64x128xbf16, #tpu.memory_space<vmem>>, vector<1x64x128xbf16>
    %62 = vector.shape_cast %61 : vector<1x64x128xbf16> to vector<64x128xbf16>
    %cst_55 = arith.constant dense<0.000000e+00> : vector<8x128xf32>
    %63 = tpu.matmul %60, %62, %cst_55 {dimension_numbers = #tpu.dot_dimension_numbers<[1], [0], [0], [1], [0, 0, 1, 1], [], []>} : vector<8x64xbf16>, vector<64x128xbf16>, vector<8x128xf32> -> vector<8x128xf32>
    %64 = arith.addf %58, %63 : vector<8x128xf32>
    %cst_56 = arith.constant dense<0.000000e+00> : vector<128xf32>
    %65 = vector.multi_reduction <add>, %64, %cst_56 [0] : vector<8x128xf32> to vector<128xf32>
    %66 = vector.shape_cast %65 : vector<128xf32> to vector<1x128xf32>
    %67 = arith.addf %8, %66 : vector<1x128xf32>
    %68 = arith.mulf %64, %64 : vector<8x128xf32>
    %cst_57 = arith.constant dense<0.000000e+00> : vector<128xf32>
    %69 = vector.multi_reduction <add>, %68, %cst_57 [0] : vector<8x128xf32> to vector<128xf32>
    %70 = vector.shape_cast %69 : vector<128xf32> to vector<1x128xf32>
    %71 = arith.addf %9, %70 : vector<1x128xf32>
    %cst_58 = arith.constant 0.000000e+00 : f32
    %72 = vector.broadcast %cst_58 : f32 to vector<8x128xf32>
    %c10 = arith.constant 10 : index
    %c0_59 = arith.constant 0 : index
    %73 = vector.load %arg7[%c10, %c0_59] : memref<20x80xf32, #tpu.memory_space<vmem>>, vector<8x64xf32>
    %74 = arith.truncf %73 : vector<8x64xf32> to vector<8x64xbf16>
    %c0_60 = arith.constant 0 : index
    %c0_61 = arith.constant 0 : index
    %c0_62 = arith.constant 0 : index
    %75 = vector.load %arg1[%c0_60, %c0_61, %c0_62] : memref<9x64x128xbf16, #tpu.memory_space<vmem>>, vector<1x64x128xbf16>
    %76 = vector.shape_cast %75 : vector<1x64x128xbf16> to vector<64x128xbf16>
    %cst_63 = arith.constant dense<0.000000e+00> : vector<8x128xf32>
    %77 = tpu.matmul %74, %76, %cst_63 {dimension_numbers = #tpu.dot_dimension_numbers<[1], [0], [0], [1], [0, 0, 1, 1], [], []>} : vector<8x64xbf16>, vector<64x128xbf16>, vector<8x128xf32> -> vector<8x128xf32>
    %78 = arith.addf %72, %77 : vector<8x128xf32>
    %c10_64 = arith.constant 10 : index
    %c8_65 = arith.constant 8 : index
    %79 = vector.load %arg7[%c10_64, %c8_65] : memref<20x80xf32, #tpu.memory_space<vmem>>, vector<8x64xf32>
    %80 = arith.truncf %79 : vector<8x64xf32> to vector<8x64xbf16>
    %c1_66 = arith.constant 1 : index
    %c0_67 = arith.constant 0 : index
    %c0_68 = arith.constant 0 : index
    %81 = vector.load %arg1[%c1_66, %c0_67, %c0_68] : memref<9x64x128xbf16, #tpu.memory_space<vmem>>, vector<1x64x128xbf16>
    %82 = vector.shape_cast %81 : vector<1x64x128xbf16> to vector<64x128xbf16>
    %cst_69 = arith.constant dense<0.000000e+00> : vector<8x128xf32>
    %83 = tpu.matmul %80, %82, %cst_69 {dimension_numbers = #tpu.dot_dimension_numbers<[1], [0], [0], [1], [0, 0, 1, 1], [], []>} : vector<8x64xbf16>, vector<64x128xbf16>, vector<8x128xf32> -> vector<8x128xf32>
    %84 = arith.addf %78, %83 : vector<8x128xf32>
    %c10_70 = arith.constant 10 : index
    %c16_71 = arith.constant 16 : index
    %85 = vector.load %arg7[%c10_70, %c16_71] : memref<20x80xf32, #tpu.memory_space<vmem>>, vector<8x64xf32>
    %86 = arith.truncf %85 : vector<8x64xf32> to vector<8x64xbf16>
    %c2_72 = arith.constant 2 : index
    %c0_73 = arith.constant 0 : index
    %c0_74 = arith.constant 0 : index
    %87 = vector.load %arg1[%c2_72, %c0_73, %c0_74] : memref<9x64x128xbf16, #tpu.memory_space<vmem>>, vector<1x64x128xbf16>
    %88 = vector.shape_cast %87 : vector<1x64x128xbf16> to vector<64x128xbf16>
    %cst_75 = arith.constant dense<0.000000e+00> : vector<8x128xf32>
    %89 = tpu.matmul %86, %88, %cst_75 {dimension_numbers = #tpu.dot_dimension_numbers<[1], [0], [0], [1], [0, 0, 1, 1], [], []>} : vector<8x64xbf16>, vector<64x128xbf16>, vector<8x128xf32> -> vector<8x128xf32>
    %90 = arith.addf %84, %89 : vector<8x128xf32>
    %c11_76 = arith.constant 11 : index
    %c0_77 = arith.constant 0 : index
    %91 = vector.load %arg7[%c11_76, %c0_77] : memref<20x80xf32, #tpu.memory_space<vmem>>, vector<8x64xf32>
    %92 = arith.truncf %91 : vector<8x64xf32> to vector<8x64xbf16>
    %c3_78 = arith.constant 3 : index
    %c0_79 = arith.constant 0 : index
    %c0_80 = arith.constant 0 : index
    %93 = vector.load %arg1[%c3_78, %c0_79, %c0_80] : memref<9x64x128xbf16, #tpu.memory_space<vmem>>, vector<1x64x128xbf16>
    %94 = vector.shape_cast %93 : vector<1x64x128xbf16> to vector<64x128xbf16>
    %cst_81 = arith.constant dense<0.000000e+00> : vector<8x128xf32>
    %95 = tpu.matmul %92, %94, %cst_81 {dimension_numbers = #tpu.dot_dimension_numbers<[1], [0], [0], [1], [0, 0, 1, 1], [], []>} : vector<8x64xbf16>, vector<64x128xbf16>, vector<8x128xf32> -> vector<8x128xf32>
    %96 = arith.addf %90, %95 : vector<8x128xf32>
    %c11_82 = arith.constant 11 : index
    %c8_83 = arith.constant 8 : index
    %97 = vector.load %arg7[%c11_82, %c8_83] : memref<20x80xf32, #tpu.memory_space<vmem>>, vector<8x64xf32>
    %98 = arith.truncf %97 : vector<8x64xf32> to vector<8x64xbf16>
    %c4_84 = arith.constant 4 : index
    %c0_85 = arith.constant 0 : index
    %c0_86 = arith.constant 0 : index
    %99 = vector.load %arg1[%c4_84, %c0_85, %c0_86] : memref<9x64x128xbf16, #tpu.memory_space<vmem>>, vector<1x64x128xbf16>
    %100 = vector.shape_cast %99 : vector<1x64x128xbf16> to vector<64x128xbf16>
    %cst_87 = arith.constant dense<0.000000e+00> : vector<8x128xf32>
    %101 = tpu.matmul %98, %100, %cst_87 {dimension_numbers = #tpu.dot_dimension_numbers<[1], [0], [0], [1], [0, 0, 1, 1], [], []>} : vector<8x64xbf16>, vector<64x128xbf16>, vector<8x128xf32> -> vector<8x128xf32>
    %102 = arith.addf %96, %101 : vector<8x128xf32>
    %c11_88 = arith.constant 11 : index
    %c16_89 = arith.constant 16 : index
    %103 = vector.load %arg7[%c11_88, %c16_89] : memref<20x80xf32, #tpu.memory_space<vmem>>, vector<8x64xf32>
    %104 = arith.truncf %103 : vector<8x64xf32> to vector<8x64xbf16>
    %c5_90 = arith.constant 5 : index
    %c0_91 = arith.constant 0 : index
    %c0_92 = arith.constant 0 : index
    %105 = vector.load %arg1[%c5_90, %c0_91, %c0_92] : memref<9x64x128xbf16, #tpu.memory_space<vmem>>, vector<1x64x128xbf16>
    %106 = vector.shape_cast %105 : vector<1x64x128xbf16> to vector<64x128xbf16>
    %cst_93 = arith.constant dense<0.000000e+00> : vector<8x128xf32>
    %107 = tpu.matmul %104, %106, %cst_93 {dimension_numbers = #tpu.dot_dimension_numbers<[1], [0], [0], [1], [0, 0, 1, 1], [], []>} : vector<8x64xbf16>, vector<64x128xbf16>, vector<8x128xf32> -> vector<8x128xf32>
    %108 = arith.addf %102, %107 : vector<8x128xf32>
    %c12 = arith.constant 12 : index
    %c0_94 = arith.constant 0 : index
    %109 = vector.load %arg7[%c12, %c0_94] : memref<20x80xf32, #tpu.memory_space<vmem>>, vector<8x64xf32>
    %110 = arith.truncf %109 : vector<8x64xf32> to vector<8x64xbf16>
    %c6_95 = arith.constant 6 : index
    %c0_96 = arith.constant 0 : index
    %c0_97 = arith.constant 0 : index
    %111 = vector.load %arg1[%c6_95, %c0_96, %c0_97] : memref<9x64x128xbf16, #tpu.memory_space<vmem>>, vector<1x64x128xbf16>
    %112 = vector.shape_cast %111 : vector<1x64x128xbf16> to vector<64x128xbf16>
    %cst_98 = arith.constant dense<0.000000e+00> : vector<8x128xf32>
    %113 = tpu.matmul %110, %112, %cst_98 {dimension_numbers = #tpu.dot_dimension_numbers<[1], [0], [0], [1], [0, 0, 1, 1], [], []>} : vector<8x64xbf16>, vector<64x128xbf16>, vector<8x128xf32> -> vector<8x128xf32>
    %114 = arith.addf %108, %113 : vector<8x128xf32>
    %c12_99 = arith.constant 12 : index
    %c8_100 = arith.constant 8 : index
    %115 = vector.load %arg7[%c12_99, %c8_100] : memref<20x80xf32, #tpu.memory_space<vmem>>, vector<8x64xf32>
    %116 = arith.truncf %115 : vector<8x64xf32> to vector<8x64xbf16>
    %c7_101 = arith.constant 7 : index
    %c0_102 = arith.constant 0 : index
    %c0_103 = arith.constant 0 : index
    %117 = vector.load %arg1[%c7_101, %c0_102, %c0_103] : memref<9x64x128xbf16, #tpu.memory_space<vmem>>, vector<1x64x128xbf16>
    %118 = vector.shape_cast %117 : vector<1x64x128xbf16> to vector<64x128xbf16>
    %cst_104 = arith.constant dense<0.000000e+00> : vector<8x128xf32>
    %119 = tpu.matmul %116, %118, %cst_104 {dimension_numbers = #tpu.dot_dimension_numbers<[1], [0], [0], [1], [0, 0, 1, 1], [], []>} : vector<8x64xbf16>, vector<64x128xbf16>, vector<8x128xf32> -> vector<8x128xf32>
    %120 = arith.addf %114, %119 : vector<8x128xf32>
    %c12_105 = arith.constant 12 : index
    %c16_106 = arith.constant 16 : index
    %121 = vector.load %arg7[%c12_105, %c16_106] : memref<20x80xf32, #tpu.memory_space<vmem>>, vector<8x64xf32>
    %122 = arith.truncf %121 : vector<8x64xf32> to vector<8x64xbf16>
    %c8_107 = arith.constant 8 : index
    %c0_108 = arith.constant 0 : index
    %c0_109 = arith.constant 0 : index
    %123 = vector.load %arg1[%c8_107, %c0_108, %c0_109] : memref<9x64x128xbf16, #tpu.memory_space<vmem>>, vector<1x64x128xbf16>
    %124 = vector.shape_cast %123 : vector<1x64x128xbf16> to vector<64x128xbf16>
    %cst_110 = arith.constant dense<0.000000e+00> : vector<8x128xf32>
    %125 = tpu.matmul %122, %124, %cst_110 {dimension_numbers = #tpu.dot_dimension_numbers<[1], [0], [0], [1], [0, 0, 1, 1], [], []>} : vector<8x64xbf16>, vector<64x128xbf16>, vector<8x128xf32> -> vector<8x128xf32>
    %126 = arith.addf %120, %125 : vector<8x128xf32>
    %cst_111 = arith.constant dense<0.000000e+00> : vector<128xf32>
    %127 = vector.multi_reduction <add>, %126, %cst_111 [0] : vector<8x128xf32> to vector<128xf32>
    %128 = vector.shape_cast %127 : vector<128xf32> to vector<1x128xf32>
    %129 = arith.addf %67, %128 : vector<1x128xf32>
    %130 = arith.mulf %126, %126 : vector<8x128xf32>
    %cst_112 = arith.constant dense<0.000000e+00> : vector<128xf32>
    %131 = vector.multi_reduction <add>, %130, %cst_112 [0] : vector<8x128xf32> to vector<128xf32>
    %132 = vector.shape_cast %131 : vector<128xf32> to vector<1x128xf32>
    %133 = arith.addf %71, %132 : vector<1x128xf32>
    %c0_113 = arith.constant 0 : index
    %c0_114 = arith.constant 0 : index
    %134 = vector.load %arg2[%c0_113, %c0_114] : memref<128x16xf32, #tpu.memory_space<vmem>>, vector<128x16xf32>
    %cst_115 = arith.constant dense<0.000000e+00> : vector<1x16xf32>
    %135 = tpu.matmul %129, %134, %cst_115 {dimension_numbers = #tpu.dot_dimension_numbers<[1], [0], [0], [1], [0, 0, 1, 1], [], []>} : vector<1x128xf32>, vector<128x16xf32>, vector<1x16xf32> -> vector<1x16xf32>
    %c0_116 = arith.constant 0 : index
    %c0_117 = arith.constant 0 : index
    %136 = vector.load %arg2[%c0_116, %c0_117] : memref<128x16xf32, #tpu.memory_space<vmem>>, vector<128x16xf32>
    %cst_118 = arith.constant dense<0.000000e+00> : vector<1x16xf32>
    %137 = tpu.matmul %133, %136, %cst_118 {dimension_numbers = #tpu.dot_dimension_numbers<[1], [0], [0], [1], [0, 0, 1, 1], [], []>} : vector<1x128xf32>, vector<128x16xf32>, vector<1x16xf32> -> vector<1x16xf32>
    %cst_119 = arith.constant 7.812500e-03 : f32
    %138 = vector.broadcast %cst_119 : f32 to vector<1x16xf32>
    %139 = arith.mulf %135, %138 : vector<1x16xf32>
    %cst_120 = arith.constant 7.812500e-03 : f32
    %140 = vector.broadcast %cst_120 : f32 to vector<1x16xf32>
    %141 = arith.mulf %137, %140 : vector<1x16xf32>
    %142 = arith.mulf %139, %139 : vector<1x16xf32>
    %143 = arith.subf %141, %142 : vector<1x16xf32>
    %cst_121 = arith.constant 0.000000e+00 : f32
    %144 = vector.broadcast %cst_121 : f32 to vector<1x16xf32>
    %145 = arith.maximumf %143, %144 : vector<1x16xf32>
    %c0_122 = arith.constant 0 : index
    %c0_123 = arith.constant 0 : index
    %146 = vector.load %arg4[%c0_122, %c0_123] : memref<1x16xf32, #tpu.memory_space<vmem>>, vector<1x16xf32>
    %cst_124 = arith.constant 9.99999974E-6 : f32
    %147 = vector.broadcast %cst_124 : f32 to vector<1x16xf32>
    %148 = arith.addf %145, %147 : vector<1x16xf32>
    %149 = math.rsqrt %148 : vector<1x16xf32>
    %150 = arith.mulf %146, %149 : vector<1x16xf32>
    %c0_125 = arith.constant 0 : index
    %c0_126 = arith.constant 0 : index
    %151 = vector.load %arg5[%c0_125, %c0_126] : memref<1x16xf32, #tpu.memory_space<vmem>>, vector<1x16xf32>
    %152 = arith.mulf %139, %150 : vector<1x16xf32>
    %153 = arith.subf %151, %152 : vector<1x16xf32>
    %c0_127 = arith.constant 0 : index
    %c0_128 = arith.constant 0 : index
    %154 = vector.load %arg3[%c0_127, %c0_128] : memref<16x128xf32, #tpu.memory_space<vmem>>, vector<16x128xf32>
    %cst_129 = arith.constant dense<0.000000e+00> : vector<1x128xf32>
    %155 = tpu.matmul %150, %154, %cst_129 {dimension_numbers = #tpu.dot_dimension_numbers<[1], [0], [0], [1], [0, 0, 1, 1], [], []>} : vector<1x16xf32>, vector<16x128xf32>, vector<1x128xf32> -> vector<1x128xf32>
    %c0_130 = arith.constant 0 : index
    %c0_131 = arith.constant 0 : index
    %156 = vector.load %arg3[%c0_130, %c0_131] : memref<16x128xf32, #tpu.memory_space<vmem>>, vector<16x128xf32>
    %cst_132 = arith.constant dense<0.000000e+00> : vector<1x128xf32>
    %157 = tpu.matmul %153, %156, %cst_132 {dimension_numbers = #tpu.dot_dimension_numbers<[1], [0], [0], [1], [0, 0, 1, 1], [], []>} : vector<1x16xf32>, vector<16x128xf32>, vector<1x128xf32> -> vector<1x128xf32>
    %158 = vector.broadcast %155 : vector<1x128xf32> to vector<8x128xf32>
    %159 = arith.mulf %64, %158 : vector<8x128xf32>
    %160 = vector.broadcast %157 : vector<1x128xf32> to vector<8x128xf32>
    %161 = arith.addf %159, %160 : vector<8x128xf32>
    %cst_133 = arith.constant 0.000000e+00 : f32
    %162 = vector.broadcast %cst_133 : f32 to vector<8x128xf32>
    %163 = arith.maximumf %161, %162 : vector<8x128xf32>
    %164 = arith.truncf %163 : vector<8x128xf32> to vector<8x128xbf16>
    %c0_134 = arith.constant 0 : index
    %c0_135 = arith.constant 0 : index
    %165 = vector.load %arg6[%c0_134, %c0_135] : memref<16x128xbf16, #tpu.memory_space<vmem>>, vector<8x128xbf16>
    tpu.vector_store %arg6[%c0_134, %c0_135], %164 {strides = array<i32>} : memref<16x128xbf16, #tpu.memory_space<vmem>>, vector<8x128xbf16>,
    %166 = vector.broadcast %155 : vector<1x128xf32> to vector<8x128xf32>
    %167 = arith.mulf %126, %166 : vector<8x128xf32>
    %168 = vector.broadcast %157 : vector<1x128xf32> to vector<8x128xf32>
    %169 = arith.addf %167, %168 : vector<8x128xf32>
    %cst_136 = arith.constant 0.000000e+00 : f32
    %170 = vector.broadcast %cst_136 : f32 to vector<8x128xf32>
    %171 = arith.maximumf %169, %170 : vector<8x128xf32>
    %172 = arith.truncf %171 : vector<8x128xf32> to vector<8x128xbf16>
    %c8_137 = arith.constant 8 : index
    %c0_138 = arith.constant 0 : index
    %173 = vector.load %arg6[%c8_137, %c0_138] : memref<16x128xbf16, #tpu.memory_space<vmem>>, vector<8x128xbf16>
    tpu.vector_store %arg6[%c8_137, %c0_138], %172 {strides = array<i32>} : memref<16x128xbf16, #tpu.memory_space<vmem>>, vector<8x128xbf16>,
    return
  }
}

module attributes {stable_mosaic.version = 11 : i64} {
  func.func @_encoder_block_kernel(%arg0: memref<16x128xbf16, #tpu.memory_space<vmem>>, %arg1: memref<9x128x128xbf16, #tpu.memory_space<vmem>>, %arg2: memref<128x16xf32, #tpu.memory_space<vmem>>, %arg3: memref<16x128xf32, #tpu.memory_space<vmem>>, %arg4: memref<1x16xf32, #tpu.memory_space<vmem>>, %arg5: memref<1x16xf32, #tpu.memory_space<vmem>>, %arg6: memref<16x128xbf16, #tpu.memory_space<vmem>>, %arg7: memref<20x160xf32, #tpu.memory_space<vmem>>) attributes {dimension_semantics = [], scalar_prefetch = 0 : i64, scratch_operands = 1 : i64, tpu.core_type = #tpu.core_type<tc>} {
    %cst = arith.constant 0.000000e+00 : f32
    %0 = vector.broadcast %cst : f32 to vector<20x160xf32>
    %c0 = arith.constant 0 : index
    %c0_0 = arith.constant 0 : index
    %1 = vector.load %arg7[%c0, %c0_0] : memref<20x160xf32, #tpu.memory_space<vmem>>, vector<20x160xf32>
    tpu.vector_store %arg7[%c0, %c0_0], %0 {strides = array<i32>} : memref<20x160xf32, #tpu.memory_space<vmem>>, vector<20x160xf32>,
    %c0_1 = arith.constant 0 : index
    %c0_2 = arith.constant 0 : index
    %2 = vector.load %arg0[%c0_1, %c0_2] : memref<16x128xbf16, #tpu.memory_space<vmem>>, vector<8x128xbf16>
    %3 = arith.extf %2 : vector<8x128xbf16> to vector<8x128xf32>
    %c1 = arith.constant 1 : index
    %c16 = arith.constant 16 : index
    %4 = vector.load %arg7[%c1, %c16] : memref<20x160xf32, #tpu.memory_space<vmem>>, vector<8x128xf32>
    tpu.vector_store %arg7[%c1, %c16], %3 {strides = array<i32>} : memref<20x160xf32, #tpu.memory_space<vmem>>, vector<8x128xf32>,
    %c8 = arith.constant 8 : index
    %c0_3 = arith.constant 0 : index
    %5 = vector.load %arg0[%c8, %c0_3] : memref<16x128xbf16, #tpu.memory_space<vmem>>, vector<8x128xbf16>
    %6 = arith.extf %5 : vector<8x128xbf16> to vector<8x128xf32>
    %c11 = arith.constant 11 : index
    %c16_4 = arith.constant 16 : index
    %7 = vector.load %arg7[%c11, %c16_4] : memref<20x160xf32, #tpu.memory_space<vmem>>, vector<8x128xf32>
    tpu.vector_store %arg7[%c11, %c16_4], %6 {strides = array<i32>} : memref<20x160xf32, #tpu.memory_space<vmem>>, vector<8x128xf32>,
    %cst_5 = arith.constant 0.000000e+00 : f32
    %8 = vector.broadcast %cst_5 : f32 to vector<1x128xf32>
    %cst_6 = arith.constant 0.000000e+00 : f32
    %9 = vector.broadcast %cst_6 : f32 to vector<1x128xf32>
    %cst_7 = arith.constant 0.000000e+00 : f32
    %10 = vector.broadcast %cst_7 : f32 to vector<8x128xf32>
    %c0_8 = arith.constant 0 : index
    %c0_9 = arith.constant 0 : index
    %11 = vector.load %arg7[%c0_8, %c0_9] : memref<20x160xf32, #tpu.memory_space<vmem>>, vector<8x128xf32>
    %12 = arith.truncf %11 : vector<8x128xf32> to vector<8x128xbf16>
    %c0_10 = arith.constant 0 : index
    %c0_11 = arith.constant 0 : index
    %c0_12 = arith.constant 0 : index
    %13 = vector.load %arg1[%c0_10, %c0_11, %c0_12] : memref<9x128x128xbf16, #tpu.memory_space<vmem>>, vector<1x128x128xbf16>
    %14 = vector.shape_cast %13 : vector<1x128x128xbf16> to vector<128x128xbf16>
    %cst_13 = arith.constant dense<0.000000e+00> : vector<8x128xf32>
    %15 = tpu.matmul %12, %14, %cst_13 {dimension_numbers = #tpu.dot_dimension_numbers<[1], [0], [0], [1], [0, 0, 1, 1], [], []>} : vector<8x128xbf16>, vector<128x128xbf16>, vector<8x128xf32> -> vector<8x128xf32>
    %16 = arith.addf %10, %15 : vector<8x128xf32>
    %c0_14 = arith.constant 0 : index
    %c16_15 = arith.constant 16 : index
    %17 = vector.load %arg7[%c0_14, %c16_15] : memref<20x160xf32, #tpu.memory_space<vmem>>, vector<8x128xf32>
    %18 = arith.truncf %17 : vector<8x128xf32> to vector<8x128xbf16>
    %c1_16 = arith.constant 1 : index
    %c0_17 = arith.constant 0 : index
    %c0_18 = arith.constant 0 : index
    %19 = vector.load %arg1[%c1_16, %c0_17, %c0_18] : memref<9x128x128xbf16, #tpu.memory_space<vmem>>, vector<1x128x128xbf16>
    %20 = vector.shape_cast %19 : vector<1x128x128xbf16> to vector<128x128xbf16>
    %cst_19 = arith.constant dense<0.000000e+00> : vector<8x128xf32>
    %21 = tpu.matmul %18, %20, %cst_19 {dimension_numbers = #tpu.dot_dimension_numbers<[1], [0], [0], [1], [0, 0, 1, 1], [], []>} : vector<8x128xbf16>, vector<128x128xbf16>, vector<8x128xf32> -> vector<8x128xf32>
    %22 = arith.addf %16, %21 : vector<8x128xf32>
    %c0_20 = arith.constant 0 : index
    %c32 = arith.constant 32 : index
    %23 = vector.load %arg7[%c0_20, %c32] : memref<20x160xf32, #tpu.memory_space<vmem>>, vector<8x128xf32>
    %24 = arith.truncf %23 : vector<8x128xf32> to vector<8x128xbf16>
    %c2 = arith.constant 2 : index
    %c0_21 = arith.constant 0 : index
    %c0_22 = arith.constant 0 : index
    %25 = vector.load %arg1[%c2, %c0_21, %c0_22] : memref<9x128x128xbf16, #tpu.memory_space<vmem>>, vector<1x128x128xbf16>
    %26 = vector.shape_cast %25 : vector<1x128x128xbf16> to vector<128x128xbf16>
    %cst_23 = arith.constant dense<0.000000e+00> : vector<8x128xf32>
    %27 = tpu.matmul %24, %26, %cst_23 {dimension_numbers = #tpu.dot_dimension_numbers<[1], [0], [0], [1], [0, 0, 1, 1], [], []>} : vector<8x128xbf16>, vector<128x128xbf16>, vector<8x128xf32> -> vector<8x128xf32>
    %28 = arith.addf %22, %27 : vector<8x128xf32>
    %c1_24 = arith.constant 1 : index
    %c0_25 = arith.constant 0 : index
    %29 = vector.load %arg7[%c1_24, %c0_25] : memref<20x160xf32, #tpu.memory_space<vmem>>, vector<8x128xf32>
    %30 = arith.truncf %29 : vector<8x128xf32> to vector<8x128xbf16>
    %c3 = arith.constant 3 : index
    %c0_26 = arith.constant 0 : index
    %c0_27 = arith.constant 0 : index
    %31 = vector.load %arg1[%c3, %c0_26, %c0_27] : memref<9x128x128xbf16, #tpu.memory_space<vmem>>, vector<1x128x128xbf16>
    %32 = vector.shape_cast %31 : vector<1x128x128xbf16> to vector<128x128xbf16>
    %cst_28 = arith.constant dense<0.000000e+00> : vector<8x128xf32>
    %33 = tpu.matmul %30, %32, %cst_28 {dimension_numbers = #tpu.dot_dimension_numbers<[1], [0], [0], [1], [0, 0, 1, 1], [], []>} : vector<8x128xbf16>, vector<128x128xbf16>, vector<8x128xf32> -> vector<8x128xf32>
    %34 = arith.addf %28, %33 : vector<8x128xf32>
    %c1_29 = arith.constant 1 : index
    %c16_30 = arith.constant 16 : index
    %35 = vector.load %arg7[%c1_29, %c16_30] : memref<20x160xf32, #tpu.memory_space<vmem>>, vector<8x128xf32>
    %36 = arith.truncf %35 : vector<8x128xf32> to vector<8x128xbf16>
    %c4 = arith.constant 4 : index
    %c0_31 = arith.constant 0 : index
    %c0_32 = arith.constant 0 : index
    %37 = vector.load %arg1[%c4, %c0_31, %c0_32] : memref<9x128x128xbf16, #tpu.memory_space<vmem>>, vector<1x128x128xbf16>
    %38 = vector.shape_cast %37 : vector<1x128x128xbf16> to vector<128x128xbf16>
    %cst_33 = arith.constant dense<0.000000e+00> : vector<8x128xf32>
    %39 = tpu.matmul %36, %38, %cst_33 {dimension_numbers = #tpu.dot_dimension_numbers<[1], [0], [0], [1], [0, 0, 1, 1], [], []>} : vector<8x128xbf16>, vector<128x128xbf16>, vector<8x128xf32> -> vector<8x128xf32>
    %40 = arith.addf %34, %39 : vector<8x128xf32>
    %c1_34 = arith.constant 1 : index
    %c32_35 = arith.constant 32 : index
    %41 = vector.load %arg7[%c1_34, %c32_35] : memref<20x160xf32, #tpu.memory_space<vmem>>, vector<8x128xf32>
    %42 = arith.truncf %41 : vector<8x128xf32> to vector<8x128xbf16>
    %c5 = arith.constant 5 : index
    %c0_36 = arith.constant 0 : index
    %c0_37 = arith.constant 0 : index
    %43 = vector.load %arg1[%c5, %c0_36, %c0_37] : memref<9x128x128xbf16, #tpu.memory_space<vmem>>, vector<1x128x128xbf16>
    %44 = vector.shape_cast %43 : vector<1x128x128xbf16> to vector<128x128xbf16>
    %cst_38 = arith.constant dense<0.000000e+00> : vector<8x128xf32>
    %45 = tpu.matmul %42, %44, %cst_38 {dimension_numbers = #tpu.dot_dimension_numbers<[1], [0], [0], [1], [0, 0, 1, 1], [], []>} : vector<8x128xbf16>, vector<128x128xbf16>, vector<8x128xf32> -> vector<8x128xf32>
    %46 = arith.addf %40, %45 : vector<8x128xf32>
    %c2_39 = arith.constant 2 : index
    %c0_40 = arith.constant 0 : index
    %47 = vector.load %arg7[%c2_39, %c0_40] : memref<20x160xf32, #tpu.memory_space<vmem>>, vector<8x128xf32>
    %48 = arith.truncf %47 : vector<8x128xf32> to vector<8x128xbf16>
    %c6 = arith.constant 6 : index
    %c0_41 = arith.constant 0 : index
    %c0_42 = arith.constant 0 : index
    %49 = vector.load %arg1[%c6, %c0_41, %c0_42] : memref<9x128x128xbf16, #tpu.memory_space<vmem>>, vector<1x128x128xbf16>
    %50 = vector.shape_cast %49 : vector<1x128x128xbf16> to vector<128x128xbf16>
    %cst_43 = arith.constant dense<0.000000e+00> : vector<8x128xf32>
    %51 = tpu.matmul %48, %50, %cst_43 {dimension_numbers = #tpu.dot_dimension_numbers<[1], [0], [0], [1], [0, 0, 1, 1], [], []>} : vector<8x128xbf16>, vector<128x128xbf16>, vector<8x128xf32> -> vector<8x128xf32>
    %52 = arith.addf %46, %51 : vector<8x128xf32>
    %c2_44 = arith.constant 2 : index
    %c16_45 = arith.constant 16 : index
    %53 = vector.load %arg7[%c2_44, %c16_45] : memref<20x160xf32, #tpu.memory_space<vmem>>, vector<8x128xf32>
    %54 = arith.truncf %53 : vector<8x128xf32> to vector<8x128xbf16>
    %c7 = arith.constant 7 : index
    %c0_46 = arith.constant 0 : index
    %c0_47 = arith.constant 0 : index
    %55 = vector.load %arg1[%c7, %c0_46, %c0_47] : memref<9x128x128xbf16, #tpu.memory_space<vmem>>, vector<1x128x128xbf16>
    %56 = vector.shape_cast %55 : vector<1x128x128xbf16> to vector<128x128xbf16>
    %cst_48 = arith.constant dense<0.000000e+00> : vector<8x128xf32>
    %57 = tpu.matmul %54, %56, %cst_48 {dimension_numbers = #tpu.dot_dimension_numbers<[1], [0], [0], [1], [0, 0, 1, 1], [], []>} : vector<8x128xbf16>, vector<128x128xbf16>, vector<8x128xf32> -> vector<8x128xf32>
    %58 = arith.addf %52, %57 : vector<8x128xf32>
    %c2_49 = arith.constant 2 : index
    %c32_50 = arith.constant 32 : index
    %59 = vector.load %arg7[%c2_49, %c32_50] : memref<20x160xf32, #tpu.memory_space<vmem>>, vector<8x128xf32>
    %60 = arith.truncf %59 : vector<8x128xf32> to vector<8x128xbf16>
    %c8_51 = arith.constant 8 : index
    %c0_52 = arith.constant 0 : index
    %c0_53 = arith.constant 0 : index
    %61 = vector.load %arg1[%c8_51, %c0_52, %c0_53] : memref<9x128x128xbf16, #tpu.memory_space<vmem>>, vector<1x128x128xbf16>
    %62 = vector.shape_cast %61 : vector<1x128x128xbf16> to vector<128x128xbf16>
    %cst_54 = arith.constant dense<0.000000e+00> : vector<8x128xf32>
    %63 = tpu.matmul %60, %62, %cst_54 {dimension_numbers = #tpu.dot_dimension_numbers<[1], [0], [0], [1], [0, 0, 1, 1], [], []>} : vector<8x128xbf16>, vector<128x128xbf16>, vector<8x128xf32> -> vector<8x128xf32>
    %64 = arith.addf %58, %63 : vector<8x128xf32>
    %cst_55 = arith.constant dense<0.000000e+00> : vector<128xf32>
    %65 = vector.multi_reduction <add>, %64, %cst_55 [0] : vector<8x128xf32> to vector<128xf32>
    %66 = vector.shape_cast %65 : vector<128xf32> to vector<1x128xf32>
    %67 = arith.addf %8, %66 : vector<1x128xf32>
    %68 = arith.mulf %64, %64 : vector<8x128xf32>
    %cst_56 = arith.constant dense<0.000000e+00> : vector<128xf32>
    %69 = vector.multi_reduction <add>, %68, %cst_56 [0] : vector<8x128xf32> to vector<128xf32>
    %70 = vector.shape_cast %69 : vector<128xf32> to vector<1x128xf32>
    %71 = arith.addf %9, %70 : vector<1x128xf32>
    %cst_57 = arith.constant 0.000000e+00 : f32
    %72 = vector.broadcast %cst_57 : f32 to vector<8x128xf32>
    %c10 = arith.constant 10 : index
    %c0_58 = arith.constant 0 : index
    %73 = vector.load %arg7[%c10, %c0_58] : memref<20x160xf32, #tpu.memory_space<vmem>>, vector<8x128xf32>
    %74 = arith.truncf %73 : vector<8x128xf32> to vector<8x128xbf16>
    %c0_59 = arith.constant 0 : index
    %c0_60 = arith.constant 0 : index
    %c0_61 = arith.constant 0 : index
    %75 = vector.load %arg1[%c0_59, %c0_60, %c0_61] : memref<9x128x128xbf16, #tpu.memory_space<vmem>>, vector<1x128x128xbf16>
    %76 = vector.shape_cast %75 : vector<1x128x128xbf16> to vector<128x128xbf16>
    %cst_62 = arith.constant dense<0.000000e+00> : vector<8x128xf32>
    %77 = tpu.matmul %74, %76, %cst_62 {dimension_numbers = #tpu.dot_dimension_numbers<[1], [0], [0], [1], [0, 0, 1, 1], [], []>} : vector<8x128xbf16>, vector<128x128xbf16>, vector<8x128xf32> -> vector<8x128xf32>
    %78 = arith.addf %72, %77 : vector<8x128xf32>
    %c10_63 = arith.constant 10 : index
    %c16_64 = arith.constant 16 : index
    %79 = vector.load %arg7[%c10_63, %c16_64] : memref<20x160xf32, #tpu.memory_space<vmem>>, vector<8x128xf32>
    %80 = arith.truncf %79 : vector<8x128xf32> to vector<8x128xbf16>
    %c1_65 = arith.constant 1 : index
    %c0_66 = arith.constant 0 : index
    %c0_67 = arith.constant 0 : index
    %81 = vector.load %arg1[%c1_65, %c0_66, %c0_67] : memref<9x128x128xbf16, #tpu.memory_space<vmem>>, vector<1x128x128xbf16>
    %82 = vector.shape_cast %81 : vector<1x128x128xbf16> to vector<128x128xbf16>
    %cst_68 = arith.constant dense<0.000000e+00> : vector<8x128xf32>
    %83 = tpu.matmul %80, %82, %cst_68 {dimension_numbers = #tpu.dot_dimension_numbers<[1], [0], [0], [1], [0, 0, 1, 1], [], []>} : vector<8x128xbf16>, vector<128x128xbf16>, vector<8x128xf32> -> vector<8x128xf32>
    %84 = arith.addf %78, %83 : vector<8x128xf32>
    %c10_69 = arith.constant 10 : index
    %c32_70 = arith.constant 32 : index
    %85 = vector.load %arg7[%c10_69, %c32_70] : memref<20x160xf32, #tpu.memory_space<vmem>>, vector<8x128xf32>
    %86 = arith.truncf %85 : vector<8x128xf32> to vector<8x128xbf16>
    %c2_71 = arith.constant 2 : index
    %c0_72 = arith.constant 0 : index
    %c0_73 = arith.constant 0 : index
    %87 = vector.load %arg1[%c2_71, %c0_72, %c0_73] : memref<9x128x128xbf16, #tpu.memory_space<vmem>>, vector<1x128x128xbf16>
    %88 = vector.shape_cast %87 : vector<1x128x128xbf16> to vector<128x128xbf16>
    %cst_74 = arith.constant dense<0.000000e+00> : vector<8x128xf32>
    %89 = tpu.matmul %86, %88, %cst_74 {dimension_numbers = #tpu.dot_dimension_numbers<[1], [0], [0], [1], [0, 0, 1, 1], [], []>} : vector<8x128xbf16>, vector<128x128xbf16>, vector<8x128xf32> -> vector<8x128xf32>
    %90 = arith.addf %84, %89 : vector<8x128xf32>
    %c11_75 = arith.constant 11 : index
    %c0_76 = arith.constant 0 : index
    %91 = vector.load %arg7[%c11_75, %c0_76] : memref<20x160xf32, #tpu.memory_space<vmem>>, vector<8x128xf32>
    %92 = arith.truncf %91 : vector<8x128xf32> to vector<8x128xbf16>
    %c3_77 = arith.constant 3 : index
    %c0_78 = arith.constant 0 : index
    %c0_79 = arith.constant 0 : index
    %93 = vector.load %arg1[%c3_77, %c0_78, %c0_79] : memref<9x128x128xbf16, #tpu.memory_space<vmem>>, vector<1x128x128xbf16>
    %94 = vector.shape_cast %93 : vector<1x128x128xbf16> to vector<128x128xbf16>
    %cst_80 = arith.constant dense<0.000000e+00> : vector<8x128xf32>
    %95 = tpu.matmul %92, %94, %cst_80 {dimension_numbers = #tpu.dot_dimension_numbers<[1], [0], [0], [1], [0, 0, 1, 1], [], []>} : vector<8x128xbf16>, vector<128x128xbf16>, vector<8x128xf32> -> vector<8x128xf32>
    %96 = arith.addf %90, %95 : vector<8x128xf32>
    %c11_81 = arith.constant 11 : index
    %c16_82 = arith.constant 16 : index
    %97 = vector.load %arg7[%c11_81, %c16_82] : memref<20x160xf32, #tpu.memory_space<vmem>>, vector<8x128xf32>
    %98 = arith.truncf %97 : vector<8x128xf32> to vector<8x128xbf16>
    %c4_83 = arith.constant 4 : index
    %c0_84 = arith.constant 0 : index
    %c0_85 = arith.constant 0 : index
    %99 = vector.load %arg1[%c4_83, %c0_84, %c0_85] : memref<9x128x128xbf16, #tpu.memory_space<vmem>>, vector<1x128x128xbf16>
    %100 = vector.shape_cast %99 : vector<1x128x128xbf16> to vector<128x128xbf16>
    %cst_86 = arith.constant dense<0.000000e+00> : vector<8x128xf32>
    %101 = tpu.matmul %98, %100, %cst_86 {dimension_numbers = #tpu.dot_dimension_numbers<[1], [0], [0], [1], [0, 0, 1, 1], [], []>} : vector<8x128xbf16>, vector<128x128xbf16>, vector<8x128xf32> -> vector<8x128xf32>
    %102 = arith.addf %96, %101 : vector<8x128xf32>
    %c11_87 = arith.constant 11 : index
    %c32_88 = arith.constant 32 : index
    %103 = vector.load %arg7[%c11_87, %c32_88] : memref<20x160xf32, #tpu.memory_space<vmem>>, vector<8x128xf32>
    %104 = arith.truncf %103 : vector<8x128xf32> to vector<8x128xbf16>
    %c5_89 = arith.constant 5 : index
    %c0_90 = arith.constant 0 : index
    %c0_91 = arith.constant 0 : index
    %105 = vector.load %arg1[%c5_89, %c0_90, %c0_91] : memref<9x128x128xbf16, #tpu.memory_space<vmem>>, vector<1x128x128xbf16>
    %106 = vector.shape_cast %105 : vector<1x128x128xbf16> to vector<128x128xbf16>
    %cst_92 = arith.constant dense<0.000000e+00> : vector<8x128xf32>
    %107 = tpu.matmul %104, %106, %cst_92 {dimension_numbers = #tpu.dot_dimension_numbers<[1], [0], [0], [1], [0, 0, 1, 1], [], []>} : vector<8x128xbf16>, vector<128x128xbf16>, vector<8x128xf32> -> vector<8x128xf32>
    %108 = arith.addf %102, %107 : vector<8x128xf32>
    %c12 = arith.constant 12 : index
    %c0_93 = arith.constant 0 : index
    %109 = vector.load %arg7[%c12, %c0_93] : memref<20x160xf32, #tpu.memory_space<vmem>>, vector<8x128xf32>
    %110 = arith.truncf %109 : vector<8x128xf32> to vector<8x128xbf16>
    %c6_94 = arith.constant 6 : index
    %c0_95 = arith.constant 0 : index
    %c0_96 = arith.constant 0 : index
    %111 = vector.load %arg1[%c6_94, %c0_95, %c0_96] : memref<9x128x128xbf16, #tpu.memory_space<vmem>>, vector<1x128x128xbf16>
    %112 = vector.shape_cast %111 : vector<1x128x128xbf16> to vector<128x128xbf16>
    %cst_97 = arith.constant dense<0.000000e+00> : vector<8x128xf32>
    %113 = tpu.matmul %110, %112, %cst_97 {dimension_numbers = #tpu.dot_dimension_numbers<[1], [0], [0], [1], [0, 0, 1, 1], [], []>} : vector<8x128xbf16>, vector<128x128xbf16>, vector<8x128xf32> -> vector<8x128xf32>
    %114 = arith.addf %108, %113 : vector<8x128xf32>
    %c12_98 = arith.constant 12 : index
    %c16_99 = arith.constant 16 : index
    %115 = vector.load %arg7[%c12_98, %c16_99] : memref<20x160xf32, #tpu.memory_space<vmem>>, vector<8x128xf32>
    %116 = arith.truncf %115 : vector<8x128xf32> to vector<8x128xbf16>
    %c7_100 = arith.constant 7 : index
    %c0_101 = arith.constant 0 : index
    %c0_102 = arith.constant 0 : index
    %117 = vector.load %arg1[%c7_100, %c0_101, %c0_102] : memref<9x128x128xbf16, #tpu.memory_space<vmem>>, vector<1x128x128xbf16>
    %118 = vector.shape_cast %117 : vector<1x128x128xbf16> to vector<128x128xbf16>
    %cst_103 = arith.constant dense<0.000000e+00> : vector<8x128xf32>
    %119 = tpu.matmul %116, %118, %cst_103 {dimension_numbers = #tpu.dot_dimension_numbers<[1], [0], [0], [1], [0, 0, 1, 1], [], []>} : vector<8x128xbf16>, vector<128x128xbf16>, vector<8x128xf32> -> vector<8x128xf32>
    %120 = arith.addf %114, %119 : vector<8x128xf32>
    %c12_104 = arith.constant 12 : index
    %c32_105 = arith.constant 32 : index
    %121 = vector.load %arg7[%c12_104, %c32_105] : memref<20x160xf32, #tpu.memory_space<vmem>>, vector<8x128xf32>
    %122 = arith.truncf %121 : vector<8x128xf32> to vector<8x128xbf16>
    %c8_106 = arith.constant 8 : index
    %c0_107 = arith.constant 0 : index
    %c0_108 = arith.constant 0 : index
    %123 = vector.load %arg1[%c8_106, %c0_107, %c0_108] : memref<9x128x128xbf16, #tpu.memory_space<vmem>>, vector<1x128x128xbf16>
    %124 = vector.shape_cast %123 : vector<1x128x128xbf16> to vector<128x128xbf16>
    %cst_109 = arith.constant dense<0.000000e+00> : vector<8x128xf32>
    %125 = tpu.matmul %122, %124, %cst_109 {dimension_numbers = #tpu.dot_dimension_numbers<[1], [0], [0], [1], [0, 0, 1, 1], [], []>} : vector<8x128xbf16>, vector<128x128xbf16>, vector<8x128xf32> -> vector<8x128xf32>
    %126 = arith.addf %120, %125 : vector<8x128xf32>
    %cst_110 = arith.constant dense<0.000000e+00> : vector<128xf32>
    %127 = vector.multi_reduction <add>, %126, %cst_110 [0] : vector<8x128xf32> to vector<128xf32>
    %128 = vector.shape_cast %127 : vector<128xf32> to vector<1x128xf32>
    %129 = arith.addf %67, %128 : vector<1x128xf32>
    %130 = arith.mulf %126, %126 : vector<8x128xf32>
    %cst_111 = arith.constant dense<0.000000e+00> : vector<128xf32>
    %131 = vector.multi_reduction <add>, %130, %cst_111 [0] : vector<8x128xf32> to vector<128xf32>
    %132 = vector.shape_cast %131 : vector<128xf32> to vector<1x128xf32>
    %133 = arith.addf %71, %132 : vector<1x128xf32>
    %c0_112 = arith.constant 0 : index
    %c0_113 = arith.constant 0 : index
    %134 = vector.load %arg2[%c0_112, %c0_113] : memref<128x16xf32, #tpu.memory_space<vmem>>, vector<128x16xf32>
    %cst_114 = arith.constant dense<0.000000e+00> : vector<1x16xf32>
    %135 = tpu.matmul %129, %134, %cst_114 {dimension_numbers = #tpu.dot_dimension_numbers<[1], [0], [0], [1], [0, 0, 1, 1], [], []>} : vector<1x128xf32>, vector<128x16xf32>, vector<1x16xf32> -> vector<1x16xf32>
    %c0_115 = arith.constant 0 : index
    %c0_116 = arith.constant 0 : index
    %136 = vector.load %arg2[%c0_115, %c0_116] : memref<128x16xf32, #tpu.memory_space<vmem>>, vector<128x16xf32>
    %cst_117 = arith.constant dense<0.000000e+00> : vector<1x16xf32>
    %137 = tpu.matmul %133, %136, %cst_117 {dimension_numbers = #tpu.dot_dimension_numbers<[1], [0], [0], [1], [0, 0, 1, 1], [], []>} : vector<1x128xf32>, vector<128x16xf32>, vector<1x16xf32> -> vector<1x16xf32>
    %cst_118 = arith.constant 7.812500e-03 : f32
    %138 = vector.broadcast %cst_118 : f32 to vector<1x16xf32>
    %139 = arith.mulf %135, %138 : vector<1x16xf32>
    %cst_119 = arith.constant 7.812500e-03 : f32
    %140 = vector.broadcast %cst_119 : f32 to vector<1x16xf32>
    %141 = arith.mulf %137, %140 : vector<1x16xf32>
    %142 = arith.mulf %139, %139 : vector<1x16xf32>
    %143 = arith.subf %141, %142 : vector<1x16xf32>
    %cst_120 = arith.constant 0.000000e+00 : f32
    %144 = vector.broadcast %cst_120 : f32 to vector<1x16xf32>
    %145 = arith.maximumf %143, %144 : vector<1x16xf32>
    %c0_121 = arith.constant 0 : index
    %c0_122 = arith.constant 0 : index
    %146 = vector.load %arg4[%c0_121, %c0_122] : memref<1x16xf32, #tpu.memory_space<vmem>>, vector<1x16xf32>
    %cst_123 = arith.constant 9.99999974E-6 : f32
    %147 = vector.broadcast %cst_123 : f32 to vector<1x16xf32>
    %148 = arith.addf %145, %147 : vector<1x16xf32>
    %149 = math.rsqrt %148 : vector<1x16xf32>
    %150 = arith.mulf %146, %149 : vector<1x16xf32>
    %c0_124 = arith.constant 0 : index
    %c0_125 = arith.constant 0 : index
    %151 = vector.load %arg5[%c0_124, %c0_125] : memref<1x16xf32, #tpu.memory_space<vmem>>, vector<1x16xf32>
    %152 = arith.mulf %139, %150 : vector<1x16xf32>
    %153 = arith.subf %151, %152 : vector<1x16xf32>
    %c0_126 = arith.constant 0 : index
    %c0_127 = arith.constant 0 : index
    %154 = vector.load %arg3[%c0_126, %c0_127] : memref<16x128xf32, #tpu.memory_space<vmem>>, vector<16x128xf32>
    %cst_128 = arith.constant dense<0.000000e+00> : vector<1x128xf32>
    %155 = tpu.matmul %150, %154, %cst_128 {dimension_numbers = #tpu.dot_dimension_numbers<[1], [0], [0], [1], [0, 0, 1, 1], [], []>} : vector<1x16xf32>, vector<16x128xf32>, vector<1x128xf32> -> vector<1x128xf32>
    %c0_129 = arith.constant 0 : index
    %c0_130 = arith.constant 0 : index
    %156 = vector.load %arg3[%c0_129, %c0_130] : memref<16x128xf32, #tpu.memory_space<vmem>>, vector<16x128xf32>
    %cst_131 = arith.constant dense<0.000000e+00> : vector<1x128xf32>
    %157 = tpu.matmul %153, %156, %cst_131 {dimension_numbers = #tpu.dot_dimension_numbers<[1], [0], [0], [1], [0, 0, 1, 1], [], []>} : vector<1x16xf32>, vector<16x128xf32>, vector<1x128xf32> -> vector<1x128xf32>
    %158 = vector.broadcast %155 : vector<1x128xf32> to vector<8x128xf32>
    %159 = arith.mulf %64, %158 : vector<8x128xf32>
    %160 = vector.broadcast %157 : vector<1x128xf32> to vector<8x128xf32>
    %161 = arith.addf %159, %160 : vector<8x128xf32>
    %cst_132 = arith.constant 0.000000e+00 : f32
    %162 = vector.broadcast %cst_132 : f32 to vector<8x128xf32>
    %163 = arith.maximumf %161, %162 : vector<8x128xf32>
    %164 = arith.truncf %163 : vector<8x128xf32> to vector<8x128xbf16>
    %c0_133 = arith.constant 0 : index
    %c0_134 = arith.constant 0 : index
    %165 = vector.load %arg6[%c0_133, %c0_134] : memref<16x128xbf16, #tpu.memory_space<vmem>>, vector<8x128xbf16>
    tpu.vector_store %arg6[%c0_133, %c0_134], %164 {strides = array<i32>} : memref<16x128xbf16, #tpu.memory_space<vmem>>, vector<8x128xbf16>,
    %166 = vector.broadcast %155 : vector<1x128xf32> to vector<8x128xf32>
    %167 = arith.mulf %126, %166 : vector<8x128xf32>
    %168 = vector.broadcast %157 : vector<1x128xf32> to vector<8x128xf32>
    %169 = arith.addf %167, %168 : vector<8x128xf32>
    %cst_135 = arith.constant 0.000000e+00 : f32
    %170 = vector.broadcast %cst_135 : f32 to vector<8x128xf32>
    %171 = arith.maximumf %169, %170 : vector<8x128xf32>
    %172 = arith.truncf %171 : vector<8x128xf32> to vector<8x128xbf16>
    %c8_136 = arith.constant 8 : index
    %c0_137 = arith.constant 0 : index
    %173 = vector.load %arg6[%c8_136, %c0_137] : memref<16x128xbf16, #tpu.memory_space<vmem>>, vector<8x128xbf16>
    tpu.vector_store %arg6[%c8_136, %c0_137], %172 {strides = array<i32>} : memref<16x128xbf16, #tpu.memory_space<vmem>>, vector<8x128xbf16>,
    return
  }
}

module attributes {stable_mosaic.version = 11 : i64} {
  func.func @_encoder_block_kernel(%arg0: memref<8x128xbf16, #tpu.memory_space<vmem>>, %arg1: memref<9x128x128xbf16, #tpu.memory_space<vmem>>, %arg2: memref<128x32xf32, #tpu.memory_space<vmem>>, %arg3: memref<32x128xf32, #tpu.memory_space<vmem>>, %arg4: memref<1x32xf32, #tpu.memory_space<vmem>>, %arg5: memref<1x32xf32, #tpu.memory_space<vmem>>, %arg6: memref<8x128xbf16, #tpu.memory_space<vmem>>, %arg7: memref<12x192xf32, #tpu.memory_space<vmem>>) attributes {dimension_semantics = [], scalar_prefetch = 0 : i64, scratch_operands = 1 : i64, tpu.core_type = #tpu.core_type<tc>} {
    %cst = arith.constant 0.000000e+00 : f32
    %0 = vector.broadcast %cst : f32 to vector<12x192xf32>
    %c0 = arith.constant 0 : index
    %c0_0 = arith.constant 0 : index
    %1 = vector.load %arg7[%c0, %c0_0] : memref<12x192xf32, #tpu.memory_space<vmem>>, vector<12x192xf32>
    tpu.vector_store %arg7[%c0, %c0_0], %0 {strides = array<i32>} : memref<12x192xf32, #tpu.memory_space<vmem>>, vector<12x192xf32>,
    %c0_1 = arith.constant 0 : index
    %c0_2 = arith.constant 0 : index
    %2 = vector.load %arg0[%c0_1, %c0_2] : memref<8x128xbf16, #tpu.memory_space<vmem>>, vector<4x128xbf16>
    %3 = arith.extf %2 : vector<4x128xbf16> to vector<4x128xf32>
    %c1 = arith.constant 1 : index
    %c32 = arith.constant 32 : index
    %4 = vector.load %arg7[%c1, %c32] : memref<12x192xf32, #tpu.memory_space<vmem>>, vector<4x128xf32>
    tpu.vector_store %arg7[%c1, %c32], %3 {strides = array<i32>} : memref<12x192xf32, #tpu.memory_space<vmem>>, vector<4x128xf32>,
    %c4 = arith.constant 4 : index
    %c0_3 = arith.constant 0 : index
    %5 = vector.load %arg0[%c4, %c0_3] : memref<8x128xbf16, #tpu.memory_space<vmem>>, vector<4x128xbf16>
    %6 = arith.extf %5 : vector<4x128xbf16> to vector<4x128xf32>
    %c7 = arith.constant 7 : index
    %c32_4 = arith.constant 32 : index
    %7 = vector.load %arg7[%c7, %c32_4] : memref<12x192xf32, #tpu.memory_space<vmem>>, vector<4x128xf32>
    tpu.vector_store %arg7[%c7, %c32_4], %6 {strides = array<i32>} : memref<12x192xf32, #tpu.memory_space<vmem>>, vector<4x128xf32>,
    %cst_5 = arith.constant 0.000000e+00 : f32
    %8 = vector.broadcast %cst_5 : f32 to vector<1x128xf32>
    %cst_6 = arith.constant 0.000000e+00 : f32
    %9 = vector.broadcast %cst_6 : f32 to vector<1x128xf32>
    %cst_7 = arith.constant 0.000000e+00 : f32
    %10 = vector.broadcast %cst_7 : f32 to vector<4x128xf32>
    %c0_8 = arith.constant 0 : index
    %c0_9 = arith.constant 0 : index
    %11 = vector.load %arg7[%c0_8, %c0_9] : memref<12x192xf32, #tpu.memory_space<vmem>>, vector<4x128xf32>
    %12 = arith.truncf %11 : vector<4x128xf32> to vector<4x128xbf16>
    %c0_10 = arith.constant 0 : index
    %c0_11 = arith.constant 0 : index
    %c0_12 = arith.constant 0 : index
    %13 = vector.load %arg1[%c0_10, %c0_11, %c0_12] : memref<9x128x128xbf16, #tpu.memory_space<vmem>>, vector<1x128x128xbf16>
    %14 = vector.shape_cast %13 : vector<1x128x128xbf16> to vector<128x128xbf16>
    %cst_13 = arith.constant dense<0.000000e+00> : vector<4x128xf32>
    %15 = tpu.matmul %12, %14, %cst_13 {dimension_numbers = #tpu.dot_dimension_numbers<[1], [0], [0], [1], [0, 0, 1, 1], [], []>} : vector<4x128xbf16>, vector<128x128xbf16>, vector<4x128xf32> -> vector<4x128xf32>
    %16 = arith.addf %10, %15 : vector<4x128xf32>
    %c0_14 = arith.constant 0 : index
    %c32_15 = arith.constant 32 : index
    %17 = vector.load %arg7[%c0_14, %c32_15] : memref<12x192xf32, #tpu.memory_space<vmem>>, vector<4x128xf32>
    %18 = arith.truncf %17 : vector<4x128xf32> to vector<4x128xbf16>
    %c1_16 = arith.constant 1 : index
    %c0_17 = arith.constant 0 : index
    %c0_18 = arith.constant 0 : index
    %19 = vector.load %arg1[%c1_16, %c0_17, %c0_18] : memref<9x128x128xbf16, #tpu.memory_space<vmem>>, vector<1x128x128xbf16>
    %20 = vector.shape_cast %19 : vector<1x128x128xbf16> to vector<128x128xbf16>
    %cst_19 = arith.constant dense<0.000000e+00> : vector<4x128xf32>
    %21 = tpu.matmul %18, %20, %cst_19 {dimension_numbers = #tpu.dot_dimension_numbers<[1], [0], [0], [1], [0, 0, 1, 1], [], []>} : vector<4x128xbf16>, vector<128x128xbf16>, vector<4x128xf32> -> vector<4x128xf32>
    %22 = arith.addf %16, %21 : vector<4x128xf32>
    %c0_20 = arith.constant 0 : index
    %c64 = arith.constant 64 : index
    %23 = vector.load %arg7[%c0_20, %c64] : memref<12x192xf32, #tpu.memory_space<vmem>>, vector<4x128xf32>
    %24 = arith.truncf %23 : vector<4x128xf32> to vector<4x128xbf16>
    %c2 = arith.constant 2 : index
    %c0_21 = arith.constant 0 : index
    %c0_22 = arith.constant 0 : index
    %25 = vector.load %arg1[%c2, %c0_21, %c0_22] : memref<9x128x128xbf16, #tpu.memory_space<vmem>>, vector<1x128x128xbf16>
    %26 = vector.shape_cast %25 : vector<1x128x128xbf16> to vector<128x128xbf16>
    %cst_23 = arith.constant dense<0.000000e+00> : vector<4x128xf32>
    %27 = tpu.matmul %24, %26, %cst_23 {dimension_numbers = #tpu.dot_dimension_numbers<[1], [0], [0], [1], [0, 0, 1, 1], [], []>} : vector<4x128xbf16>, vector<128x128xbf16>, vector<4x128xf32> -> vector<4x128xf32>
    %28 = arith.addf %22, %27 : vector<4x128xf32>
    %c1_24 = arith.constant 1 : index
    %c0_25 = arith.constant 0 : index
    %29 = vector.load %arg7[%c1_24, %c0_25] : memref<12x192xf32, #tpu.memory_space<vmem>>, vector<4x128xf32>
    %30 = arith.truncf %29 : vector<4x128xf32> to vector<4x128xbf16>
    %c3 = arith.constant 3 : index
    %c0_26 = arith.constant 0 : index
    %c0_27 = arith.constant 0 : index
    %31 = vector.load %arg1[%c3, %c0_26, %c0_27] : memref<9x128x128xbf16, #tpu.memory_space<vmem>>, vector<1x128x128xbf16>
    %32 = vector.shape_cast %31 : vector<1x128x128xbf16> to vector<128x128xbf16>
    %cst_28 = arith.constant dense<0.000000e+00> : vector<4x128xf32>
    %33 = tpu.matmul %30, %32, %cst_28 {dimension_numbers = #tpu.dot_dimension_numbers<[1], [0], [0], [1], [0, 0, 1, 1], [], []>} : vector<4x128xbf16>, vector<128x128xbf16>, vector<4x128xf32> -> vector<4x128xf32>
    %34 = arith.addf %28, %33 : vector<4x128xf32>
    %c1_29 = arith.constant 1 : index
    %c32_30 = arith.constant 32 : index
    %35 = vector.load %arg7[%c1_29, %c32_30] : memref<12x192xf32, #tpu.memory_space<vmem>>, vector<4x128xf32>
    %36 = arith.truncf %35 : vector<4x128xf32> to vector<4x128xbf16>
    %c4_31 = arith.constant 4 : index
    %c0_32 = arith.constant 0 : index
    %c0_33 = arith.constant 0 : index
    %37 = vector.load %arg1[%c4_31, %c0_32, %c0_33] : memref<9x128x128xbf16, #tpu.memory_space<vmem>>, vector<1x128x128xbf16>
    %38 = vector.shape_cast %37 : vector<1x128x128xbf16> to vector<128x128xbf16>
    %cst_34 = arith.constant dense<0.000000e+00> : vector<4x128xf32>
    %39 = tpu.matmul %36, %38, %cst_34 {dimension_numbers = #tpu.dot_dimension_numbers<[1], [0], [0], [1], [0, 0, 1, 1], [], []>} : vector<4x128xbf16>, vector<128x128xbf16>, vector<4x128xf32> -> vector<4x128xf32>
    %40 = arith.addf %34, %39 : vector<4x128xf32>
    %c1_35 = arith.constant 1 : index
    %c64_36 = arith.constant 64 : index
    %41 = vector.load %arg7[%c1_35, %c64_36] : memref<12x192xf32, #tpu.memory_space<vmem>>, vector<4x128xf32>
    %42 = arith.truncf %41 : vector<4x128xf32> to vector<4x128xbf16>
    %c5 = arith.constant 5 : index
    %c0_37 = arith.constant 0 : index
    %c0_38 = arith.constant 0 : index
    %43 = vector.load %arg1[%c5, %c0_37, %c0_38] : memref<9x128x128xbf16, #tpu.memory_space<vmem>>, vector<1x128x128xbf16>
    %44 = vector.shape_cast %43 : vector<1x128x128xbf16> to vector<128x128xbf16>
    %cst_39 = arith.constant dense<0.000000e+00> : vector<4x128xf32>
    %45 = tpu.matmul %42, %44, %cst_39 {dimension_numbers = #tpu.dot_dimension_numbers<[1], [0], [0], [1], [0, 0, 1, 1], [], []>} : vector<4x128xbf16>, vector<128x128xbf16>, vector<4x128xf32> -> vector<4x128xf32>
    %46 = arith.addf %40, %45 : vector<4x128xf32>
    %c2_40 = arith.constant 2 : index
    %c0_41 = arith.constant 0 : index
    %47 = vector.load %arg7[%c2_40, %c0_41] : memref<12x192xf32, #tpu.memory_space<vmem>>, vector<4x128xf32>
    %48 = arith.truncf %47 : vector<4x128xf32> to vector<4x128xbf16>
    %c6 = arith.constant 6 : index
    %c0_42 = arith.constant 0 : index
    %c0_43 = arith.constant 0 : index
    %49 = vector.load %arg1[%c6, %c0_42, %c0_43] : memref<9x128x128xbf16, #tpu.memory_space<vmem>>, vector<1x128x128xbf16>
    %50 = vector.shape_cast %49 : vector<1x128x128xbf16> to vector<128x128xbf16>
    %cst_44 = arith.constant dense<0.000000e+00> : vector<4x128xf32>
    %51 = tpu.matmul %48, %50, %cst_44 {dimension_numbers = #tpu.dot_dimension_numbers<[1], [0], [0], [1], [0, 0, 1, 1], [], []>} : vector<4x128xbf16>, vector<128x128xbf16>, vector<4x128xf32> -> vector<4x128xf32>
    %52 = arith.addf %46, %51 : vector<4x128xf32>
    %c2_45 = arith.constant 2 : index
    %c32_46 = arith.constant 32 : index
    %53 = vector.load %arg7[%c2_45, %c32_46] : memref<12x192xf32, #tpu.memory_space<vmem>>, vector<4x128xf32>
    %54 = arith.truncf %53 : vector<4x128xf32> to vector<4x128xbf16>
    %c7_47 = arith.constant 7 : index
    %c0_48 = arith.constant 0 : index
    %c0_49 = arith.constant 0 : index
    %55 = vector.load %arg1[%c7_47, %c0_48, %c0_49] : memref<9x128x128xbf16, #tpu.memory_space<vmem>>, vector<1x128x128xbf16>
    %56 = vector.shape_cast %55 : vector<1x128x128xbf16> to vector<128x128xbf16>
    %cst_50 = arith.constant dense<0.000000e+00> : vector<4x128xf32>
    %57 = tpu.matmul %54, %56, %cst_50 {dimension_numbers = #tpu.dot_dimension_numbers<[1], [0], [0], [1], [0, 0, 1, 1], [], []>} : vector<4x128xbf16>, vector<128x128xbf16>, vector<4x128xf32> -> vector<4x128xf32>
    %58 = arith.addf %52, %57 : vector<4x128xf32>
    %c2_51 = arith.constant 2 : index
    %c64_52 = arith.constant 64 : index
    %59 = vector.load %arg7[%c2_51, %c64_52] : memref<12x192xf32, #tpu.memory_space<vmem>>, vector<4x128xf32>
    %60 = arith.truncf %59 : vector<4x128xf32> to vector<4x128xbf16>
    %c8 = arith.constant 8 : index
    %c0_53 = arith.constant 0 : index
    %c0_54 = arith.constant 0 : index
    %61 = vector.load %arg1[%c8, %c0_53, %c0_54] : memref<9x128x128xbf16, #tpu.memory_space<vmem>>, vector<1x128x128xbf16>
    %62 = vector.shape_cast %61 : vector<1x128x128xbf16> to vector<128x128xbf16>
    %cst_55 = arith.constant dense<0.000000e+00> : vector<4x128xf32>
    %63 = tpu.matmul %60, %62, %cst_55 {dimension_numbers = #tpu.dot_dimension_numbers<[1], [0], [0], [1], [0, 0, 1, 1], [], []>} : vector<4x128xbf16>, vector<128x128xbf16>, vector<4x128xf32> -> vector<4x128xf32>
    %64 = arith.addf %58, %63 : vector<4x128xf32>
    %cst_56 = arith.constant dense<0.000000e+00> : vector<128xf32>
    %65 = vector.multi_reduction <add>, %64, %cst_56 [0] : vector<4x128xf32> to vector<128xf32>
    %66 = vector.shape_cast %65 : vector<128xf32> to vector<1x128xf32>
    %67 = arith.addf %8, %66 : vector<1x128xf32>
    %68 = arith.mulf %64, %64 : vector<4x128xf32>
    %cst_57 = arith.constant dense<0.000000e+00> : vector<128xf32>
    %69 = vector.multi_reduction <add>, %68, %cst_57 [0] : vector<4x128xf32> to vector<128xf32>
    %70 = vector.shape_cast %69 : vector<128xf32> to vector<1x128xf32>
    %71 = arith.addf %9, %70 : vector<1x128xf32>
    %cst_58 = arith.constant 0.000000e+00 : f32
    %72 = vector.broadcast %cst_58 : f32 to vector<4x128xf32>
    %c6_59 = arith.constant 6 : index
    %c0_60 = arith.constant 0 : index
    %73 = vector.load %arg7[%c6_59, %c0_60] : memref<12x192xf32, #tpu.memory_space<vmem>>, vector<4x128xf32>
    %74 = arith.truncf %73 : vector<4x128xf32> to vector<4x128xbf16>
    %c0_61 = arith.constant 0 : index
    %c0_62 = arith.constant 0 : index
    %c0_63 = arith.constant 0 : index
    %75 = vector.load %arg1[%c0_61, %c0_62, %c0_63] : memref<9x128x128xbf16, #tpu.memory_space<vmem>>, vector<1x128x128xbf16>
    %76 = vector.shape_cast %75 : vector<1x128x128xbf16> to vector<128x128xbf16>
    %cst_64 = arith.constant dense<0.000000e+00> : vector<4x128xf32>
    %77 = tpu.matmul %74, %76, %cst_64 {dimension_numbers = #tpu.dot_dimension_numbers<[1], [0], [0], [1], [0, 0, 1, 1], [], []>} : vector<4x128xbf16>, vector<128x128xbf16>, vector<4x128xf32> -> vector<4x128xf32>
    %78 = arith.addf %72, %77 : vector<4x128xf32>
    %c6_65 = arith.constant 6 : index
    %c32_66 = arith.constant 32 : index
    %79 = vector.load %arg7[%c6_65, %c32_66] : memref<12x192xf32, #tpu.memory_space<vmem>>, vector<4x128xf32>
    %80 = arith.truncf %79 : vector<4x128xf32> to vector<4x128xbf16>
    %c1_67 = arith.constant 1 : index
    %c0_68 = arith.constant 0 : index
    %c0_69 = arith.constant 0 : index
    %81 = vector.load %arg1[%c1_67, %c0_68, %c0_69] : memref<9x128x128xbf16, #tpu.memory_space<vmem>>, vector<1x128x128xbf16>
    %82 = vector.shape_cast %81 : vector<1x128x128xbf16> to vector<128x128xbf16>
    %cst_70 = arith.constant dense<0.000000e+00> : vector<4x128xf32>
    %83 = tpu.matmul %80, %82, %cst_70 {dimension_numbers = #tpu.dot_dimension_numbers<[1], [0], [0], [1], [0, 0, 1, 1], [], []>} : vector<4x128xbf16>, vector<128x128xbf16>, vector<4x128xf32> -> vector<4x128xf32>
    %84 = arith.addf %78, %83 : vector<4x128xf32>
    %c6_71 = arith.constant 6 : index
    %c64_72 = arith.constant 64 : index
    %85 = vector.load %arg7[%c6_71, %c64_72] : memref<12x192xf32, #tpu.memory_space<vmem>>, vector<4x128xf32>
    %86 = arith.truncf %85 : vector<4x128xf32> to vector<4x128xbf16>
    %c2_73 = arith.constant 2 : index
    %c0_74 = arith.constant 0 : index
    %c0_75 = arith.constant 0 : index
    %87 = vector.load %arg1[%c2_73, %c0_74, %c0_75] : memref<9x128x128xbf16, #tpu.memory_space<vmem>>, vector<1x128x128xbf16>
    %88 = vector.shape_cast %87 : vector<1x128x128xbf16> to vector<128x128xbf16>
    %cst_76 = arith.constant dense<0.000000e+00> : vector<4x128xf32>
    %89 = tpu.matmul %86, %88, %cst_76 {dimension_numbers = #tpu.dot_dimension_numbers<[1], [0], [0], [1], [0, 0, 1, 1], [], []>} : vector<4x128xbf16>, vector<128x128xbf16>, vector<4x128xf32> -> vector<4x128xf32>
    %90 = arith.addf %84, %89 : vector<4x128xf32>
    %c7_77 = arith.constant 7 : index
    %c0_78 = arith.constant 0 : index
    %91 = vector.load %arg7[%c7_77, %c0_78] : memref<12x192xf32, #tpu.memory_space<vmem>>, vector<4x128xf32>
    %92 = arith.truncf %91 : vector<4x128xf32> to vector<4x128xbf16>
    %c3_79 = arith.constant 3 : index
    %c0_80 = arith.constant 0 : index
    %c0_81 = arith.constant 0 : index
    %93 = vector.load %arg1[%c3_79, %c0_80, %c0_81] : memref<9x128x128xbf16, #tpu.memory_space<vmem>>, vector<1x128x128xbf16>
    %94 = vector.shape_cast %93 : vector<1x128x128xbf16> to vector<128x128xbf16>
    %cst_82 = arith.constant dense<0.000000e+00> : vector<4x128xf32>
    %95 = tpu.matmul %92, %94, %cst_82 {dimension_numbers = #tpu.dot_dimension_numbers<[1], [0], [0], [1], [0, 0, 1, 1], [], []>} : vector<4x128xbf16>, vector<128x128xbf16>, vector<4x128xf32> -> vector<4x128xf32>
    %96 = arith.addf %90, %95 : vector<4x128xf32>
    %c7_83 = arith.constant 7 : index
    %c32_84 = arith.constant 32 : index
    %97 = vector.load %arg7[%c7_83, %c32_84] : memref<12x192xf32, #tpu.memory_space<vmem>>, vector<4x128xf32>
    %98 = arith.truncf %97 : vector<4x128xf32> to vector<4x128xbf16>
    %c4_85 = arith.constant 4 : index
    %c0_86 = arith.constant 0 : index
    %c0_87 = arith.constant 0 : index
    %99 = vector.load %arg1[%c4_85, %c0_86, %c0_87] : memref<9x128x128xbf16, #tpu.memory_space<vmem>>, vector<1x128x128xbf16>
    %100 = vector.shape_cast %99 : vector<1x128x128xbf16> to vector<128x128xbf16>
    %cst_88 = arith.constant dense<0.000000e+00> : vector<4x128xf32>
    %101 = tpu.matmul %98, %100, %cst_88 {dimension_numbers = #tpu.dot_dimension_numbers<[1], [0], [0], [1], [0, 0, 1, 1], [], []>} : vector<4x128xbf16>, vector<128x128xbf16>, vector<4x128xf32> -> vector<4x128xf32>
    %102 = arith.addf %96, %101 : vector<4x128xf32>
    %c7_89 = arith.constant 7 : index
    %c64_90 = arith.constant 64 : index
    %103 = vector.load %arg7[%c7_89, %c64_90] : memref<12x192xf32, #tpu.memory_space<vmem>>, vector<4x128xf32>
    %104 = arith.truncf %103 : vector<4x128xf32> to vector<4x128xbf16>
    %c5_91 = arith.constant 5 : index
    %c0_92 = arith.constant 0 : index
    %c0_93 = arith.constant 0 : index
    %105 = vector.load %arg1[%c5_91, %c0_92, %c0_93] : memref<9x128x128xbf16, #tpu.memory_space<vmem>>, vector<1x128x128xbf16>
    %106 = vector.shape_cast %105 : vector<1x128x128xbf16> to vector<128x128xbf16>
    %cst_94 = arith.constant dense<0.000000e+00> : vector<4x128xf32>
    %107 = tpu.matmul %104, %106, %cst_94 {dimension_numbers = #tpu.dot_dimension_numbers<[1], [0], [0], [1], [0, 0, 1, 1], [], []>} : vector<4x128xbf16>, vector<128x128xbf16>, vector<4x128xf32> -> vector<4x128xf32>
    %108 = arith.addf %102, %107 : vector<4x128xf32>
    %c8_95 = arith.constant 8 : index
    %c0_96 = arith.constant 0 : index
    %109 = vector.load %arg7[%c8_95, %c0_96] : memref<12x192xf32, #tpu.memory_space<vmem>>, vector<4x128xf32>
    %110 = arith.truncf %109 : vector<4x128xf32> to vector<4x128xbf16>
    %c6_97 = arith.constant 6 : index
    %c0_98 = arith.constant 0 : index
    %c0_99 = arith.constant 0 : index
    %111 = vector.load %arg1[%c6_97, %c0_98, %c0_99] : memref<9x128x128xbf16, #tpu.memory_space<vmem>>, vector<1x128x128xbf16>
    %112 = vector.shape_cast %111 : vector<1x128x128xbf16> to vector<128x128xbf16>
    %cst_100 = arith.constant dense<0.000000e+00> : vector<4x128xf32>
    %113 = tpu.matmul %110, %112, %cst_100 {dimension_numbers = #tpu.dot_dimension_numbers<[1], [0], [0], [1], [0, 0, 1, 1], [], []>} : vector<4x128xbf16>, vector<128x128xbf16>, vector<4x128xf32> -> vector<4x128xf32>
    %114 = arith.addf %108, %113 : vector<4x128xf32>
    %c8_101 = arith.constant 8 : index
    %c32_102 = arith.constant 32 : index
    %115 = vector.load %arg7[%c8_101, %c32_102] : memref<12x192xf32, #tpu.memory_space<vmem>>, vector<4x128xf32>
    %116 = arith.truncf %115 : vector<4x128xf32> to vector<4x128xbf16>
    %c7_103 = arith.constant 7 : index
    %c0_104 = arith.constant 0 : index
    %c0_105 = arith.constant 0 : index
    %117 = vector.load %arg1[%c7_103, %c0_104, %c0_105] : memref<9x128x128xbf16, #tpu.memory_space<vmem>>, vector<1x128x128xbf16>
    %118 = vector.shape_cast %117 : vector<1x128x128xbf16> to vector<128x128xbf16>
    %cst_106 = arith.constant dense<0.000000e+00> : vector<4x128xf32>
    %119 = tpu.matmul %116, %118, %cst_106 {dimension_numbers = #tpu.dot_dimension_numbers<[1], [0], [0], [1], [0, 0, 1, 1], [], []>} : vector<4x128xbf16>, vector<128x128xbf16>, vector<4x128xf32> -> vector<4x128xf32>
    %120 = arith.addf %114, %119 : vector<4x128xf32>
    %c8_107 = arith.constant 8 : index
    %c64_108 = arith.constant 64 : index
    %121 = vector.load %arg7[%c8_107, %c64_108] : memref<12x192xf32, #tpu.memory_space<vmem>>, vector<4x128xf32>
    %122 = arith.truncf %121 : vector<4x128xf32> to vector<4x128xbf16>
    %c8_109 = arith.constant 8 : index
    %c0_110 = arith.constant 0 : index
    %c0_111 = arith.constant 0 : index
    %123 = vector.load %arg1[%c8_109, %c0_110, %c0_111] : memref<9x128x128xbf16, #tpu.memory_space<vmem>>, vector<1x128x128xbf16>
    %124 = vector.shape_cast %123 : vector<1x128x128xbf16> to vector<128x128xbf16>
    %cst_112 = arith.constant dense<0.000000e+00> : vector<4x128xf32>
    %125 = tpu.matmul %122, %124, %cst_112 {dimension_numbers = #tpu.dot_dimension_numbers<[1], [0], [0], [1], [0, 0, 1, 1], [], []>} : vector<4x128xbf16>, vector<128x128xbf16>, vector<4x128xf32> -> vector<4x128xf32>
    %126 = arith.addf %120, %125 : vector<4x128xf32>
    %cst_113 = arith.constant dense<0.000000e+00> : vector<128xf32>
    %127 = vector.multi_reduction <add>, %126, %cst_113 [0] : vector<4x128xf32> to vector<128xf32>
    %128 = vector.shape_cast %127 : vector<128xf32> to vector<1x128xf32>
    %129 = arith.addf %67, %128 : vector<1x128xf32>
    %130 = arith.mulf %126, %126 : vector<4x128xf32>
    %cst_114 = arith.constant dense<0.000000e+00> : vector<128xf32>
    %131 = vector.multi_reduction <add>, %130, %cst_114 [0] : vector<4x128xf32> to vector<128xf32>
    %132 = vector.shape_cast %131 : vector<128xf32> to vector<1x128xf32>
    %133 = arith.addf %71, %132 : vector<1x128xf32>
    %c0_115 = arith.constant 0 : index
    %c0_116 = arith.constant 0 : index
    %134 = vector.load %arg2[%c0_115, %c0_116] : memref<128x32xf32, #tpu.memory_space<vmem>>, vector<128x32xf32>
    %cst_117 = arith.constant dense<0.000000e+00> : vector<1x32xf32>
    %135 = tpu.matmul %129, %134, %cst_117 {dimension_numbers = #tpu.dot_dimension_numbers<[1], [0], [0], [1], [0, 0, 1, 1], [], []>} : vector<1x128xf32>, vector<128x32xf32>, vector<1x32xf32> -> vector<1x32xf32>
    %c0_118 = arith.constant 0 : index
    %c0_119 = arith.constant 0 : index
    %136 = vector.load %arg2[%c0_118, %c0_119] : memref<128x32xf32, #tpu.memory_space<vmem>>, vector<128x32xf32>
    %cst_120 = arith.constant dense<0.000000e+00> : vector<1x32xf32>
    %137 = tpu.matmul %133, %136, %cst_120 {dimension_numbers = #tpu.dot_dimension_numbers<[1], [0], [0], [1], [0, 0, 1, 1], [], []>} : vector<1x128xf32>, vector<128x32xf32>, vector<1x32xf32> -> vector<1x32xf32>
    %cst_121 = arith.constant 3.125000e-02 : f32
    %138 = vector.broadcast %cst_121 : f32 to vector<1x32xf32>
    %139 = arith.mulf %135, %138 : vector<1x32xf32>
    %cst_122 = arith.constant 3.125000e-02 : f32
    %140 = vector.broadcast %cst_122 : f32 to vector<1x32xf32>
    %141 = arith.mulf %137, %140 : vector<1x32xf32>
    %142 = arith.mulf %139, %139 : vector<1x32xf32>
    %143 = arith.subf %141, %142 : vector<1x32xf32>
    %cst_123 = arith.constant 0.000000e+00 : f32
    %144 = vector.broadcast %cst_123 : f32 to vector<1x32xf32>
    %145 = arith.maximumf %143, %144 : vector<1x32xf32>
    %c0_124 = arith.constant 0 : index
    %c0_125 = arith.constant 0 : index
    %146 = vector.load %arg4[%c0_124, %c0_125] : memref<1x32xf32, #tpu.memory_space<vmem>>, vector<1x32xf32>
    %cst_126 = arith.constant 9.99999974E-6 : f32
    %147 = vector.broadcast %cst_126 : f32 to vector<1x32xf32>
    %148 = arith.addf %145, %147 : vector<1x32xf32>
    %149 = math.rsqrt %148 : vector<1x32xf32>
    %150 = arith.mulf %146, %149 : vector<1x32xf32>
    %c0_127 = arith.constant 0 : index
    %c0_128 = arith.constant 0 : index
    %151 = vector.load %arg5[%c0_127, %c0_128] : memref<1x32xf32, #tpu.memory_space<vmem>>, vector<1x32xf32>
    %152 = arith.mulf %139, %150 : vector<1x32xf32>
    %153 = arith.subf %151, %152 : vector<1x32xf32>
    %c0_129 = arith.constant 0 : index
    %c0_130 = arith.constant 0 : index
    %154 = vector.load %arg3[%c0_129, %c0_130] : memref<32x128xf32, #tpu.memory_space<vmem>>, vector<32x128xf32>
    %cst_131 = arith.constant dense<0.000000e+00> : vector<1x128xf32>
    %155 = tpu.matmul %150, %154, %cst_131 {dimension_numbers = #tpu.dot_dimension_numbers<[1], [0], [0], [1], [0, 0, 1, 1], [], []>} : vector<1x32xf32>, vector<32x128xf32>, vector<1x128xf32> -> vector<1x128xf32>
    %c0_132 = arith.constant 0 : index
    %c0_133 = arith.constant 0 : index
    %156 = vector.load %arg3[%c0_132, %c0_133] : memref<32x128xf32, #tpu.memory_space<vmem>>, vector<32x128xf32>
    %cst_134 = arith.constant dense<0.000000e+00> : vector<1x128xf32>
    %157 = tpu.matmul %153, %156, %cst_134 {dimension_numbers = #tpu.dot_dimension_numbers<[1], [0], [0], [1], [0, 0, 1, 1], [], []>} : vector<1x32xf32>, vector<32x128xf32>, vector<1x128xf32> -> vector<1x128xf32>
    %158 = vector.broadcast %155 : vector<1x128xf32> to vector<4x128xf32>
    %159 = arith.mulf %64, %158 : vector<4x128xf32>
    %160 = vector.broadcast %157 : vector<1x128xf32> to vector<4x128xf32>
    %161 = arith.addf %159, %160 : vector<4x128xf32>
    %cst_135 = arith.constant 0.000000e+00 : f32
    %162 = vector.broadcast %cst_135 : f32 to vector<4x128xf32>
    %163 = arith.maximumf %161, %162 : vector<4x128xf32>
    %164 = arith.truncf %163 : vector<4x128xf32> to vector<4x128xbf16>
    %c0_136 = arith.constant 0 : index
    %c0_137 = arith.constant 0 : index
    %165 = vector.load %arg6[%c0_136, %c0_137] : memref<8x128xbf16, #tpu.memory_space<vmem>>, vector<4x128xbf16>
    tpu.vector_store %arg6[%c0_136, %c0_137], %164 {strides = array<i32>} : memref<8x128xbf16, #tpu.memory_space<vmem>>, vector<4x128xbf16>,
    %166 = vector.broadcast %155 : vector<1x128xf32> to vector<4x128xf32>
    %167 = arith.mulf %126, %166 : vector<4x128xf32>
    %168 = vector.broadcast %157 : vector<1x128xf32> to vector<4x128xf32>
    %169 = arith.addf %167, %168 : vector<4x128xf32>
    %cst_138 = arith.constant 0.000000e+00 : f32
    %170 = vector.broadcast %cst_138 : f32 to vector<4x128xf32>
    %171 = arith.maximumf %169, %170 : vector<4x128xf32>
    %172 = arith.truncf %171 : vector<4x128xf32> to vector<4x128xbf16>
    %c4_139 = arith.constant 4 : index
    %c0_140 = arith.constant 0 : index
    %173 = vector.load %arg6[%c4_139, %c0_140] : memref<8x128xbf16, #tpu.memory_space<vmem>>, vector<4x128xbf16>
    tpu.vector_store %arg6[%c4_139, %c0_140], %172 {strides = array<i32>} : memref<8x128xbf16, #tpu.memory_space<vmem>>, vector<4x128xbf16>,
    return
  }
}

module attributes {stable_mosaic.version = 11 : i64} {
  func.func @_encoder_block_kernel(%arg0: memref<8x64xbf16, #tpu.memory_space<vmem>>, %arg1: memref<9x64x128xbf16, #tpu.memory_space<vmem>>, %arg2: memref<128x32xf32, #tpu.memory_space<vmem>>, %arg3: memref<32x128xf32, #tpu.memory_space<vmem>>, %arg4: memref<1x32xf32, #tpu.memory_space<vmem>>, %arg5: memref<1x32xf32, #tpu.memory_space<vmem>>, %arg6: memref<8x128xbf16, #tpu.memory_space<vmem>>, %arg7: memref<12x96xf32, #tpu.memory_space<vmem>>) attributes {dimension_semantics = [], scalar_prefetch = 0 : i64, scratch_operands = 1 : i64, tpu.core_type = #tpu.core_type<tc>} {
    %cst = arith.constant 0.000000e+00 : f32
    %0 = vector.broadcast %cst : f32 to vector<12x96xf32>
    %c0 = arith.constant 0 : index
    %c0_0 = arith.constant 0 : index
    %1 = vector.load %arg7[%c0, %c0_0] : memref<12x96xf32, #tpu.memory_space<vmem>>, vector<12x96xf32>
    tpu.vector_store %arg7[%c0, %c0_0], %0 {strides = array<i32>} : memref<12x96xf32, #tpu.memory_space<vmem>>, vector<12x96xf32>,
    %c0_1 = arith.constant 0 : index
    %c0_2 = arith.constant 0 : index
    %2 = vector.load %arg0[%c0_1, %c0_2] : memref<8x64xbf16, #tpu.memory_space<vmem>>, vector<4x64xbf16>
    %3 = arith.extf %2 : vector<4x64xbf16> to vector<4x64xf32>
    %c1 = arith.constant 1 : index
    %c16 = arith.constant 16 : index
    %4 = vector.load %arg7[%c1, %c16] : memref<12x96xf32, #tpu.memory_space<vmem>>, vector<4x64xf32>
    tpu.vector_store %arg7[%c1, %c16], %3 {strides = array<i32>} : memref<12x96xf32, #tpu.memory_space<vmem>>, vector<4x64xf32>,
    %c4 = arith.constant 4 : index
    %c0_3 = arith.constant 0 : index
    %5 = vector.load %arg0[%c4, %c0_3] : memref<8x64xbf16, #tpu.memory_space<vmem>>, vector<4x64xbf16>
    %6 = arith.extf %5 : vector<4x64xbf16> to vector<4x64xf32>
    %c7 = arith.constant 7 : index
    %c16_4 = arith.constant 16 : index
    %7 = vector.load %arg7[%c7, %c16_4] : memref<12x96xf32, #tpu.memory_space<vmem>>, vector<4x64xf32>
    tpu.vector_store %arg7[%c7, %c16_4], %6 {strides = array<i32>} : memref<12x96xf32, #tpu.memory_space<vmem>>, vector<4x64xf32>,
    %cst_5 = arith.constant 0.000000e+00 : f32
    %8 = vector.broadcast %cst_5 : f32 to vector<1x128xf32>
    %cst_6 = arith.constant 0.000000e+00 : f32
    %9 = vector.broadcast %cst_6 : f32 to vector<1x128xf32>
    %cst_7 = arith.constant 0.000000e+00 : f32
    %10 = vector.broadcast %cst_7 : f32 to vector<4x128xf32>
    %c0_8 = arith.constant 0 : index
    %c0_9 = arith.constant 0 : index
    %11 = vector.load %arg7[%c0_8, %c0_9] : memref<12x96xf32, #tpu.memory_space<vmem>>, vector<4x64xf32>
    %12 = arith.truncf %11 : vector<4x64xf32> to vector<4x64xbf16>
    %c0_10 = arith.constant 0 : index
    %c0_11 = arith.constant 0 : index
    %c0_12 = arith.constant 0 : index
    %13 = vector.load %arg1[%c0_10, %c0_11, %c0_12] : memref<9x64x128xbf16, #tpu.memory_space<vmem>>, vector<1x64x128xbf16>
    %14 = vector.shape_cast %13 : vector<1x64x128xbf16> to vector<64x128xbf16>
    %cst_13 = arith.constant dense<0.000000e+00> : vector<4x128xf32>
    %15 = tpu.matmul %12, %14, %cst_13 {dimension_numbers = #tpu.dot_dimension_numbers<[1], [0], [0], [1], [0, 0, 1, 1], [], []>} : vector<4x64xbf16>, vector<64x128xbf16>, vector<4x128xf32> -> vector<4x128xf32>
    %16 = arith.addf %10, %15 : vector<4x128xf32>
    %c0_14 = arith.constant 0 : index
    %c16_15 = arith.constant 16 : index
    %17 = vector.load %arg7[%c0_14, %c16_15] : memref<12x96xf32, #tpu.memory_space<vmem>>, vector<4x64xf32>
    %18 = arith.truncf %17 : vector<4x64xf32> to vector<4x64xbf16>
    %c1_16 = arith.constant 1 : index
    %c0_17 = arith.constant 0 : index
    %c0_18 = arith.constant 0 : index
    %19 = vector.load %arg1[%c1_16, %c0_17, %c0_18] : memref<9x64x128xbf16, #tpu.memory_space<vmem>>, vector<1x64x128xbf16>
    %20 = vector.shape_cast %19 : vector<1x64x128xbf16> to vector<64x128xbf16>
    %cst_19 = arith.constant dense<0.000000e+00> : vector<4x128xf32>
    %21 = tpu.matmul %18, %20, %cst_19 {dimension_numbers = #tpu.dot_dimension_numbers<[1], [0], [0], [1], [0, 0, 1, 1], [], []>} : vector<4x64xbf16>, vector<64x128xbf16>, vector<4x128xf32> -> vector<4x128xf32>
    %22 = arith.addf %16, %21 : vector<4x128xf32>
    %c0_20 = arith.constant 0 : index
    %c32 = arith.constant 32 : index
    %23 = vector.load %arg7[%c0_20, %c32] : memref<12x96xf32, #tpu.memory_space<vmem>>, vector<4x64xf32>
    %24 = arith.truncf %23 : vector<4x64xf32> to vector<4x64xbf16>
    %c2 = arith.constant 2 : index
    %c0_21 = arith.constant 0 : index
    %c0_22 = arith.constant 0 : index
    %25 = vector.load %arg1[%c2, %c0_21, %c0_22] : memref<9x64x128xbf16, #tpu.memory_space<vmem>>, vector<1x64x128xbf16>
    %26 = vector.shape_cast %25 : vector<1x64x128xbf16> to vector<64x128xbf16>
    %cst_23 = arith.constant dense<0.000000e+00> : vector<4x128xf32>
    %27 = tpu.matmul %24, %26, %cst_23 {dimension_numbers = #tpu.dot_dimension_numbers<[1], [0], [0], [1], [0, 0, 1, 1], [], []>} : vector<4x64xbf16>, vector<64x128xbf16>, vector<4x128xf32> -> vector<4x128xf32>
    %28 = arith.addf %22, %27 : vector<4x128xf32>
    %c1_24 = arith.constant 1 : index
    %c0_25 = arith.constant 0 : index
    %29 = vector.load %arg7[%c1_24, %c0_25] : memref<12x96xf32, #tpu.memory_space<vmem>>, vector<4x64xf32>
    %30 = arith.truncf %29 : vector<4x64xf32> to vector<4x64xbf16>
    %c3 = arith.constant 3 : index
    %c0_26 = arith.constant 0 : index
    %c0_27 = arith.constant 0 : index
    %31 = vector.load %arg1[%c3, %c0_26, %c0_27] : memref<9x64x128xbf16, #tpu.memory_space<vmem>>, vector<1x64x128xbf16>
    %32 = vector.shape_cast %31 : vector<1x64x128xbf16> to vector<64x128xbf16>
    %cst_28 = arith.constant dense<0.000000e+00> : vector<4x128xf32>
    %33 = tpu.matmul %30, %32, %cst_28 {dimension_numbers = #tpu.dot_dimension_numbers<[1], [0], [0], [1], [0, 0, 1, 1], [], []>} : vector<4x64xbf16>, vector<64x128xbf16>, vector<4x128xf32> -> vector<4x128xf32>
    %34 = arith.addf %28, %33 : vector<4x128xf32>
    %c1_29 = arith.constant 1 : index
    %c16_30 = arith.constant 16 : index
    %35 = vector.load %arg7[%c1_29, %c16_30] : memref<12x96xf32, #tpu.memory_space<vmem>>, vector<4x64xf32>
    %36 = arith.truncf %35 : vector<4x64xf32> to vector<4x64xbf16>
    %c4_31 = arith.constant 4 : index
    %c0_32 = arith.constant 0 : index
    %c0_33 = arith.constant 0 : index
    %37 = vector.load %arg1[%c4_31, %c0_32, %c0_33] : memref<9x64x128xbf16, #tpu.memory_space<vmem>>, vector<1x64x128xbf16>
    %38 = vector.shape_cast %37 : vector<1x64x128xbf16> to vector<64x128xbf16>
    %cst_34 = arith.constant dense<0.000000e+00> : vector<4x128xf32>
    %39 = tpu.matmul %36, %38, %cst_34 {dimension_numbers = #tpu.dot_dimension_numbers<[1], [0], [0], [1], [0, 0, 1, 1], [], []>} : vector<4x64xbf16>, vector<64x128xbf16>, vector<4x128xf32> -> vector<4x128xf32>
    %40 = arith.addf %34, %39 : vector<4x128xf32>
    %c1_35 = arith.constant 1 : index
    %c32_36 = arith.constant 32 : index
    %41 = vector.load %arg7[%c1_35, %c32_36] : memref<12x96xf32, #tpu.memory_space<vmem>>, vector<4x64xf32>
    %42 = arith.truncf %41 : vector<4x64xf32> to vector<4x64xbf16>
    %c5 = arith.constant 5 : index
    %c0_37 = arith.constant 0 : index
    %c0_38 = arith.constant 0 : index
    %43 = vector.load %arg1[%c5, %c0_37, %c0_38] : memref<9x64x128xbf16, #tpu.memory_space<vmem>>, vector<1x64x128xbf16>
    %44 = vector.shape_cast %43 : vector<1x64x128xbf16> to vector<64x128xbf16>
    %cst_39 = arith.constant dense<0.000000e+00> : vector<4x128xf32>
    %45 = tpu.matmul %42, %44, %cst_39 {dimension_numbers = #tpu.dot_dimension_numbers<[1], [0], [0], [1], [0, 0, 1, 1], [], []>} : vector<4x64xbf16>, vector<64x128xbf16>, vector<4x128xf32> -> vector<4x128xf32>
    %46 = arith.addf %40, %45 : vector<4x128xf32>
    %c2_40 = arith.constant 2 : index
    %c0_41 = arith.constant 0 : index
    %47 = vector.load %arg7[%c2_40, %c0_41] : memref<12x96xf32, #tpu.memory_space<vmem>>, vector<4x64xf32>
    %48 = arith.truncf %47 : vector<4x64xf32> to vector<4x64xbf16>
    %c6 = arith.constant 6 : index
    %c0_42 = arith.constant 0 : index
    %c0_43 = arith.constant 0 : index
    %49 = vector.load %arg1[%c6, %c0_42, %c0_43] : memref<9x64x128xbf16, #tpu.memory_space<vmem>>, vector<1x64x128xbf16>
    %50 = vector.shape_cast %49 : vector<1x64x128xbf16> to vector<64x128xbf16>
    %cst_44 = arith.constant dense<0.000000e+00> : vector<4x128xf32>
    %51 = tpu.matmul %48, %50, %cst_44 {dimension_numbers = #tpu.dot_dimension_numbers<[1], [0], [0], [1], [0, 0, 1, 1], [], []>} : vector<4x64xbf16>, vector<64x128xbf16>, vector<4x128xf32> -> vector<4x128xf32>
    %52 = arith.addf %46, %51 : vector<4x128xf32>
    %c2_45 = arith.constant 2 : index
    %c16_46 = arith.constant 16 : index
    %53 = vector.load %arg7[%c2_45, %c16_46] : memref<12x96xf32, #tpu.memory_space<vmem>>, vector<4x64xf32>
    %54 = arith.truncf %53 : vector<4x64xf32> to vector<4x64xbf16>
    %c7_47 = arith.constant 7 : index
    %c0_48 = arith.constant 0 : index
    %c0_49 = arith.constant 0 : index
    %55 = vector.load %arg1[%c7_47, %c0_48, %c0_49] : memref<9x64x128xbf16, #tpu.memory_space<vmem>>, vector<1x64x128xbf16>
    %56 = vector.shape_cast %55 : vector<1x64x128xbf16> to vector<64x128xbf16>
    %cst_50 = arith.constant dense<0.000000e+00> : vector<4x128xf32>
    %57 = tpu.matmul %54, %56, %cst_50 {dimension_numbers = #tpu.dot_dimension_numbers<[1], [0], [0], [1], [0, 0, 1, 1], [], []>} : vector<4x64xbf16>, vector<64x128xbf16>, vector<4x128xf32> -> vector<4x128xf32>
    %58 = arith.addf %52, %57 : vector<4x128xf32>
    %c2_51 = arith.constant 2 : index
    %c32_52 = arith.constant 32 : index
    %59 = vector.load %arg7[%c2_51, %c32_52] : memref<12x96xf32, #tpu.memory_space<vmem>>, vector<4x64xf32>
    %60 = arith.truncf %59 : vector<4x64xf32> to vector<4x64xbf16>
    %c8 = arith.constant 8 : index
    %c0_53 = arith.constant 0 : index
    %c0_54 = arith.constant 0 : index
    %61 = vector.load %arg1[%c8, %c0_53, %c0_54] : memref<9x64x128xbf16, #tpu.memory_space<vmem>>, vector<1x64x128xbf16>
    %62 = vector.shape_cast %61 : vector<1x64x128xbf16> to vector<64x128xbf16>
    %cst_55 = arith.constant dense<0.000000e+00> : vector<4x128xf32>
    %63 = tpu.matmul %60, %62, %cst_55 {dimension_numbers = #tpu.dot_dimension_numbers<[1], [0], [0], [1], [0, 0, 1, 1], [], []>} : vector<4x64xbf16>, vector<64x128xbf16>, vector<4x128xf32> -> vector<4x128xf32>
    %64 = arith.addf %58, %63 : vector<4x128xf32>
    %cst_56 = arith.constant dense<0.000000e+00> : vector<128xf32>
    %65 = vector.multi_reduction <add>, %64, %cst_56 [0] : vector<4x128xf32> to vector<128xf32>
    %66 = vector.shape_cast %65 : vector<128xf32> to vector<1x128xf32>
    %67 = arith.addf %8, %66 : vector<1x128xf32>
    %68 = arith.mulf %64, %64 : vector<4x128xf32>
    %cst_57 = arith.constant dense<0.000000e+00> : vector<128xf32>
    %69 = vector.multi_reduction <add>, %68, %cst_57 [0] : vector<4x128xf32> to vector<128xf32>
    %70 = vector.shape_cast %69 : vector<128xf32> to vector<1x128xf32>
    %71 = arith.addf %9, %70 : vector<1x128xf32>
    %cst_58 = arith.constant 0.000000e+00 : f32
    %72 = vector.broadcast %cst_58 : f32 to vector<4x128xf32>
    %c6_59 = arith.constant 6 : index
    %c0_60 = arith.constant 0 : index
    %73 = vector.load %arg7[%c6_59, %c0_60] : memref<12x96xf32, #tpu.memory_space<vmem>>, vector<4x64xf32>
    %74 = arith.truncf %73 : vector<4x64xf32> to vector<4x64xbf16>
    %c0_61 = arith.constant 0 : index
    %c0_62 = arith.constant 0 : index
    %c0_63 = arith.constant 0 : index
    %75 = vector.load %arg1[%c0_61, %c0_62, %c0_63] : memref<9x64x128xbf16, #tpu.memory_space<vmem>>, vector<1x64x128xbf16>
    %76 = vector.shape_cast %75 : vector<1x64x128xbf16> to vector<64x128xbf16>
    %cst_64 = arith.constant dense<0.000000e+00> : vector<4x128xf32>
    %77 = tpu.matmul %74, %76, %cst_64 {dimension_numbers = #tpu.dot_dimension_numbers<[1], [0], [0], [1], [0, 0, 1, 1], [], []>} : vector<4x64xbf16>, vector<64x128xbf16>, vector<4x128xf32> -> vector<4x128xf32>
    %78 = arith.addf %72, %77 : vector<4x128xf32>
    %c6_65 = arith.constant 6 : index
    %c16_66 = arith.constant 16 : index
    %79 = vector.load %arg7[%c6_65, %c16_66] : memref<12x96xf32, #tpu.memory_space<vmem>>, vector<4x64xf32>
    %80 = arith.truncf %79 : vector<4x64xf32> to vector<4x64xbf16>
    %c1_67 = arith.constant 1 : index
    %c0_68 = arith.constant 0 : index
    %c0_69 = arith.constant 0 : index
    %81 = vector.load %arg1[%c1_67, %c0_68, %c0_69] : memref<9x64x128xbf16, #tpu.memory_space<vmem>>, vector<1x64x128xbf16>
    %82 = vector.shape_cast %81 : vector<1x64x128xbf16> to vector<64x128xbf16>
    %cst_70 = arith.constant dense<0.000000e+00> : vector<4x128xf32>
    %83 = tpu.matmul %80, %82, %cst_70 {dimension_numbers = #tpu.dot_dimension_numbers<[1], [0], [0], [1], [0, 0, 1, 1], [], []>} : vector<4x64xbf16>, vector<64x128xbf16>, vector<4x128xf32> -> vector<4x128xf32>
    %84 = arith.addf %78, %83 : vector<4x128xf32>
    %c6_71 = arith.constant 6 : index
    %c32_72 = arith.constant 32 : index
    %85 = vector.load %arg7[%c6_71, %c32_72] : memref<12x96xf32, #tpu.memory_space<vmem>>, vector<4x64xf32>
    %86 = arith.truncf %85 : vector<4x64xf32> to vector<4x64xbf16>
    %c2_73 = arith.constant 2 : index
    %c0_74 = arith.constant 0 : index
    %c0_75 = arith.constant 0 : index
    %87 = vector.load %arg1[%c2_73, %c0_74, %c0_75] : memref<9x64x128xbf16, #tpu.memory_space<vmem>>, vector<1x64x128xbf16>
    %88 = vector.shape_cast %87 : vector<1x64x128xbf16> to vector<64x128xbf16>
    %cst_76 = arith.constant dense<0.000000e+00> : vector<4x128xf32>
    %89 = tpu.matmul %86, %88, %cst_76 {dimension_numbers = #tpu.dot_dimension_numbers<[1], [0], [0], [1], [0, 0, 1, 1], [], []>} : vector<4x64xbf16>, vector<64x128xbf16>, vector<4x128xf32> -> vector<4x128xf32>
    %90 = arith.addf %84, %89 : vector<4x128xf32>
    %c7_77 = arith.constant 7 : index
    %c0_78 = arith.constant 0 : index
    %91 = vector.load %arg7[%c7_77, %c0_78] : memref<12x96xf32, #tpu.memory_space<vmem>>, vector<4x64xf32>
    %92 = arith.truncf %91 : vector<4x64xf32> to vector<4x64xbf16>
    %c3_79 = arith.constant 3 : index
    %c0_80 = arith.constant 0 : index
    %c0_81 = arith.constant 0 : index
    %93 = vector.load %arg1[%c3_79, %c0_80, %c0_81] : memref<9x64x128xbf16, #tpu.memory_space<vmem>>, vector<1x64x128xbf16>
    %94 = vector.shape_cast %93 : vector<1x64x128xbf16> to vector<64x128xbf16>
    %cst_82 = arith.constant dense<0.000000e+00> : vector<4x128xf32>
    %95 = tpu.matmul %92, %94, %cst_82 {dimension_numbers = #tpu.dot_dimension_numbers<[1], [0], [0], [1], [0, 0, 1, 1], [], []>} : vector<4x64xbf16>, vector<64x128xbf16>, vector<4x128xf32> -> vector<4x128xf32>
    %96 = arith.addf %90, %95 : vector<4x128xf32>
    %c7_83 = arith.constant 7 : index
    %c16_84 = arith.constant 16 : index
    %97 = vector.load %arg7[%c7_83, %c16_84] : memref<12x96xf32, #tpu.memory_space<vmem>>, vector<4x64xf32>
    %98 = arith.truncf %97 : vector<4x64xf32> to vector<4x64xbf16>
    %c4_85 = arith.constant 4 : index
    %c0_86 = arith.constant 0 : index
    %c0_87 = arith.constant 0 : index
    %99 = vector.load %arg1[%c4_85, %c0_86, %c0_87] : memref<9x64x128xbf16, #tpu.memory_space<vmem>>, vector<1x64x128xbf16>
    %100 = vector.shape_cast %99 : vector<1x64x128xbf16> to vector<64x128xbf16>
    %cst_88 = arith.constant dense<0.000000e+00> : vector<4x128xf32>
    %101 = tpu.matmul %98, %100, %cst_88 {dimension_numbers = #tpu.dot_dimension_numbers<[1], [0], [0], [1], [0, 0, 1, 1], [], []>} : vector<4x64xbf16>, vector<64x128xbf16>, vector<4x128xf32> -> vector<4x128xf32>
    %102 = arith.addf %96, %101 : vector<4x128xf32>
    %c7_89 = arith.constant 7 : index
    %c32_90 = arith.constant 32 : index
    %103 = vector.load %arg7[%c7_89, %c32_90] : memref<12x96xf32, #tpu.memory_space<vmem>>, vector<4x64xf32>
    %104 = arith.truncf %103 : vector<4x64xf32> to vector<4x64xbf16>
    %c5_91 = arith.constant 5 : index
    %c0_92 = arith.constant 0 : index
    %c0_93 = arith.constant 0 : index
    %105 = vector.load %arg1[%c5_91, %c0_92, %c0_93] : memref<9x64x128xbf16, #tpu.memory_space<vmem>>, vector<1x64x128xbf16>
    %106 = vector.shape_cast %105 : vector<1x64x128xbf16> to vector<64x128xbf16>
    %cst_94 = arith.constant dense<0.000000e+00> : vector<4x128xf32>
    %107 = tpu.matmul %104, %106, %cst_94 {dimension_numbers = #tpu.dot_dimension_numbers<[1], [0], [0], [1], [0, 0, 1, 1], [], []>} : vector<4x64xbf16>, vector<64x128xbf16>, vector<4x128xf32> -> vector<4x128xf32>
    %108 = arith.addf %102, %107 : vector<4x128xf32>
    %c8_95 = arith.constant 8 : index
    %c0_96 = arith.constant 0 : index
    %109 = vector.load %arg7[%c8_95, %c0_96] : memref<12x96xf32, #tpu.memory_space<vmem>>, vector<4x64xf32>
    %110 = arith.truncf %109 : vector<4x64xf32> to vector<4x64xbf16>
    %c6_97 = arith.constant 6 : index
    %c0_98 = arith.constant 0 : index
    %c0_99 = arith.constant 0 : index
    %111 = vector.load %arg1[%c6_97, %c0_98, %c0_99] : memref<9x64x128xbf16, #tpu.memory_space<vmem>>, vector<1x64x128xbf16>
    %112 = vector.shape_cast %111 : vector<1x64x128xbf16> to vector<64x128xbf16>
    %cst_100 = arith.constant dense<0.000000e+00> : vector<4x128xf32>
    %113 = tpu.matmul %110, %112, %cst_100 {dimension_numbers = #tpu.dot_dimension_numbers<[1], [0], [0], [1], [0, 0, 1, 1], [], []>} : vector<4x64xbf16>, vector<64x128xbf16>, vector<4x128xf32> -> vector<4x128xf32>
    %114 = arith.addf %108, %113 : vector<4x128xf32>
    %c8_101 = arith.constant 8 : index
    %c16_102 = arith.constant 16 : index
    %115 = vector.load %arg7[%c8_101, %c16_102] : memref<12x96xf32, #tpu.memory_space<vmem>>, vector<4x64xf32>
    %116 = arith.truncf %115 : vector<4x64xf32> to vector<4x64xbf16>
    %c7_103 = arith.constant 7 : index
    %c0_104 = arith.constant 0 : index
    %c0_105 = arith.constant 0 : index
    %117 = vector.load %arg1[%c7_103, %c0_104, %c0_105] : memref<9x64x128xbf16, #tpu.memory_space<vmem>>, vector<1x64x128xbf16>
    %118 = vector.shape_cast %117 : vector<1x64x128xbf16> to vector<64x128xbf16>
    %cst_106 = arith.constant dense<0.000000e+00> : vector<4x128xf32>
    %119 = tpu.matmul %116, %118, %cst_106 {dimension_numbers = #tpu.dot_dimension_numbers<[1], [0], [0], [1], [0, 0, 1, 1], [], []>} : vector<4x64xbf16>, vector<64x128xbf16>, vector<4x128xf32> -> vector<4x128xf32>
    %120 = arith.addf %114, %119 : vector<4x128xf32>
    %c8_107 = arith.constant 8 : index
    %c32_108 = arith.constant 32 : index
    %121 = vector.load %arg7[%c8_107, %c32_108] : memref<12x96xf32, #tpu.memory_space<vmem>>, vector<4x64xf32>
    %122 = arith.truncf %121 : vector<4x64xf32> to vector<4x64xbf16>
    %c8_109 = arith.constant 8 : index
    %c0_110 = arith.constant 0 : index
    %c0_111 = arith.constant 0 : index
    %123 = vector.load %arg1[%c8_109, %c0_110, %c0_111] : memref<9x64x128xbf16, #tpu.memory_space<vmem>>, vector<1x64x128xbf16>
    %124 = vector.shape_cast %123 : vector<1x64x128xbf16> to vector<64x128xbf16>
    %cst_112 = arith.constant dense<0.000000e+00> : vector<4x128xf32>
    %125 = tpu.matmul %122, %124, %cst_112 {dimension_numbers = #tpu.dot_dimension_numbers<[1], [0], [0], [1], [0, 0, 1, 1], [], []>} : vector<4x64xbf16>, vector<64x128xbf16>, vector<4x128xf32> -> vector<4x128xf32>
    %126 = arith.addf %120, %125 : vector<4x128xf32>
    %cst_113 = arith.constant dense<0.000000e+00> : vector<128xf32>
    %127 = vector.multi_reduction <add>, %126, %cst_113 [0] : vector<4x128xf32> to vector<128xf32>
    %128 = vector.shape_cast %127 : vector<128xf32> to vector<1x128xf32>
    %129 = arith.addf %67, %128 : vector<1x128xf32>
    %130 = arith.mulf %126, %126 : vector<4x128xf32>
    %cst_114 = arith.constant dense<0.000000e+00> : vector<128xf32>
    %131 = vector.multi_reduction <add>, %130, %cst_114 [0] : vector<4x128xf32> to vector<128xf32>
    %132 = vector.shape_cast %131 : vector<128xf32> to vector<1x128xf32>
    %133 = arith.addf %71, %132 : vector<1x128xf32>
    %c0_115 = arith.constant 0 : index
    %c0_116 = arith.constant 0 : index
    %134 = vector.load %arg2[%c0_115, %c0_116] : memref<128x32xf32, #tpu.memory_space<vmem>>, vector<128x32xf32>
    %cst_117 = arith.constant dense<0.000000e+00> : vector<1x32xf32>
    %135 = tpu.matmul %129, %134, %cst_117 {dimension_numbers = #tpu.dot_dimension_numbers<[1], [0], [0], [1], [0, 0, 1, 1], [], []>} : vector<1x128xf32>, vector<128x32xf32>, vector<1x32xf32> -> vector<1x32xf32>
    %c0_118 = arith.constant 0 : index
    %c0_119 = arith.constant 0 : index
    %136 = vector.load %arg2[%c0_118, %c0_119] : memref<128x32xf32, #tpu.memory_space<vmem>>, vector<128x32xf32>
    %cst_120 = arith.constant dense<0.000000e+00> : vector<1x32xf32>
    %137 = tpu.matmul %133, %136, %cst_120 {dimension_numbers = #tpu.dot_dimension_numbers<[1], [0], [0], [1], [0, 0, 1, 1], [], []>} : vector<1x128xf32>, vector<128x32xf32>, vector<1x32xf32> -> vector<1x32xf32>
    %cst_121 = arith.constant 3.125000e-02 : f32
    %138 = vector.broadcast %cst_121 : f32 to vector<1x32xf32>
    %139 = arith.mulf %135, %138 : vector<1x32xf32>
    %cst_122 = arith.constant 3.125000e-02 : f32
    %140 = vector.broadcast %cst_122 : f32 to vector<1x32xf32>
    %141 = arith.mulf %137, %140 : vector<1x32xf32>
    %142 = arith.mulf %139, %139 : vector<1x32xf32>
    %143 = arith.subf %141, %142 : vector<1x32xf32>
    %cst_123 = arith.constant 0.000000e+00 : f32
    %144 = vector.broadcast %cst_123 : f32 to vector<1x32xf32>
    %145 = arith.maximumf %143, %144 : vector<1x32xf32>
    %c0_124 = arith.constant 0 : index
    %c0_125 = arith.constant 0 : index
    %146 = vector.load %arg4[%c0_124, %c0_125] : memref<1x32xf32, #tpu.memory_space<vmem>>, vector<1x32xf32>
    %cst_126 = arith.constant 9.99999974E-6 : f32
    %147 = vector.broadcast %cst_126 : f32 to vector<1x32xf32>
    %148 = arith.addf %145, %147 : vector<1x32xf32>
    %149 = math.rsqrt %148 : vector<1x32xf32>
    %150 = arith.mulf %146, %149 : vector<1x32xf32>
    %c0_127 = arith.constant 0 : index
    %c0_128 = arith.constant 0 : index
    %151 = vector.load %arg5[%c0_127, %c0_128] : memref<1x32xf32, #tpu.memory_space<vmem>>, vector<1x32xf32>
    %152 = arith.mulf %139, %150 : vector<1x32xf32>
    %153 = arith.subf %151, %152 : vector<1x32xf32>
    %c0_129 = arith.constant 0 : index
    %c0_130 = arith.constant 0 : index
    %154 = vector.load %arg3[%c0_129, %c0_130] : memref<32x128xf32, #tpu.memory_space<vmem>>, vector<32x128xf32>
    %cst_131 = arith.constant dense<0.000000e+00> : vector<1x128xf32>
    %155 = tpu.matmul %150, %154, %cst_131 {dimension_numbers = #tpu.dot_dimension_numbers<[1], [0], [0], [1], [0, 0, 1, 1], [], []>} : vector<1x32xf32>, vector<32x128xf32>, vector<1x128xf32> -> vector<1x128xf32>
    %c0_132 = arith.constant 0 : index
    %c0_133 = arith.constant 0 : index
    %156 = vector.load %arg3[%c0_132, %c0_133] : memref<32x128xf32, #tpu.memory_space<vmem>>, vector<32x128xf32>
    %cst_134 = arith.constant dense<0.000000e+00> : vector<1x128xf32>
    %157 = tpu.matmul %153, %156, %cst_134 {dimension_numbers = #tpu.dot_dimension_numbers<[1], [0], [0], [1], [0, 0, 1, 1], [], []>} : vector<1x32xf32>, vector<32x128xf32>, vector<1x128xf32> -> vector<1x128xf32>
    %158 = vector.broadcast %155 : vector<1x128xf32> to vector<4x128xf32>
    %159 = arith.mulf %64, %158 : vector<4x128xf32>
    %160 = vector.broadcast %157 : vector<1x128xf32> to vector<4x128xf32>
    %161 = arith.addf %159, %160 : vector<4x128xf32>
    %cst_135 = arith.constant 0.000000e+00 : f32
    %162 = vector.broadcast %cst_135 : f32 to vector<4x128xf32>
    %163 = arith.maximumf %161, %162 : vector<4x128xf32>
    %164 = arith.truncf %163 : vector<4x128xf32> to vector<4x128xbf16>
    %c0_136 = arith.constant 0 : index
    %c0_137 = arith.constant 0 : index
    %165 = vector.load %arg6[%c0_136, %c0_137] : memref<8x128xbf16, #tpu.memory_space<vmem>>, vector<4x128xbf16>
    tpu.vector_store %arg6[%c0_136, %c0_137], %164 {strides = array<i32>} : memref<8x128xbf16, #tpu.memory_space<vmem>>, vector<4x128xbf16>,
    %166 = vector.broadcast %155 : vector<1x128xf32> to vector<4x128xf32>
    %167 = arith.mulf %126, %166 : vector<4x128xf32>
    %168 = vector.broadcast %157 : vector<1x128xf32> to vector<4x128xf32>
    %169 = arith.addf %167, %168 : vector<4x128xf32>
    %cst_138 = arith.constant 0.000000e+00 : f32
    %170 = vector.broadcast %cst_138 : f32 to vector<4x128xf32>
    %171 = arith.maximumf %169, %170 : vector<4x128xf32>
    %172 = arith.truncf %171 : vector<4x128xf32> to vector<4x128xbf16>
    %c4_139 = arith.constant 4 : index
    %c0_140 = arith.constant 0 : index
    %173 = vector.load %arg6[%c4_139, %c0_140] : memref<8x128xbf16, #tpu.memory_space<vmem>>, vector<4x128xbf16>
    tpu.vector_store %arg6[%c4_139, %c0_140], %172 {strides = array<i32>} : memref<8x128xbf16, #tpu.memory_space<vmem>>, vector<4x128xbf16>,
    return
  }
}

module attributes {stable_mosaic.version = 11 : i64} {
  func.func @_fc_head_kernel(%arg0: i32, %arg1: memref<2x128xbf16, #tpu.memory_space<vmem>>, %arg2: memref<128x512xbf16, #tpu.memory_space<vmem>>, %arg3: memref<1x512xf32, #tpu.memory_space<vmem>>, %arg4: memref<512x256xbf16, #tpu.memory_space<vmem>>, %arg5: memref<1x256xf32, #tpu.memory_space<vmem>>, %arg6: memref<256x5xbf16, #tpu.memory_space<vmem>>, %arg7: memref<1x5xf32, #tpu.memory_space<vmem>>, %arg8: memref<2x5xf32, #tpu.memory_space<vmem>>, %arg9: memref<2x512xf32, #tpu.memory_space<vmem>>) attributes {dimension_semantics = [#tpu.dimension_semantics<arbitrary>], iteration_bounds = array<i64: 1>, scalar_prefetch = 0 : i64, scratch_operands = 1 : i64, tpu.core_type = #tpu.core_type<tc>, window_params = [{transform_indices = @transform_0, window_bounds = array<i64: 2, 128>}, {transform_indices = @transform_1, window_bounds = array<i64: 128, 512>}, {pipeline_mode = #tpu.pipeline_mode<synchronous>, transform_indices = @transform_2, window_bounds = array<i64: 1, 512>}, {pipeline_mode = #tpu.pipeline_mode<synchronous>, transform_indices = @transform_3, window_bounds = array<i64: 512, 256>}, {pipeline_mode = #tpu.pipeline_mode<synchronous>, transform_indices = @transform_4, window_bounds = array<i64: 1, 256>}, {pipeline_mode = #tpu.pipeline_mode<synchronous>, transform_indices = @transform_5, window_bounds = array<i64: 256, 5>}, {pipeline_mode = #tpu.pipeline_mode<synchronous>, transform_indices = @transform_6, window_bounds = array<i64: 1, 5>}, {pipeline_mode = #tpu.pipeline_mode<synchronous>, transform_indices = @transform_7, window_bounds = array<i64: 2, 5>}]} {
    %c0_i32 = arith.constant 0 : i32
    %0 = arith.cmpi eq, %arg0, %c0_i32 : i32
    %1 = arith.extui %0 : i1 to i32
    %c0_i32_0 = arith.constant 0 : i32
    %2 = arith.cmpi ne, %1, %c0_i32_0 : i32
    scf.if %2 {
      %cst_10 = arith.constant 0.000000e+00 : f32
      %12 = vector.broadcast %cst_10 : f32 to vector<2x512xf32>
      %c0_11 = arith.constant 0 : index
      %c0_12 = arith.constant 0 : index
      %13 = vector.load %arg9[%c0_11, %c0_12] : memref<2x512xf32, #tpu.memory_space<vmem>>, vector<2x512xf32>
      tpu.vector_store %arg9[%c0_11, %c0_12], %12 {strides = array<i32>} : memref<2x512xf32, #tpu.memory_space<vmem>>, vector<2x512xf32>,
    } else {
    }
    %c0 = arith.constant 0 : index
    %c0_1 = arith.constant 0 : index
    %3 = vector.load %arg9[%c0, %c0_1] : memref<2x512xf32, #tpu.memory_space<vmem>>, vector<2x512xf32>
    %c0_2 = arith.constant 0 : index
    %c0_3 = arith.constant 0 : index
    %4 = vector.load %arg1[%c0_2, %c0_3] : memref<2x128xbf16, #tpu.memory_space<vmem>>, vector<2x128xbf16>
    %c0_4 = arith.constant 0 : index
    %c0_5 = arith.constant 0 : index
    %5 = vector.load %arg2[%c0_4, %c0_5] : memref<128x512xbf16, #tpu.memory_space<vmem>>, vector<128x512xbf16>
    %cst = arith.constant dense<0.000000e+00> : vector<2x512xf32>
    %6 = tpu.matmul %4, %5, %cst {dimension_numbers = #tpu.dot_dimension_numbers<[1], [0], [0], [1], [0, 0, 1, 1], [], []>} : vector<2x128xbf16>, vector<128x512xbf16>, vector<2x512xf32> -> vector<2x512xf32>
    %7 = arith.addf %3, %6 : vector<2x512xf32>
    %c0_6 = arith.constant 0 : index
    %c0_7 = arith.constant 0 : index
    %8 = vector.load %arg9[%c0_6, %c0_7] : memref<2x512xf32, #tpu.memory_space<vmem>>, vector<2x512xf32>
    tpu.vector_store %arg9[%c0_6, %c0_7], %7 {strides = array<i32>} : memref<2x512xf32, #tpu.memory_space<vmem>>, vector<2x512xf32>,
    %c0_i32_8 = arith.constant 0 : i32
    %9 = arith.cmpi eq, %arg0, %c0_i32_8 : i32
    %10 = arith.extui %9 : i1 to i32
    %c0_i32_9 = arith.constant 0 : i32
    %11 = arith.cmpi ne, %10, %c0_i32_9 : i32
    scf.if %11 {
      %c0_10 = arith.constant 0 : index
      %c0_11 = arith.constant 0 : index
      %12 = vector.load %arg9[%c0_10, %c0_11] : memref<2x512xf32, #tpu.memory_space<vmem>>, vector<2x512xf32>
      %c0_12 = arith.constant 0 : index
      %c0_13 = arith.constant 0 : index
      %13 = vector.load %arg3[%c0_12, %c0_13] : memref<1x512xf32, #tpu.memory_space<vmem>>, vector<1x512xf32>
      %14 = vector.broadcast %13 : vector<1x512xf32> to vector<2x512xf32>
      %15 = arith.addf %12, %14 : vector<2x512xf32>
      %cst_14 = arith.constant 0.000000e+00 : f32
      %16 = vector.broadcast %cst_14 : f32 to vector<2x512xf32>
      %17 = arith.maximumf %15, %16 : vector<2x512xf32>
      %18 = arith.truncf %17 : vector<2x512xf32> to vector<2x512xbf16>
      %c0_15 = arith.constant 0 : index
      %c0_16 = arith.constant 0 : index
      %19 = vector.load %arg4[%c0_15, %c0_16] : memref<512x256xbf16, #tpu.memory_space<vmem>>, vector<512x256xbf16>
      %cst_17 = arith.constant dense<0.000000e+00> : vector<2x256xf32>
      %20 = tpu.matmul %18, %19, %cst_17 {dimension_numbers = #tpu.dot_dimension_numbers<[1], [0], [0], [1], [0, 0, 1, 1], [], []>} : vector<2x512xbf16>, vector<512x256xbf16>, vector<2x256xf32> -> vector<2x256xf32>
      %c0_18 = arith.constant 0 : index
      %c0_19 = arith.constant 0 : index
      %21 = vector.load %arg5[%c0_18, %c0_19] : memref<1x256xf32, #tpu.memory_space<vmem>>, vector<1x256xf32>
      %22 = vector.broadcast %21 : vector<1x256xf32> to vector<2x256xf32>
      %23 = arith.addf %20, %22 : vector<2x256xf32>
      %cst_20 = arith.constant 0.000000e+00 : f32
      %24 = vector.broadcast %cst_20 : f32 to vector<2x256xf32>
      %25 = arith.maximumf %23, %24 : vector<2x256xf32>
      %26 = arith.truncf %25 : vector<2x256xf32> to vector<2x256xbf16>
      %c0_21 = arith.constant 0 : index
      %c0_22 = arith.constant 0 : index
      %27 = vector.load %arg6[%c0_21, %c0_22] : memref<256x5xbf16, #tpu.memory_space<vmem>>, vector<256x5xbf16>
      %cst_23 = arith.constant dense<0.000000e+00> : vector<2x5xf32>
      %28 = tpu.matmul %26, %27, %cst_23 {dimension_numbers = #tpu.dot_dimension_numbers<[1], [0], [0], [1], [0, 0, 1, 1], [], []>} : vector<2x256xbf16>, vector<256x5xbf16>, vector<2x5xf32> -> vector<2x5xf32>
      %c0_24 = arith.constant 0 : index
      %c0_25 = arith.constant 0 : index
      %29 = vector.load %arg7[%c0_24, %c0_25] : memref<1x5xf32, #tpu.memory_space<vmem>>, vector<1x5xf32>
      %30 = vector.broadcast %29 : vector<1x5xf32> to vector<2x5xf32>
      %31 = arith.addf %28, %30 : vector<2x5xf32>
      %c0_26 = arith.constant 0 : index
      %c0_27 = arith.constant 0 : index
      %32 = vector.load %arg8[%c0_26, %c0_27] : memref<2x5xf32, #tpu.memory_space<vmem>>, vector<2x5xf32>
      tpu.vector_store %arg8[%c0_26, %c0_27], %31 {strides = array<i32>} : memref<2x5xf32, #tpu.memory_space<vmem>>, vector<2x5xf32>,
    } else {
    }
    return
  }
  func.func @transform_0(%arg0: i32) -> (i32, i32) {
    %c0_i32 = arith.constant 0 : i32
    %c0_i32_0 = arith.constant 0 : i32
    return %c0_i32, %arg0 : i32, i32
  }
  func.func @transform_1(%arg0: i32) -> (i32, i32) {
    %c0_i32 = arith.constant 0 : i32
    %c0_i32_0 = arith.constant 0 : i32
    return %arg0, %c0_i32 : i32, i32
  }
  func.func @transform_2(%arg0: i32) -> (i32, i32) {
    %c0_i32 = arith.constant 0 : i32
    %c0_i32_0 = arith.constant 0 : i32
    %c0_i32_1 = arith.constant 0 : i32
    return %c0_i32, %c0_i32_0 : i32, i32
  }
  func.func @transform_3(%arg0: i32) -> (i32, i32) {
    %c0_i32 = arith.constant 0 : i32
    %c0_i32_0 = arith.constant 0 : i32
    %c0_i32_1 = arith.constant 0 : i32
    return %c0_i32, %c0_i32_0 : i32, i32
  }
  func.func @transform_4(%arg0: i32) -> (i32, i32) {
    %c0_i32 = arith.constant 0 : i32
    %c0_i32_0 = arith.constant 0 : i32
    %c0_i32_1 = arith.constant 0 : i32
    return %c0_i32, %c0_i32_0 : i32, i32
  }
  func.func @transform_5(%arg0: i32) -> (i32, i32) {
    %c0_i32 = arith.constant 0 : i32
    %c0_i32_0 = arith.constant 0 : i32
    %c0_i32_1 = arith.constant 0 : i32
    return %c0_i32, %c0_i32_0 : i32, i32
  }
  func.func @transform_6(%arg0: i32) -> (i32, i32) {
    %c0_i32 = arith.constant 0 : i32
    %c0_i32_0 = arith.constant 0 : i32
    %c0_i32_1 = arith.constant 0 : i32
    return %c0_i32, %c0_i32_0 : i32, i32
  }
  func.func @transform_7(%arg0: i32) -> (i32, i32) {
    %c0_i32 = arith.constant 0 : i32
    %c0_i32_0 = arith.constant 0 : i32
    %c0_i32_1 = arith.constant 0 : i32
    return %c0_i32, %c0_i32_0 : i32, i32
  }
}

</mosaic_0001>

<bundles_post_ra>
// kernel: classifier_forward.7
= control target key start
LH: loop header
LB: loop body
LE: loop exit
PB: predicated region body
PF: predicated region fallthrough
CT: control target
= control target key end

     0   :  { %vm24_vm0 = vcmask 441344   ;;  %vm29_vm1 = vcmask 437248   ;;  %v2199_v2 = vmov 0.0   ;;  %vm2201_vm2 = vmmov 0   ;;  %s2202_s7 = smov 122   ;;  %s2203_s8 = smov 125   ;;  %s2557_s0 = inlined_call_operand.vmem [shape: bf16[32,48], index: 0, kind: input, shape index: {}]   ;;  %s2558_s1 = inlined_call_operand.vmem [shape: bf16[9,48,128], index: 1, kind: input, shape index: {}]   ;;  %s2559_s2 = inlined_call_operand.vmem [shape: f32[128,8], index: 2, kind: input, shape index: {}]   ;;  %s2560_s3 = inlined_call_operand.vmem [shape: f32[8,128], index: 3, kind: input, shape index: {}]   ;;  %s2561_s4 = inlined_call_operand.vmem [shape: f32[1,8], index: 4, kind: input, shape index: {}]   ;;  %s2562_s5 = inlined_call_operand.vmem [shape: f32[1,8], index: 5, kind: input, shape index: {}]   ;;  %s2563_s6 = inlined_call_operand.vmem [shape: bf16[32,128], index: 6, kind: output, shape index: {}]  }
   0x1   :  { %v1653_v0 = vld [vmem:[%s2557_s0] sm:$0xff]   ;;  %v1670_v1 = vld [vmem:[%s2557_s0 + $0x8] sm:$0xff]   ;;  %25 = vst.msk [vmem:[#allocation2] sm:$0xff] %vm24_vm0, %v2199_v2  ;;  %26 = vst.msk [vmem:[#allocation2 + $0x8] sm:$0xff] %vm24_vm0, %v2199_v2  ;;  %1782 = vmatprep.subr.bf16.mxu0 %v2199_v2  ;;  %1872 = vmatprep.subr.bf16.mxu1 %v2199_v2  ;;  %s2200_s0 = smov 3   ;;  %vm43_vm3 = vcmask 416792  }
   0x2   :  { %27 = vst.msk [vmem:[#allocation2 + $0x10] sm:$0xff] %vm24_vm0, %v2199_v2  ;;  %28 = vst.msk [vmem:[#allocation2 + $0x18] sm:$0xff] %vm24_vm0, %v2199_v2  ;;  %v1654_v3 = vunpack.c.l.bf16 %v1653_v0  ;;  %v1655_v4 = vunpack.c.h.bf16 %v1653_v0  ;;  %v1658_v5 = vunpack.c.l.bf16 %v1670_v1  ;;  %v1659_v6 = vunpack.c.h.bf16 %v1670_v1  ;;  %v2170_v9 = vld [vmem:[%s2558_s1 + $0x18] sm:$0xff]   ;;  %1788 = vmatprep.mubr.msk.bf16.mxu0 %vm2201_vm2, %v2199_v2  ;;  %1878 = vmatprep.mubr.msk.bf16.mxu1 %vm2201_vm2, %v2199_v2  ;;  %v2171_v10 = vld [vmem:[%s2558_s1 + $0x20] sm:$0xff]  }
   0x3   :  { %30 = vst.msk [vmem:[#allocation2 + $0x20] sm:$0xf] %vm29_vm1, %v2199_v2  ;;  %1783 = vmatpush3.bf16.msra.mxu0 %v2170_v9  ;;  %1873 = vmatpush3.bf16.msra.mxu1 %v2170_v9  ;;  %v2172_v11 = vld [vmem:[%s2558_s1 + $0x28] sm:$0xff]   ;;  %vm97_vm4 = vcmask 392192   ;;  %v2173_v36 = vld [vmem:[%s2558_s1] sm:$0xff]   ;;  %v2175_v40 = vld [vmem:[%s2558_s1 + $0x10] sm:$0xff]  }
   0x4   :  { %v2160_v7 = vpack.i.bf16 %v1655_v4, %v1654_v3  ;;  %v2165_v8 = vpack.i.bf16 %v1659_v6, %v1658_v5  ;;  %1784 = vmatprep.subr.bf16.mxu0 %v2199_v2  ;;  %1874 = vmatprep.subr.bf16.mxu1 %v2199_v2  ;;  %v2174_v38 = vld [vmem:[%s2558_s1 + $0x8] sm:$0xff]   ;;  %v2176_v41 = vld [vmem:[%s2558_s1 + $0x30] sm:$0xff]   ;;  %v2177_v42 = vld [vmem:[%s2558_s1 + $0x38] sm:$0xff]   ;;  %vm1358_vm5 = vcmask 64512  }
   0x5   :  { %v2178_v43 = vld [vmem:[%s2558_s1 + $0x40] sm:$0xff]   ;;  %v2179_v44 = vld [vmem:[%s2558_s1 + $0x48] sm:$0xff]   ;;  %v2180_v46 = vld [vmem:[%s2558_s1 + $0x50] sm:$0xff]  }
   0x6   :  { %2161 = vrot.lane.b32.xlu0 %v2160_v7, %s2200_s0  ;;  %v2181_v48 = vld [vmem:[%s2558_s1 + $0x58] sm:$0xff]   ;;  %v2182_v49 = vld [vmem:[%s2558_s1 + $0x60] sm:$0xff]   ;;  %v2183_v50 = vld [vmem:[%s2558_s1 + $0x68] sm:$0xff]  }
   0x7   :  { %1785 = vmatpush3.bf16.msra.mxu0 %v2171_v10  ;;  %1875 = vmatpush3.bf16.msra.mxu1 %v2171_v10  ;;  %v2184_v51 = vld [vmem:[%s2558_s1 + $0x70] sm:$0xff]   ;;  %v2185_v52 = vld [vmem:[%s2558_s1 + $0x78] sm:$0xff]   ;;  %v2186_v54 = vld [vmem:[%s2558_s1 + $0x80] sm:$0xff]   ;;  %v2204_v10 = vmov 0.0|0.0  }
   0x8   :  { %1786 = vmatprep.subr.bf16.mxu0 %v2199_v2  ;;  %1876 = vmatprep.subr.bf16.mxu1 %v2199_v2  ;;  %v2187_v56 = vld [vmem:[%s2558_s1 + $0x88] sm:$0xff]   ;;  %v2188_v57 = vld [vmem:[%s2558_s1 + $0x90] sm:$0xff]   ;;  %v2189_v59 = vld [vmem:[%s2558_s1 + $0x98] sm:$0xff]  }
   0x9   :  { %v2190_v61 = vld [vmem:[%s2558_s1 + $0xa0] sm:$0xff]   ;;  %v2191_v62 = vld [vmem:[%s2558_s1 + $0xa8] sm:$0xff]   ;;  %v2192_v63 = vld [vmem:[%s2558_s1 + $0xb0] sm:$0xff]  }
   0xa   :  { %2166 = vrot.lane.b32.xlu0 %v2165_v8, %s2200_s0  ;;  %v2193_v0 = vld [vmem:[%s2558_s1 + $0xb8] sm:$0xff]   ;;  %v2194_v1 = vld [vmem:[%s2558_s1 + $0xc0] sm:$0xff]   ;;  %v2195_v4 = vld [vmem:[%s2558_s1 + $0xc8] sm:$0xff]  }
   0xb   :  { %1787 = vmatpush3.bf16.msra.mxu0 %v2172_v11  ;;  %1877 = vmatpush3.bf16.msra.mxu1 %v2172_v11  ;;  %v2196_v6 = vld [vmem:[%s2558_s1 + $0xd0] sm:$0xff]   ;;  %v1189_v7 = vld [vmem:[%s2559_s2] sm:$0xff]  ;;  %v1190_v8 = vld [vmem:[%s2559_s2 + $0x8] sm:$0xff] }
   0xc   :  { %1792 = vmatprep.subr.bf16.mxu0 %v2199_v2  ;;  %1882 = vmatprep.subr.bf16.mxu1 %v2199_v2  ;;  %v2043_v9 = vpack.c.bf16 %v1190_v8, %v1189_v7  ;;  %v1191_v11 = vld [vmem:[%s2559_s2 + $0x10] sm:$0xff] }
  0x78   :  { %v2162_v12 = vpop.permute.xlu0 %2161 }
  0x79   :  { %v2164_v13 = vunpack.i.h.bf16 %v2162_v12  ;;  %v2163_v14 = vunpack.i.l.bf16 %v2162_v12  ;;  %v1192_v12 = vld [vmem:[%s2559_s2 + $0x18] sm:$0xff] }
  0x7b   :  { %45 = vst.msk [vmem:[#allocation2 + $0x9] sm:$0xff] %vm43_vm3, %v2164_v13  ;;  %44 = vst.msk [vmem:[#allocation2 + $0x1] sm:$0xff] %vm43_vm3, %v2163_v14  ;;  %v2046_v14 = vpack.c.bf16 %v1192_v12, %v1191_v11 }
  0x7c   :  { %v2167_v15 = vpop.permute.xlu0 %2166 }
  0x7d   :  { %v2169_v16 = vunpack.i.h.bf16 %v2167_v15  ;;  %v2168_v17 = vunpack.i.l.bf16 %v2167_v15 }
  0x7f   :  { %59 = vst.msk [vmem:[#allocation2 + $0x1b] sm:$0xff] %vm43_vm3, %v2169_v16  ;;  %58 = vst.msk [vmem:[#allocation2 + $0x13] sm:$0xff] %vm43_vm3, %v2168_v17  ;;  %v1193_v16 = vld [vmem:[%s2559_s2 + $0x20] sm:$0xff]  ;;  %v1194_v17 = vld [vmem:[%s2559_s2 + $0x28] sm:$0xff] }
  0x82   :  { %v60_v18 = vld [vmem:[#allocation2] sm:$0xff]  ;;  %v61_v19 = vld [vmem:[#allocation2 + $0x8] sm:$0xff] }
  0x83   :  { %v62_v20 = vpack.c.bf16 %v61_v19, %v60_v18  ;;  %v277_v21 = vld [vmem:[#allocation2 + $0x1] sm:$0xff]  ;;  %v278_v22 = vld [vmem:[#allocation2 + $0x9] sm:$0xff]  ;;  %v2049_v18 = vpack.c.bf16 %v1194_v17, %v1193_v16 }
  0x84   :  { %v2272_v25 = vpack.c.bf16 %v278_v22, %v277_v21  ;;  %v498_v27 = vld [vmem:[#allocation2 + $0x2] sm:$0xff]  ;;  %v499_v28 = vld [vmem:[#allocation2 + $0xa] sm:$0xff] }
  0x85   :  { %211 = vrot.lane.b32.xlu0 %v62_v20, %s2202_s7  ;;  %77 = vrot.lane.b32.xlu1 %v62_v20, %s2203_s8  ;;  %v2276_v31 = vpack.c.bf16 %v499_v28, %v498_v27  ;;  %v1195_v19 = vld [vmem:[%s2559_s2 + $0x30] sm:$0xff]  ;;  %v1197_v22 = vld [vmem:[%s2559_s2 + $0x40] sm:$0xff] }
  0x86   :  { %v737_v23 = vld [vmem:[#allocation2 + $0x12] sm:$0xff]  ;;  %v738_v24 = vld [vmem:[#allocation2 + $0x1a] sm:$0xff] }
  0x87   :  { %v739_v26 = vpack.c.bf16 %v738_v24, %v737_v23  ;;  %v879_v29 = vld [vmem:[#allocation2 + $0x13] sm:$0xff]  ;;  %v880_v30 = vld [vmem:[#allocation2 + $0x1b] sm:$0xff]  ;;  %v1198_v23 = vld [vmem:[%s2559_s2 + $0x48] sm:$0xff] }
  0x88   :  { %v2278_v32 = vpack.c.bf16 %v880_v30, %v879_v29  ;;  %v1025_v33 = vld [vmem:[#allocation2 + $0x14] sm:$0xff]  ;;  %v1026_v34 = vld [vmem:[#allocation2 + $0x1c] sm:$0xff]  ;;  %v2055_v24 = vpack.c.bf16 %v1198_v23, %v1197_v22  ;;  %v1202_v29 = vld [vmem:[%s2559_s2 + $0x68] sm:$0xff] }
  0x89   :  { %359 = vrot.lane.b32.xlu0 %v2272_v25, %s2203_s8  ;;  %741 = vrot.lane.b32.xlu1 %v739_v26, %s2203_s8  ;;  %v2284_v35 = vpack.c.bf16 %v1026_v34, %v1025_v33  ;;  %v1201_v28 = vld [vmem:[%s2559_s2 + $0x60] sm:$0xff] }
  0x8a   :  { %v2061_v30 = vpack.c.bf16 %v1202_v29, %v1201_v28  ;;  %v1505_v29 = vlaneseq }
  0x8d   :  { %432 = vrot.lane.b32.xlu0 %v2272_v25, %s2202_s7  ;;  %831 = vrot.lane.b32.xlu1 %v739_v26, %s2202_s7 }
  0x91   :  { %580 = vrot.lane.b32.xlu0 %v2276_v31, %s2203_s8  ;;  %929 = vrot.lane.b32.xlu1 %v2278_v32, %s2203_s8 }
  0x95   :  { %653 = vrot.lane.b32.xlu0 %v2276_v31, %s2202_s7  ;;  %977 = vrot.lane.b32.xlu1 %v2278_v32, %s2202_s7 }
  0x99   :  { %1075 = vrot.lane.b32.xlu1 %v2284_v35, %s2203_s8 }
  0x9d   :  { %1123 = vrot.lane.b32.xlu1 %v2284_v35, %s2202_s7 }
  0xf7   :  { %v78_v37 = vpop.permute.xlu1 %77  ;;  %v212_v45 = vpop.permute.xlu0 %211 }
  0xf8   :  { %1789 = vmatmul.mubr.msk.bf16.vlgmr.msra.gmra.mrb[0].mxu0 %vm97_vm4, %v78_v37 }
  0xf9   :  { %1793 = vmatpush3.bf16.msra.mxu0 %v2173_v36  ;;  %1798 = vmatprep.mubr.msk.bf16.mxu0 %vm2201_vm2, %v2199_v2 }
  0xfa   :  { %1794 = vmatprep.subr.bf16.mxu0 %v2199_v2 }
  0xfb   :  { %v742_v39 = vpop.permute.xlu1 %741  ;;  %v360_v53 = vpop.permute.xlu0 %359 }
  0xfc   :  { %1879 = vmatmul.mubr.msk.bf16.vlgmr.msra.gmra.mrb[0].mxu1 %vm97_vm4, %v742_v39 }
  0xfd   :  { %1883 = vmatpush3.bf16.msra.mxu1 %v2173_v36  ;;  %1795 = vmatpush3.bf16.msra.mxu0 %v2174_v38 }
  0xfe   :  { %1884 = vmatprep.subr.bf16.mxu1 %v2199_v2  ;;  %1796 = vmatprep.subr.bf16.mxu0 %v2199_v2 }
  0xff   :  { %1888 = vmatprep.mubr.msk.bf16.mxu1 %vm2201_vm2, %v2199_v2  ;;  %v832_v47 = vpop.permute.xlu1 %831  ;;  %v433_v58 = vpop.permute.xlu0 %432 }
 0x101   :  { %1885 = vmatpush3.bf16.msra.mxu1 %v2174_v38  ;;  %1797 = vmatpush3.bf16.msra.mxu0 %v2175_v40 }
 0x102   :  { %1886 = vmatprep.subr.bf16.mxu1 %v2199_v2  ;;  %1802 = vmatprep.subr.bf16.mxu0 %v2199_v2 }
 0x103   :  { %v930_v55 = vpop.permute.xlu1 %929  ;;  %v581_v3 = vpop.permute.xlu0 %580 }
 0x104   :  { %1799 = vmatmul.mubr.msk.bf16.vlgmr.msra.gmra.mrb[0].mxu0 %vm97_vm4, %v62_v20  ;;  %v1196_v20 = vld [vmem:[%s2559_s2 + $0x38] sm:$0xff] }
 0x105   :  { %1887 = vmatpush3.bf16.msra.mxu1 %v2175_v40  ;;  %1803 = vmatpush3.bf16.msra.mxu0 %v2176_v41  ;;  %v2052_v21 = vpack.c.bf16 %v1196_v20, %v1195_v19 }
 0x106   :  { %1892 = vmatprep.subr.bf16.mxu1 %v2199_v2  ;;  %1804 = vmatprep.subr.bf16.mxu0 %v2199_v2 }
 0x107   :  { %1808 = vmatprep.mubr.msk.bf16.mxu0 %vm2201_vm2, %v2199_v2  ;;  %v978_v60 = vpop.permute.xlu1 %977  ;;  %v654_v13 = vpop.permute.xlu0 %653 }
 0x108   :  { %1889 = vmatmul.mubr.msk.bf16.vlgmr.msra.gmra.mrb[0].mxu1 %vm97_vm4, %v739_v26  ;;  %v1200_v26 = vld [vmem:[%s2559_s2 + $0x58] sm:$0xff] }
 0x109   :  { %1893 = vmatpush3.bf16.msra.mxu1 %v2176_v41  ;;  %1805 = vmatpush3.bf16.msra.mxu0 %v2177_v42 }
 0x10a   :  { %1894 = vmatprep.subr.bf16.mxu1 %v2199_v2  ;;  %1806 = vmatprep.subr.bf16.mxu0 %v2199_v2 }
 0x10b   :  { %1898 = vmatprep.mubr.msk.bf16.mxu1 %vm2201_vm2, %v2199_v2  ;;  %v1076_v5 = vpop.permute.xlu1 %1075 }
 0x10d   :  { %1895 = vmatpush3.bf16.msra.mxu1 %v2177_v42  ;;  %1807 = vmatpush3.bf16.msra.mxu0 %v2178_v43 }
 0x10e   :  { %1896 = vmatprep.subr.bf16.mxu1 %v2199_v2  ;;  %1812 = vmatprep.subr.bf16.mxu0 %v2199_v2 }
 0x10f   :  { %v1124_v15 = vpop.permute.xlu1 %1123 }
 0x110   :  { %1809 = vmatmul.mubr.msk.bf16.vlgmr.msra.gmra.mrb[0].mxu0 %vm97_vm4, %v212_v45 }
 0x111   :  { %1897 = vmatpush3.bf16.msra.mxu1 %v2178_v43  ;;  %1813 = vmatpush3.bf16.msra.mxu0 %v2179_v44 }
 0x112   :  { %1902 = vmatprep.subr.bf16.mxu1 %v2199_v2  ;;  %1814 = vmatprep.subr.bf16.mxu0 %v2199_v2 }
 0x113   :  { %1818 = vmatprep.mubr.msk.bf16.mxu0 %vm2201_vm2, %v2199_v2 }
 0x114   :  { %1899 = vmatmul.mubr.msk.bf16.vlgmr.msra.gmra.mrb[0].mxu1 %vm97_vm4, %v832_v47 }
 0x115   :  { %1903 = vmatpush3.bf16.msra.mxu1 %v2179_v44  ;;  %1815 = vmatpush3.bf16.msra.mxu0 %v2180_v46 }
 0x116   :  { %1904 = vmatprep.subr.bf16.mxu1 %v2199_v2  ;;  %1816 = vmatprep.subr.bf16.mxu0 %v2199_v2 }
 0x117   :  { %1908 = vmatprep.mubr.msk.bf16.mxu1 %vm2201_vm2, %v2199_v2 }
 0x119   :  { %1905 = vmatpush3.bf16.msra.mxu1 %v2180_v46  ;;  %1817 = vmatpush3.bf16.msra.mxu0 %v2181_v48 }
 0x11a   :  { %1906 = vmatprep.subr.bf16.mxu1 %v2199_v2  ;;  %1822 = vmatprep.subr.bf16.mxu0 %v2199_v2 }
 0x11c   :  { %1819 = vmatmul.mubr.msk.bf16.vlgmr.msra.gmra.mrb[0].mxu0 %vm97_vm4, %v2272_v25  ;;  %v1199_v25 = vld [vmem:[%s2559_s2 + $0x50] sm:$0xff] }
 0x11d   :  { %1907 = vmatpush3.bf16.msra.mxu1 %v2181_v48  ;;  %1823 = vmatpush3.bf16.msra.mxu0 %v2182_v49  ;;  %v2058_v27 = vpack.c.bf16 %v1200_v26, %v1199_v25  ;;  %v1354_v26 = vld [vmem:[%s2562_s5] sm:$0x1] }
 0x11e   :  { %1912 = vmatprep.subr.bf16.mxu1 %v2199_v2  ;;  %1824 = vmatprep.subr.bf16.mxu0 %v2199_v2 }
 0x11f   :  { %1828 = vmatprep.mubr.msk.bf16.mxu0 %vm2201_vm2, %v2199_v2 }
 0x120   :  { %1909 = vmatmul.mubr.msk.bf16.vlgmr.msra.gmra.mrb[0].mxu1 %vm97_vm4, %v2278_v32  ;;  %v1204_v32 = vld [vmem:[%s2559_s2 + $0x78] sm:$0xff] }
 0x121   :  { %1913 = vmatpush3.bf16.msra.mxu1 %v2182_v49  ;;  %1825 = vmatpush3.bf16.msra.mxu0 %v2183_v50 }
 0x122   :  { %1914 = vmatprep.subr.bf16.mxu1 %v2199_v2  ;;  %1826 = vmatprep.subr.bf16.mxu0 %v2199_v2 }
 0x123   :  { %1918 = vmatprep.mubr.msk.bf16.mxu1 %vm2201_vm2, %v2199_v2 }
 0x125   :  { %1915 = vmatpush3.bf16.msra.mxu1 %v2183_v50  ;;  %1827 = vmatpush3.bf16.msra.mxu0 %v2184_v51 }
 0x126   :  { %1916 = vmatprep.subr.bf16.mxu1 %v2199_v2  ;;  %1832 = vmatprep.subr.bf16.mxu0 %v2199_v2 }
 0x128   :  { %1829 = vmatmul.mubr.msk.bf16.vlgmr.msra.gmra.mrb[0].mxu0 %vm97_vm4, %v360_v53 }
 0x129   :  { %1917 = vmatpush3.bf16.msra.mxu1 %v2184_v51  ;;  %1833 = vmatpush3.bf16.msra.mxu0 %v2185_v52 }
 0x12a   :  { %1922 = vmatprep.subr.bf16.mxu1 %v2199_v2  ;;  %1834 = vmatprep.subr.bf16.mxu0 %v2199_v2 }
 0x12b   :  { %1838 = vmatprep.mubr.msk.bf16.mxu0 %vm2201_vm2, %v2199_v2 }
 0x12c   :  { %1919 = vmatmul.mubr.msk.bf16.vlgmr.msra.gmra.mrb[0].mxu1 %vm97_vm4, %v930_v55 }
 0x12d   :  { %1923 = vmatpush3.bf16.msra.mxu1 %v2185_v52  ;;  %1835 = vmatpush3.bf16.msra.mxu0 %v2186_v54 }
 0x12e   :  { %1924 = vmatprep.subr.bf16.mxu1 %v2199_v2  ;;  %1836 = vmatprep.subr.bf16.mxu0 %v2199_v2 }
 0x12f   :  { %1928 = vmatprep.mubr.msk.bf16.mxu1 %vm2201_vm2, %v2199_v2 }
 0x131   :  { %1925 = vmatpush3.bf16.msra.mxu1 %v2186_v54  ;;  %1837 = vmatpush3.bf16.msra.mxu0 %v2187_v56 }
 0x132   :  { %1926 = vmatprep.subr.bf16.mxu1 %v2199_v2  ;;  %1842 = vmatprep.subr.bf16.mxu0 %v2199_v2 }
 0x134   :  { %1839 = vmatmul.mubr.msk.bf16.vlgmr.msra.gmra.mrb[0].mxu0 %vm97_vm4, %v433_v58 }
 0x135   :  { %1927 = vmatpush3.bf16.msra.mxu1 %v2187_v56  ;;  %1843 = vmatpush3.bf16.msra.mxu0 %v2188_v57 }
 0x136   :  { %1932 = vmatprep.subr.bf16.mxu1 %v2199_v2  ;;  %1844 = vmatprep.subr.bf16.mxu0 %v2199_v2 }
 0x137   :  { %1848 = vmatprep.mubr.msk.bf16.mxu0 %vm2201_vm2, %v2199_v2 }
 0x138   :  { %1929 = vmatmul.mubr.msk.bf16.vlgmr.msra.gmra.mrb[0].mxu1 %vm97_vm4, %v978_v60 }
 0x139   :  { %1933 = vmatpush3.bf16.msra.mxu1 %v2188_v57  ;;  %1845 = vmatpush3.bf16.msra.mxu0 %v2189_v59 }
 0x13a   :  { %1934 = vmatprep.subr.bf16.mxu1 %v2199_v2  ;;  %1846 = vmatprep.subr.bf16.mxu0 %v2199_v2 }
 0x13b   :  { %1938 = vmatprep.mubr.msk.bf16.mxu1 %vm2201_vm2, %v2199_v2 }
 0x13d   :  { %1935 = vmatpush3.bf16.msra.mxu1 %v2189_v59  ;;  %1847 = vmatpush3.bf16.msra.mxu0 %v2190_v61 }
 0x13e   :  { %1936 = vmatprep.subr.bf16.mxu1 %v2199_v2  ;;  %1852 = vmatprep.subr.bf16.mxu0 %v2199_v2 }
 0x140   :  { %1849 = vmatmul.mubr.msk.bf16.vlgmr.msra.gmra.mrb[0].mxu0 %vm97_vm4, %v2276_v31  ;;  %v1203_v31 = vld [vmem:[%s2559_s2 + $0x70] sm:$0xff] }
 0x141   :  { %1937 = vmatpush3.bf16.msra.mxu1 %v2190_v61  ;;  %1853 = vmatpush3.bf16.msra.mxu0 %v2191_v62  ;;  %v2064_v33 = vpack.c.bf16 %v1204_v32, %v1203_v31 }
 0x142   :  { %1942 = vmatprep.subr.bf16.mxu1 %v2199_v2  ;;  %1854 = vmatprep.subr.bf16.mxu0 %v2199_v2 }
 0x143   :  { %1858 = vmatprep.mubr.msk.bf16.mxu0 %vm2201_vm2, %v2199_v2 }
 0x144   :  { %1939 = vmatmul.mubr.msk.bf16.vlgmr.msra.gmra.mrb[0].mxu1 %vm97_vm4, %v2284_v35 }
 0x145   :  { %1943 = vmatpush3.bf16.msra.mxu1 %v2191_v62  ;;  %1855 = vmatpush3.bf16.msra.mxu0 %v2192_v63 }
 0x146   :  { %1944 = vmatprep.subr.bf16.mxu1 %v2199_v2  ;;  %1856 = vmatprep.subr.bf16.mxu0 %v2199_v2 }
 0x147   :  { %1948 = vmatprep.mubr.msk.bf16.mxu1 %vm2201_vm2, %v2199_v2 }
 0x149   :  { %1945 = vmatpush3.bf16.msra.mxu1 %v2192_v63  ;;  %1857 = vmatpush3.bf16.msra.mxu0 %v2193_v0 }
 0x14a   :  { %1946 = vmatprep.subr.bf16.mxu1 %v2199_v2  ;;  %1862 = vmatprep.subr.bf16.mxu0 %v2199_v2 }
 0x14c   :  { %1859 = vmatmul.mubr.msk.bf16.vlgmr.msra.gmra.mrb[0].mxu0 %vm97_vm4, %v581_v3 }
 0x14d   :  { %1947 = vmatpush3.bf16.msra.mxu1 %v2193_v0  ;;  %1863 = vmatpush3.bf16.msra.mxu0 %v2194_v1 }
 0x14e   :  { %1952 = vmatprep.subr.bf16.mxu1 %v2199_v2  ;;  %1864 = vmatprep.subr.bf16.mxu0 %v2199_v2 }
 0x14f   :  { %1868 = vmatprep.mubr.msk.bf16.mxu0 %vm2201_vm2, %v2199_v2 }
 0x150   :  { %1949 = vmatmul.mubr.msk.bf16.vlgmr.msra.gmra.mrb[0].mxu1 %vm97_vm4, %v1076_v5 }
 0x151   :  { %1953 = vmatpush3.bf16.msra.mxu1 %v2194_v1  ;;  %1865 = vmatpush3.bf16.msra.mxu0 %v2195_v4 }
 0x152   :  { %1954 = vmatprep.subr.bf16.mxu1 %v2199_v2  ;;  %1866 = vmatprep.subr.bf16.mxu0 %v2199_v2 }
 0x153   :  { %1958 = vmatprep.mubr.msk.bf16.mxu1 %vm2201_vm2, %v2199_v2 }
 0x155   :  { %1955 = vmatpush3.bf16.msra.mxu1 %v2195_v4  ;;  %1867 = vmatpush3.bf16.msra.mxu0 %v2196_v6 }
 0x156   :  { %1956 = vmatprep.subr.bf16.mxu1 %v2199_v2  ;;  %2042 = vmatprep.subr.bf16.mxu0 %v2204_v10 }
 0x158   :  { %1869 = vmatmul.mubr.msk.bf16.vlgmr.msra.gmra.mrb[0].mxu0 %vm97_vm4, %v654_v13  ;;  %v1357_v13 = vld [vmem:[%s2560_s3] sm:$0xff] }
 0x159   :  { %1957 = vmatpush3.bf16.msra.mxu1 %v2196_v6  ;;  %2044 = vmatpush3.bf16.msra.mxu0 %v2043_v9 }
 0x15a   :  { %2066 = vmatprep.subr.bf16.mxu1 %v2204_v10  ;;  %2045 = vmatprep.subr.bf16.mxu0 %v2204_v10 }
 0x15b   :  { %1994 = vmatprep.mubr.msk.f32.mxu0 %vm2201_vm2, %v2199_v2 }
 0x15c   :  { %1959 = vmatmul.mubr.msk.bf16.vlgmr.msra.gmra.mrb[0].mxu1 %vm97_vm4, %v1124_v15 }
 0x15d   :  { %2068 = vmatpush3.bf16.msra.mxu1 %v2043_v9  ;;  %2047 = vmatpush3.bf16.msra.mxu0 %v2046_v14 }
 0x15e   :  { %2069 = vmatprep.subr.bf16.mxu1 %v2204_v10  ;;  %2048 = vmatprep.subr.bf16.mxu0 %v2204_v10 }
 0x15f   :  { %2029 = vmatprep.mubr.msk.f32.mxu1 %vm2201_vm2, %v2199_v2 }
 0x161   :  { %2071 = vmatpush3.bf16.msra.mxu1 %v2046_v14  ;;  %2050 = vmatpush3.bf16.msra.mxu0 %v2049_v18 }
 0x162   :  { %2072 = vmatprep.subr.bf16.mxu1 %v2204_v10  ;;  %2051 = vmatprep.subr.bf16.mxu0 %v2204_v10 }
 0x165   :  { %2074 = vmatpush3.bf16.msra.mxu1 %v2049_v18  ;;  %2053 = vmatpush3.bf16.msra.mxu0 %v2052_v21 }
 0x166   :  { %2075 = vmatprep.subr.bf16.mxu1 %v2204_v10  ;;  %2054 = vmatprep.subr.bf16.mxu0 %v2204_v10 }
 0x169   :  { %2077 = vmatpush3.bf16.msra.mxu1 %v2052_v21  ;;  %2056 = vmatpush3.bf16.msra.mxu0 %v2055_v24 }
 0x16a   :  { %2078 = vmatprep.subr.bf16.mxu1 %v2204_v10  ;;  %2057 = vmatprep.subr.bf16.mxu0 %v2204_v10 }
 0x16d   :  { %2080 = vmatpush3.bf16.msra.mxu1 %v2055_v24  ;;  %2059 = vmatpush3.bf16.msra.mxu0 %v2058_v27 }
 0x16e   :  { %2081 = vmatprep.subr.bf16.mxu1 %v2204_v10  ;;  %2060 = vmatprep.subr.bf16.mxu0 %v2204_v10 }
 0x171   :  { %2083 = vmatpush3.bf16.msra.mxu1 %v2058_v27  ;;  %2062 = vmatpush3.bf16.msra.mxu0 %v2061_v30 }
 0x172   :  { %2084 = vmatprep.subr.bf16.mxu1 %v2204_v10  ;;  %2063 = vmatprep.subr.bf16.mxu0 %v2204_v10 }
 0x175   :  { %2086 = vmatpush3.bf16.msra.mxu1 %v2061_v30  ;;  %2065 = vmatpush3.bf16.msra.mxu0 %v2064_v33  ;;  %v1506_v30 = vshrl.u32 %v1505_v29, 7 }
 0x176   :  { %2087 = vmatprep.subr.bf16.mxu1 %v2204_v10  ;;  %2032 = vmatprep.subr.mxu0 %v2199_v2 }
 0x177   :  { %v1507_v31 = vsub.s32 0, %v1506_v30 }
 0x179   :  { %2089 = vmatpush3.bf16.msra.mxu1 %v2064_v33 }
 0x17a   :  { %2037 = vmatprep.subr.mxu1 %v2199_v2 }
 0x22b   :  { %v2514_v34 = vpop.f32.mrb[0].mxu0 }
 0x22c   :  { %v1870_v35 = vpop.f32.mrb[1].mxu0  ;;  %v727_v37 = vmul.f32 %v2514_v34, %v2514_v34 }
 0x22d   :  { %v2516_v36 = vpop.f32.mrb[2].mxu0 }
 0x22e   :  { %v719_v38 = vadd.f32 %v2516_v36, %v2514_v34  ;;  %v728_v39 = vmul.f32 %v2516_v36, %v2516_v36  ;;  %v1871_v40 = vpop.f32.mrb[3].mxu0 }
 0x22f   :  { %v2524_v41 = vpop.f32.mrb[0].mxu1 }
 0x230   :  { %v720_v42 = vrot.slane %v719_v38, 4  ;;  %v729_v43 = vadd.f32 %v728_v39, %v727_v37  ;;  %v1960_v44 = vpop.f32.mrb[1].mxu1  ;;  %v1179_v45 = vmul.f32 %v2524_v41, %v2524_v41 }
 0x231   :  { %v2528_v46 = vpop.f32.mrb[2].mxu1 }
 0x232   :  { %v721_v47 = vadd.f32 %v720_v42, %v719_v38  ;;  %v730_v48 = vrot.slane %v729_v43, 4  ;;  %v1171_v49 = vadd.f32 %v2528_v46, %v2524_v41  ;;  %v1180_v50 = vmul.f32 %v2528_v46, %v2528_v46  ;;  %v1961_v51 = vpop.f32.mrb[3].mxu1 }
 0x234   :  { %v722_v52 = vrot.slane %v721_v47, 2  ;;  %v731_v53 = vadd.f32 %v730_v48, %v729_v43  ;;  %v1172_v54 = vrot.slane %v1171_v49, 4  ;;  %v1181_v55 = vadd.f32 %v1180_v50, %v1179_v45 }
 0x236   :  { %v723_v56 = vadd.f32 %v722_v52, %v721_v47  ;;  %v732_v57 = vrot.slane %v731_v53, 2  ;;  %v1173_v58 = vadd.f32 %v1172_v54, %v1171_v49  ;;  %v1182_v59 = vrot.slane %v1181_v55, 4 }
 0x238   :  { %v733_v60 = vadd.f32 %v732_v57, %v731_v53  ;;  %v1174_v61 = vrot.slane %v1173_v58, 2  ;;  %v1183_v62 = vadd.f32 %v1182_v59, %v1181_v55  ;;  %v724_v63 = vrot.slane %v723_v56, 1 }
 0x23a   :  { %v1175_v0 = vadd.f32 %v1174_v61, %v1173_v58  ;;  %v1184_v1 = vrot.slane %v1183_v62, 2  ;;  %v734_v5 = vrot.slane %v733_v60, 1  ;;  %v725_v6 = vadd.f32 %v724_v63, %v723_v56 }
 0x23c   :  { %v1176_v3 = vrot.slane %v1175_v0, 1  ;;  %v1185_v4 = vadd.f32 %v1184_v1, %v1183_v62  ;;  %v735_v10 = vadd.f32 %v734_v5, %v733_v60 }
 0x23e   :  { %v1177_v7 = vadd.f32 %v1176_v3, %v1175_v0  ;;  %v1186_v8 = vrot.slane %v1185_v4, 1 }
 0x240   :  { %v1178_v9 = vadd.f32 %v1177_v7, %v725_v6  ;;  %v1187_v11 = vadd.f32 %v1186_v8, %v1185_v4 }
 0x242   :  { %1995 = vmatmul.mubr.f32.vlgmr.msra.gmra.mrb[4].mxu0 %v1178_v9  ;;  %v1188_v12 = vadd.f32 %v1187_v11, %v735_v10 }
 0x243   :  { %2034 = vmatprep.mubr.msk.f32.mxu0 %vm2201_vm2, %v2199_v2  ;;  %2033 = vmatpush3.msra.mxu0 %v1357_v13 }
 0x244   :  { %2030 = vmatmul.mubr.f32.vlgmr.msra.gmra.mrb[4].mxu1 %v1188_v12 }
 0x245   :  { %2039 = vmatprep.mubr.msk.f32.mxu1 %vm2201_vm2, %v2199_v2  ;;  %2038 = vmatpush3.msra.mxu1 %v1357_v13  ;;  %v1350_v2 = vld [vmem:[%s2561_s4] sm:$0x1] }
 0x315   :  { %v1271_v14 = vpop.f32.mrb[4].mxu0 }
 0x316   :  { %v1345_v15 = vmul.f32 0.001953125, %v1271_v14  ;;  %v1996_v16 = vpop.f32.mrb[5].mxu0 }
 0x317   :  { %v1341_v17 = vpop.f32.mrb[4].mxu1 }
 0x318   :  { %v1347_v18 = vmul.f32 %v1345_v15, %v1345_v15  ;;  %v1346_v19 = vmul.f32 0.001953125, %v1341_v17  ;;  %v2031_v20 = vpop.f32.mrb[5].mxu1 }
 0x31a   :  { %v1348_v21 = vsub.f32 %v1346_v19, %v1347_v18 }
 0x31c   :  { %v1349_v22 = vmax.f32 %v1348_v21, 0.0 }
 0x31e   :  { %v1351_v23 = vadd.f32 1e-05, %v1349_v22 }
 0x320   :  { %2197 = vrsqrt.f32 %v1351_v23 }
 0x32a   :  { %v2198_v24 = vpop.eup %2197 }
 0x32b   :  { %v1353_v25 = vmul.f32 %v2198_v24, %v1350_v2 }
 0x32d   :  { %2035 = vmatmul.mubr.msk.f32.vlgmr.msra.gmra.mrb[6].mxu0 %vm1358_vm5, %v1353_v25  ;;  %v1355_v27 = vmul.f32 %v1353_v25, %v1345_v15 }
 0x32f   :  { %v1356_v28 = vsub.f32 %v1354_v26, %v1355_v27 }
 0x331   :  { %2040 = vmatmul.mubr.msk.f32.vlgmr.msra.gmra.mrb[6].mxu1 %vm1358_vm5, %v1356_v28 }
 0x400   :  { %v1428_v32 = vpop.f32.mrb[6].mxu0 }
 0x401   :  { %v1508_v33 = vrot.slane %v1428_v32, %v1507_v31  ;;  %v2036_v35 = vpop.f32.mrb[7].mxu0 }
 0x403   :  { %v1509_v37 = vmul.f32 %v1508_v33, %v2514_v34  ;;  %v1510_v38 = vmul.f32 %v1508_v33, %v2516_v36  ;;  %v1529_v39 = vmul.f32 %v1508_v33, %v2524_v41  ;;  %v1530_v40 = vmul.f32 %v1508_v33, %v2528_v46 }
 0x404   :  { %v1501_v42 = vpop.f32.mrb[6].mxu1 }
 0x405   :  { %v1514_v43 = vrot.slane %v1501_v42, %v1507_v31  ;;  %v2041_v44 = vpop.f32.mrb[7].mxu1 }
 0x407   :  { %v1515_v45 = vadd.f32 %v1514_v43, %v1509_v37  ;;  %v1516_v47 = vadd.f32 %v1514_v43, %v1510_v38  ;;  %v1531_v48 = vadd.f32 %v1529_v39, %v1514_v43  ;;  %v1532_v49 = vadd.f32 %v1530_v40, %v1514_v43 }
 0x409   :  { %v1517_v50 = vmax.f32 %v1515_v45, 0.0  ;;  %v1518_v51 = vmax.f32 %v1516_v47, 0.0  ;;  %v1533_v52 = vmax.f32 %v1531_v48, 0.0  ;;  %v1534_v53 = vmax.f32 %v1532_v49, 0.0 }
 0x40b   :  { %v1663_v54 = vpack.c.bf16 %v1518_v51, %v1517_v50  ;;  %v1668_v55 = vpack.c.bf16 %v1534_v53, %v1533_v52 }
 0x40d   :  { %1664 = vst [vmem:[%s2563_s6] sm:$0xff] %v1663_v54   ;;  %1671 = vst [vmem:[%s2563_s6 + $0x8] sm:$0xff] %v1668_v55  }

// kernel: classifier_forward.8
= control target key start
LH: loop header
LB: loop body
LE: loop exit
PB: predicated region body
PF: predicated region fallthrough
CT: control target
= control target key end

     0   :  { %vm25_vm0 = vcmask 130048   ;;  %v3192_v2 = vmov 0.0   ;;  %vm34_vm1 = vcmask 125952   ;;  %vm73_vm2 = vcmask 1042432   ;;  %s3195_s17 = smov 120   ;;  %s3196_s18 = smov 112   ;;  %s3850_s0 = inlined_call_operand.vmem [shape: bf16[32,128], index: 0, kind: input, shape index: {}]   ;;  %s3851_s1 = inlined_call_operand.vmem [shape: bf16[9,128,128], index: 1, kind: input, shape index: {}]   ;;  %s3852_s2 = inlined_call_operand.vmem [shape: f32[128,8], index: 2, kind: input, shape index: {}]   ;;  %s3853_s3 = inlined_call_operand.vmem [shape: f32[8,128], index: 3, kind: input, shape index: {}]   ;;  %s3854_s4 = inlined_call_operand.vmem [shape: f32[1,8], index: 4, kind: input, shape index: {}]   ;;  %s3855_s5 = inlined_call_operand.vmem [shape: f32[1,8], index: 5, kind: input, shape index: {}]   ;;  %s3856_s6 = inlined_call_operand.vmem [shape: bf16[32,128], index: 6, kind: output, shape index: {}]  }
   0x1   :  { %v2348_v0 = vld [vmem:[%s3850_s0 + $0x8] sm:$0xff]   ;;  %v2331_v1 = vld [vmem:[%s3850_s0] sm:$0xff]   ;;  %29 = vst [vmem:[#allocation2 + $0x20] sm:$0xff] %v3192_v2  ;;  %30 = vst.msk [vmem:[#allocation2 + $0x28] sm:$0xff] %vm25_vm0, %v3192_v2  ;;  %2550 = vmatprep.subr.bf16.mxu0 %v3192_v2  ;;  %2730 = vmatprep.subr.bf16.mxu1 %v3192_v2  ;;  %vm42_vm3 = vcmask 1040384   ;;  %s3193_s0 = smov 8  }
   0x2   :  { %24 = vst [vmem:[#allocation2] sm:$0xff] %v3192_v2  ;;  %26 = vst.msk [vmem:[#allocation2 + $0x8] sm:$0xff] %vm25_vm0, %v3192_v2  ;;  %v2336_v3 = vunpack.c.l.bf16 %v2348_v0  ;;  %v2337_v4 = vunpack.c.h.bf16 %v2348_v0  ;;  %v2332_v5 = vunpack.c.l.bf16 %v2331_v1  ;;  %v2333_v6 = vunpack.c.h.bf16 %v2331_v1  ;;  %v3118_v15 = vld [vmem:[%s3851_s1 + $0x40] sm:$0xff]   ;;  %v3119_v16 = vld [vmem:[%s3851_s1 + $0x48] sm:$0xff]  }
   0x3   :  { %27 = vst [vmem:[#allocation2 + $0x10] sm:$0xff] %v3192_v2  ;;  %28 = vst.msk [vmem:[#allocation2 + $0x18] sm:$0xff] %vm25_vm0, %v3192_v2  ;;  %2551 = vmatpush3.bf16.msra.mxu0 %v3118_v15  ;;  %2731 = vmatpush3.bf16.msra.mxu1 %v3118_v15  ;;  %v3120_v17 = vld [vmem:[%s3851_s1 + $0x50] sm:$0xff]   ;;  %v3121_v18 = vld [vmem:[%s3851_s1 + $0x58] sm:$0xff]   ;;  %vm59_vm4 = vcmask 1047616   ;;  %vm61_vm5 = vcmask 64512  }
   0x4   :  { %31 = vst [vmem:[#allocation2 + $0x30] sm:$0xff] %v3192_v2  ;;  %32 = vst.msk [vmem:[#allocation2 + $0x38] sm:$0xff] %vm25_vm0, %v3192_v2  ;;  %v74_v7 = vrot.slane %v2336_v3, 5  ;;  %v75_v8 = vrot.slane %v2337_v4, 5  ;;  %v43_v9 = vrot.slane %v2332_v5, 7  ;;  %v3251_v10 = vrot.slane %v2333_v6, 7  ;;  %2552 = vmatprep.subr.bf16.mxu0 %v3192_v2  ;;  %2732 = vmatprep.subr.bf16.mxu1 %v3192_v2 }
   0x5   :  { %33 = vst [vmem:[#allocation2 + $0x40] sm:$0xf] %v3192_v2  ;;  %35 = vst.msk [vmem:[#allocation2 + $0x48] sm:$0xf] %vm34_vm1, %v3192_v2  ;;  %v3122_v19 = vld [vmem:[%s3851_s1 + $0x60] sm:$0xff]   ;;  %v3123_v20 = vld [vmem:[%s3851_s1 + $0x68] sm:$0xff]  }
   0x6   :  { %v76_v11 = vsel %vm73_vm2, %v74_v7, %v75_v8  ;;  %v45_v12 = vsel %vm42_vm3, %v43_v9, %v3251_v10  ;;  %v3113_v14 = vpack.i.bf16 %v43_v9, %v75_v8  ;;  %v3124_v21 = vld [vmem:[%s3851_s1 + $0x70] sm:$0xff]   ;;  %v3125_v22 = vld [vmem:[%s3851_s1 + $0x78] sm:$0xff]   ;;  %vm86_vm6 = vcmask 1047619  }
   0x7   :  { %v3108_v13 = vpack.i.bf16 %v76_v11, %v74_v7  ;;  %48 = vrot.lane.b32.xlu1 %v45_v12, %s3193_s0  ;;  %2553 = vmatpush3.bf16.msra.mxu0 %v3119_v16  ;;  %vm88_vm7 = vcmask 64515   ;;  %vm55_vm8 = vcmask 1047617   ;;  %vm57_vm9 = vcmask 64513   ;;  %v3126_v11 = vld [vmem:[%s3851_s1] sm:$0xff]  }
   0x8   :  { %2733 = vmatpush3.bf16.msra.mxu1 %v3119_v16  ;;  %2554 = vmatprep.subr.bf16.mxu0 %v3192_v2  ;;  %vm92_vm10 = vcmask 1042496   ;;  %vm94_vm11 = vcmask 59392   ;;  %vm3194_vm12 = vmmov 0   ;;  %vm849_vm13 = vcmask 1046528  }
   0x9   :  { %3109 = vrot.lane.b32.xlu0 %v3108_v13, %s3193_s0  ;;  %2734 = vmatprep.subr.bf16.mxu1 %v3192_v2  ;;  %vm1579_vm14 = vcmask 1045504   ;;  %vm1371_vm15 = vsmask.f32 6400  ;;  %vm141_vm0 = vcmask 982016   ;;  %vm63_vm1 = vcmask 1040448  }
   0xa   :  { %2566 = vmatprep.mubr.msk.bf16.mxu0 %vm3194_vm12, %v3192_v2  ;;  %2746 = vmatprep.mubr.msk.bf16.mxu1 %vm3194_vm12, %v3192_v2  ;;  %vm65_vm2 = vcmask 57344   ;;  %vm459_vm3 = vsmask.f32 7424 }
   0xb   :  { %2555 = vmatpush3.bf16.msra.mxu0 %v3120_v17 }
   0xc   :  { %2735 = vmatpush3.bf16.msra.mxu1 %v3120_v17  ;;  %2556 = vmatprep.subr.bf16.mxu0 %v3192_v2  ;;  %v3127_v17 = vld [vmem:[%s3851_s1 + $0x8] sm:$0xff]  }
   0xd   :  { %3114 = vrot.lane.b32.xlu0 %v3113_v14, %s3193_s0  ;;  %2736 = vmatprep.subr.bf16.mxu1 %v3192_v2 }
   0xf   :  { %2557 = vmatpush3.bf16.msra.mxu0 %v3121_v18 }
  0x10   :  { %2737 = vmatpush3.bf16.msra.mxu1 %v3121_v18  ;;  %2558 = vmatprep.subr.bf16.mxu0 %v3192_v2 }
  0x11   :  { %2738 = vmatprep.subr.bf16.mxu1 %v3192_v2 }
  0x13   :  { %2559 = vmatpush3.bf16.msra.mxu0 %v3122_v19 }
  0x14   :  { %2739 = vmatpush3.bf16.msra.mxu1 %v3122_v19  ;;  %2560 = vmatprep.subr.bf16.mxu0 %v3192_v2 }
  0x15   :  { %2740 = vmatprep.subr.bf16.mxu1 %v3192_v2 }
  0x17   :  { %2561 = vmatpush3.bf16.msra.mxu0 %v3123_v20 }
  0x18   :  { %2741 = vmatpush3.bf16.msra.mxu1 %v3123_v20  ;;  %2562 = vmatprep.subr.bf16.mxu0 %v3192_v2 }
  0x19   :  { %2742 = vmatprep.subr.bf16.mxu1 %v3192_v2 }
  0x1b   :  { %2563 = vmatpush3.bf16.msra.mxu0 %v3124_v21 }
  0x1c   :  { %2743 = vmatpush3.bf16.msra.mxu1 %v3124_v21  ;;  %2564 = vmatprep.subr.bf16.mxu0 %v3192_v2 }
  0x1d   :  { %2744 = vmatprep.subr.bf16.mxu1 %v3192_v2 }
  0x1f   :  { %2565 = vmatpush3.bf16.msra.mxu0 %v3125_v22 }
  0x20   :  { %2745 = vmatpush3.bf16.msra.mxu1 %v3125_v22  ;;  %2570 = vmatprep.subr.bf16.mxu0 %v3192_v2 }
  0x21   :  { %2750 = vmatprep.subr.bf16.mxu1 %v3192_v2 }
  0x79   :  { %v49_v23 = vpop.permute.xlu1 %48 }
  0x7a   :  { %60 = vst.msk [vmem:[#allocation2 + $0x10] sm:$0xff] %vm59_vm4, %v49_v23 }
  0x7b   :  { %62 = vst.msk [vmem:[#allocation2 + $0x18] sm:$0xff] %vm61_vm5, %v49_v23  ;;  %v3110_v24 = vpop.permute.xlu0 %3109 }
  0x7c   :  { %v3112_v25 = vunpack.i.h.bf16 %v3110_v24  ;;  %v3111_v26 = vunpack.i.l.bf16 %v3110_v24  ;;  %v3128_v24 = vld [vmem:[%s3851_s1 + $0x10] sm:$0xff]  }
  0x7e   :  { %87 = vst.msk [vmem:[#allocation2 + $0x20] sm:$0xf8] %vm86_vm6, %v3111_v26 }
  0x7f   :  { %89 = vst.msk [vmem:[#allocation2 + $0x28] sm:$0xf8] %vm88_vm7, %v3111_v26  ;;  %v3115_v27 = vpop.permute.xlu0 %3114 }
  0x80   :  { %90 = vst.msk [vmem:[#allocation2 + $0x30] sm:$0xff] %vm59_vm4, %v3112_v25  ;;  %v3117_v28 = vunpack.i.h.bf16 %v3115_v27  ;;  %v3116_v29 = vunpack.i.l.bf16 %v3115_v27  ;;  %vm343_vm4 = vcmask 916480  }
  0x81   :  { %91 = vst.msk [vmem:[#allocation2 + $0x38] sm:$0xff] %vm61_vm5, %v3112_v25  ;;  %v3309_v35 = vld [vmem:[#allocation2 + $0x10] sm:$0xff] }
  0x82   :  { %56 = vst.msk [vmem:[#allocation2] sm:$0xfe] %vm55_vm8, %v3117_v28  ;;  %v3307_v34 = vld [vmem:[#allocation2 + $0x18] sm:$0xff] }
  0x83   :  { %58 = vst.msk [vmem:[#allocation2 + $0x8] sm:$0xfe] %vm57_vm9, %v3117_v28 }
  0x84   :  { %93 = vst.msk [vmem:[#allocation2 + $0x40] sm:$0x7] %vm92_vm10, %v3116_v29 }
  0x85   :  { %95 = vst.msk [vmem:[#allocation2 + $0x48] sm:$0x7] %vm94_vm11, %v3116_v29  ;;  %v1209_v32 = vld [vmem:[#allocation2 + $0x20] sm:$0xfc] }
  0x86   :  { %v1214_v30 = vld [vmem:[#allocation2 + $0x28] sm:$0xfc]  ;;  %v1367_v52 = vld [vmem:[#allocation2 + $0x20] sm:$0xf8] }
  0x87   :  { %v3305_v33 = vld [vmem:[#allocation2 + $0x30] sm:$0xff]  ;;  %v1573_v58 = vld [vmem:[#allocation2 + $0x20] sm:$0xf0]  ;;  %v1434_v16 = vld [vmem:[#allocation2 + $0x28] sm:$0xf8] }
  0x88   :  { %v3303_v31 = vld [vmem:[#allocation2 + $0x38] sm:$0xff]  ;;  %v1212_v40 = vpack.c.bf16 %v3305_v33, %v1209_v32  ;;  %v1369_v53 = vpack.c.bf16 %v3305_v33, %v1367_v52  ;;  %v1575_v0 = vpack.c.bf16 %v3305_v33, %v1573_v58  ;;  %v3130_v52 = vld [vmem:[%s3851_s1 + $0x20] sm:$0xff]  }
  0x89   :  { %v1217_v36 = vpack.c.bf16 %v3303_v31, %v1214_v30  ;;  %v96_v38 = vld [vmem:[#allocation2] sm:$0xff]  ;;  %v1438_v23 = vpack.c.bf16 %v3303_v31, %v1434_v16 }
  0x8a   :  { %v115_v37 = vld [vmem:[#allocation2 + $0x8] sm:$0xff]  ;;  %v3315_v42 = vpack.c.bf16 %v3309_v35, %v96_v38  ;;  %v1223_v48 = vrot.slane %v1212_v40, 1  ;;  %v1373_v56 = vshrl.u32 %v1369_v53, 16  ;;  %v1376_v57 = vshll.u32 %v1369_v53, 16  ;;  %v564_v22 = vld [vmem:[#allocation2] sm:$0xfe] }
  0x8b   :  { %v117_v41 = vpack.c.bf16 %v3307_v34, %v115_v37  ;;  %v1211_v44 = vld [vmem:[#allocation2 + $0x40] sm:$0x3]  ;;  %v1226_v46 = vrot.slane %v1217_v36, 1  ;;  %v1580_v5 = vrot.slane %v1575_v0, 2  ;;  %v565_v15 = vld [vmem:[#allocation2 + $0x8] sm:$0xfe]  ;;  %v570_v28 = vpack.c.bf16 %v3309_v35, %v564_v22 }
  0x8c   :  { %v1216_v39 = vld [vmem:[#allocation2 + $0x48] sm:$0x3]  ;;  %v1213_v45 = vpack.c.bf16 %v1211_v44, %v1211_v44  ;;  %137 = vrot.lane.b32.xlu1 %v3315_v42, %s3195_s17  ;;  %v1368_v54 = vld [vmem:[#allocation2 + $0x40] sm:$0x7]  ;;  %v1375_v60 = vrot.slane %v1373_v56, 1  ;;  %v1378_v61 = vrot.slane %v1376_v57, 2  ;;  %v571_v21 = vpack.c.bf16 %v3307_v34, %v565_v15 }
  0x8d   :  { %v1218_v43 = vpack.c.bf16 %v1216_v39, %v1216_v39  ;;  %139 = vrot.lane.b32.xlu0 %v117_v41, %s3195_s17  ;;  %v1370_v55 = vpack.c.bf16 %v1368_v54, %v1368_v54  ;;  %v1574_v59 = vld [vmem:[#allocation2 + $0x40] sm:$0xf]  ;;  %v1436_v25 = vld [vmem:[#allocation2 + $0x48] sm:$0x7]  ;;  %v1459_v32 = vshrl.u32 %v1438_v23, 16  ;;  %v3129_v39 = vld [vmem:[%s3851_s1 + $0x18] sm:$0xff]  }
  0x8e   :  { %v1224_v49 = vrot.slane %v1213_v45, 1  ;;  %v1576_v1 = vpack.c.bf16 %v1574_v59, %v1574_v59  ;;  %v1379_v7 = vor.u32 %v1378_v61, %v1375_v60  ;;  %v437_v26 = vld [vmem:[#allocation2] sm:$0xfe]  ;;  %v606_v30 = vshll.u32 %v571_v21, 16 }
  0x8f   :  { %v1227_v47 = vrot.slane %v1218_v43, 1  ;;  %v1381_v62 = vshrl.u32 %v1370_v55, 16  ;;  %v1384_v63 = vshll.u32 %v1370_v55, 16  ;;  %v1435_v29 = vld [vmem:[#allocation2 + $0x40] sm:$0x7]  ;;  %v1440_v37 = vpack.c.bf16 %v1436_v25, %v1436_v25 }
  0x90   :  { %v3322_v51 = vsel %vm849_vm13, %v1223_v48, %v1224_v49  ;;  %v1581_v6 = vrot.slane %v1576_v1, 2  ;;  %v1433_v36 = vld [vmem:[#allocation2 + $0x20] sm:$0xf8]  ;;  %v440_v38 = vpack.c.bf16 %v3309_v35, %v437_v26  ;;  %v1462_v40 = vshll.u32 %v1438_v23, 16  ;;  %v3132_v26 = vld [vmem:[%s3851_s1 + $0x30] sm:$0xff]  }
  0x91   :  { %v1228_v50 = vsel %vm849_vm13, %v1226_v46, %v1227_v47  ;;  %1229 = vrot.lane.b32.xlu1 %v3322_v51, %s3195_s17  ;;  %v1383_v3 = vrot.slane %v1381_v62, 1  ;;  %v1386_v4 = vrot.slane %v1384_v63, 2  ;;  %v594_v43 = vshll.u32 %v570_v28, 16 }
  0x92   :  { %1231 = vrot.lane.b32.xlu0 %v1228_v50, %s3195_s17  ;;  %v3338_v9 = vsel %vm1579_vm14, %v1580_v5, %v1581_v6  ;;  %v1437_v44 = vpack.c.bf16 %v3305_v33, %v1433_v36  ;;  %v608_v45 = vrot.slane %v606_v30, 1  ;;  %v3371_v46 = vrot.slane %v1459_v32, 1 }
  0x93   :  { %v1387_v8 = vor.u32 %v1386_v4, %v1383_v3  ;;  %v604_v47 = vshrl.u32 %v571_v21, 16  ;;  %v1467_v48 = vshrl.u32 %v1440_v37, 16  ;;  %v1470_v49 = vshll.u32 %v1440_v37, 16  ;;  %v3133_v37 = vld [vmem:[%s3851_s1 + $0x38] sm:$0xff]  }
  0x94   :  { %v592_v53 = vshrl.u32 %v570_v28, 16  ;;  %v1464_v54 = vrot.slane %v1462_v40, 2  ;;  %v596_v59 = vrot.slane %v594_v43, 1  ;;  %v1442_v60 = vshrl.u32 %v1437_v44, 16  ;;  %v946_v40 = vld [vmem:[#allocation2 + $0x8] sm:$0xfc] }
  0x95   :  { %50 = vrot.lane.b32.xlu1 %v3251_v10, %s3193_s0  ;;  %v3341_v10 = vsel %vm1371_vm15, %v1379_v7, %v1387_v8  ;;  %v609_v62 = vor.u32 %v608_v45, %v604_v47  ;;  %v1445_v0 = vshll.u32 %v1437_v44, 16  ;;  %v1469_v3 = vrot.slane %v1467_v48, 1  ;;  %v3131_v7 = vld [vmem:[%s3851_s1 + $0x28] sm:$0xff]   ;;  %v3134_v43 = vld [vmem:[%s3851_s1 + $0x80] sm:$0xff]  }
  0x96   :  { %339 = vrot.lane.b32.xlu0 %v3315_v42, %s3196_s18  ;;  %v1472_v4 = vrot.slane %v1470_v49, 2  ;;  %v461_v15 = vshrl.u32 %v440_v38, 16  ;;  %v1629_v47 = vld [vmem:[#allocation2 + $0x40] sm:$0xf]  ;;  %v950_v48 = vpack.c.bf16 %v3307_v34, %v946_v40 }
  0x98   :  { %v1473_v21 = vor.u32 %v1472_v4, %v1469_v3  ;;  %v977_v34 = vrot.slane %v950_v48, 1  ;;  %v3137_v3 = vld [vmem:[%s3851_s1 + $0x98] sm:$0xff]   ;;  %v3138_v4 = vld [vmem:[%s3851_s1 + $0xa0] sm:$0xff]   ;;  %v3164_v48 = vld [vmem:[%s3851_s1 + $0x170] sm:$0xff]  }
  0x99   :  { %341 = vrot.lane.b32.xlu1 %v117_v41, %s3196_s18  ;;  %v1439_v41 = vpack.c.bf16 %v1435_v29, %v1435_v29  ;;  %v1465_v29 = vor.u32 %v1464_v54, %v3371_v46  ;;  %v1630_v46 = vld [vmem:[#allocation2 + $0x48] sm:$0xf] }
  0x9a   :  { %1318 = vrot.lane.b32.xlu0 %v3322_v51, %s3196_s18 }
  0x9b   :  { %v1450_v55 = vshrl.u32 %v1439_v41, 16  ;;  %v1453_v56 = vshll.u32 %v1439_v41, 16  ;;  %v1474_v32 = vsel %vm1371_vm15, %v1465_v29, %v1473_v21  ;;  %v945_v41 = vld [vmem:[#allocation2] sm:$0xfc]  ;;  %v3147_v21 = vld [vmem:[%s3851_s1 + $0xe8] sm:$0xff]   ;;  %v3156_v29 = vld [vmem:[%s3851_s1 + $0x130] sm:$0xff]  }
  0x9c   :  { %v949_v49 = vpack.c.bf16 %v3309_v35, %v945_v41 }
  0x9d   :  { %1320 = vrot.lane.b32.xlu1 %v1228_v50, %s3196_s18  ;;  %v463_v50 = vshll.u32 %v440_v38, 16 }
  0x9f   :  { %v465_v6 = vrot.slane %v463_v50, 1  ;;  %v1628_v50 = vld [vmem:[#allocation2 + $0x28] sm:$0xf0] }
  0xa1   :  { %v466_v22 = vor.u32 %v465_v6, %v461_v15  ;;  %v3140_v6 = vld [vmem:[%s3851_s1 + $0xb0] sm:$0xff]   ;;  %v3143_v15 = vld [vmem:[%s3851_s1 + $0xc8] sm:$0xff]  }
  0xfe   :  { %v138_v13 = vpop.permute.xlu1 %137 }
  0xff   :  { %v140_v12 = vpop.permute.xlu0 %139 }
 0x100   :  { %v142_v14 = vsel %vm141_vm0, %v138_v13, %v140_v12  ;;  %v1452_v12 = vrot.slane %v1450_v55, 1  ;;  %v1455_v13 = vrot.slane %v1453_v56, 2  ;;  %v1634_v56 = vpack.c.bf16 %v1630_v46, %v1630_v46  ;;  %v3162_v46 = vld [vmem:[%s3851_s1 + $0x160] sm:$0xff]  }
 0x101   :  { %2567 = vmatmul.mubr.bf16.vlgmr.msra.gmra.mrb[0].mxu0 %v142_v14  ;;  %v597_v14 = vor.u32 %v596_v59, %v592_v53  ;;  %v3135_v53 = vld [vmem:[%s3851_s1 + $0x88] sm:$0xff]  }
 0x102   :  { %2571 = vmatpush3.bf16.msra.mxu0 %v3126_v11  ;;  %2586 = vmatprep.mubr.msk.bf16.mxu0 %vm3194_vm12, %v3192_v2 }
 0x103   :  { %v1230_v19 = vpop.permute.xlu1 %1229  ;;  %2572 = vmatprep.subr.bf16.mxu0 %v3192_v2 }
 0x104   :  { %v1232_v18 = vpop.permute.xlu0 %1231 }
 0x105   :  { %v1233_v20 = vsel %vm141_vm0, %v1230_v19, %v1232_v18  ;;  %v1444_v19 = vrot.slane %v1442_v60, 1 }
 0x106   :  { %2747 = vmatmul.mubr.bf16.vlgmr.msra.gmra.mrb[0].mxu1 %v1233_v20  ;;  %2573 = vmatpush3.bf16.msra.mxu0 %v3127_v17  ;;  %v1447_v20 = vrot.slane %v1445_v0, 2 }
 0x107   :  { %2751 = vmatpush3.bf16.msra.mxu1 %v3126_v11  ;;  %v51_v27 = vpop.permute.xlu1 %50  ;;  %2574 = vmatprep.subr.bf16.mxu0 %v3192_v2 }
 0x108   :  { %2752 = vmatprep.subr.bf16.mxu1 %v3192_v2  ;;  %64 = vst.msk [vmem:[#allocation2 + $0x20] sm:$0x1] %vm63_vm1, %v51_v27  ;;  %2766 = vmatprep.mubr.msk.bf16.mxu1 %vm3194_vm12, %v3192_v2  ;;  %v1448_v30 = vor.u32 %v1447_v20, %v1444_v19  ;;  %v3145_v19 = vld [vmem:[%s3851_s1 + $0xd8] sm:$0xff]   ;;  %v3146_v20 = vld [vmem:[%s3851_s1 + $0xe0] sm:$0xff]  }
 0x109   :  { %66 = vst.msk [vmem:[#allocation2 + $0x28] sm:$0x1] %vm65_vm2, %v51_v27  ;;  %v1456_v27 = vor.u32 %v1455_v13, %v1452_v12  ;;  %v3142_v12 = vld [vmem:[%s3851_s1 + $0xc0] sm:$0xff]  }
 0x10a   :  { %2575 = vmatpush3.bf16.msra.mxu0 %v3128_v24 }
 0x10b   :  { %2753 = vmatpush3.bf16.msra.mxu1 %v3127_v17  ;;  %2576 = vmatprep.subr.bf16.mxu0 %v3192_v2  ;;  %v1457_v36 = vsel %vm1371_vm15, %v1448_v30, %v1456_v27  ;;  %v3153_v27 = vld [vmem:[%s3851_s1 + $0x118] sm:$0xff]  }
 0x10c   :  { %2754 = vmatprep.subr.bf16.mxu1 %v3192_v2  ;;  %v3157_v30 = vld [vmem:[%s3851_s1 + $0x138] sm:$0xff]  }
 0x10e   :  { %2577 = vmatpush3.bf16.msra.mxu0 %v3129_v39 }
 0x10f   :  { %2755 = vmatpush3.bf16.msra.mxu1 %v3128_v24  ;;  %2578 = vmatprep.subr.bf16.mxu0 %v3192_v2  ;;  %v568_v58 = vld [vmem:[#allocation2 + $0x20] sm:$0x1] }
 0x110   :  { %2756 = vmatprep.subr.bf16.mxu1 %v3192_v2  ;;  %v569_v57 = vld [vmem:[#allocation2 + $0x28] sm:$0x1]  ;;  %v572_v63 = vpack.c.bf16 %v568_v58, %v568_v58  ;;  %v439_v1 = vld [vmem:[#allocation2 + $0x20] sm:$0x1]  ;;  %v1632_v58 = vpack.c.bf16 %v3303_v31, %v1628_v50 }
 0x111   :  { %v573_v61 = vpack.c.bf16 %v569_v57, %v569_v57  ;;  %v441_v5 = vpack.c.bf16 %v439_v1, %v439_v1  ;;  %v948_v38 = vld [vmem:[#allocation2 + $0x28] sm:$0x3]  ;;  %v1633_v57 = vpack.c.bf16 %v1629_v47, %v1629_v47 }
 0x112   :  { %2579 = vmatpush3.bf16.msra.mxu0 %v3130_v52  ;;  %v599_v11 = vshll.u32 %v572_v63, 16  ;;  %v952_v44 = vpack.c.bf16 %v948_v38, %v948_v38  ;;  %v1643_v63 = vrot.slane %v1634_v56, 2  ;;  %v1642_v31 = vrot.slane %v1632_v58, 2  ;;  %v3163_v47 = vld [vmem:[%s3851_s1 + $0x168] sm:$0xff]   ;;  %v3169_v58 = vld [vmem:[%s3851_s1 + $0x198] sm:$0xff]  }
 0x113   :  { %2757 = vmatpush3.bf16.msra.mxu1 %v3129_v39  ;;  %v611_v8 = vshll.u32 %v573_v61, 16  ;;  %2580 = vmatprep.subr.bf16.mxu0 %v3192_v2  ;;  %v468_v16 = vshll.u32 %v441_v5, 16  ;;  %v947_v39 = vld [vmem:[#allocation2 + $0x20] sm:$0x3]  ;;  %v1640_v0 = vrot.slane %v1633_v57, 2  ;;  %v3139_v5 = vld [vmem:[%s3851_s1 + $0xa8] sm:$0xff]  }
 0x114   :  { %2758 = vmatprep.subr.bf16.mxu1 %v3192_v2  ;;  %v601_v18 = vrot.slane %v599_v11, 1  ;;  %v951_v45 = vpack.c.bf16 %v947_v39, %v947_v39  ;;  %v978_v54 = vrot.slane %v952_v44, 1  ;;  %v340_v11 = vpop.permute.xlu0 %339  ;;  %v3159_v39 = vld [vmem:[%s3851_s1 + $0x148] sm:$0xff]   ;;  %v3160_v44 = vld [vmem:[%s3851_s1 + $0x150] sm:$0xff]  }
 0x115   :  { %v613_v17 = vrot.slane %v611_v8, 1  ;;  %v470_v23 = vrot.slane %v468_v16, 1  ;;  %v342_v8 = vpop.permute.xlu1 %341  ;;  %v3167_v57 = vld [vmem:[%s3851_s1 + $0x188] sm:$0xff]  }
 0x116   :  { %2581 = vmatpush3.bf16.msra.mxu0 %v3131_v7  ;;  %v602_v25 = vsel %vm459_vm3, %v597_v14, %v601_v18  ;;  %v975_v55 = vrot.slane %v951_v45, 1  ;;  %v979_v60 = vsel %vm849_vm13, %v977_v34, %v978_v54  ;;  %v344_v13 = vsel %vm343_vm4, %v340_v11, %v342_v8  ;;  %v3144_v18 = vld [vmem:[%s3851_s1 + $0xd0] sm:$0xff]   ;;  %v3161_v45 = vld [vmem:[%s3851_s1 + $0x158] sm:$0xff]  }
 0x117   :  { %2759 = vmatpush3.bf16.msra.mxu1 %v3130_v52  ;;  %v614_v24 = vsel %vm459_vm3, %v609_v62, %v613_v17  ;;  %615 = vrot.lane.b32.xlu0 %v602_v25, %s3195_s17  ;;  %v3391_v28 = vsel %vm459_vm3, %v466_v22, %v470_v23  ;;  %v1627_v52 = vld [vmem:[#allocation2 + $0x20] sm:$0xf0]  ;;  %v3136_v62 = vld [vmem:[%s3851_s1 + $0x90] sm:$0xff]   ;;  %v3149_v23 = vld [vmem:[%s3851_s1 + $0xf8] sm:$0xff]  }
 0x118   :  { %617 = vrot.lane.b32.xlu1 %v614_v24, %s3195_s17  ;;  %2582 = vmatprep.subr.bf16.mxu0 %v3192_v2  ;;  %v1631_v59 = vpack.c.bf16 %v3305_v33, %v1627_v52  ;;  %v1319_v16 = vpop.permute.xlu0 %1318  ;;  %v3148_v22 = vld [vmem:[%s3851_s1 + $0xf0] sm:$0xff]   ;;  %v3181_v11 = vld [vmem:[%s3851_s1 + $0x1f8] sm:$0xff]  }
 0x119   :  { %2760 = vmatprep.subr.bf16.mxu1 %v3192_v2  ;;  %v1321_v14 = vpop.permute.xlu1 %1320  ;;  %v3180_v8 = vld [vmem:[%s3851_s1 + $0x1f0] sm:$0xff]  }
 0x11a   :  { %2583 = vmatpush3.bf16.msra.mxu0 %v3132_v26  ;;  %v1639_v33 = vrot.slane %v1631_v59, 2  ;;  %v1322_v17 = vsel %vm343_vm4, %v1319_v16, %v1321_v14  ;;  %v3170_v59 = vld [vmem:[%s3851_s1 + $0x1a0] sm:$0xff]  }
 0x11b   :  { %2761 = vmatpush3.bf16.msra.mxu1 %v3131_v7  ;;  %1475 = vrot.lane.b32.xlu0 %v1457_v36, %s3195_s17  ;;  %v3141_v7 = vld [vmem:[%s3851_s1 + $0xb8] sm:$0xff]   ;;  %v3182_v14 = vld [vmem:[%s3851_s1 + $0x200] sm:$0xff]  }
 0x11c   :  { %1477 = vrot.lane.b32.xlu1 %v1474_v32, %s3195_s17  ;;  %2584 = vmatprep.subr.bf16.mxu0 %v3192_v2  ;;  %v1641_v1 = vsel %vm1579_vm14, %v1639_v33, %v1640_v0 }
 0x11d   :  { %2762 = vmatprep.subr.bf16.mxu1 %v3192_v2 }
 0x11e   :  { %2585 = vmatpush3.bf16.msra.mxu0 %v3133_v37 }
 0x11f   :  { %2763 = vmatpush3.bf16.msra.mxu1 %v3132_v26  ;;  %729 = vrot.lane.b32.xlu0 %v602_v25, %s3196_s18  ;;  %v3151_v25 = vld [vmem:[%s3851_s1 + $0x108] sm:$0xff]   ;;  %v3152_v26 = vld [vmem:[%s3851_s1 + $0x110] sm:$0xff]  }
 0x120   :  { %731 = vrot.lane.b32.xlu1 %v614_v24, %s3196_s18  ;;  %2590 = vmatprep.subr.bf16.mxu0 %v3192_v2  ;;  %v3150_v24 = vld [vmem:[%s3851_s1 + $0x100] sm:$0xff]  }
 0x121   :  { %2764 = vmatprep.subr.bf16.mxu1 %v3192_v2  ;;  %2587 = vmatmul.mubr.bf16.vlgmr.msra.gmra.mrb[0].mxu0 %v3315_v42  ;;  %v974_v42 = vrot.slane %v949_v49, 1  ;;  %v3165_v49 = vld [vmem:[%s3851_s1 + $0x178] sm:$0xff]  }
 0x122   :  { %2591 = vmatpush3.bf16.msra.mxu0 %v3134_v43  ;;  %2606 = vmatprep.mubr.msk.bf16.mxu0 %vm3194_vm12, %v3192_v2 }
 0x123   :  { %2765 = vmatpush3.bf16.msra.mxu1 %v3133_v37  ;;  %1524 = vrot.lane.b32.xlu0 %v1457_v36, %s3196_s18  ;;  %v976_v61 = vsel %vm849_vm13, %v974_v42, %v975_v55  ;;  %v3168_v42 = vld [vmem:[%s3851_s1 + $0x190] sm:$0xff]  }
 0x124   :  { %1526 = vrot.lane.b32.xlu1 %v1474_v32, %s3196_s18  ;;  %2592 = vmatprep.subr.bf16.mxu0 %v3192_v2  ;;  %v3158_v32 = vld [vmem:[%s3851_s1 + $0x140] sm:$0xff]  }
 0x125   :  { %2770 = vmatprep.subr.bf16.mxu1 %v3192_v2 }
 0x126   :  { %2767 = vmatmul.mubr.bf16.vlgmr.msra.gmra.mrb[0].mxu1 %v3322_v51  ;;  %2593 = vmatpush3.bf16.msra.mxu0 %v3135_v53  ;;  %v1644_v51 = vsel %vm1579_vm14, %v1642_v31, %v1643_v63  ;;  %v826_v63 = vld [vmem:[#allocation2] sm:$0xfc]  ;;  %v3173_v31 = vld [vmem:[%s3851_s1 + $0x1b8] sm:$0xff]  }
 0x127   :  { %2771 = vmatpush3.bf16.msra.mxu1 %v3134_v43  ;;  %980 = vrot.lane.b32.xlu0 %v976_v61, %s3195_s17  ;;  %v828_v33 = vpack.c.bf16 %v3309_v35, %v826_v63  ;;  %v3175_v35 = vld [vmem:[%s3851_s1 + $0x1c8] sm:$0xff]  }
 0x128   :  { %982 = vrot.lane.b32.xlu1 %v979_v60, %s3195_s17  ;;  %2594 = vmatprep.subr.bf16.mxu0 %v3192_v2 }
 0x129   :  { %2772 = vmatprep.subr.bf16.mxu1 %v3192_v2  ;;  %2786 = vmatprep.mubr.msk.bf16.mxu1 %vm3194_vm12, %v3192_v2 }
 0x12a   :  { %2595 = vmatpush3.bf16.msra.mxu0 %v3136_v62 }
 0x12b   :  { %2773 = vmatpush3.bf16.msra.mxu1 %v3135_v53  ;;  %1645 = vrot.lane.b32.xlu0 %v1641_v1, %s3195_s17  ;;  %v3166_v53 = vld [vmem:[%s3851_s1 + $0x180] sm:$0xff]  }
 0x12c   :  { %1647 = vrot.lane.b32.xlu1 %v1644_v51, %s3195_s17  ;;  %2596 = vmatprep.subr.bf16.mxu0 %v3192_v2 }
 0x12d   :  { %2774 = vmatprep.subr.bf16.mxu1 %v3192_v2 }
 0x12e   :  { %2597 = vmatpush3.bf16.msra.mxu0 %v3137_v3 }
 0x12f   :  { %2775 = vmatpush3.bf16.msra.mxu1 %v3136_v62  ;;  %1094 = vrot.lane.b32.xlu0 %v976_v61, %s3196_s18  ;;  %v827_v61 = vld [vmem:[#allocation2 + $0x20] sm:$0x3]  ;;  %v3172_v62 = vld [vmem:[%s3851_s1 + $0x1b0] sm:$0xff]  }
 0x130   :  { %1096 = vrot.lane.b32.xlu1 %v979_v60, %s3196_s18  ;;  %2598 = vmatprep.subr.bf16.mxu0 %v3192_v2  ;;  %v3171_v60 = vld [vmem:[%s3851_s1 + $0x1a8] sm:$0xff]   ;;  %v829_v0 = vpack.c.bf16 %v827_v61, %v827_v61 }
 0x131   :  { %2776 = vmatprep.subr.bf16.mxu1 %v3192_v2 }
 0x132   :  { %2599 = vmatpush3.bf16.msra.mxu0 %v3138_v4 }
 0x133   :  { %2777 = vmatpush3.bf16.msra.mxu1 %v3137_v3  ;;  %1694 = vrot.lane.b32.xlu0 %v1641_v1, %s3196_s18  ;;  %v850_v1 = vrot.slane %v828_v33, 1  ;;  %v3174_v3 = vld [vmem:[%s3851_s1 + $0x1c0] sm:$0xff]  }
 0x134   :  { %1696 = vrot.lane.b32.xlu1 %v1644_v51, %s3196_s18  ;;  %2600 = vmatprep.subr.bf16.mxu0 %v3192_v2  ;;  %v851_v51 = vrot.slane %v829_v0, 1 }
 0x135   :  { %2778 = vmatprep.subr.bf16.mxu1 %v3192_v2 }
 0x136   :  { %2601 = vmatpush3.bf16.msra.mxu0 %v3139_v5 }
 0x137   :  { %2779 = vmatpush3.bf16.msra.mxu1 %v3138_v4  ;;  %2602 = vmatprep.subr.bf16.mxu0 %v3192_v2  ;;  %v852_v4 = vsel %vm849_vm13, %v850_v1, %v851_v51 }
 0x138   :  { %2780 = vmatprep.subr.bf16.mxu1 %v3192_v2 }
 0x13a   :  { %2603 = vmatpush3.bf16.msra.mxu0 %v3140_v6 }
 0x13b   :  { %2781 = vmatpush3.bf16.msra.mxu1 %v3139_v5  ;;  %2604 = vmatprep.subr.bf16.mxu0 %v3192_v2  ;;  %v3176_v5 = vld [vmem:[%s3851_s1 + $0x1d0] sm:$0xff]  }
 0x13c   :  { %2782 = vmatprep.subr.bf16.mxu1 %v3192_v2 }
 0x13e   :  { %2605 = vmatpush3.bf16.msra.mxu0 %v3141_v7 }
 0x13f   :  { %2783 = vmatpush3.bf16.msra.mxu1 %v3140_v6  ;;  %2610 = vmatprep.subr.bf16.mxu0 %v3192_v2  ;;  %v3177_v6 = vld [vmem:[%s3851_s1 + $0x1d8] sm:$0xff]  }
 0x140   :  { %2784 = vmatprep.subr.bf16.mxu1 %v3192_v2 }
 0x141   :  { %2607 = vmatmul.mubr.bf16.vlgmr.msra.gmra.mrb[0].mxu0 %v344_v13 }
 0x142   :  { %2611 = vmatpush3.bf16.msra.mxu0 %v3142_v12  ;;  %2626 = vmatprep.mubr.msk.bf16.mxu0 %vm3194_vm12, %v3192_v2 }
 0x143   :  { %2785 = vmatpush3.bf16.msra.mxu1 %v3141_v7  ;;  %2612 = vmatprep.subr.bf16.mxu0 %v3192_v2  ;;  %v3179_v7 = vld [vmem:[%s3851_s1 + $0x1e8] sm:$0xff]  }
 0x144   :  { %2790 = vmatprep.subr.bf16.mxu1 %v3192_v2 }
 0x146   :  { %2787 = vmatmul.mubr.bf16.vlgmr.msra.gmra.mrb[0].mxu1 %v1322_v17  ;;  %2613 = vmatpush3.bf16.msra.mxu0 %v3143_v15 }
 0x147   :  { %2791 = vmatpush3.bf16.msra.mxu1 %v3142_v12  ;;  %2614 = vmatprep.subr.bf16.mxu0 %v3192_v2 }
 0x148   :  { %2792 = vmatprep.subr.bf16.mxu1 %v3192_v2  ;;  %2806 = vmatprep.mubr.msk.bf16.mxu1 %vm3194_vm12, %v3192_v2 }
 0x14a   :  { %2615 = vmatpush3.bf16.msra.mxu0 %v3144_v18 }
 0x14b   :  { %2793 = vmatpush3.bf16.msra.mxu1 %v3143_v15  ;;  %2616 = vmatprep.subr.bf16.mxu0 %v3192_v2 }
 0x14c   :  { %2794 = vmatprep.subr.bf16.mxu1 %v3192_v2 }
 0x14e   :  { %2617 = vmatpush3.bf16.msra.mxu0 %v3145_v19 }
 0x14f   :  { %2795 = vmatpush3.bf16.msra.mxu1 %v3144_v18  ;;  %2618 = vmatprep.subr.bf16.mxu0 %v3192_v2  ;;  %v3183_v18 = vld [vmem:[%s3851_s1 + $0x208] sm:$0xff]  }
 0x150   :  { %2796 = vmatprep.subr.bf16.mxu1 %v3192_v2 }
 0x152   :  { %2619 = vmatpush3.bf16.msra.mxu0 %v3146_v20 }
 0x153   :  { %2797 = vmatpush3.bf16.msra.mxu1 %v3145_v19  ;;  %2620 = vmatprep.subr.bf16.mxu0 %v3192_v2 }
 0x154   :  { %2798 = vmatprep.subr.bf16.mxu1 %v3192_v2 }
 0x156   :  { %2621 = vmatpush3.bf16.msra.mxu0 %v3147_v21 }
 0x157   :  { %2799 = vmatpush3.bf16.msra.mxu1 %v3146_v20  ;;  %2622 = vmatprep.subr.bf16.mxu0 %v3192_v2  ;;  %v3184_v20 = vld [vmem:[%s3851_s1 + $0x210] sm:$0xff]  }
 0x158   :  { %2800 = vmatprep.subr.bf16.mxu1 %v3192_v2 }
 0x15a   :  { %2623 = vmatpush3.bf16.msra.mxu0 %v3148_v22 }
 0x15b   :  { %2801 = vmatpush3.bf16.msra.mxu1 %v3147_v21  ;;  %2624 = vmatprep.subr.bf16.mxu0 %v3192_v2  ;;  %v3185_v21 = vld [vmem:[%s3851_s1 + $0x218] sm:$0xff]  }
 0x15c   :  { %2802 = vmatprep.subr.bf16.mxu1 %v3192_v2 }
 0x15e   :  { %2625 = vmatpush3.bf16.msra.mxu0 %v3149_v23 }
 0x15f   :  { %2803 = vmatpush3.bf16.msra.mxu1 %v3148_v22  ;;  %2630 = vmatprep.subr.bf16.mxu0 %v3192_v2  ;;  %v3186_v22 = vld [vmem:[%s3851_s1 + $0x220] sm:$0xff]  }
 0x160   :  { %2804 = vmatprep.subr.bf16.mxu1 %v3192_v2 }
 0x161   :  { %2627 = vmatmul.mubr.bf16.vlgmr.msra.gmra.mrb[0].mxu0 %v3391_v28  ;;  %v3155_v28 = vld [vmem:[%s3851_s1 + $0x128] sm:$0xff]  }
 0x162   :  { %2631 = vmatpush3.bf16.msra.mxu0 %v3150_v24  ;;  %2646 = vmatprep.mubr.msk.bf16.mxu0 %vm3194_vm12, %v3192_v2 }
 0x163   :  { %2805 = vmatpush3.bf16.msra.mxu1 %v3149_v23  ;;  %2632 = vmatprep.subr.bf16.mxu0 %v3192_v2  ;;  %v3187_v23 = vld [vmem:[%s3851_s1 + $0x228] sm:$0xff]  }
 0x164   :  { %2810 = vmatprep.subr.bf16.mxu1 %v3192_v2 }
 0x166   :  { %2807 = vmatmul.mubr.bf16.vlgmr.msra.gmra.mrb[0].mxu1 %v3341_v10  ;;  %2633 = vmatpush3.bf16.msra.mxu0 %v3151_v25  ;;  %v3154_v10 = vld [vmem:[%s3851_s1 + $0x120] sm:$0xff]  }
 0x167   :  { %2811 = vmatpush3.bf16.msra.mxu1 %v3150_v24  ;;  %2634 = vmatprep.subr.bf16.mxu0 %v3192_v2  ;;  %v3188_v24 = vld [vmem:[%s3851_s1 + $0x230] sm:$0xff]  }
 0x168   :  { %2812 = vmatprep.subr.bf16.mxu1 %v3192_v2  ;;  %2826 = vmatprep.mubr.msk.bf16.mxu1 %vm3194_vm12, %v3192_v2 }
 0x16a   :  { %2635 = vmatpush3.bf16.msra.mxu0 %v3152_v26 }
 0x16b   :  { %2813 = vmatpush3.bf16.msra.mxu1 %v3151_v25  ;;  %2636 = vmatprep.subr.bf16.mxu0 %v3192_v2  ;;  %v3189_v25 = vld [vmem:[%s3851_s1 + $0x238] sm:$0xff]  }
 0x16c   :  { %2814 = vmatprep.subr.bf16.mxu1 %v3192_v2 }
 0x16e   :  { %2637 = vmatpush3.bf16.msra.mxu0 %v3153_v27 }
 0x16f   :  { %2815 = vmatpush3.bf16.msra.mxu1 %v3152_v26  ;;  %2638 = vmatprep.subr.bf16.mxu0 %v3192_v2 }
 0x170   :  { %2816 = vmatprep.subr.bf16.mxu1 %v3192_v2 }
 0x172   :  { %2639 = vmatpush3.bf16.msra.mxu0 %v3154_v10 }
 0x173   :  { %2817 = vmatpush3.bf16.msra.mxu1 %v3153_v27  ;;  %2640 = vmatprep.subr.bf16.mxu0 %v3192_v2 }
 0x174   :  { %2818 = vmatprep.subr.bf16.mxu1 %v3192_v2 }
 0x176   :  { %2641 = vmatpush3.bf16.msra.mxu0 %v3155_v28 }
 0x177   :  { %2819 = vmatpush3.bf16.msra.mxu1 %v3154_v10  ;;  %2642 = vmatprep.subr.bf16.mxu0 %v3192_v2  ;;  %v1761_v10 = vld [vmem:[%s3852_s2] sm:$0xff] }
 0x178   :  { %2820 = vmatprep.subr.bf16.mxu1 %v3192_v2 }
 0x17a   :  { %2643 = vmatpush3.bf16.msra.mxu0 %v3156_v29 }
 0x17b   :  { %2821 = vmatpush3.bf16.msra.mxu1 %v3155_v28  ;;  %2644 = vmatprep.subr.bf16.mxu0 %v3192_v2  ;;  %v1762_v28 = vld [vmem:[%s3852_s2 + $0x8] sm:$0xff] }
 0x17c   :  { %2822 = vmatprep.subr.bf16.mxu1 %v3192_v2 }
 0x17e   :  { %2645 = vmatpush3.bf16.msra.mxu0 %v3157_v30 }
 0x17f   :  { %2823 = vmatpush3.bf16.msra.mxu1 %v3156_v29  ;;  %2650 = vmatprep.subr.bf16.mxu0 %v3192_v2  ;;  %v2991_v29 = vpack.c.bf16 %v1762_v28, %v1761_v10 }
 0x180   :  { %2824 = vmatprep.subr.bf16.mxu1 %v3192_v2 }
 0x183   :  { %2825 = vmatpush3.bf16.msra.mxu1 %v3157_v30  ;;  %v3197_v30 = vmov 0.0|0.0  }
 0x184   :  { %2830 = vmatprep.subr.bf16.mxu1 %v3192_v2 }
 0x189   :  { %v616_v36 = vpop.permute.xlu0 %615 }
 0x18a   :  { %v618_v37 = vpop.permute.xlu1 %617 }
 0x18b   :  { %v619_v38 = vsel %vm141_vm0, %v616_v36, %v618_v37  ;;  %v1764_v36 = vld [vmem:[%s3852_s2 + $0x18] sm:$0xff] }
 0x18c   :  { %2647 = vmatmul.mubr.bf16.vlgmr.msra.gmra.mrb[0].mxu0 %v619_v38 }
 0x18d   :  { %2651 = vmatpush3.bf16.msra.mxu0 %v3158_v32  ;;  %2666 = vmatprep.mubr.msk.bf16.mxu0 %vm3194_vm12, %v3192_v2  ;;  %v1476_v40 = vpop.permute.xlu0 %1475 }
 0x18e   :  { %v1478_v41 = vpop.permute.xlu1 %1477  ;;  %2652 = vmatprep.subr.bf16.mxu0 %v3192_v2 }
 0x18f   :  { %v1479_v43 = vsel %vm141_vm0, %v1476_v40, %v1478_v41 }
 0x190   :  { %2827 = vmatmul.mubr.bf16.vlgmr.msra.gmra.mrb[0].mxu1 %v1479_v43  ;;  %v1765_v43 = vld [vmem:[%s3852_s2 + $0x20] sm:$0xff] }
 0x191   :  { %2653 = vmatpush3.bf16.msra.mxu0 %v3159_v39  ;;  %2831 = vmatpush3.bf16.msra.mxu1 %v3158_v32  ;;  %v730_v50 = vpop.permute.xlu0 %729  ;;  %v1763_v32 = vld [vmem:[%s3852_s2 + $0x10] sm:$0xff] }
 0x192   :  { %2654 = vmatprep.subr.bf16.mxu0 %v3192_v2  ;;  %2832 = vmatprep.subr.bf16.mxu1 %v3192_v2  ;;  %v732_v52 = vpop.permute.xlu1 %731  ;;  %v2994_v40 = vpack.c.bf16 %v1764_v36, %v1763_v32 }
 0x193   :  { %2846 = vmatprep.mubr.msk.bf16.mxu1 %vm3194_vm12, %v3192_v2  ;;  %v733_v54 = vsel %vm343_vm4, %v730_v50, %v732_v52  ;;  %v1770_v50 = vld [vmem:[%s3852_s2 + $0x48] sm:$0xff]  ;;  %v1771_v52 = vld [vmem:[%s3852_s2 + $0x50] sm:$0xff] }
 0x195   :  { %2655 = vmatpush3.bf16.msra.mxu0 %v3160_v44  ;;  %2833 = vmatpush3.bf16.msra.mxu1 %v3159_v39  ;;  %v1525_v55 = vpop.permute.xlu0 %1524 }
 0x196   :  { %2656 = vmatprep.subr.bf16.mxu0 %v3192_v2  ;;  %2834 = vmatprep.subr.bf16.mxu1 %v3192_v2  ;;  %v1527_v56 = vpop.permute.xlu1 %1526 }
 0x197   :  { %v1528_v34 = vsel %vm343_vm4, %v1525_v55, %v1527_v56  ;;  %v1773_v56 = vld [vmem:[%s3852_s2 + $0x60] sm:$0xff] }
 0x199   :  { %2657 = vmatpush3.bf16.msra.mxu0 %v3161_v45  ;;  %2835 = vmatpush3.bf16.msra.mxu1 %v3160_v44  ;;  %v981_v12 = vpop.permute.xlu0 %980  ;;  %v1766_v44 = vld [vmem:[%s3852_s2 + $0x28] sm:$0xff] }
 0x19a   :  { %2658 = vmatprep.subr.bf16.mxu0 %v3192_v2  ;;  %2836 = vmatprep.subr.bf16.mxu1 %v3192_v2  ;;  %v983_v13 = vpop.permute.xlu1 %982 }
 0x19b   :  { %v984_v15 = vsel %vm141_vm0, %v981_v12, %v983_v13 }
 0x19d   :  { %2659 = vmatpush3.bf16.msra.mxu0 %v3162_v46  ;;  %2837 = vmatpush3.bf16.msra.mxu1 %v3161_v45  ;;  %v1646_v16 = vpop.permute.xlu0 %1645  ;;  %v2997_v45 = vpack.c.bf16 %v1766_v44, %v1765_v43 }
 0x19e   :  { %2660 = vmatprep.subr.bf16.mxu0 %v3192_v2  ;;  %2838 = vmatprep.subr.bf16.mxu1 %v3192_v2  ;;  %v1648_v17 = vpop.permute.xlu1 %1647 }
 0x19f   :  { %v1649_v19 = vsel %vm141_vm0, %v1646_v16, %v1648_v17 }
 0x1a1   :  { %2661 = vmatpush3.bf16.msra.mxu0 %v3163_v47  ;;  %2839 = vmatpush3.bf16.msra.mxu1 %v3162_v46  ;;  %v1095_v26 = vpop.permute.xlu0 %1094  ;;  %v1767_v46 = vld [vmem:[%s3852_s2 + $0x30] sm:$0xff] }
 0x1a2   :  { %2662 = vmatprep.subr.bf16.mxu0 %v3192_v2  ;;  %2840 = vmatprep.subr.bf16.mxu1 %v3192_v2  ;;  %v1097_v27 = vpop.permute.xlu1 %1096 }
 0x1a3   :  { %v1098_v37 = vsel %vm343_vm4, %v1095_v26, %v1097_v27 }
 0x1a5   :  { %2663 = vmatpush3.bf16.msra.mxu0 %v3164_v48  ;;  %2841 = vmatpush3.bf16.msra.mxu1 %v3163_v47  ;;  %v1695_v38 = vpop.permute.xlu0 %1694  ;;  %v1768_v47 = vld [vmem:[%s3852_s2 + $0x38] sm:$0xff] }
 0x1a6   :  { %2664 = vmatprep.subr.bf16.mxu0 %v3192_v2  ;;  %2842 = vmatprep.subr.bf16.mxu1 %v3192_v2  ;;  %v1697_v39 = vpop.permute.xlu1 %1696 }
 0x1a7   :  { %v1698_v41 = vsel %vm343_vm4, %v1695_v38, %v1697_v39  ;;  %v1929_v39 = vld [vmem:[%s3853_s3] sm:$0xff] }
 0x1a9   :  { %2665 = vmatpush3.bf16.msra.mxu0 %v3165_v49  ;;  %2843 = vmatpush3.bf16.msra.mxu1 %v3164_v48  ;;  %v3000_v48 = vpack.c.bf16 %v1768_v47, %v1767_v46 }
 0x1aa   :  { %2670 = vmatprep.subr.bf16.mxu0 %v3192_v2  ;;  %2844 = vmatprep.subr.bf16.mxu1 %v3192_v2 }
 0x1ac   :  { %2667 = vmatmul.mubr.bf16.vlgmr.msra.gmra.mrb[0].mxu0 %v733_v54  ;;  %v1772_v54 = vld [vmem:[%s3852_s2 + $0x58] sm:$0xff] }
 0x1ad   :  { %2671 = vmatpush3.bf16.msra.mxu0 %v3166_v53  ;;  %2845 = vmatpush3.bf16.msra.mxu1 %v3165_v49  ;;  %v1769_v49 = vld [vmem:[%s3852_s2 + $0x40] sm:$0xff]  ;;  %v3006_v55 = vpack.c.bf16 %v1772_v54, %v1771_v52 }
 0x1ae   :  { %2672 = vmatprep.subr.bf16.mxu0 %v3192_v2  ;;  %2850 = vmatprep.subr.bf16.mxu1 %v3192_v2  ;;  %v1926_v54 = vld [vmem:[%s3855_s5] sm:$0x1] }
 0x1af   :  { %2686 = vmatprep.mubr.msk.bf16.mxu0 %vm3194_vm12, %v3192_v2 }
 0x1b0   :  { %2847 = vmatmul.mubr.bf16.vlgmr.msra.gmra.mrb[0].mxu1 %v1528_v34 }
 0x1b1   :  { %2673 = vmatpush3.bf16.msra.mxu0 %v3167_v57  ;;  %2851 = vmatpush3.bf16.msra.mxu1 %v3166_v53  ;;  %v3003_v53 = vpack.c.bf16 %v1770_v50, %v1769_v49 }
 0x1b2   :  { %2674 = vmatprep.subr.bf16.mxu0 %v3192_v2  ;;  %2852 = vmatprep.subr.bf16.mxu1 %v3192_v2 }
 0x1b3   :  { %2866 = vmatprep.mubr.msk.bf16.mxu1 %vm3194_vm12, %v3192_v2 }
 0x1b5   :  { %2675 = vmatpush3.bf16.msra.mxu0 %v3168_v42  ;;  %2853 = vmatpush3.bf16.msra.mxu1 %v3167_v57  ;;  %v1774_v57 = vld [vmem:[%s3852_s2 + $0x68] sm:$0xff] }
 0x1b6   :  { %2676 = vmatprep.subr.bf16.mxu0 %v3192_v2  ;;  %2854 = vmatprep.subr.bf16.mxu1 %v3192_v2  ;;  %v3009_v34 = vpack.c.bf16 %v1774_v57, %v1773_v56  ;;  %v2076_v57 = vlaneseq }
 0x1b9   :  { %2677 = vmatpush3.bf16.msra.mxu0 %v3169_v58  ;;  %2855 = vmatpush3.bf16.msra.mxu1 %v3168_v42  ;;  %v1775_v42 = vld [vmem:[%s3852_s2 + $0x70] sm:$0xff] }
 0x1ba   :  { %2678 = vmatprep.subr.bf16.mxu0 %v3192_v2  ;;  %2856 = vmatprep.subr.bf16.mxu1 %v3192_v2 }
 0x1bd   :  { %2679 = vmatpush3.bf16.msra.mxu0 %v3170_v59  ;;  %2857 = vmatpush3.bf16.msra.mxu1 %v3169_v58  ;;  %v1776_v58 = vld [vmem:[%s3852_s2 + $0x78] sm:$0xff] }
 0x1be   :  { %2680 = vmatprep.subr.bf16.mxu0 %v3192_v2  ;;  %2858 = vmatprep.subr.bf16.mxu1 %v3192_v2 }
 0x1c1   :  { %2681 = vmatpush3.bf16.msra.mxu0 %v3171_v60  ;;  %2859 = vmatpush3.bf16.msra.mxu1 %v3170_v59  ;;  %v3012_v59 = vpack.c.bf16 %v1776_v58, %v1775_v42 }
 0x1c2   :  { %2682 = vmatprep.subr.bf16.mxu0 %v3192_v2  ;;  %2860 = vmatprep.subr.bf16.mxu1 %v3192_v2 }
 0x1c5   :  { %2683 = vmatpush3.bf16.msra.mxu0 %v3172_v62  ;;  %2861 = vmatpush3.bf16.msra.mxu1 %v3171_v60 }
 0x1c6   :  { %2684 = vmatprep.subr.bf16.mxu0 %v3192_v2  ;;  %2862 = vmatprep.subr.bf16.mxu1 %v3192_v2 }
 0x1c9   :  { %2685 = vmatpush3.bf16.msra.mxu0 %v3173_v31  ;;  %2863 = vmatpush3.bf16.msra.mxu1 %v3172_v62 }
 0x1ca   :  { %2690 = vmatprep.subr.bf16.mxu0 %v3192_v2  ;;  %2864 = vmatprep.subr.bf16.mxu1 %v3192_v2 }
 0x1cc   :  { %2687 = vmatmul.mubr.bf16.vlgmr.msra.gmra.mrb[0].mxu0 %v852_v4 }
 0x1cd   :  { %2691 = vmatpush3.bf16.msra.mxu0 %v3174_v3  ;;  %2865 = vmatpush3.bf16.msra.mxu1 %v3173_v31 }
 0x1ce   :  { %2692 = vmatprep.subr.bf16.mxu0 %v3192_v2  ;;  %2870 = vmatprep.subr.bf16.mxu1 %v3192_v2 }
 0x1cf   :  { %2706 = vmatprep.mubr.msk.bf16.mxu0 %vm3194_vm12, %v3192_v2 }
 0x1d0   :  { %2867 = vmatmul.mubr.bf16.vlgmr.msra.gmra.mrb[0].mxu1 %v3338_v9  ;;  %v3178_v9 = vld [vmem:[%s3851_s1 + $0x1e0] sm:$0xff]  }
 0x1d1   :  { %2693 = vmatpush3.bf16.msra.mxu0 %v3175_v35  ;;  %2871 = vmatpush3.bf16.msra.mxu1 %v3174_v3 }
 0x1d2   :  { %2694 = vmatprep.subr.bf16.mxu0 %v3192_v2  ;;  %2872 = vmatprep.subr.bf16.mxu1 %v3192_v2 }
 0x1d3   :  { %2886 = vmatprep.mubr.msk.bf16.mxu1 %vm3194_vm12, %v3192_v2 }
 0x1d5   :  { %2695 = vmatpush3.bf16.msra.mxu0 %v3176_v5  ;;  %2873 = vmatpush3.bf16.msra.mxu1 %v3175_v35 }
 0x1d6   :  { %2696 = vmatprep.subr.bf16.mxu0 %v3192_v2  ;;  %2874 = vmatprep.subr.bf16.mxu1 %v3192_v2 }
 0x1d9   :  { %2697 = vmatpush3.bf16.msra.mxu0 %v3177_v6  ;;  %2875 = vmatpush3.bf16.msra.mxu1 %v3176_v5 }
 0x1da   :  { %2698 = vmatprep.subr.bf16.mxu0 %v3192_v2  ;;  %2876 = vmatprep.subr.bf16.mxu1 %v3192_v2 }
 0x1dd   :  { %2699 = vmatpush3.bf16.msra.mxu0 %v3178_v9  ;;  %2877 = vmatpush3.bf16.msra.mxu1 %v3177_v6 }
 0x1de   :  { %2700 = vmatprep.subr.bf16.mxu0 %v3192_v2  ;;  %2878 = vmatprep.subr.bf16.mxu1 %v3192_v2 }
 0x1e1   :  { %2701 = vmatpush3.bf16.msra.mxu0 %v3179_v7  ;;  %2879 = vmatpush3.bf16.msra.mxu1 %v3178_v9 }
 0x1e2   :  { %2702 = vmatprep.subr.bf16.mxu0 %v3192_v2  ;;  %2880 = vmatprep.subr.bf16.mxu1 %v3192_v2 }
 0x1e5   :  { %2703 = vmatpush3.bf16.msra.mxu0 %v3180_v8  ;;  %2881 = vmatpush3.bf16.msra.mxu1 %v3179_v7 }
 0x1e6   :  { %2704 = vmatprep.subr.bf16.mxu0 %v3192_v2  ;;  %2882 = vmatprep.subr.bf16.mxu1 %v3192_v2 }
 0x1e9   :  { %2705 = vmatpush3.bf16.msra.mxu0 %v3181_v11  ;;  %2883 = vmatpush3.bf16.msra.mxu1 %v3180_v8 }
 0x1ea   :  { %2710 = vmatprep.subr.bf16.mxu0 %v3192_v2  ;;  %2884 = vmatprep.subr.bf16.mxu1 %v3192_v2 }
 0x1ec   :  { %2707 = vmatmul.mubr.bf16.vlgmr.msra.gmra.mrb[0].mxu0 %v984_v15 }
 0x1ed   :  { %2711 = vmatpush3.bf16.msra.mxu0 %v3182_v14  ;;  %2885 = vmatpush3.bf16.msra.mxu1 %v3181_v11 }
 0x1ee   :  { %2712 = vmatprep.subr.bf16.mxu0 %v3192_v2  ;;  %2890 = vmatprep.subr.bf16.mxu1 %v3192_v2 }
 0x1ef   :  { %2726 = vmatprep.mubr.msk.bf16.mxu0 %vm3194_vm12, %v3192_v2 }
 0x1f0   :  { %2887 = vmatmul.mubr.bf16.vlgmr.msra.gmra.mrb[0].mxu1 %v1649_v19 }
 0x1f1   :  { %2713 = vmatpush3.bf16.msra.mxu0 %v3183_v18  ;;  %2891 = vmatpush3.bf16.msra.mxu1 %v3182_v14 }
 0x1f2   :  { %2714 = vmatprep.subr.bf16.mxu0 %v3192_v2  ;;  %2892 = vmatprep.subr.bf16.mxu1 %v3192_v2 }
 0x1f3   :  { %2906 = vmatprep.mubr.msk.bf16.mxu1 %vm3194_vm12, %v3192_v2 }
 0x1f5   :  { %2715 = vmatpush3.bf16.msra.mxu0 %v3184_v20  ;;  %2893 = vmatpush3.bf16.msra.mxu1 %v3183_v18 }
 0x1f6   :  { %2716 = vmatprep.subr.bf16.mxu0 %v3192_v2  ;;  %2894 = vmatprep.subr.bf16.mxu1 %v3192_v2 }
 0x1f9   :  { %2717 = vmatpush3.bf16.msra.mxu0 %v3185_v21  ;;  %2895 = vmatpush3.bf16.msra.mxu1 %v3184_v20 }
 0x1fa   :  { %2718 = vmatprep.subr.bf16.mxu0 %v3192_v2  ;;  %2896 = vmatprep.subr.bf16.mxu1 %v3192_v2 }
 0x1fd   :  { %2719 = vmatpush3.bf16.msra.mxu0 %v3186_v22  ;;  %2897 = vmatpush3.bf16.msra.mxu1 %v3185_v21 }
 0x1fe   :  { %2720 = vmatprep.subr.bf16.mxu0 %v3192_v2  ;;  %2898 = vmatprep.subr.bf16.mxu1 %v3192_v2 }
 0x201   :  { %2721 = vmatpush3.bf16.msra.mxu0 %v3187_v23  ;;  %2899 = vmatpush3.bf16.msra.mxu1 %v3186_v22 }
 0x202   :  { %2722 = vmatprep.subr.bf16.mxu0 %v3192_v2  ;;  %2900 = vmatprep.subr.bf16.mxu1 %v3192_v2 }
 0x205   :  { %2723 = vmatpush3.bf16.msra.mxu0 %v3188_v24  ;;  %2901 = vmatpush3.bf16.msra.mxu1 %v3187_v23 }
 0x206   :  { %2724 = vmatprep.subr.bf16.mxu0 %v3192_v2  ;;  %2902 = vmatprep.subr.bf16.mxu1 %v3192_v2 }
 0x209   :  { %2725 = vmatpush3.bf16.msra.mxu0 %v3189_v25  ;;  %2903 = vmatpush3.bf16.msra.mxu1 %v3188_v24 }
 0x20a   :  { %2904 = vmatprep.subr.bf16.mxu1 %v3192_v2  ;;  %2990 = vmatprep.subr.bf16.mxu0 %v3197_v30 }
 0x20c   :  { %2727 = vmatmul.mubr.bf16.vlgmr.msra.gmra.mrb[0].mxu0 %v1098_v37 }
 0x20d   :  { %2905 = vmatpush3.bf16.msra.mxu1 %v3189_v25  ;;  %2992 = vmatpush3.bf16.msra.mxu0 %v2991_v29 }
 0x20e   :  { %3014 = vmatprep.subr.bf16.mxu1 %v3197_v30  ;;  %2993 = vmatprep.subr.bf16.mxu0 %v3197_v30 }
 0x20f   :  { %2942 = vmatprep.mubr.msk.f32.mxu0 %vm3194_vm12, %v3192_v2 }
 0x210   :  { %2907 = vmatmul.mubr.bf16.vlgmr.msra.gmra.mrb[0].mxu1 %v1698_v41 }
 0x211   :  { %3016 = vmatpush3.bf16.msra.mxu1 %v2991_v29  ;;  %2995 = vmatpush3.bf16.msra.mxu0 %v2994_v40 }
 0x212   :  { %3017 = vmatprep.subr.bf16.mxu1 %v3197_v30  ;;  %2996 = vmatprep.subr.bf16.mxu0 %v3197_v30 }
 0x213   :  { %2977 = vmatprep.mubr.msk.f32.mxu1 %vm3194_vm12, %v3192_v2 }
 0x215   :  { %3019 = vmatpush3.bf16.msra.mxu1 %v2994_v40  ;;  %2998 = vmatpush3.bf16.msra.mxu0 %v2997_v45 }
 0x216   :  { %3020 = vmatprep.subr.bf16.mxu1 %v3197_v30  ;;  %2999 = vmatprep.subr.bf16.mxu0 %v3197_v30 }
 0x219   :  { %3022 = vmatpush3.bf16.msra.mxu1 %v2997_v45  ;;  %3001 = vmatpush3.bf16.msra.mxu0 %v3000_v48 }
 0x21a   :  { %3023 = vmatprep.subr.bf16.mxu1 %v3197_v30  ;;  %3002 = vmatprep.subr.bf16.mxu0 %v3197_v30 }
 0x21d   :  { %3025 = vmatpush3.bf16.msra.mxu1 %v3000_v48  ;;  %3004 = vmatpush3.bf16.msra.mxu0 %v3003_v53 }
 0x21e   :  { %3026 = vmatprep.subr.bf16.mxu1 %v3197_v30  ;;  %3005 = vmatprep.subr.bf16.mxu0 %v3197_v30 }
 0x221   :  { %3028 = vmatpush3.bf16.msra.mxu1 %v3003_v53  ;;  %3007 = vmatpush3.bf16.msra.mxu0 %v3006_v55 }
 0x222   :  { %3029 = vmatprep.subr.bf16.mxu1 %v3197_v30  ;;  %3008 = vmatprep.subr.bf16.mxu0 %v3197_v30 }
 0x225   :  { %3031 = vmatpush3.bf16.msra.mxu1 %v3006_v55  ;;  %3010 = vmatpush3.bf16.msra.mxu0 %v3009_v34 }
 0x226   :  { %3032 = vmatprep.subr.bf16.mxu1 %v3197_v30  ;;  %3011 = vmatprep.subr.bf16.mxu0 %v3197_v30 }
 0x229   :  { %3034 = vmatpush3.bf16.msra.mxu1 %v3009_v34  ;;  %3013 = vmatpush3.bf16.msra.mxu0 %v3012_v59  ;;  %v2077_v34 = vshrl.u32 %v2076_v57, 7 }
 0x22a   :  { %3035 = vmatprep.subr.bf16.mxu1 %v3197_v30  ;;  %2980 = vmatprep.subr.mxu0 %v3192_v2 }
 0x22b   :  { %v2078_v42 = vsub.s32 0, %v2077_v34 }
 0x22d   :  { %3037 = vmatpush3.bf16.msra.mxu1 %v3012_v59 }
 0x22e   :  { %2985 = vmatprep.subr.mxu1 %v3192_v2 }
 0x2df   :  { %v3805_v60 = vpop.f32.mrb[0].mxu0 }
 0x2e0   :  { %v2728_v61 = vpop.f32.mrb[1].mxu0  ;;  %v1199_v63 = vmul.f32 %v3805_v60, %v3805_v60 }
 0x2e1   :  { %v3807_v62 = vpop.f32.mrb[2].mxu0 }
 0x2e2   :  { %v1191_v0 = vadd.f32 %v3807_v62, %v3805_v60  ;;  %v1200_v31 = vmul.f32 %v3807_v62, %v3807_v62  ;;  %v2729_v33 = vpop.f32.mrb[3].mxu0 }
 0x2e3   :  { %v3815_v51 = vpop.f32.mrb[0].mxu1 }
 0x2e4   :  { %v1192_v1 = vrot.slane %v1191_v0, 4  ;;  %v1201_v3 = vadd.f32 %v1200_v31, %v1199_v63  ;;  %v2908_v4 = vpop.f32.mrb[1].mxu1  ;;  %v1751_v35 = vmul.f32 %v3815_v51, %v3815_v51 }
 0x2e5   :  { %v3819_v5 = vpop.f32.mrb[2].mxu1 }
 0x2e6   :  { %v1193_v6 = vadd.f32 %v1192_v1, %v1191_v0  ;;  %v1202_v9 = vrot.slane %v1201_v3, 4  ;;  %v1743_v7 = vadd.f32 %v3819_v5, %v3815_v51  ;;  %v1752_v8 = vmul.f32 %v3819_v5, %v3819_v5  ;;  %v2909_v11 = vpop.f32.mrb[3].mxu1 }
 0x2e8   :  { %v1194_v12 = vrot.slane %v1193_v6, 2  ;;  %v1203_v13 = vadd.f32 %v1202_v9, %v1201_v3  ;;  %v1744_v14 = vrot.slane %v1743_v7, 4  ;;  %v1753_v15 = vadd.f32 %v1752_v8, %v1751_v35 }
 0x2ea   :  { %v1195_v16 = vadd.f32 %v1194_v12, %v1193_v6  ;;  %v1204_v17 = vrot.slane %v1203_v13, 2  ;;  %v1745_v18 = vadd.f32 %v1744_v14, %v1743_v7  ;;  %v1754_v19 = vrot.slane %v1753_v15, 4 }
 0x2ec   :  { %v1205_v20 = vadd.f32 %v1204_v17, %v1203_v13  ;;  %v1746_v21 = vrot.slane %v1745_v18, 2  ;;  %v1755_v22 = vadd.f32 %v1754_v19, %v1753_v15  ;;  %v1196_v23 = vrot.slane %v1195_v16, 1 }
 0x2ee   :  { %v1747_v24 = vadd.f32 %v1746_v21, %v1745_v18  ;;  %v1756_v25 = vrot.slane %v1755_v22, 2  ;;  %v1206_v10 = vrot.slane %v1205_v20, 1  ;;  %v1197_v28 = vadd.f32 %v1196_v23, %v1195_v16 }
 0x2f0   :  { %v1748_v26 = vrot.slane %v1747_v24, 1  ;;  %v1757_v27 = vadd.f32 %v1756_v25, %v1755_v22  ;;  %v1207_v36 = vadd.f32 %v1206_v10, %v1205_v20 }
 0x2f2   :  { %v1749_v29 = vadd.f32 %v1748_v26, %v1747_v24  ;;  %v1758_v30 = vrot.slane %v1757_v27, 1 }
 0x2f4   :  { %v1750_v32 = vadd.f32 %v1749_v29, %v1197_v28  ;;  %v1759_v37 = vadd.f32 %v1758_v30, %v1757_v27 }
 0x2f6   :  { %2943 = vmatmul.mubr.f32.vlgmr.msra.gmra.mrb[4].mxu0 %v1750_v32  ;;  %v1760_v38 = vadd.f32 %v1759_v37, %v1207_v36 }
 0x2f7   :  { %2982 = vmatprep.mubr.msk.f32.mxu0 %vm3194_vm12, %v3192_v2  ;;  %2981 = vmatpush3.msra.mxu0 %v1929_v39 }
 0x2f8   :  { %2978 = vmatmul.mubr.f32.vlgmr.msra.gmra.mrb[4].mxu1 %v1760_v38 }
 0x2f9   :  { %2987 = vmatprep.mubr.msk.f32.mxu1 %vm3194_vm12, %v3192_v2  ;;  %2986 = vmatpush3.msra.mxu1 %v1929_v39  ;;  %v1922_v2 = vld [vmem:[%s3854_s4] sm:$0x1] }
 0x3c9   :  { %v1843_v40 = vpop.f32.mrb[4].mxu0 }
 0x3ca   :  { %v1917_v41 = vmul.f32 0.001953125, %v1843_v40  ;;  %v2944_v43 = vpop.f32.mrb[5].mxu0 }
 0x3cb   :  { %v1913_v44 = vpop.f32.mrb[4].mxu1 }
 0x3cc   :  { %v1919_v45 = vmul.f32 %v1917_v41, %v1917_v41  ;;  %v1918_v46 = vmul.f32 0.001953125, %v1913_v44  ;;  %v2979_v47 = vpop.f32.mrb[5].mxu1 }
 0x3ce   :  { %v1920_v48 = vsub.f32 %v1918_v46, %v1919_v45 }
 0x3d0   :  { %v1921_v49 = vmax.f32 %v1920_v48, 0.0 }
 0x3d2   :  { %v1923_v50 = vadd.f32 1e-05, %v1921_v49 }
 0x3d4   :  { %3190 = vrsqrt.f32 %v1923_v50 }
 0x3de   :  { %v3191_v52 = vpop.eup %3190 }
 0x3df   :  { %v1925_v53 = vmul.f32 %v3191_v52, %v1922_v2 }
 0x3e1   :  { %2983 = vmatmul.mubr.msk.f32.vlgmr.msra.gmra.mrb[6].mxu0 %vm61_vm5, %v1925_v53  ;;  %v1927_v55 = vmul.f32 %v1925_v53, %v1917_v41 }
 0x3e3   :  { %v1928_v56 = vsub.f32 %v1926_v54, %v1927_v55 }
 0x3e5   :  { %2988 = vmatmul.mubr.msk.f32.vlgmr.msra.gmra.mrb[6].mxu1 %vm61_vm5, %v1928_v56 }
 0x4b4   :  { %v1999_v58 = vpop.f32.mrb[6].mxu0 }
 0x4b5   :  { %v2079_v59 = vrot.slane %v1999_v58, %v2078_v42  ;;  %v2984_v61 = vpop.f32.mrb[7].mxu0 }
 0x4b7   :  { %v2080_v63 = vmul.f32 %v2079_v59, %v3805_v60  ;;  %v2081_v0 = vmul.f32 %v2079_v59, %v3807_v62  ;;  %v2100_v31 = vmul.f32 %v2079_v59, %v3815_v51  ;;  %v2101_v33 = vmul.f32 %v2079_v59, %v3819_v5 }
 0x4b8   :  { %v2072_v1 = vpop.f32.mrb[6].mxu1 }
 0x4b9   :  { %v2085_v3 = vrot.slane %v2072_v1, %v2078_v42  ;;  %v2989_v4 = vpop.f32.mrb[7].mxu1 }
 0x4bb   :  { %v2086_v35 = vadd.f32 %v2085_v3, %v2080_v63  ;;  %v2087_v6 = vadd.f32 %v2085_v3, %v2081_v0  ;;  %v2102_v9 = vadd.f32 %v2100_v31, %v2085_v3  ;;  %v2103_v7 = vadd.f32 %v2101_v33, %v2085_v3 }
 0x4bd   :  { %v2088_v8 = vmax.f32 %v2086_v35, 0.0  ;;  %v2089_v11 = vmax.f32 %v2087_v6, 0.0  ;;  %v2104_v12 = vmax.f32 %v2102_v9, 0.0  ;;  %v2105_v13 = vmax.f32 %v2103_v7, 0.0 }
 0x4bf   :  { %v2341_v14 = vpack.c.bf16 %v2089_v11, %v2088_v8  ;;  %v2346_v15 = vpack.c.bf16 %v2105_v13, %v2104_v12 }
 0x4c1   :  { %2342 = vst [vmem:[%s3856_s6] sm:$0xff] %v2341_v14   ;;  %2349 = vst [vmem:[%s3856_s6 + $0x8] sm:$0xff] %v2346_v15  }

// kernel: classifier_forward.9
= control target key start
LH: loop header
LB: loop body
LE: loop exit
PB: predicated region body
PF: predicated region fallthrough
CT: control target
= control target key end

     0   :  { %vm24_vm0 = vcmask 654336   ;;  %vm27_vm1 = vcmask 650240   ;;  %v2257_v1 = vmov 0.0   ;;  %s2258_s23 = smov 8   ;;  %vm2259_vm2 = vmmov 0   ;;  %s2260_s7 = smov 120   ;;  %s2646_s0 = inlined_call_operand.vmem [shape: bf16[16,64], index: 0, kind: input, shape index: {}]   ;;  %s2647_s1 = inlined_call_operand.vmem [shape: bf16[9,64,128], index: 1, kind: input, shape index: {}]   ;;  %s2648_s2 = inlined_call_operand.vmem [shape: f32[128,16], index: 2, kind: input, shape index: {}]   ;;  %s2649_s3 = inlined_call_operand.vmem [shape: f32[16,128], index: 3, kind: input, shape index: {}]   ;;  %s2650_s4 = inlined_call_operand.vmem [shape: f32[1,16], index: 4, kind: input, shape index: {}]   ;;  %s2651_s5 = inlined_call_operand.vmem [shape: f32[1,16], index: 5, kind: input, shape index: {}]   ;;  %s2652_s6 = inlined_call_operand.vmem [shape: bf16[16,128], index: 6, kind: output, shape index: {}]  }
   0x1   :  { %v29_v0 = vld [vmem:[%s2646_s0] sm:$0xff]   ;;  %25 = vst.msk [vmem:[#allocation2] sm:$0xff] %vm24_vm0, %v2257_v1  ;;  %26 = vst.msk [vmem:[#allocation2 + $0x8] sm:$0xff] %vm24_vm0, %v2257_v1  ;;  %1790 = vmatprep.subr.bf16.mxu0 %v2257_v1  ;;  %1898 = vmatprep.subr.bf16.mxu1 %v2257_v1  ;;  %v2220_v6 = vld [vmem:[%s2647_s1 + $0x28] sm:$0xff]   ;;  %vm35_vm3 = vcmask 588864   ;;  %s2261_s8 = smov 112  }
   0x2   :  { %28 = vst.msk [vmem:[#allocation2 + $0x10] sm:$0xf] %vm27_vm1, %v2257_v1  ;;  %v30_v2 = vunpack.c.l.bf16 %v29_v0  ;;  %v38_v3 = vunpack.c.h.bf16 %v29_v0  ;;  %v2219_v5 = vld [vmem:[%s2647_s1 + $0x20] sm:$0xff]   ;;  %1798 = vmatprep.mubr.msk.bf16.mxu0 %vm2259_vm2, %v2257_v1  ;;  %1906 = vmatprep.mubr.msk.bf16.mxu1 %vm2259_vm2, %v2257_v1  ;;  %v2221_v7 = vld [vmem:[%s2647_s1 + $0x30] sm:$0xff]   ;;  %v2222_v8 = vld [vmem:[%s2647_s1 + $0x38] sm:$0xff]   ;;  %vm90_vm4 = vcmask 523264  }
   0x3   :  { %1791 = vmatpush3.bf16.msra.mxu0 %v2219_v5  ;;  %1899 = vmatpush3.bf16.msra.mxu1 %v2219_v5  ;;  %v2223_v24 = vld [vmem:[%s2647_s1] sm:$0xff]   ;;  %v2224_v27 = vld [vmem:[%s2647_s1 + $0x8] sm:$0xff]   ;;  %v2225_v28 = vld [vmem:[%s2647_s1 + $0x10] sm:$0xff]   ;;  %vm1371_vm5 = vcmask 130048  }
   0x4   :  { %v2214_v4 = vpack.i.bf16 %v38_v3, %v30_v2  ;;  %1792 = vmatprep.subr.bf16.mxu0 %v2257_v1  ;;  %1900 = vmatprep.subr.bf16.mxu1 %v2257_v1  ;;  %v2226_v29 = vld [vmem:[%s2647_s1 + $0x18] sm:$0xff]   ;;  %v2227_v30 = vld [vmem:[%s2647_s1 + $0x40] sm:$0xff]   ;;  %v2228_v31 = vld [vmem:[%s2647_s1 + $0x48] sm:$0xff]  }
   0x5   :  { %v2229_v32 = vld [vmem:[%s2647_s1 + $0x50] sm:$0xff]   ;;  %v2230_v33 = vld [vmem:[%s2647_s1 + $0x58] sm:$0xff]   ;;  %v2231_v34 = vld [vmem:[%s2647_s1 + $0x60] sm:$0xff]  }
   0x6   :  { %2215 = vrot.lane.b32.xlu0 %v2214_v4, %s2258_s23  ;;  %v2232_v37 = vld [vmem:[%s2647_s1 + $0x68] sm:$0xff]   ;;  %v2233_v38 = vld [vmem:[%s2647_s1 + $0x70] sm:$0xff]   ;;  %v2234_v39 = vld [vmem:[%s2647_s1 + $0x78] sm:$0xff]  }
   0x7   :  { %1793 = vmatpush3.bf16.msra.mxu0 %v2220_v6  ;;  %1901 = vmatpush3.bf16.msra.mxu1 %v2220_v6  ;;  %v2235_v40 = vld [vmem:[%s2647_s1 + $0x80] sm:$0xff]   ;;  %v2236_v41 = vld [vmem:[%s2647_s1 + $0x88] sm:$0xff]   ;;  %v2237_v42 = vld [vmem:[%s2647_s1 + $0x90] sm:$0xff]   ;;  %v2262_v6 = vmov 0.0|0.0  }
   0x8   :  { %1794 = vmatprep.subr.bf16.mxu0 %v2257_v1  ;;  %1902 = vmatprep.subr.bf16.mxu1 %v2257_v1  ;;  %v2238_v43 = vld [vmem:[%s2647_s1 + $0x98] sm:$0xff]   ;;  %v2239_v44 = vld [vmem:[%s2647_s1 + $0xa0] sm:$0xff]   ;;  %v2240_v47 = vld [vmem:[%s2647_s1 + $0xa8] sm:$0xff]  }
   0x9   :  { %v2241_v48 = vld [vmem:[%s2647_s1 + $0xb0] sm:$0xff]   ;;  %v2242_v49 = vld [vmem:[%s2647_s1 + $0xb8] sm:$0xff]   ;;  %v2243_v50 = vld [vmem:[%s2647_s1 + $0xc0] sm:$0xff]  }
   0xa   :  { %v2244_v53 = vld [vmem:[%s2647_s1 + $0xc8] sm:$0xff]   ;;  %v2245_v54 = vld [vmem:[%s2647_s1 + $0xd0] sm:$0xff]   ;;  %v2246_v55 = vld [vmem:[%s2647_s1 + $0xd8] sm:$0xff]  }
   0xb   :  { %1795 = vmatpush3.bf16.msra.mxu0 %v2221_v7  ;;  %1903 = vmatpush3.bf16.msra.mxu1 %v2221_v7  ;;  %v2247_v56 = vld [vmem:[%s2647_s1 + $0xe0] sm:$0xff]   ;;  %v2248_v57 = vld [vmem:[%s2647_s1 + $0xe8] sm:$0xff]   ;;  %v2249_v58 = vld [vmem:[%s2647_s1 + $0xf0] sm:$0xff]  }
   0xc   :  { %1796 = vmatprep.subr.bf16.mxu0 %v2257_v1  ;;  %1904 = vmatprep.subr.bf16.mxu1 %v2257_v1  ;;  %v2250_v59 = vld [vmem:[%s2647_s1 + $0xf8] sm:$0xff]   ;;  %v2251_v60 = vld [vmem:[%s2647_s1 + $0x100] sm:$0xff]   ;;  %v2252_v63 = vld [vmem:[%s2647_s1 + $0x108] sm:$0xff]  }
   0xd   :  { %v2253_v0 = vld [vmem:[%s2647_s1 + $0x110] sm:$0xff]   ;;  %v2254_v2 = vld [vmem:[%s2647_s1 + $0x118] sm:$0xff]   ;;  %v1201_v3 = vld [vmem:[%s2648_s2] sm:$0xff] }
   0xe   :  { %v1202_v4 = vld [vmem:[%s2648_s2 + $0x8] sm:$0xff]  ;;  %v1203_v7 = vld [vmem:[%s2648_s2 + $0x10] sm:$0xff] }
   0xf   :  { %1797 = vmatpush3.bf16.msra.mxu0 %v2222_v8  ;;  %1905 = vmatpush3.bf16.msra.mxu1 %v2222_v8  ;;  %v2091_v5 = vpack.c.bf16 %v1202_v4, %v1201_v3  ;;  %v1204_v8 = vld [vmem:[%s2648_s2 + $0x18] sm:$0xff]  ;;  %v1369_v3 = vld [vmem:[%s2649_s3] sm:$0xff]  ;;  %v1370_v4 = vld [vmem:[%s2649_s3 + $0x8] sm:$0xff] }
  0x10   :  { %1802 = vmatprep.subr.bf16.mxu0 %v2257_v1  ;;  %1910 = vmatprep.subr.bf16.mxu1 %v2257_v1 }
  0x78   :  { %v2216_v9 = vpop.permute.xlu0 %2215 }
  0x79   :  { %v2218_v10 = vunpack.i.h.bf16 %v2216_v9  ;;  %v2217_v11 = vunpack.i.l.bf16 %v2216_v9 }
  0x7b   :  { %43 = vst.msk [vmem:[#allocation2 + $0xb] sm:$0xff] %vm35_vm3, %v2218_v10  ;;  %36 = vst.msk [vmem:[#allocation2 + $0x1] sm:$0xff] %vm35_vm3, %v2217_v11  ;;  %v2094_v11 = vpack.c.bf16 %v1204_v8, %v1203_v7 }
  0x82   :  { %v771_v12 = vld [vmem:[#allocation2 + $0xa] sm:$0xff]  ;;  %v44_v13 = vld [vmem:[#allocation2] sm:$0xff] }
  0x83   :  { %v772_v14 = vpack.c.bf16 %v771_v12, %v771_v12  ;;  %v45_v15 = vpack.c.bf16 %v44_v13, %v44_v13  ;;  %v280_v16 = vld [vmem:[#allocation2 + $0x1] sm:$0xff]  ;;  %v908_v17 = vld [vmem:[#allocation2 + $0xb] sm:$0xff] }
  0x84   :  { %v2330_v18 = vpack.c.bf16 %v280_v16, %v280_v16  ;;  %v2332_v19 = vpack.c.bf16 %v908_v17, %v908_v17  ;;  %v518_v20 = vld [vmem:[#allocation2 + $0x2] sm:$0xff]  ;;  %v1047_v21 = vld [vmem:[#allocation2 + $0xc] sm:$0xff]  ;;  %v1208_v16 = vld [vmem:[%s2648_s2 + $0x38] sm:$0xff] }
  0x85   :  { %774 = vrot.lane.b32.xlu1 %v772_v14, %s2260_s7  ;;  %64 = vrot.lane.b32.xlu0 %v45_v15, %s2260_s7  ;;  %v2338_v22 = vpack.c.bf16 %v518_v20, %v518_v20  ;;  %v2340_v23 = vpack.c.bf16 %v1047_v21, %v1047_v21  ;;  %v1205_v12 = vld [vmem:[%s2648_s2 + $0x20] sm:$0xff]  ;;  %v1206_v13 = vld [vmem:[%s2648_s2 + $0x28] sm:$0xff] }
  0x86   :  { %v1211_v21 = vld [vmem:[%s2648_s2 + $0x50] sm:$0xff] }
  0x89   :  { %210 = vrot.lane.b32.xlu1 %v45_v15, %s2261_s8  ;;  %862 = vrot.lane.b32.xlu0 %v772_v14, %s2261_s8 }
  0x8d   :  { %369 = vrot.lane.b32.xlu1 %v2330_v18, %s2260_s7  ;;  %955 = vrot.lane.b32.xlu0 %v2332_v19, %s2260_s7 }
  0x91   :  { %448 = vrot.lane.b32.xlu1 %v2330_v18, %s2261_s8  ;;  %1001 = vrot.lane.b32.xlu0 %v2332_v19, %s2261_s8 }
  0x95   :  { %607 = vrot.lane.b32.xlu1 %v2338_v22, %s2260_s7  ;;  %1094 = vrot.lane.b32.xlu0 %v2340_v23, %s2260_s7 }
  0x99   :  { %686 = vrot.lane.b32.xlu1 %v2338_v22, %s2261_s8  ;;  %1140 = vrot.lane.b32.xlu0 %v2340_v23, %s2261_s8 }
  0xf7   :  { %v775_v25 = vpop.permute.xlu1 %774  ;;  %v65_v26 = vpop.permute.xlu0 %64 }
  0xf8   :  { %1799 = vmatmul.mubr.msk.bf16.vlgmr.msra.gmra.mrb[0].mxu0 %vm90_vm4, %v65_v26  ;;  %1907 = vmatmul.mubr.msk.bf16.vlgmr.msra.gmra.mrb[0].mxu1 %vm90_vm4, %v775_v25  ;;  %v1214_v25 = vld [vmem:[%s2648_s2 + $0x68] sm:$0xff] }
  0xf9   :  { %1803 = vmatpush3.bf16.msra.mxu0 %v2223_v24  ;;  %1911 = vmatpush3.bf16.msra.mxu1 %v2223_v24  ;;  %v1213_v24 = vld [vmem:[%s2648_s2 + $0x60] sm:$0xff] }
  0xfa   :  { %1912 = vmatprep.subr.bf16.mxu1 %v2257_v1  ;;  %1804 = vmatprep.subr.bf16.mxu0 %v2257_v1  ;;  %v2109_v26 = vpack.c.bf16 %v1214_v25, %v1213_v24 }
  0xfb   :  { %1810 = vmatprep.mubr.msk.bf16.mxu0 %vm2259_vm2, %v2257_v1  ;;  %1918 = vmatprep.mubr.msk.bf16.mxu1 %vm2259_vm2, %v2257_v1  ;;  %v211_v35 = vpop.permute.xlu1 %210  ;;  %v863_v36 = vpop.permute.xlu0 %862 }
  0xfd   :  { %1805 = vmatpush3.bf16.msra.mxu0 %v2224_v27  ;;  %1913 = vmatpush3.bf16.msra.mxu1 %v2224_v27  ;;  %v1215_v27 = vld [vmem:[%s2648_s2 + $0x70] sm:$0xff] }
  0xfe   :  { %1914 = vmatprep.subr.bf16.mxu1 %v2257_v1  ;;  %1806 = vmatprep.subr.bf16.mxu0 %v2257_v1 }
  0xff   :  { %v370_v45 = vpop.permute.xlu1 %369  ;;  %v956_v46 = vpop.permute.xlu0 %955 }
 0x101   :  { %1807 = vmatpush3.bf16.msra.mxu0 %v2225_v28  ;;  %1915 = vmatpush3.bf16.msra.mxu1 %v2225_v28  ;;  %v1216_v28 = vld [vmem:[%s2648_s2 + $0x78] sm:$0xff] }
 0x102   :  { %1916 = vmatprep.subr.bf16.mxu1 %v2257_v1  ;;  %1808 = vmatprep.subr.bf16.mxu0 %v2257_v1 }
 0x103   :  { %v449_v51 = vpop.permute.xlu1 %448  ;;  %v1002_v52 = vpop.permute.xlu0 %1001 }
 0x105   :  { %1809 = vmatpush3.bf16.msra.mxu0 %v2226_v29  ;;  %1917 = vmatpush3.bf16.msra.mxu1 %v2226_v29  ;;  %v2112_v29 = vpack.c.bf16 %v1216_v28, %v1215_v27 }
 0x106   :  { %1922 = vmatprep.subr.bf16.mxu1 %v2257_v1  ;;  %1814 = vmatprep.subr.bf16.mxu0 %v2257_v1 }
 0x107   :  { %v608_v61 = vpop.permute.xlu1 %607  ;;  %v1095_v62 = vpop.permute.xlu0 %1094 }
 0x108   :  { %1919 = vmatmul.mubr.msk.bf16.vlgmr.msra.gmra.mrb[0].mxu1 %vm90_vm4, %v772_v14  ;;  %1811 = vmatmul.mubr.msk.bf16.vlgmr.msra.gmra.mrb[0].mxu0 %vm90_vm4, %v45_v15  ;;  %v2097_v14 = vpack.c.bf16 %v1206_v13, %v1205_v12  ;;  %v1207_v15 = vld [vmem:[%s2648_s2 + $0x30] sm:$0xff] }
 0x109   :  { %1815 = vmatpush3.bf16.msra.mxu0 %v2227_v30  ;;  %1923 = vmatpush3.bf16.msra.mxu1 %v2227_v30  ;;  %v2100_v17 = vpack.c.bf16 %v1208_v16, %v1207_v15  ;;  %v1362_v15 = vld [vmem:[%s2650_s4] sm:$0x1] }
 0x10a   :  { %1924 = vmatprep.subr.bf16.mxu1 %v2257_v1  ;;  %1816 = vmatprep.subr.bf16.mxu0 %v2257_v1 }
 0x10b   :  { %1822 = vmatprep.mubr.msk.bf16.mxu0 %vm2259_vm2, %v2257_v1  ;;  %1930 = vmatprep.mubr.msk.bf16.mxu1 %vm2259_vm2, %v2257_v1  ;;  %v687_v9 = vpop.permute.xlu1 %686  ;;  %v1141_v10 = vpop.permute.xlu0 %1140 }
 0x10d   :  { %1817 = vmatpush3.bf16.msra.mxu0 %v2228_v31  ;;  %1925 = vmatpush3.bf16.msra.mxu1 %v2228_v31 }
 0x10e   :  { %1818 = vmatprep.subr.bf16.mxu0 %v2257_v1  ;;  %1926 = vmatprep.subr.bf16.mxu1 %v2257_v1 }
 0x111   :  { %1819 = vmatpush3.bf16.msra.mxu0 %v2229_v32  ;;  %1927 = vmatpush3.bf16.msra.mxu1 %v2229_v32 }
 0x112   :  { %1820 = vmatprep.subr.bf16.mxu0 %v2257_v1  ;;  %1928 = vmatprep.subr.bf16.mxu1 %v2257_v1 }
 0x115   :  { %1821 = vmatpush3.bf16.msra.mxu0 %v2230_v33  ;;  %1929 = vmatpush3.bf16.msra.mxu1 %v2230_v33 }
 0x116   :  { %1826 = vmatprep.subr.bf16.mxu0 %v2257_v1  ;;  %1934 = vmatprep.subr.bf16.mxu1 %v2257_v1 }
 0x118   :  { %1823 = vmatmul.mubr.msk.bf16.vlgmr.msra.gmra.mrb[0].mxu0 %vm90_vm4, %v211_v35  ;;  %1931 = vmatmul.mubr.msk.bf16.vlgmr.msra.gmra.mrb[0].mxu1 %vm90_vm4, %v863_v36 }
 0x119   :  { %1827 = vmatpush3.bf16.msra.mxu0 %v2231_v34  ;;  %1935 = vmatpush3.bf16.msra.mxu1 %v2231_v34 }
 0x11a   :  { %1828 = vmatprep.subr.bf16.mxu0 %v2257_v1  ;;  %1936 = vmatprep.subr.bf16.mxu1 %v2257_v1 }
 0x11b   :  { %1834 = vmatprep.mubr.msk.bf16.mxu0 %vm2259_vm2, %v2257_v1  ;;  %1942 = vmatprep.mubr.msk.bf16.mxu1 %vm2259_vm2, %v2257_v1 }
 0x11d   :  { %1829 = vmatpush3.bf16.msra.mxu0 %v2232_v37  ;;  %1937 = vmatpush3.bf16.msra.mxu1 %v2232_v37 }
 0x11e   :  { %1830 = vmatprep.subr.bf16.mxu0 %v2257_v1  ;;  %1938 = vmatprep.subr.bf16.mxu1 %v2257_v1 }
 0x121   :  { %1831 = vmatpush3.bf16.msra.mxu0 %v2233_v38  ;;  %1939 = vmatpush3.bf16.msra.mxu1 %v2233_v38 }
 0x122   :  { %1832 = vmatprep.subr.bf16.mxu0 %v2257_v1  ;;  %1940 = vmatprep.subr.bf16.mxu1 %v2257_v1 }
 0x125   :  { %1833 = vmatpush3.bf16.msra.mxu0 %v2234_v39  ;;  %1941 = vmatpush3.bf16.msra.mxu1 %v2234_v39 }
 0x126   :  { %1838 = vmatprep.subr.bf16.mxu0 %v2257_v1  ;;  %1946 = vmatprep.subr.bf16.mxu1 %v2257_v1 }
 0x128   :  { %1835 = vmatmul.mubr.msk.bf16.vlgmr.msra.gmra.mrb[0].mxu0 %vm90_vm4, %v2330_v18  ;;  %1943 = vmatmul.mubr.msk.bf16.vlgmr.msra.gmra.mrb[0].mxu1 %vm90_vm4, %v2332_v19  ;;  %v1209_v18 = vld [vmem:[%s2648_s2 + $0x40] sm:$0xff]  ;;  %v1210_v19 = vld [vmem:[%s2648_s2 + $0x48] sm:$0xff] }
 0x129   :  { %1839 = vmatpush3.bf16.msra.mxu0 %v2235_v40  ;;  %1947 = vmatpush3.bf16.msra.mxu1 %v2235_v40  ;;  %v2103_v20 = vpack.c.bf16 %v1210_v19, %v1209_v18  ;;  %v1366_v18 = vld [vmem:[%s2651_s5] sm:$0x1] }
 0x12a   :  { %1840 = vmatprep.subr.bf16.mxu0 %v2257_v1  ;;  %1948 = vmatprep.subr.bf16.mxu1 %v2257_v1 }
 0x12b   :  { %1846 = vmatprep.mubr.msk.bf16.mxu0 %vm2259_vm2, %v2257_v1  ;;  %1954 = vmatprep.mubr.msk.bf16.mxu1 %vm2259_vm2, %v2257_v1 }
 0x12d   :  { %1841 = vmatpush3.bf16.msra.mxu0 %v2236_v41  ;;  %1949 = vmatpush3.bf16.msra.mxu1 %v2236_v41 }
 0x12e   :  { %1842 = vmatprep.subr.bf16.mxu0 %v2257_v1  ;;  %1950 = vmatprep.subr.bf16.mxu1 %v2257_v1 }
 0x131   :  { %1843 = vmatpush3.bf16.msra.mxu0 %v2237_v42  ;;  %1951 = vmatpush3.bf16.msra.mxu1 %v2237_v42 }
 0x132   :  { %1844 = vmatprep.subr.bf16.mxu0 %v2257_v1  ;;  %1952 = vmatprep.subr.bf16.mxu1 %v2257_v1 }
 0x135   :  { %1845 = vmatpush3.bf16.msra.mxu0 %v2238_v43  ;;  %1953 = vmatpush3.bf16.msra.mxu1 %v2238_v43 }
 0x136   :  { %1850 = vmatprep.subr.bf16.mxu0 %v2257_v1  ;;  %1958 = vmatprep.subr.bf16.mxu1 %v2257_v1 }
 0x138   :  { %1847 = vmatmul.mubr.msk.bf16.vlgmr.msra.gmra.mrb[0].mxu0 %vm90_vm4, %v370_v45  ;;  %1955 = vmatmul.mubr.msk.bf16.vlgmr.msra.gmra.mrb[0].mxu1 %vm90_vm4, %v956_v46 }
 0x139   :  { %1851 = vmatpush3.bf16.msra.mxu0 %v2239_v44  ;;  %1959 = vmatpush3.bf16.msra.mxu1 %v2239_v44 }
 0x13a   :  { %1852 = vmatprep.subr.bf16.mxu0 %v2257_v1  ;;  %1960 = vmatprep.subr.bf16.mxu1 %v2257_v1 }
 0x13b   :  { %1858 = vmatprep.mubr.msk.bf16.mxu0 %vm2259_vm2, %v2257_v1  ;;  %1966 = vmatprep.mubr.msk.bf16.mxu1 %vm2259_vm2, %v2257_v1 }
 0x13d   :  { %1853 = vmatpush3.bf16.msra.mxu0 %v2240_v47  ;;  %1961 = vmatpush3.bf16.msra.mxu1 %v2240_v47 }
 0x13e   :  { %1854 = vmatprep.subr.bf16.mxu0 %v2257_v1  ;;  %1962 = vmatprep.subr.bf16.mxu1 %v2257_v1 }
 0x141   :  { %1855 = vmatpush3.bf16.msra.mxu0 %v2241_v48  ;;  %1963 = vmatpush3.bf16.msra.mxu1 %v2241_v48 }
 0x142   :  { %1856 = vmatprep.subr.bf16.mxu0 %v2257_v1  ;;  %1964 = vmatprep.subr.bf16.mxu1 %v2257_v1 }
 0x145   :  { %1857 = vmatpush3.bf16.msra.mxu0 %v2242_v49  ;;  %1965 = vmatpush3.bf16.msra.mxu1 %v2242_v49 }
 0x146   :  { %1862 = vmatprep.subr.bf16.mxu0 %v2257_v1  ;;  %1970 = vmatprep.subr.bf16.mxu1 %v2257_v1 }
 0x148   :  { %1859 = vmatmul.mubr.msk.bf16.vlgmr.msra.gmra.mrb[0].mxu0 %vm90_vm4, %v449_v51  ;;  %1967 = vmatmul.mubr.msk.bf16.vlgmr.msra.gmra.mrb[0].mxu1 %vm90_vm4, %v1002_v52 }
 0x149   :  { %1863 = vmatpush3.bf16.msra.mxu0 %v2243_v50  ;;  %1971 = vmatpush3.bf16.msra.mxu1 %v2243_v50 }
 0x14a   :  { %1864 = vmatprep.subr.bf16.mxu0 %v2257_v1  ;;  %1972 = vmatprep.subr.bf16.mxu1 %v2257_v1 }
 0x14b   :  { %1870 = vmatprep.mubr.msk.bf16.mxu0 %vm2259_vm2, %v2257_v1  ;;  %1978 = vmatprep.mubr.msk.bf16.mxu1 %vm2259_vm2, %v2257_v1 }
 0x14d   :  { %1865 = vmatpush3.bf16.msra.mxu0 %v2244_v53  ;;  %1973 = vmatpush3.bf16.msra.mxu1 %v2244_v53 }
 0x14e   :  { %1866 = vmatprep.subr.bf16.mxu0 %v2257_v1  ;;  %1974 = vmatprep.subr.bf16.mxu1 %v2257_v1 }
 0x151   :  { %1867 = vmatpush3.bf16.msra.mxu0 %v2245_v54  ;;  %1975 = vmatpush3.bf16.msra.mxu1 %v2245_v54 }
 0x152   :  { %1868 = vmatprep.subr.bf16.mxu0 %v2257_v1  ;;  %1976 = vmatprep.subr.bf16.mxu1 %v2257_v1 }
 0x155   :  { %1869 = vmatpush3.bf16.msra.mxu0 %v2246_v55  ;;  %1977 = vmatpush3.bf16.msra.mxu1 %v2246_v55 }
 0x156   :  { %1874 = vmatprep.subr.bf16.mxu0 %v2257_v1  ;;  %1982 = vmatprep.subr.bf16.mxu1 %v2257_v1 }
 0x158   :  { %1871 = vmatmul.mubr.msk.bf16.vlgmr.msra.gmra.mrb[0].mxu0 %vm90_vm4, %v2338_v22  ;;  %1979 = vmatmul.mubr.msk.bf16.vlgmr.msra.gmra.mrb[0].mxu1 %vm90_vm4, %v2340_v23  ;;  %v1212_v22 = vld [vmem:[%s2648_s2 + $0x58] sm:$0xff] }
 0x159   :  { %1875 = vmatpush3.bf16.msra.mxu0 %v2247_v56  ;;  %1983 = vmatpush3.bf16.msra.mxu1 %v2247_v56  ;;  %v2106_v23 = vpack.c.bf16 %v1212_v22, %v1211_v21  ;;  %v1518_v21 = vlaneseq }
 0x15a   :  { %1876 = vmatprep.subr.bf16.mxu0 %v2257_v1  ;;  %1984 = vmatprep.subr.bf16.mxu1 %v2257_v1 }
 0x15b   :  { %1882 = vmatprep.mubr.msk.bf16.mxu0 %vm2259_vm2, %v2257_v1  ;;  %1990 = vmatprep.mubr.msk.bf16.mxu1 %vm2259_vm2, %v2257_v1  ;;  %v1519_v22 = vshrl.u32 %v1518_v21, 7 }
 0x15d   :  { %1877 = vmatpush3.bf16.msra.mxu0 %v2248_v57  ;;  %1985 = vmatpush3.bf16.msra.mxu1 %v2248_v57 }
 0x15e   :  { %1878 = vmatprep.subr.bf16.mxu0 %v2257_v1  ;;  %1986 = vmatprep.subr.bf16.mxu1 %v2257_v1 }
 0x161   :  { %1879 = vmatpush3.bf16.msra.mxu0 %v2249_v58  ;;  %1987 = vmatpush3.bf16.msra.mxu1 %v2249_v58 }
 0x162   :  { %1880 = vmatprep.subr.bf16.mxu0 %v2257_v1  ;;  %1988 = vmatprep.subr.bf16.mxu1 %v2257_v1 }
 0x165   :  { %1881 = vmatpush3.bf16.msra.mxu0 %v2250_v59  ;;  %1989 = vmatpush3.bf16.msra.mxu1 %v2250_v59 }
 0x166   :  { %1886 = vmatprep.subr.bf16.mxu0 %v2257_v1  ;;  %1994 = vmatprep.subr.bf16.mxu1 %v2257_v1 }
 0x168   :  { %1883 = vmatmul.mubr.msk.bf16.vlgmr.msra.gmra.mrb[0].mxu0 %vm90_vm4, %v608_v61  ;;  %1991 = vmatmul.mubr.msk.bf16.vlgmr.msra.gmra.mrb[0].mxu1 %vm90_vm4, %v1095_v62 }
 0x169   :  { %1887 = vmatpush3.bf16.msra.mxu0 %v2251_v60  ;;  %1995 = vmatpush3.bf16.msra.mxu1 %v2251_v60 }
 0x16a   :  { %1888 = vmatprep.subr.bf16.mxu0 %v2257_v1  ;;  %1996 = vmatprep.subr.bf16.mxu1 %v2257_v1 }
 0x16b   :  { %1894 = vmatprep.mubr.msk.bf16.mxu0 %vm2259_vm2, %v2257_v1  ;;  %2002 = vmatprep.mubr.msk.bf16.mxu1 %vm2259_vm2, %v2257_v1 }
 0x16d   :  { %1889 = vmatpush3.bf16.msra.mxu0 %v2252_v63  ;;  %1997 = vmatpush3.bf16.msra.mxu1 %v2252_v63 }
 0x16e   :  { %1890 = vmatprep.subr.bf16.mxu0 %v2257_v1  ;;  %1998 = vmatprep.subr.bf16.mxu1 %v2257_v1 }
 0x171   :  { %1891 = vmatpush3.bf16.msra.mxu0 %v2253_v0  ;;  %1999 = vmatpush3.bf16.msra.mxu1 %v2253_v0 }
 0x172   :  { %1892 = vmatprep.subr.bf16.mxu0 %v2257_v1  ;;  %2000 = vmatprep.subr.bf16.mxu1 %v2257_v1 }
 0x175   :  { %1893 = vmatpush3.bf16.msra.mxu0 %v2254_v2  ;;  %2001 = vmatpush3.bf16.msra.mxu1 %v2254_v2 }
 0x176   :  { %2090 = vmatprep.subr.bf16.mxu0 %v2262_v6  ;;  %2114 = vmatprep.subr.bf16.mxu1 %v2262_v6 }
 0x178   :  { %1895 = vmatmul.mubr.msk.bf16.vlgmr.msra.gmra.mrb[0].mxu0 %vm90_vm4, %v687_v9  ;;  %2003 = vmatmul.mubr.msk.bf16.vlgmr.msra.gmra.mrb[0].mxu1 %vm90_vm4, %v1141_v10 }
 0x179   :  { %2092 = vmatpush3.bf16.msra.mxu0 %v2091_v5  ;;  %2116 = vmatpush3.bf16.msra.mxu1 %v2091_v5  ;;  %v2139_v5 = vpack.c.bf16 %v1370_v4, %v1369_v3 }
 0x17a   :  { %2093 = vmatprep.subr.bf16.mxu0 %v2262_v6  ;;  %2117 = vmatprep.subr.bf16.mxu1 %v2262_v6 }
 0x17b   :  { %2038 = vmatprep.mubr.msk.f32.mxu0 %vm2259_vm2, %v2257_v1  ;;  %2073 = vmatprep.mubr.msk.f32.mxu1 %vm2259_vm2, %v2257_v1 }
 0x17d   :  { %2095 = vmatpush3.bf16.msra.mxu0 %v2094_v11  ;;  %2119 = vmatpush3.bf16.msra.mxu1 %v2094_v11 }
 0x17e   :  { %2096 = vmatprep.subr.bf16.mxu0 %v2262_v6  ;;  %2120 = vmatprep.subr.bf16.mxu1 %v2262_v6 }
 0x181   :  { %2098 = vmatpush3.bf16.msra.mxu0 %v2097_v14  ;;  %2122 = vmatpush3.bf16.msra.mxu1 %v2097_v14 }
 0x182   :  { %2099 = vmatprep.subr.bf16.mxu0 %v2262_v6  ;;  %2123 = vmatprep.subr.bf16.mxu1 %v2262_v6 }
 0x185   :  { %2101 = vmatpush3.bf16.msra.mxu0 %v2100_v17  ;;  %2125 = vmatpush3.bf16.msra.mxu1 %v2100_v17 }
 0x186   :  { %2102 = vmatprep.subr.bf16.mxu0 %v2262_v6  ;;  %2126 = vmatprep.subr.bf16.mxu1 %v2262_v6 }
 0x189   :  { %2104 = vmatpush3.bf16.msra.mxu0 %v2103_v20  ;;  %2128 = vmatpush3.bf16.msra.mxu1 %v2103_v20 }
 0x18a   :  { %2105 = vmatprep.subr.bf16.mxu0 %v2262_v6  ;;  %2129 = vmatprep.subr.bf16.mxu1 %v2262_v6 }
 0x18d   :  { %2107 = vmatpush3.bf16.msra.mxu0 %v2106_v23  ;;  %2131 = vmatpush3.bf16.msra.mxu1 %v2106_v23  ;;  %v1520_v23 = vsub.s32 0, %v1519_v22 }
 0x18e   :  { %2108 = vmatprep.subr.bf16.mxu0 %v2262_v6  ;;  %2132 = vmatprep.subr.bf16.mxu1 %v2262_v6 }
 0x191   :  { %2110 = vmatpush3.bf16.msra.mxu0 %v2109_v26  ;;  %2134 = vmatpush3.bf16.msra.mxu1 %v2109_v26 }
 0x192   :  { %2111 = vmatprep.subr.bf16.mxu0 %v2262_v6  ;;  %2135 = vmatprep.subr.bf16.mxu1 %v2262_v6 }
 0x195   :  { %2113 = vmatpush3.bf16.msra.mxu0 %v2112_v29  ;;  %2137 = vmatpush3.bf16.msra.mxu1 %v2112_v29 }
 0x196   :  { %2138 = vmatprep.subr.bf16.mxu0 %v2262_v6  ;;  %2141 = vmatprep.subr.bf16.mxu1 %v2262_v6 }
 0x24b   :  { %v2610_v30 = vpop.f32.mrb[0].mxu0  ;;  %v2612_v31 = vpop.f32.mrb[0].mxu1 }
 0x24c   :  { %v756_v32 = vrot.slane %v2610_v30, 4  ;;  %v763_v33 = vmul.f32 %v2610_v30, %v2610_v30  ;;  %v1186_v34 = vrot.slane %v2612_v31, 4  ;;  %v1193_v35 = vmul.f32 %v2612_v31, %v2612_v31  ;;  %v1896_v36 = vpop.f32.mrb[1].mxu0  ;;  %v2004_v37 = vpop.f32.mrb[1].mxu1 }
 0x24d   :  { %v752_v38 = vpop.f32.mrb[2].mxu0  ;;  %v1182_v39 = vpop.f32.mrb[2].mxu1 }
 0x24e   :  { %v757_v40 = vadd.f32 %v756_v32, %v2610_v30  ;;  %v764_v41 = vrot.slane %v763_v33, 4  ;;  %v1187_v42 = vadd.f32 %v1186_v34, %v2612_v31  ;;  %v1194_v43 = vrot.slane %v1193_v35, 4  ;;  %v1897_v44 = vpop.f32.mrb[3].mxu0  ;;  %v2005_v45 = vpop.f32.mrb[3].mxu1 }
 0x250   :  { %v758_v46 = vrot.slane %v757_v40, 2  ;;  %v765_v47 = vadd.f32 %v764_v41, %v763_v33  ;;  %v1188_v48 = vrot.slane %v1187_v42, 2  ;;  %v1195_v49 = vadd.f32 %v1194_v43, %v1193_v35 }
 0x252   :  { %v759_v50 = vadd.f32 %v758_v46, %v757_v40  ;;  %v766_v51 = vrot.slane %v765_v47, 2  ;;  %v1189_v52 = vadd.f32 %v1188_v48, %v1187_v42  ;;  %v1196_v53 = vrot.slane %v1195_v49, 2 }
 0x254   :  { %v760_v54 = vrot.slane %v759_v50, 1  ;;  %v767_v55 = vadd.f32 %v766_v51, %v765_v47  ;;  %v1190_v56 = vrot.slane %v1189_v52, 1  ;;  %v1197_v57 = vadd.f32 %v1196_v53, %v1195_v49 }
 0x256   :  { %v761_v58 = vadd.f32 %v760_v54, %v759_v50  ;;  %v1191_v59 = vadd.f32 %v1190_v56, %v1189_v52  ;;  %v768_v60 = vrot.slane %v767_v55, 1  ;;  %v1198_v61 = vrot.slane %v1197_v57, 1 }
 0x258   :  { %v1192_v62 = vadd.f32 %v1191_v59, %v761_v58  ;;  %v769_v63 = vadd.f32 %v768_v60, %v767_v55  ;;  %v1199_v0 = vadd.f32 %v1198_v61, %v1197_v57 }
 0x25a   :  { %2039 = vmatmul.mubr.f32.vlgmr.msra.gmra.mrb[4].mxu0 %v1192_v62  ;;  %v1200_v2 = vadd.f32 %v1199_v0, %v769_v63 }
 0x25b   :  { %2080 = vmatprep.mubr.msk.f32.mxu0 %vm2259_vm2, %v2257_v1  ;;  %2140 = vmatpush3.bf16.msra.mxu0 %v2139_v5 }
 0x25c   :  { %2074 = vmatmul.mubr.f32.vlgmr.msra.gmra.mrb[4].mxu1 %v1200_v2 }
 0x25d   :  { %2087 = vmatprep.mubr.msk.f32.mxu1 %vm2259_vm2, %v2257_v1  ;;  %2143 = vmatpush3.bf16.msra.mxu1 %v2139_v5 }
 0x32d   :  { %v1283_v6 = vpop.f32.mrb[4].mxu0 }
 0x32e   :  { %v1357_v7 = vmul.f32 0.0078125, %v1283_v6  ;;  %v2040_v8 = vpop.f32.mrb[5].mxu0 }
 0x32f   :  { %v1353_v9 = vpop.f32.mrb[4].mxu1 }
 0x330   :  { %v1359_v10 = vmul.f32 %v1357_v7, %v1357_v7  ;;  %v1358_v11 = vmul.f32 0.0078125, %v1353_v9  ;;  %v2075_v12 = vpop.f32.mrb[5].mxu1 }
 0x332   :  { %v1360_v13 = vsub.f32 %v1358_v11, %v1359_v10 }
 0x334   :  { %v1361_v1 = vmax.f32 %v1360_v13, 0.0 }
 0x336   :  { %v1363_v14 = vadd.f32 1e-05, %v1361_v1 }
 0x338   :  { %2255 = vrsqrt.f32 %v1363_v14 }
 0x342   :  { %v2256_v16 = vpop.eup %2255 }
 0x343   :  { %v1365_v17 = vmul.f32 %v2256_v16, %v1362_v15 }
 0x345   :  { %2081 = vmatmul.mubr.msk.f32.vlgmr.msra.gmra.mrb[6].mxu0 %vm1371_vm5, %v1365_v17  ;;  %v1367_v19 = vmul.f32 %v1365_v17, %v1357_v7 }
 0x347   :  { %v1368_v20 = vsub.f32 %v1366_v18, %v1367_v19 }
 0x349   :  { %2088 = vmatmul.mubr.msk.f32.vlgmr.msra.gmra.mrb[6].mxu1 %vm1371_vm5, %v1368_v20 }
 0x418   :  { %v1441_v24 = vpop.f32.mrb[6].mxu0 }
 0x419   :  { %v1521_v25 = vrot.slane %v1441_v24, %v1520_v23  ;;  %v2082_v26 = vpop.f32.mrb[7].mxu0 }
 0x41b   :  { %v1522_v27 = vmul.f32 %v1521_v25, %v2610_v30  ;;  %v1531_v28 = vmul.f32 %v1521_v25, %v2612_v31 }
 0x41c   :  { %v1514_v29 = vpop.f32.mrb[6].mxu1 }
 0x41d   :  { %v1526_v32 = vrot.slane %v1514_v29, %v1520_v23  ;;  %v2089_v33 = vpop.f32.mrb[7].mxu1 }
 0x41f   :  { %v1527_v34 = vadd.f32 %v1526_v32, %v1522_v27  ;;  %v1532_v35 = vadd.f32 %v1531_v28, %v1526_v32 }
 0x421   :  { %v1528_v36 = vmax.f32 %v1527_v34, 0.0  ;;  %v1533_v37 = vmax.f32 %v1532_v35, 0.0 }
 0x423   :  { %v1529_v38 = vpack.c.bf16 %v1528_v36, %v1528_v36  ;;  %v1534_v39 = vpack.c.bf16 %v1533_v37, %v1533_v37 }
 0x425   :  { %1530 = vst [vmem:[%s2652_s6] sm:$0xf] %v1529_v38  ;;  %1535 = vst [vmem:[%s2652_s6 + $0x4] sm:$0xf] %v1534_v39 }

// kernel: classifier_forward.10
= control target key start
LH: loop header
LB: loop body
LE: loop exit
PB: predicated region body
PF: predicated region fallthrough
CT: control target
= control target key end

     0   :  { %vm25_vm0 = vcmask 261120   ;;  %vm30_vm1 = vcmask 257024   ;;  %v2983_v1 = vmov 0.0   ;;  %vm54_vm2 = vcmask 1047683   ;;  %s2986_s15 = smov 112   ;;  %s2987_s16 = smov 96   ;;  %s3581_s0 = inlined_call_operand.vmem [shape: bf16[16,128], index: 0, kind: input, shape index: {}]   ;;  %s3582_s1 = inlined_call_operand.vmem [shape: bf16[9,128,128], index: 1, kind: input, shape index: {}]   ;;  %s3583_s2 = inlined_call_operand.vmem [shape: f32[128,16], index: 2, kind: input, shape index: {}]   ;;  %s3584_s3 = inlined_call_operand.vmem [shape: f32[16,128], index: 3, kind: input, shape index: {}]   ;;  %s3585_s4 = inlined_call_operand.vmem [shape: f32[1,16], index: 4, kind: input, shape index: {}]   ;;  %s3586_s5 = inlined_call_operand.vmem [shape: f32[1,16], index: 5, kind: input, shape index: {}]   ;;  %s3587_s6 = inlined_call_operand.vmem [shape: bf16[16,128], index: 6, kind: output, shape index: {}]  }
   0x1   :  { %v47_v0 = vld [vmem:[%s3581_s0] sm:$0xff]   ;;  %27 = vst [vmem:[#allocation2 + $0x10] sm:$0xff] %v2983_v1  ;;  %28 = vst.msk [vmem:[#allocation2 + $0x18] sm:$0xff] %vm25_vm0, %v2983_v1  ;;  %2341 = vmatprep.subr.bf16.mxu0 %v2983_v1  ;;  %2521 = vmatprep.subr.bf16.mxu1 %v2983_v1  ;;  %s2984_s0 = smov 16   ;;  %v2910_v7 = vld [vmem:[%s3582_s1 + $0x48] sm:$0xff]   ;;  %vm56_vm3 = vcmask 130051  }
   0x2   :  { %29 = vst [vmem:[#allocation2 + $0x20] sm:$0xf] %v2983_v1  ;;  %31 = vst.msk [vmem:[#allocation2 + $0x28] sm:$0xf] %vm30_vm1, %v2983_v1  ;;  %v48_v2 = vunpack.c.h.bf16 %v47_v0  ;;  %v33_v3 = vunpack.c.l.bf16 %v47_v0  ;;  %v2909_v6 = vld [vmem:[%s3582_s1 + $0x40] sm:$0xff]   ;;  %v2911_v8 = vld [vmem:[%s3582_s1 + $0x50] sm:$0xff]  }
   0x3   :  { %24 = vst [vmem:[#allocation2] sm:$0xff] %v2983_v1  ;;  %26 = vst.msk [vmem:[#allocation2 + $0x8] sm:$0xff] %vm25_vm0, %v2983_v1  ;;  %2342 = vmatpush3.bf16.msra.mxu0 %v2909_v6  ;;  %2522 = vmatpush3.bf16.msra.mxu1 %v2909_v6  ;;  %v2912_v9 = vld [vmem:[%s3582_s1 + $0x58] sm:$0xff]   ;;  %v2913_v10 = vld [vmem:[%s3582_s1 + $0x60] sm:$0xff]   ;;  %vm58_vm4 = vcmask 1042560   ;;  %vm60_vm5 = vcmask 124928  }
   0x4   :  { %v50_v4 = vrot.slane %v48_v2, 5  ;;  %v35_v5 = vrot.slane %v33_v3, 7  ;;  %2343 = vmatprep.subr.bf16.mxu0 %v2983_v1  ;;  %2523 = vmatprep.subr.bf16.mxu1 %v2983_v1  ;;  %v2914_v11 = vld [vmem:[%s3582_s1 + $0x68] sm:$0xff]   ;;  %v2915_v12 = vld [vmem:[%s3582_s1 + $0x70] sm:$0xff]   ;;  %v2916_v14 = vld [vmem:[%s3582_s1 + $0x78] sm:$0xff]   ;;  %vm39_vm6 = vcmask 1047681  }
   0x5   :  { %vm41_vm7 = vcmask 130049   ;;  %vm43_vm8 = vcmask 1040512   ;;  %vm45_vm9 = vcmask 122880   ;;  %vm2985_vm10 = vmmov 0  }
   0x6   :  { %51 = vrot.lane.b32.xlu0 %v50_v4, %s2984_s0  ;;  %2357 = vmatprep.mubr.msk.bf16.mxu0 %vm2985_vm10, %v2983_v1  ;;  %vm105_vm11 = vcmask 916480   ;;  %vm305_vm12 = vcmask 785408   ;;  %vm1768_vm13 = vcmask 130048  }
   0x7   :  { %2344 = vmatpush3.bf16.msra.mxu0 %v2910_v7  ;;  %2524 = vmatpush3.bf16.msra.mxu1 %v2910_v7 }
   0x8   :  { %2345 = vmatprep.subr.bf16.mxu0 %v2983_v1  ;;  %2525 = vmatprep.subr.bf16.mxu1 %v2983_v1 }
   0x9   :  { %2537 = vmatprep.mubr.msk.bf16.mxu1 %vm2985_vm10, %v2983_v1 }
   0xa   :  { %36 = vrot.lane.b32.xlu0 %v35_v5, %s2984_s0 }
   0xb   :  { %2346 = vmatpush3.bf16.msra.mxu0 %v2911_v8  ;;  %2526 = vmatpush3.bf16.msra.mxu1 %v2911_v8 }
   0xc   :  { %2347 = vmatprep.subr.bf16.mxu0 %v2983_v1  ;;  %2527 = vmatprep.subr.bf16.mxu1 %v2983_v1 }
   0xf   :  { %2348 = vmatpush3.bf16.msra.mxu0 %v2912_v9  ;;  %2528 = vmatpush3.bf16.msra.mxu1 %v2912_v9 }
  0x10   :  { %2349 = vmatprep.subr.bf16.mxu0 %v2983_v1  ;;  %2529 = vmatprep.subr.bf16.mxu1 %v2983_v1 }
  0x13   :  { %2350 = vmatpush3.bf16.msra.mxu0 %v2913_v10  ;;  %2530 = vmatpush3.bf16.msra.mxu1 %v2913_v10 }
  0x14   :  { %2351 = vmatprep.subr.bf16.mxu0 %v2983_v1  ;;  %2531 = vmatprep.subr.bf16.mxu1 %v2983_v1 }
  0x17   :  { %2352 = vmatpush3.bf16.msra.mxu0 %v2914_v11  ;;  %2532 = vmatpush3.bf16.msra.mxu1 %v2914_v11 }
  0x18   :  { %2353 = vmatprep.subr.bf16.mxu0 %v2983_v1  ;;  %2533 = vmatprep.subr.bf16.mxu1 %v2983_v1 }
  0x1b   :  { %2354 = vmatpush3.bf16.msra.mxu0 %v2915_v12  ;;  %2534 = vmatpush3.bf16.msra.mxu1 %v2915_v12  ;;  %v2917_v12 = vld [vmem:[%s3582_s1] sm:$0xff]  }
  0x1c   :  { %2355 = vmatprep.subr.bf16.mxu0 %v2983_v1  ;;  %2535 = vmatprep.subr.bf16.mxu1 %v2983_v1 }
  0x1f   :  { %2356 = vmatpush3.bf16.msra.mxu0 %v2916_v14  ;;  %2536 = vmatpush3.bf16.msra.mxu1 %v2916_v14 }
  0x20   :  { %2361 = vmatprep.subr.bf16.mxu0 %v2983_v1  ;;  %2541 = vmatprep.subr.bf16.mxu1 %v2983_v1 }
  0x78   :  { %v52_v13 = vpop.permute.xlu0 %51 }
  0x79   :  { %55 = vst.msk [vmem:[#allocation2 + $0x10] sm:$0xf8] %vm54_vm2, %v52_v13 }
  0x7a   :  { %57 = vst.msk [vmem:[#allocation2 + $0x18] sm:$0xf8] %vm56_vm3, %v52_v13 }
  0x7b   :  { %59 = vst.msk [vmem:[#allocation2 + $0x20] sm:$0x7] %vm58_vm4, %v52_v13 }
  0x7c   :  { %61 = vst.msk [vmem:[#allocation2 + $0x28] sm:$0x7] %vm60_vm5, %v52_v13  ;;  %v37_v15 = vpop.permute.xlu0 %36 }
  0x7d   :  { %40 = vst.msk [vmem:[#allocation2] sm:$0xfe] %vm39_vm6, %v37_v15 }
  0x7e   :  { %42 = vst.msk [vmem:[#allocation2 + $0x8] sm:$0xfe] %vm41_vm7, %v37_v15 }
  0x7f   :  { %44 = vst.msk [vmem:[#allocation2 + $0x10] sm:$0x1] %vm43_vm8, %v37_v15 }
  0x80   :  { %46 = vst.msk [vmem:[#allocation2 + $0x18] sm:$0x1] %vm45_vm9, %v37_v15  ;;  %v1119_v16 = vld [vmem:[#allocation2 + $0x10] sm:$0xfc]  ;;  %v2918_v15 = vld [vmem:[%s3582_s1 + $0x8] sm:$0xff]  }
  0x81   :  { %v1316_v20 = vld [vmem:[#allocation2 + $0x10] sm:$0xf8]  ;;  %v1122_v27 = vld [vmem:[#allocation2 + $0x18] sm:$0xfc] }
  0x82   :  { %v1120_v17 = vld [vmem:[#allocation2 + $0x20] sm:$0x3]  ;;  %v1317_v42 = vld [vmem:[#allocation2 + $0x18] sm:$0xf8]  ;;  %v1479_v60 = vld [vmem:[#allocation2 + $0x10] sm:$0xf0] }
  0x83   :  { %v1121_v18 = vpack.c.bf16 %v1120_v17, %v1119_v16  ;;  %v1318_v23 = vld [vmem:[#allocation2 + $0x20] sm:$0x7]  ;;  %v1123_v28 = vld [vmem:[#allocation2 + $0x28] sm:$0x3]  ;;  %v1480_v6 = vld [vmem:[#allocation2 + $0x18] sm:$0xf0] }
  0x84   :  { %v62_v21 = vld [vmem:[#allocation2] sm:$0xff]  ;;  %v1320_v30 = vpack.c.bf16 %v1318_v23, %v1316_v20  ;;  %v1124_v33 = vpack.c.bf16 %v1123_v28, %v1122_v27  ;;  %v1319_v43 = vld [vmem:[#allocation2 + $0x28] sm:$0x7]  ;;  %v2919_v20 = vld [vmem:[%s3582_s1 + $0x10] sm:$0xff]  }
  0x85   :  { %v3079_v19 = vrot.slane %v1121_v18, 1  ;;  %v514_v22 = vld [vmem:[#allocation2] sm:$0xfe]  ;;  %v3083_v24 = vpack.c.bf16 %v62_v21, %v62_v21  ;;  %v80_v26 = vld [vmem:[#allocation2 + $0x8] sm:$0xff]  ;;  %v1321_v48 = vpack.c.bf16 %v1319_v43, %v1317_v42  ;;  %v2920_v21 = vld [vmem:[%s3582_s1 + $0x18] sm:$0xff]  }
  0x86   :  { %v516_v25 = vld [vmem:[#allocation2 + $0x10] sm:$0x1]  ;;  %v81_v32 = vpack.c.bf16 %v80_v26, %v80_v26  ;;  %v515_v34 = vld [vmem:[#allocation2 + $0x8] sm:$0xfe]  ;;  %v1323_v37 = vshrl.u32 %v1320_v30, 16  ;;  %v1326_v38 = vshll.u32 %v1320_v30, 16 }
  0x87   :  { %1129 = vrot.lane.b32.xlu0 %v3079_v19, %s2986_s15  ;;  %v518_v29 = vpack.c.bf16 %v516_v25, %v514_v22  ;;  %101 = vrot.lane.b32.xlu1 %v3083_v24, %s2986_s15  ;;  %v517_v35 = vld [vmem:[#allocation2 + $0x18] sm:$0x1]  ;;  %v1128_v39 = vrot.slane %v1124_v33, 1  ;;  %v1331_v51 = vshrl.u32 %v1321_v48, 16  ;;  %v1334_v52 = vshll.u32 %v1321_v48, 16  ;;  %v2921_v22 = vld [vmem:[%s3582_s1 + $0x20] sm:$0xff]  }
  0x88   :  { %v519_v41 = vpack.c.bf16 %v517_v35, %v515_v34  ;;  %v1325_v45 = vrot.slane %v1323_v37, 1  ;;  %v1328_v46 = vrot.slane %v1326_v38, 2  ;;  %v870_v54 = vld [vmem:[#allocation2] sm:$0xfc]  ;;  %v872_v55 = vld [vmem:[#allocation2 + $0x10] sm:$0x3] }
  0x89   :  { %v540_v31 = vshll.u32 %v518_v29, 16  ;;  %v538_v40 = vshrl.u32 %v518_v29, 16  ;;  %v1333_v57 = vrot.slane %v1331_v51, 1  ;;  %v1336_v58 = vrot.slane %v1334_v52, 2  ;;  %v1481_v61 = vld [vmem:[#allocation2 + $0x20] sm:$0xf] }
  0x8a   :  { %v547_v47 = vshll.u32 %v519_v41, 16  ;;  %v1329_v49 = vor.u32 %v1328_v46, %v1325_v45  ;;  %v545_v53 = vshrl.u32 %v519_v41, 16  ;;  %v874_v59 = vpack.c.bf16 %v872_v55, %v870_v54  ;;  %v871_v2 = vld [vmem:[#allocation2 + $0x8] sm:$0xfc]  ;;  %v873_v3 = vld [vmem:[#allocation2 + $0x18] sm:$0x3] }
  0x8b   :  { %301 = vrot.lane.b32.xlu0 %v3083_v24, %s2987_s16  ;;  %103 = vrot.lane.b32.xlu1 %v81_v32, %s2986_s15  ;;  %v542_v36 = vrot.slane %v540_v31, 1  ;;  %v1337_v62 = vor.u32 %v1336_v58, %v1333_v57  ;;  %v1483_v0 = vpack.c.bf16 %v1481_v61, %v1479_v60  ;;  %v875_v5 = vpack.c.bf16 %v873_v3, %v871_v2  ;;  %v1482_v7 = vld [vmem:[#allocation2 + $0x28] sm:$0xf]  ;;  %v2923_v25 = vld [vmem:[%s3582_s1 + $0x30] sm:$0xff]   ;;  %v2924_v26 = vld [vmem:[%s3582_s1 + $0x38] sm:$0xff]  }
  0x8c   :  { %v549_v50 = vrot.slane %v547_v47, 1  ;;  %v895_v63 = vrot.slane %v874_v59, 1  ;;  %v1484_v9 = vpack.c.bf16 %v1482_v7, %v1480_v6  ;;  %v2922_v23 = vld [vmem:[%s3582_s1 + $0x28] sm:$0xff]   ;;  %v2925_v27 = vld [vmem:[%s3582_s1 + $0x80] sm:$0xff]   ;;  %v2928_v29 = vld [vmem:[%s3582_s1 + $0x98] sm:$0xff]  }
  0x8d   :  { %v543_v44 = vor.u32 %v542_v36, %v538_v40  ;;  %v1487_v4 = vrot.slane %v1483_v0, 2  ;;  %v896_v8 = vrot.slane %v875_v5, 1  ;;  %v2926_v28 = vld [vmem:[%s3582_s1 + $0x88] sm:$0xff]   ;;  %v2931_v31 = vld [vmem:[%s3582_s1 + $0xb0] sm:$0xff]   ;;  %v2933_v35 = vld [vmem:[%s3582_s1 + $0xc0] sm:$0xff]  }
  0x8e   :  { %v550_v56 = vor.u32 %v549_v50, %v545_v53  ;;  %v1488_v10 = vrot.slane %v1484_v9, 2  ;;  %v2930_v30 = vld [vmem:[%s3582_s1 + $0xa8] sm:$0xff]   ;;  %v2935_v41 = vld [vmem:[%s3582_s1 + $0xd0] sm:$0xff]   ;;  %v2936_v42 = vld [vmem:[%s3582_s1 + $0xd8] sm:$0xff]  }
  0x8f   :  { %1216 = vrot.lane.b32.xlu0 %v3079_v19, %s2987_s16  ;;  %1131 = vrot.lane.b32.xlu1 %v1128_v39, %s2986_s15  ;;  %v2934_v38 = vld [vmem:[%s3582_s1 + $0xc8] sm:$0xff]   ;;  %v2937_v43 = vld [vmem:[%s3582_s1 + $0xe0] sm:$0xff]   ;;  %v398_v45 = vld [vmem:[#allocation2 + $0x10] sm:$0x1] }
  0x90   :  { %v2938_v46 = vld [vmem:[%s3582_s1 + $0xe8] sm:$0xff]   ;;  %v1263_v48 = vld [vmem:[#allocation2 + $0x10] sm:$0xf8]  ;;  %v2940_v53 = vld [vmem:[%s3582_s1 + $0xf8] sm:$0xff]  }
  0x91   :  { %v2939_v50 = vld [vmem:[%s3582_s1 + $0xf0] sm:$0xff]   ;;  %v2941_v58 = vld [vmem:[%s3582_s1 + $0x100] sm:$0xff]   ;;  %v2944_v2 = vld [vmem:[%s3582_s1 + $0x118] sm:$0xff]  }
  0x92   :  { %v2943_v0 = vld [vmem:[%s3582_s1 + $0x110] sm:$0xff]   ;;  %v2945_v3 = vld [vmem:[%s3582_s1 + $0x120] sm:$0xff]   ;;  %v2948_v6 = vld [vmem:[%s3582_s1 + $0x138] sm:$0xff]  }
  0x93   :  { %551 = vrot.lane.b32.xlu0 %v543_v44, %s2986_s15  ;;  %303 = vrot.lane.b32.xlu1 %v81_v32, %s2987_s16  ;;  %v2932_v32 = vld [vmem:[%s3582_s1 + $0xb8] sm:$0xff]   ;;  %v2947_v5 = vld [vmem:[%s3582_s1 + $0x130] sm:$0xff]  }
  0x94   :  { %v2949_v9 = vld [vmem:[%s3582_s1 + $0x140] sm:$0xff]  }
  0x97   :  { %1338 = vrot.lane.b32.xlu0 %v1329_v49, %s2986_s15  ;;  %1218 = vrot.lane.b32.xlu1 %v1128_v39, %s2987_s16 }
  0x9b   :  { %663 = vrot.lane.b32.xlu0 %v543_v44, %s2987_s16  ;;  %553 = vrot.lane.b32.xlu1 %v550_v56, %s2986_s15  ;;  %v397_v44 = vld [vmem:[#allocation2] sm:$0xfe] }
  0x9c   :  { %v399_v47 = vpack.c.bf16 %v398_v45, %v397_v44  ;;  %v2967_v45 = vld [vmem:[%s3582_s1 + $0x1d0] sm:$0xff]  }
  0x9e   :  { %v420_v51 = vshll.u32 %v399_v47, 16  ;;  %v418_v57 = vshrl.u32 %v399_v47, 16  ;;  %v2969_v47 = vld [vmem:[%s3582_s1 + $0x1e0] sm:$0xff]  }
  0x9f   :  { %1385 = vrot.lane.b32.xlu0 %v1329_v49, %s2987_s16  ;;  %1340 = vrot.lane.b32.xlu1 %v1337_v62, %s2986_s15  ;;  %v1264_v49 = vld [vmem:[#allocation2 + $0x20] sm:$0x7] }
  0xa0   :  { %v1265_v52 = vpack.c.bf16 %v1264_v49, %v1263_v48  ;;  %v422_v54 = vrot.slane %v420_v51, 1  ;;  %v2970_v48 = vld [vmem:[%s3582_s1 + $0x1e8] sm:$0xff]   ;;  %v2971_v49 = vld [vmem:[%s3582_s1 + $0x1f0] sm:$0xff]  }
  0xa2   :  { %v1267_v55 = vshrl.u32 %v1265_v52, 16  ;;  %v423_v59 = vor.u32 %v422_v54, %v418_v57 }
  0xa3   :  { %897 = vrot.lane.b32.xlu0 %v895_v63, %s2986_s15  ;;  %665 = vrot.lane.b32.xlu1 %v550_v56, %s2987_s16  ;;  %v1270_v56 = vshll.u32 %v1265_v52, 16 }
  0xa4   :  { %v1269_v60 = vrot.slane %v1267_v55, 1 }
  0xa5   :  { %v1272_v61 = vrot.slane %v1270_v56, 2  ;;  %v2974_v56 = vld [vmem:[%s3582_s1 + $0x208] sm:$0xff]  }
  0xa7   :  { %1489 = vrot.lane.b32.xlu0 %v1487_v4, %s2986_s15  ;;  %1387 = vrot.lane.b32.xlu1 %v1337_v62, %s2987_s16  ;;  %v2942_v62 = vld [vmem:[%s3582_s1 + $0x108] sm:$0xff]  }
  0xab   :  { %1009 = vrot.lane.b32.xlu0 %v895_v63, %s2987_s16  ;;  %899 = vrot.lane.b32.xlu1 %v896_v8, %s2986_s15  ;;  %v1273_v63 = vor.u32 %v1272_v61, %v1269_v60  ;;  %v2976_v60 = vld [vmem:[%s3582_s1 + $0x218] sm:$0xff]   ;;  %v2977_v61 = vld [vmem:[%s3582_s1 + $0x220] sm:$0xff]  }
  0xaf   :  { %1536 = vrot.lane.b32.xlu0 %v1487_v4, %s2987_s16  ;;  %1491 = vrot.lane.b32.xlu1 %v1488_v10, %s2986_s15  ;;  %v2946_v4 = vld [vmem:[%s3582_s1 + $0x128] sm:$0xff]  }
  0xb3   :  { %1011 = vrot.lane.b32.xlu1 %v896_v8, %s2987_s16 }
  0xb7   :  { %1538 = vrot.lane.b32.xlu1 %v1488_v10, %s2987_s16 }
  0xf9   :  { %v102_v11 = vpop.permute.xlu1 %101  ;;  %v1130_v16 = vpop.permute.xlu0 %1129 }
  0xfd   :  { %v104_v13 = vpop.permute.xlu1 %103  ;;  %v302_v34 = vpop.permute.xlu0 %301 }
  0xfe   :  { %v106_v14 = vsel %vm105_vm11, %v102_v11, %v104_v13 }
  0xff   :  { %2358 = vmatmul.mubr.bf16.vlgmr.msra.gmra.mrb[0].mxu0 %v106_v14 }
 0x100   :  { %2362 = vmatpush3.bf16.msra.mxu0 %v2917_v12  ;;  %2377 = vmatprep.mubr.msk.bf16.mxu0 %vm2985_vm10, %v2983_v1 }
 0x101   :  { %v1132_v17 = vpop.permute.xlu1 %1131  ;;  %2363 = vmatprep.subr.bf16.mxu0 %v2983_v1  ;;  %v1217_v39 = vpop.permute.xlu0 %1216 }
 0x102   :  { %v1133_v18 = vsel %vm105_vm11, %v1130_v16, %v1132_v17  ;;  %v2952_v16 = vld [vmem:[%s3582_s1 + $0x158] sm:$0xff]   ;;  %v2953_v17 = vld [vmem:[%s3582_s1 + $0x160] sm:$0xff]  }
 0x103   :  { %2538 = vmatmul.mubr.bf16.vlgmr.msra.gmra.mrb[0].mxu1 %v1133_v18  ;;  %v2954_v18 = vld [vmem:[%s3582_s1 + $0x168] sm:$0xff]  }
 0x104   :  { %2364 = vmatpush3.bf16.msra.mxu0 %v2918_v15  ;;  %2542 = vmatpush3.bf16.msra.mxu1 %v2917_v12  ;;  %v2950_v12 = vld [vmem:[%s3582_s1 + $0x148] sm:$0xff]  }
 0x105   :  { %2365 = vmatprep.subr.bf16.mxu0 %v2983_v1  ;;  %2543 = vmatprep.subr.bf16.mxu1 %v2983_v1  ;;  %v304_v33 = vpop.permute.xlu1 %303  ;;  %v552_v8 = vpop.permute.xlu0 %551 }
 0x106   :  { %2557 = vmatprep.mubr.msk.bf16.mxu1 %vm2985_vm10, %v2983_v1  ;;  %v306_v36 = vsel %vm305_vm12, %v302_v34, %v304_v33  ;;  %v2963_v33 = vld [vmem:[%s3582_s1 + $0x1b0] sm:$0xff]   ;;  %v758_v34 = vld [vmem:[#allocation2] sm:$0xfc] }
 0x108   :  { %2366 = vmatpush3.bf16.msra.mxu0 %v2919_v20  ;;  %2544 = vmatpush3.bf16.msra.mxu1 %v2918_v15  ;;  %v2951_v15 = vld [vmem:[%s3582_s1 + $0x150] sm:$0xff]  }
 0x109   :  { %2367 = vmatprep.subr.bf16.mxu0 %v2983_v1  ;;  %2545 = vmatprep.subr.bf16.mxu1 %v2983_v1  ;;  %v1219_v37 = vpop.permute.xlu1 %1218  ;;  %v1339_v13 = vpop.permute.xlu0 %1338 }
 0x10a   :  { %v1220_v40 = vsel %vm305_vm12, %v1217_v39, %v1219_v37  ;;  %v1433_v39 = vld [vmem:[#allocation2 + $0x20] sm:$0xf] }
 0x10c   :  { %2368 = vmatpush3.bf16.msra.mxu0 %v2920_v21  ;;  %2546 = vmatpush3.bf16.msra.mxu1 %v2919_v20  ;;  %v2955_v20 = vld [vmem:[%s3582_s1 + $0x170] sm:$0xff]  }
 0x10d   :  { %2369 = vmatprep.subr.bf16.mxu0 %v2983_v1  ;;  %2547 = vmatprep.subr.bf16.mxu1 %v2983_v1  ;;  %v554_v7 = vpop.permute.xlu1 %553 }
 0x10e   :  { %v555_v10 = vsel %vm105_vm11, %v552_v8, %v554_v7  ;;  %v2988_v7 = vmov 0.0|0.0   ;;  %v1600_v8 = vld [vmem:[%s3583_s2 + $0x10] sm:$0xff] }
 0x110   :  { %2370 = vmatpush3.bf16.msra.mxu0 %v2921_v22  ;;  %2548 = vmatpush3.bf16.msra.mxu1 %v2920_v21  ;;  %v2956_v21 = vld [vmem:[%s3582_s1 + $0x178] sm:$0xff]  }
 0x111   :  { %2371 = vmatprep.subr.bf16.mxu0 %v2983_v1  ;;  %2549 = vmatprep.subr.bf16.mxu1 %v2983_v1  ;;  %v1341_v11 = vpop.permute.xlu1 %1340 }
 0x112   :  { %v1342_v14 = vsel %vm105_vm11, %v1339_v13, %v1341_v11 }
 0x114   :  { %2372 = vmatpush3.bf16.msra.mxu0 %v2922_v23  ;;  %2550 = vmatpush3.bf16.msra.mxu1 %v2921_v22 }
 0x115   :  { %2373 = vmatprep.subr.bf16.mxu0 %v2983_v1  ;;  %2551 = vmatprep.subr.bf16.mxu1 %v2983_v1  ;;  %v666_v22 = vpop.permute.xlu1 %665 }
 0x118   :  { %2374 = vmatpush3.bf16.msra.mxu0 %v2923_v25  ;;  %2552 = vmatpush3.bf16.msra.mxu1 %v2922_v23  ;;  %v664_v23 = vpop.permute.xlu0 %663 }
 0x119   :  { %2375 = vmatprep.subr.bf16.mxu0 %v2983_v1  ;;  %2553 = vmatprep.subr.bf16.mxu1 %v2983_v1 }
 0x11c   :  { %2376 = vmatpush3.bf16.msra.mxu0 %v2924_v26  ;;  %2554 = vmatpush3.bf16.msra.mxu1 %v2923_v25  ;;  %v2957_v25 = vld [vmem:[%s3582_s1 + $0x180] sm:$0xff]  }
 0x11d   :  { %2381 = vmatprep.subr.bf16.mxu0 %v2983_v1  ;;  %2555 = vmatprep.subr.bf16.mxu1 %v2983_v1 }
 0x11f   :  { %2378 = vmatmul.mubr.bf16.vlgmr.msra.gmra.mrb[0].mxu0 %v3083_v24  ;;  %v2927_v24 = vld [vmem:[%s3582_s1 + $0x90] sm:$0xff]  }
 0x120   :  { %2382 = vmatpush3.bf16.msra.mxu0 %v2925_v27  ;;  %2556 = vmatpush3.bf16.msra.mxu1 %v2924_v26  ;;  %v667_v26 = vsel %vm305_vm12, %v664_v23, %v666_v22  ;;  %v1606_v22 = vld [vmem:[%s3583_s2 + $0x40] sm:$0xff]  ;;  %v1607_v23 = vld [vmem:[%s3583_s2 + $0x48] sm:$0xff] }
 0x121   :  { %2383 = vmatprep.subr.bf16.mxu0 %v2983_v1  ;;  %2561 = vmatprep.subr.bf16.mxu1 %v2983_v1 }
 0x122   :  { %2397 = vmatprep.mubr.msk.bf16.mxu0 %vm2985_vm10, %v2983_v1 }
 0x123   :  { %2558 = vmatmul.mubr.bf16.vlgmr.msra.gmra.mrb[0].mxu1 %v3079_v19  ;;  %v2929_v19 = vld [vmem:[%s3582_s1 + $0xa0] sm:$0xff]  }
 0x124   :  { %2384 = vmatpush3.bf16.msra.mxu0 %v2926_v28  ;;  %2562 = vmatpush3.bf16.msra.mxu1 %v2925_v27  ;;  %v1388_v27 = vpop.permute.xlu1 %1387 }
 0x125   :  { %2385 = vmatprep.subr.bf16.mxu0 %v2983_v1  ;;  %2563 = vmatprep.subr.bf16.mxu1 %v2983_v1 }
 0x126   :  { %2577 = vmatprep.mubr.msk.bf16.mxu1 %vm2985_vm10, %v2983_v1 }
 0x128   :  { %2386 = vmatpush3.bf16.msra.mxu0 %v2927_v24  ;;  %2564 = vmatpush3.bf16.msra.mxu1 %v2926_v28  ;;  %v2958_v28 = vld [vmem:[%s3582_s1 + $0x188] sm:$0xff]   ;;  %v900_v51 = vpop.permute.xlu1 %899 }
 0x129   :  { %2387 = vmatprep.subr.bf16.mxu0 %v2983_v1  ;;  %2565 = vmatprep.subr.bf16.mxu1 %v2983_v1 }
 0x12c   :  { %2388 = vmatpush3.bf16.msra.mxu0 %v2928_v29  ;;  %2566 = vmatpush3.bf16.msra.mxu1 %v2927_v24  ;;  %v1386_v24 = vpop.permute.xlu0 %1385  ;;  %v1492_v55 = vpop.permute.xlu1 %1491 }
 0x12d   :  { %2389 = vmatprep.subr.bf16.mxu0 %v2983_v1  ;;  %2567 = vmatprep.subr.bf16.mxu1 %v2983_v1 }
 0x130   :  { %2390 = vmatpush3.bf16.msra.mxu0 %v2929_v19  ;;  %2568 = vmatpush3.bf16.msra.mxu1 %v2928_v29  ;;  %v1389_v29 = vsel %vm305_vm12, %v1386_v24, %v1388_v27  ;;  %v898_v52 = vpop.permute.xlu0 %897  ;;  %v1609_v27 = vld [vmem:[%s3583_s2 + $0x58] sm:$0xff]  ;;  %v1610_v24 = vld [vmem:[%s3583_s2 + $0x60] sm:$0xff] }
 0x131   :  { %2391 = vmatprep.subr.bf16.mxu0 %v2983_v1  ;;  %2569 = vmatprep.subr.bf16.mxu1 %v2983_v1  ;;  %v901_v54 = vsel %vm105_vm11, %v898_v52, %v900_v51 }
 0x134   :  { %2392 = vmatpush3.bf16.msra.mxu0 %v2930_v30  ;;  %2570 = vmatpush3.bf16.msra.mxu1 %v2929_v19  ;;  %v2959_v19 = vld [vmem:[%s3582_s1 + $0x190] sm:$0xff]   ;;  %v1490_v57 = vpop.permute.xlu0 %1489 }
 0x135   :  { %2393 = vmatprep.subr.bf16.mxu0 %v2983_v1  ;;  %2571 = vmatprep.subr.bf16.mxu1 %v2983_v1 }
 0x138   :  { %2394 = vmatpush3.bf16.msra.mxu0 %v2931_v31  ;;  %2572 = vmatpush3.bf16.msra.mxu1 %v2930_v30  ;;  %v2960_v30 = vld [vmem:[%s3582_s1 + $0x198] sm:$0xff]  }
 0x139   :  { %2395 = vmatprep.subr.bf16.mxu0 %v2983_v1  ;;  %2573 = vmatprep.subr.bf16.mxu1 %v2983_v1 }
 0x13c   :  { %2396 = vmatpush3.bf16.msra.mxu0 %v2932_v32  ;;  %2574 = vmatpush3.bf16.msra.mxu1 %v2931_v31  ;;  %v2961_v31 = vld [vmem:[%s3582_s1 + $0x1a0] sm:$0xff]  }
 0x13d   :  { %2401 = vmatprep.subr.bf16.mxu0 %v2983_v1  ;;  %2575 = vmatprep.subr.bf16.mxu1 %v2983_v1 }
 0x13f   :  { %2398 = vmatmul.mubr.bf16.vlgmr.msra.gmra.mrb[0].mxu0 %v306_v36  ;;  %v2964_v36 = vld [vmem:[%s3582_s1 + $0x1b8] sm:$0xff]  }
 0x140   :  { %2402 = vmatpush3.bf16.msra.mxu0 %v2933_v35  ;;  %2576 = vmatpush3.bf16.msra.mxu1 %v2932_v32  ;;  %v2962_v32 = vld [vmem:[%s3582_s1 + $0x1a8] sm:$0xff]  }
 0x141   :  { %2403 = vmatprep.subr.bf16.mxu0 %v2983_v1  ;;  %2581 = vmatprep.subr.bf16.mxu1 %v2983_v1 }
 0x142   :  { %2417 = vmatprep.mubr.msk.bf16.mxu0 %vm2985_vm10, %v2983_v1 }
 0x143   :  { %2578 = vmatmul.mubr.bf16.vlgmr.msra.gmra.mrb[0].mxu1 %v1220_v40  ;;  %v2965_v40 = vld [vmem:[%s3582_s1 + $0x1c0] sm:$0xff]  }
 0x144   :  { %2404 = vmatpush3.bf16.msra.mxu0 %v2934_v38  ;;  %2582 = vmatpush3.bf16.msra.mxu1 %v2933_v35  ;;  %v759_v35 = vld [vmem:[#allocation2 + $0x10] sm:$0x3] }
 0x145   :  { %2405 = vmatprep.subr.bf16.mxu0 %v2983_v1  ;;  %2583 = vmatprep.subr.bf16.mxu1 %v2983_v1  ;;  %v760_v37 = vpack.c.bf16 %v759_v35, %v758_v34 }
 0x146   :  { %2597 = vmatprep.mubr.msk.bf16.mxu1 %vm2985_vm10, %v2983_v1 }
 0x148   :  { %2406 = vmatpush3.bf16.msra.mxu0 %v2935_v41  ;;  %2584 = vmatpush3.bf16.msra.mxu1 %v2934_v38  ;;  %v1432_v38 = vld [vmem:[#allocation2 + $0x10] sm:$0xf0] }
 0x149   :  { %2407 = vmatprep.subr.bf16.mxu0 %v2983_v1  ;;  %2585 = vmatprep.subr.bf16.mxu1 %v2983_v1 }
 0x14c   :  { %2408 = vmatpush3.bf16.msra.mxu0 %v2936_v42  ;;  %2586 = vmatpush3.bf16.msra.mxu1 %v2935_v41  ;;  %v779_v41 = vrot.slane %v760_v37, 1 }
 0x14d   :  { %2409 = vmatprep.subr.bf16.mxu0 %v2983_v1  ;;  %2587 = vmatprep.subr.bf16.mxu1 %v2983_v1 }
 0x150   :  { %2410 = vmatpush3.bf16.msra.mxu0 %v2937_v43  ;;  %2588 = vmatpush3.bf16.msra.mxu1 %v2936_v42  ;;  %v1434_v42 = vpack.c.bf16 %v1433_v39, %v1432_v38 }
 0x151   :  { %2411 = vmatprep.subr.bf16.mxu0 %v2983_v1  ;;  %2589 = vmatprep.subr.bf16.mxu1 %v2983_v1 }
 0x152   :  { %v1436_v44 = vrot.slane %v1434_v42, 2 }
 0x154   :  { %2412 = vmatpush3.bf16.msra.mxu0 %v2938_v46  ;;  %2590 = vmatpush3.bf16.msra.mxu1 %v2937_v43  ;;  %v2966_v43 = vld [vmem:[%s3582_s1 + $0x1c8] sm:$0xff]  }
 0x155   :  { %2413 = vmatprep.subr.bf16.mxu0 %v2983_v1  ;;  %2591 = vmatprep.subr.bf16.mxu1 %v2983_v1 }
 0x158   :  { %2414 = vmatpush3.bf16.msra.mxu0 %v2939_v50  ;;  %2592 = vmatpush3.bf16.msra.mxu1 %v2938_v46  ;;  %v2968_v46 = vld [vmem:[%s3582_s1 + $0x1d8] sm:$0xff]  }
 0x159   :  { %2415 = vmatprep.subr.bf16.mxu0 %v2983_v1  ;;  %2593 = vmatprep.subr.bf16.mxu1 %v2983_v1 }
 0x15c   :  { %2416 = vmatpush3.bf16.msra.mxu0 %v2940_v53  ;;  %2594 = vmatpush3.bf16.msra.mxu1 %v2939_v50  ;;  %v2972_v50 = vld [vmem:[%s3582_s1 + $0x1f8] sm:$0xff]  }
 0x15d   :  { %2421 = vmatprep.subr.bf16.mxu0 %v2983_v1  ;;  %2595 = vmatprep.subr.bf16.mxu1 %v2983_v1 }
 0x15f   :  { %2418 = vmatmul.mubr.bf16.vlgmr.msra.gmra.mrb[0].mxu0 %v423_v59  ;;  %v2975_v59 = vld [vmem:[%s3582_s1 + $0x210] sm:$0xff]  }
 0x160   :  { %2422 = vmatpush3.bf16.msra.mxu0 %v2941_v58  ;;  %2596 = vmatpush3.bf16.msra.mxu1 %v2940_v53  ;;  %v2973_v53 = vld [vmem:[%s3582_s1 + $0x200] sm:$0xff]  }
 0x161   :  { %2423 = vmatprep.subr.bf16.mxu0 %v2983_v1  ;;  %2601 = vmatprep.subr.bf16.mxu1 %v2983_v1 }
 0x162   :  { %2437 = vmatprep.mubr.msk.bf16.mxu0 %vm2985_vm10, %v2983_v1 }
 0x163   :  { %2598 = vmatmul.mubr.bf16.vlgmr.msra.gmra.mrb[0].mxu1 %v1273_v63  ;;  %v2979_v63 = vld [vmem:[%s3582_s1 + $0x230] sm:$0xff]  }
 0x164   :  { %2424 = vmatpush3.bf16.msra.mxu0 %v2942_v62  ;;  %2602 = vmatpush3.bf16.msra.mxu1 %v2941_v58  ;;  %v1493_v58 = vsel %vm105_vm11, %v1490_v57, %v1492_v55 }
 0x165   :  { %2425 = vmatprep.subr.bf16.mxu0 %v2983_v1  ;;  %2603 = vmatprep.subr.bf16.mxu1 %v2983_v1 }
 0x166   :  { %2617 = vmatprep.mubr.msk.bf16.mxu1 %vm2985_vm10, %v2983_v1 }
 0x168   :  { %2426 = vmatpush3.bf16.msra.mxu0 %v2943_v0  ;;  %2604 = vmatpush3.bf16.msra.mxu1 %v2942_v62  ;;  %v2978_v62 = vld [vmem:[%s3582_s1 + $0x228] sm:$0xff]  }
 0x169   :  { %2427 = vmatprep.subr.bf16.mxu0 %v2983_v1  ;;  %2605 = vmatprep.subr.bf16.mxu1 %v2983_v1 }
 0x16c   :  { %2428 = vmatpush3.bf16.msra.mxu0 %v2944_v2  ;;  %2606 = vmatpush3.bf16.msra.mxu1 %v2943_v0  ;;  %v2980_v0 = vld [vmem:[%s3582_s1 + $0x238] sm:$0xff]  }
 0x16d   :  { %2429 = vmatprep.subr.bf16.mxu0 %v2983_v1  ;;  %2607 = vmatprep.subr.bf16.mxu1 %v2983_v1 }
 0x170   :  { %2430 = vmatpush3.bf16.msra.mxu0 %v2945_v3  ;;  %2608 = vmatpush3.bf16.msra.mxu1 %v2944_v2  ;;  %v1012_v2 = vpop.permute.xlu1 %1011 }
 0x171   :  { %2431 = vmatprep.subr.bf16.mxu0 %v2983_v1  ;;  %2609 = vmatprep.subr.bf16.mxu1 %v2983_v1 }
 0x174   :  { %2432 = vmatpush3.bf16.msra.mxu0 %v2946_v4  ;;  %2610 = vmatpush3.bf16.msra.mxu1 %v2945_v3  ;;  %v1598_v3 = vld [vmem:[%s3583_s2] sm:$0xff]  ;;  %v1539_v11 = vpop.permute.xlu1 %1538 }
 0x175   :  { %2433 = vmatprep.subr.bf16.mxu0 %v2983_v1  ;;  %2611 = vmatprep.subr.bf16.mxu1 %v2983_v1 }
 0x178   :  { %2434 = vmatpush3.bf16.msra.mxu0 %v2947_v5  ;;  %2612 = vmatpush3.bf16.msra.mxu1 %v2946_v4  ;;  %v1599_v4 = vld [vmem:[%s3583_s2 + $0x8] sm:$0xff] }
 0x179   :  { %2435 = vmatprep.subr.bf16.mxu0 %v2983_v1  ;;  %2613 = vmatprep.subr.bf16.mxu1 %v2983_v1 }
 0x17c   :  { %2436 = vmatpush3.bf16.msra.mxu0 %v2948_v6  ;;  %2614 = vmatpush3.bf16.msra.mxu1 %v2947_v5  ;;  %v1010_v5 = vpop.permute.xlu0 %1009 }
 0x17d   :  { %2441 = vmatprep.subr.bf16.mxu0 %v2983_v1  ;;  %2615 = vmatprep.subr.bf16.mxu1 %v2983_v1 }
 0x17f   :  { %2438 = vmatmul.mubr.bf16.vlgmr.msra.gmra.mrb[0].mxu0 %v555_v10  ;;  %v1013_v10 = vsel %vm305_vm12, %v1010_v5, %v1012_v2 }
 0x180   :  { %2442 = vmatpush3.bf16.msra.mxu0 %v2949_v9  ;;  %2616 = vmatpush3.bf16.msra.mxu1 %v2948_v6  ;;  %v2786_v6 = vpack.c.bf16 %v1599_v4, %v1598_v3  ;;  %v1537_v13 = vpop.permute.xlu0 %1536 }
 0x181   :  { %2443 = vmatprep.subr.bf16.mxu0 %v2983_v1  ;;  %2621 = vmatprep.subr.bf16.mxu1 %v2983_v1 }
 0x182   :  { %2457 = vmatprep.mubr.msk.bf16.mxu0 %vm2985_vm10, %v2983_v1 }
 0x183   :  { %2618 = vmatmul.mubr.bf16.vlgmr.msra.gmra.mrb[0].mxu1 %v1342_v14  ;;  %v1602_v14 = vld [vmem:[%s3583_s2 + $0x20] sm:$0xff] }
 0x184   :  { %2444 = vmatpush3.bf16.msra.mxu0 %v2950_v12  ;;  %2622 = vmatpush3.bf16.msra.mxu1 %v2949_v9  ;;  %v1601_v9 = vld [vmem:[%s3583_s2 + $0x18] sm:$0xff] }
 0x185   :  { %2445 = vmatprep.subr.bf16.mxu0 %v2983_v1  ;;  %2623 = vmatprep.subr.bf16.mxu1 %v2983_v1 }
 0x186   :  { %2637 = vmatprep.mubr.msk.bf16.mxu1 %vm2985_vm10, %v2983_v1 }
 0x188   :  { %2446 = vmatpush3.bf16.msra.mxu0 %v2951_v15  ;;  %2624 = vmatpush3.bf16.msra.mxu1 %v2950_v12  ;;  %v2789_v12 = vpack.c.bf16 %v1601_v9, %v1600_v8 }
 0x189   :  { %2447 = vmatprep.subr.bf16.mxu0 %v2983_v1  ;;  %2625 = vmatprep.subr.bf16.mxu1 %v2983_v1 }
 0x18c   :  { %2448 = vmatpush3.bf16.msra.mxu0 %v2952_v16  ;;  %2626 = vmatpush3.bf16.msra.mxu1 %v2951_v15  ;;  %v1603_v15 = vld [vmem:[%s3583_s2 + $0x28] sm:$0xff] }
 0x18d   :  { %2449 = vmatprep.subr.bf16.mxu0 %v2983_v1  ;;  %2627 = vmatprep.subr.bf16.mxu1 %v2983_v1 }
 0x190   :  { %2450 = vmatpush3.bf16.msra.mxu0 %v2953_v17  ;;  %2628 = vmatpush3.bf16.msra.mxu1 %v2952_v16  ;;  %v1540_v16 = vsel %vm305_vm12, %v1537_v13, %v1539_v11 }
 0x191   :  { %2451 = vmatprep.subr.bf16.mxu0 %v2983_v1  ;;  %2629 = vmatprep.subr.bf16.mxu1 %v2983_v1 }
 0x194   :  { %2452 = vmatpush3.bf16.msra.mxu0 %v2954_v18  ;;  %2630 = vmatpush3.bf16.msra.mxu1 %v2953_v17  ;;  %v2792_v17 = vpack.c.bf16 %v1603_v15, %v1602_v14 }
 0x195   :  { %2453 = vmatprep.subr.bf16.mxu0 %v2983_v1  ;;  %2631 = vmatprep.subr.bf16.mxu1 %v2983_v1 }
 0x198   :  { %2454 = vmatpush3.bf16.msra.mxu0 %v2955_v20  ;;  %2632 = vmatpush3.bf16.msra.mxu1 %v2954_v18  ;;  %v1604_v18 = vld [vmem:[%s3583_s2 + $0x30] sm:$0xff] }
 0x199   :  { %2455 = vmatprep.subr.bf16.mxu0 %v2983_v1  ;;  %2633 = vmatprep.subr.bf16.mxu1 %v2983_v1 }
 0x19c   :  { %2456 = vmatpush3.bf16.msra.mxu0 %v2956_v21  ;;  %2634 = vmatpush3.bf16.msra.mxu1 %v2955_v20  ;;  %v1605_v20 = vld [vmem:[%s3583_s2 + $0x38] sm:$0xff] }
 0x19d   :  { %2461 = vmatprep.subr.bf16.mxu0 %v2983_v1  ;;  %2635 = vmatprep.subr.bf16.mxu1 %v2983_v1 }
 0x19f   :  { %2458 = vmatmul.mubr.bf16.vlgmr.msra.gmra.mrb[0].mxu0 %v667_v26  ;;  %v2798_v26 = vpack.c.bf16 %v1607_v23, %v1606_v22  ;;  %v1763_v22 = vld [vmem:[%s3586_s5] sm:$0x1] }
 0x1a0   :  { %2462 = vmatpush3.bf16.msra.mxu0 %v2957_v25  ;;  %2636 = vmatpush3.bf16.msra.mxu1 %v2956_v21  ;;  %v2795_v21 = vpack.c.bf16 %v1605_v20, %v1604_v18  ;;  %v1759_v18 = vld [vmem:[%s3585_s4] sm:$0x1] }
 0x1a1   :  { %2463 = vmatprep.subr.bf16.mxu0 %v2983_v1  ;;  %2641 = vmatprep.subr.bf16.mxu1 %v2983_v1 }
 0x1a2   :  { %2477 = vmatprep.mubr.msk.bf16.mxu0 %vm2985_vm10, %v2983_v1 }
 0x1a3   :  { %2638 = vmatmul.mubr.bf16.vlgmr.msra.gmra.mrb[0].mxu1 %v1389_v29  ;;  %v1611_v29 = vld [vmem:[%s3583_s2 + $0x68] sm:$0xff] }
 0x1a4   :  { %2464 = vmatpush3.bf16.msra.mxu0 %v2958_v28  ;;  %2642 = vmatpush3.bf16.msra.mxu1 %v2957_v25  ;;  %v1608_v25 = vld [vmem:[%s3583_s2 + $0x50] sm:$0xff] }
 0x1a5   :  { %2465 = vmatprep.subr.bf16.mxu0 %v2983_v1  ;;  %2643 = vmatprep.subr.bf16.mxu1 %v2983_v1 }
 0x1a6   :  { %2657 = vmatprep.mubr.msk.bf16.mxu1 %vm2985_vm10, %v2983_v1 }
 0x1a8   :  { %2466 = vmatpush3.bf16.msra.mxu0 %v2959_v19  ;;  %2644 = vmatpush3.bf16.msra.mxu1 %v2958_v28  ;;  %v2801_v28 = vpack.c.bf16 %v1609_v27, %v1608_v25 }
 0x1a9   :  { %2467 = vmatprep.subr.bf16.mxu0 %v2983_v1  ;;  %2645 = vmatprep.subr.bf16.mxu1 %v2983_v1 }
 0x1ac   :  { %2468 = vmatpush3.bf16.msra.mxu0 %v2960_v30  ;;  %2646 = vmatpush3.bf16.msra.mxu1 %v2959_v19  ;;  %v2804_v19 = vpack.c.bf16 %v1611_v29, %v1610_v24 }
 0x1ad   :  { %2469 = vmatprep.subr.bf16.mxu0 %v2983_v1  ;;  %2647 = vmatprep.subr.bf16.mxu1 %v2983_v1 }
 0x1b0   :  { %2470 = vmatpush3.bf16.msra.mxu0 %v2961_v31  ;;  %2648 = vmatpush3.bf16.msra.mxu1 %v2960_v30  ;;  %v1612_v30 = vld [vmem:[%s3583_s2 + $0x70] sm:$0xff] }
 0x1b1   :  { %2471 = vmatprep.subr.bf16.mxu0 %v2983_v1  ;;  %2649 = vmatprep.subr.bf16.mxu1 %v2983_v1 }
 0x1b4   :  { %2472 = vmatpush3.bf16.msra.mxu0 %v2962_v32  ;;  %2650 = vmatpush3.bf16.msra.mxu1 %v2961_v31  ;;  %v1613_v31 = vld [vmem:[%s3583_s2 + $0x78] sm:$0xff] }
 0x1b5   :  { %2473 = vmatprep.subr.bf16.mxu0 %v2983_v1  ;;  %2651 = vmatprep.subr.bf16.mxu1 %v2983_v1 }
 0x1b8   :  { %2474 = vmatpush3.bf16.msra.mxu0 %v2963_v33  ;;  %2652 = vmatpush3.bf16.msra.mxu1 %v2962_v32  ;;  %v2807_v32 = vpack.c.bf16 %v1613_v31, %v1612_v30 }
 0x1b9   :  { %2475 = vmatprep.subr.bf16.mxu0 %v2983_v1  ;;  %2653 = vmatprep.subr.bf16.mxu1 %v2983_v1 }
 0x1bc   :  { %2476 = vmatpush3.bf16.msra.mxu0 %v2964_v36  ;;  %2654 = vmatpush3.bf16.msra.mxu1 %v2963_v33 }
 0x1bd   :  { %2481 = vmatprep.subr.bf16.mxu0 %v2983_v1  ;;  %2655 = vmatprep.subr.bf16.mxu1 %v2983_v1 }
 0x1bf   :  { %2478 = vmatmul.mubr.bf16.vlgmr.msra.gmra.mrb[0].mxu0 %v779_v41 }
 0x1c0   :  { %2482 = vmatpush3.bf16.msra.mxu0 %v2965_v40  ;;  %2656 = vmatpush3.bf16.msra.mxu1 %v2964_v36 }
 0x1c1   :  { %2483 = vmatprep.subr.bf16.mxu0 %v2983_v1  ;;  %2661 = vmatprep.subr.bf16.mxu1 %v2983_v1 }
 0x1c2   :  { %2497 = vmatprep.mubr.msk.bf16.mxu0 %vm2985_vm10, %v2983_v1 }
 0x1c3   :  { %2658 = vmatmul.mubr.bf16.vlgmr.msra.gmra.mrb[0].mxu1 %v1436_v44 }
 0x1c4   :  { %2484 = vmatpush3.bf16.msra.mxu0 %v2966_v43  ;;  %2662 = vmatpush3.bf16.msra.mxu1 %v2965_v40 }
 0x1c5   :  { %2485 = vmatprep.subr.bf16.mxu0 %v2983_v1  ;;  %2663 = vmatprep.subr.bf16.mxu1 %v2983_v1 }
 0x1c6   :  { %2677 = vmatprep.mubr.msk.bf16.mxu1 %vm2985_vm10, %v2983_v1 }
 0x1c8   :  { %2486 = vmatpush3.bf16.msra.mxu0 %v2967_v45  ;;  %2664 = vmatpush3.bf16.msra.mxu1 %v2966_v43 }
 0x1c9   :  { %2487 = vmatprep.subr.bf16.mxu0 %v2983_v1  ;;  %2665 = vmatprep.subr.bf16.mxu1 %v2983_v1 }
 0x1cc   :  { %2488 = vmatpush3.bf16.msra.mxu0 %v2968_v46  ;;  %2666 = vmatpush3.bf16.msra.mxu1 %v2967_v45 }
 0x1cd   :  { %2489 = vmatprep.subr.bf16.mxu0 %v2983_v1  ;;  %2667 = vmatprep.subr.bf16.mxu1 %v2983_v1 }
 0x1d0   :  { %2490 = vmatpush3.bf16.msra.mxu0 %v2969_v47  ;;  %2668 = vmatpush3.bf16.msra.mxu1 %v2968_v46 }
 0x1d1   :  { %2491 = vmatprep.subr.bf16.mxu0 %v2983_v1  ;;  %2669 = vmatprep.subr.bf16.mxu1 %v2983_v1 }
 0x1d4   :  { %2492 = vmatpush3.bf16.msra.mxu0 %v2970_v48  ;;  %2670 = vmatpush3.bf16.msra.mxu1 %v2969_v47 }
 0x1d5   :  { %2493 = vmatprep.subr.bf16.mxu0 %v2983_v1  ;;  %2671 = vmatprep.subr.bf16.mxu1 %v2983_v1 }
 0x1d8   :  { %2494 = vmatpush3.bf16.msra.mxu0 %v2971_v49  ;;  %2672 = vmatpush3.bf16.msra.mxu1 %v2970_v48 }
 0x1d9   :  { %2495 = vmatprep.subr.bf16.mxu0 %v2983_v1  ;;  %2673 = vmatprep.subr.bf16.mxu1 %v2983_v1 }
 0x1dc   :  { %2496 = vmatpush3.bf16.msra.mxu0 %v2972_v50  ;;  %2674 = vmatpush3.bf16.msra.mxu1 %v2971_v49 }
 0x1dd   :  { %2501 = vmatprep.subr.bf16.mxu0 %v2983_v1  ;;  %2675 = vmatprep.subr.bf16.mxu1 %v2983_v1 }
 0x1df   :  { %2498 = vmatmul.mubr.bf16.vlgmr.msra.gmra.mrb[0].mxu0 %v901_v54 }
 0x1e0   :  { %2502 = vmatpush3.bf16.msra.mxu0 %v2973_v53  ;;  %2676 = vmatpush3.bf16.msra.mxu1 %v2972_v50 }
 0x1e1   :  { %2503 = vmatprep.subr.bf16.mxu0 %v2983_v1  ;;  %2681 = vmatprep.subr.bf16.mxu1 %v2983_v1 }
 0x1e2   :  { %2517 = vmatprep.mubr.msk.bf16.mxu0 %vm2985_vm10, %v2983_v1 }
 0x1e3   :  { %2678 = vmatmul.mubr.bf16.vlgmr.msra.gmra.mrb[0].mxu1 %v1493_v58 }
 0x1e4   :  { %2504 = vmatpush3.bf16.msra.mxu0 %v2974_v56  ;;  %2682 = vmatpush3.bf16.msra.mxu1 %v2973_v53 }
 0x1e5   :  { %2505 = vmatprep.subr.bf16.mxu0 %v2983_v1  ;;  %2683 = vmatprep.subr.bf16.mxu1 %v2983_v1 }
 0x1e6   :  { %2697 = vmatprep.mubr.msk.bf16.mxu1 %vm2985_vm10, %v2983_v1 }
 0x1e8   :  { %2506 = vmatpush3.bf16.msra.mxu0 %v2975_v59  ;;  %2684 = vmatpush3.bf16.msra.mxu1 %v2974_v56 }
 0x1e9   :  { %2507 = vmatprep.subr.bf16.mxu0 %v2983_v1  ;;  %2685 = vmatprep.subr.bf16.mxu1 %v2983_v1 }
 0x1ec   :  { %2508 = vmatpush3.bf16.msra.mxu0 %v2976_v60  ;;  %2686 = vmatpush3.bf16.msra.mxu1 %v2975_v59 }
 0x1ed   :  { %2509 = vmatprep.subr.bf16.mxu0 %v2983_v1  ;;  %2687 = vmatprep.subr.bf16.mxu1 %v2983_v1 }
 0x1f0   :  { %2510 = vmatpush3.bf16.msra.mxu0 %v2977_v61  ;;  %2688 = vmatpush3.bf16.msra.mxu1 %v2976_v60 }
 0x1f1   :  { %2511 = vmatprep.subr.bf16.mxu0 %v2983_v1  ;;  %2689 = vmatprep.subr.bf16.mxu1 %v2983_v1 }
 0x1f4   :  { %2512 = vmatpush3.bf16.msra.mxu0 %v2978_v62  ;;  %2690 = vmatpush3.bf16.msra.mxu1 %v2977_v61 }
 0x1f5   :  { %2513 = vmatprep.subr.bf16.mxu0 %v2983_v1  ;;  %2691 = vmatprep.subr.bf16.mxu1 %v2983_v1 }
 0x1f8   :  { %2514 = vmatpush3.bf16.msra.mxu0 %v2979_v63  ;;  %2692 = vmatpush3.bf16.msra.mxu1 %v2978_v62 }
 0x1f9   :  { %2515 = vmatprep.subr.bf16.mxu0 %v2983_v1  ;;  %2693 = vmatprep.subr.bf16.mxu1 %v2983_v1 }
 0x1fc   :  { %2516 = vmatpush3.bf16.msra.mxu0 %v2980_v0  ;;  %2694 = vmatpush3.bf16.msra.mxu1 %v2979_v63 }
 0x1fd   :  { %2695 = vmatprep.subr.bf16.mxu1 %v2983_v1  ;;  %2785 = vmatprep.subr.bf16.mxu0 %v2988_v7 }
 0x1ff   :  { %2518 = vmatmul.mubr.bf16.vlgmr.msra.gmra.mrb[0].mxu0 %v1013_v10 }
 0x200   :  { %2696 = vmatpush3.bf16.msra.mxu1 %v2980_v0  ;;  %2787 = vmatpush3.bf16.msra.mxu0 %v2786_v6 }
 0x201   :  { %2809 = vmatprep.subr.bf16.mxu1 %v2988_v7  ;;  %2788 = vmatprep.subr.bf16.mxu0 %v2988_v7 }
 0x202   :  { %2733 = vmatprep.mubr.msk.f32.mxu0 %vm2985_vm10, %v2983_v1 }
 0x203   :  { %2698 = vmatmul.mubr.bf16.vlgmr.msra.gmra.mrb[0].mxu1 %v1540_v16 }
 0x204   :  { %2811 = vmatpush3.bf16.msra.mxu1 %v2786_v6  ;;  %2790 = vmatpush3.bf16.msra.mxu0 %v2789_v12  ;;  %v1766_v6 = vld [vmem:[%s3584_s3] sm:$0xff] }
 0x205   :  { %2812 = vmatprep.subr.bf16.mxu1 %v2988_v7  ;;  %2791 = vmatprep.subr.bf16.mxu0 %v2988_v7 }
 0x206   :  { %2768 = vmatprep.mubr.msk.f32.mxu1 %vm2985_vm10, %v2983_v1 }
 0x208   :  { %2814 = vmatpush3.bf16.msra.mxu1 %v2789_v12  ;;  %2793 = vmatpush3.bf16.msra.mxu0 %v2792_v17 }
 0x209   :  { %2815 = vmatprep.subr.bf16.mxu1 %v2988_v7  ;;  %2794 = vmatprep.subr.bf16.mxu0 %v2988_v7 }
 0x20c   :  { %2817 = vmatpush3.bf16.msra.mxu1 %v2792_v17  ;;  %2796 = vmatpush3.bf16.msra.mxu0 %v2795_v21 }
 0x20d   :  { %2818 = vmatprep.subr.bf16.mxu1 %v2988_v7  ;;  %2797 = vmatprep.subr.bf16.mxu0 %v2988_v7 }
 0x210   :  { %2820 = vmatpush3.bf16.msra.mxu1 %v2795_v21  ;;  %2799 = vmatpush3.bf16.msra.mxu0 %v2798_v26 }
 0x211   :  { %2821 = vmatprep.subr.bf16.mxu1 %v2988_v7  ;;  %2800 = vmatprep.subr.bf16.mxu0 %v2988_v7 }
 0x214   :  { %2823 = vmatpush3.bf16.msra.mxu1 %v2798_v26  ;;  %2802 = vmatpush3.bf16.msra.mxu0 %v2801_v28  ;;  %v1915_v26 = vlaneseq }
 0x215   :  { %2824 = vmatprep.subr.bf16.mxu1 %v2988_v7  ;;  %2803 = vmatprep.subr.bf16.mxu0 %v2988_v7 }
 0x216   :  { %v1916_v27 = vshrl.u32 %v1915_v26, 7 }
 0x218   :  { %2826 = vmatpush3.bf16.msra.mxu1 %v2801_v28  ;;  %2805 = vmatpush3.bf16.msra.mxu0 %v2804_v19  ;;  %v1917_v28 = vsub.s32 0, %v1916_v27 }
 0x219   :  { %2827 = vmatprep.subr.bf16.mxu1 %v2988_v7  ;;  %2806 = vmatprep.subr.bf16.mxu0 %v2988_v7 }
 0x21c   :  { %2829 = vmatpush3.bf16.msra.mxu1 %v2804_v19  ;;  %2808 = vmatpush3.bf16.msra.mxu0 %v2807_v32 }
 0x21d   :  { %2830 = vmatprep.subr.bf16.mxu1 %v2988_v7  ;;  %2833 = vmatprep.subr.bf16.mxu0 %v2988_v7 }
 0x220   :  { %2832 = vmatpush3.bf16.msra.mxu1 %v2807_v32 }
 0x221   :  { %2836 = vmatprep.subr.bf16.mxu1 %v2988_v7  ;;  %v1767_v7 = vld [vmem:[%s3584_s3 + $0x8] sm:$0xff] }
 0x222   :  { %v2834_v8 = vpack.c.bf16 %v1767_v7, %v1766_v6 }
 0x2d2   :  { %v3545_v33 = vpop.f32.mrb[0].mxu0 }
 0x2d3   :  { %v1104_v34 = vrot.slane %v3545_v33, 4  ;;  %v1111_v35 = vmul.f32 %v3545_v33, %v3545_v33  ;;  %v2519_v36 = vpop.f32.mrb[1].mxu0 }
 0x2d4   :  { %v1100_v37 = vpop.f32.mrb[2].mxu0 }
 0x2d5   :  { %v1105_v38 = vadd.f32 %v1104_v34, %v3545_v33  ;;  %v1112_v39 = vrot.slane %v1111_v35, 4  ;;  %v2520_v40 = vpop.f32.mrb[3].mxu0 }
 0x2d6   :  { %v3551_v41 = vpop.f32.mrb[0].mxu1 }
 0x2d7   :  { %v1106_v42 = vrot.slane %v1105_v38, 2  ;;  %v1113_v43 = vadd.f32 %v1112_v39, %v1111_v35  ;;  %v1583_v44 = vrot.slane %v3551_v41, 4  ;;  %v1590_v45 = vmul.f32 %v3551_v41, %v3551_v41  ;;  %v2699_v46 = vpop.f32.mrb[1].mxu1 }
 0x2d8   :  { %v1579_v47 = vpop.f32.mrb[2].mxu1 }
 0x2d9   :  { %v1107_v48 = vadd.f32 %v1106_v42, %v1105_v38  ;;  %v1114_v49 = vrot.slane %v1113_v43, 2  ;;  %v1584_v50 = vadd.f32 %v1583_v44, %v3551_v41  ;;  %v1591_v51 = vrot.slane %v1590_v45, 4  ;;  %v2700_v52 = vpop.f32.mrb[3].mxu1 }
 0x2db   :  { %v1115_v53 = vadd.f32 %v1114_v49, %v1113_v43  ;;  %v1585_v54 = vrot.slane %v1584_v50, 2  ;;  %v1592_v55 = vadd.f32 %v1591_v51, %v1590_v45  ;;  %v1108_v56 = vrot.slane %v1107_v48, 1 }
 0x2dd   :  { %v1586_v57 = vadd.f32 %v1585_v54, %v1584_v50  ;;  %v1593_v58 = vrot.slane %v1592_v55, 2  ;;  %v1116_v61 = vrot.slane %v1115_v53, 1  ;;  %v1109_v62 = vadd.f32 %v1108_v56, %v1107_v48 }
 0x2df   :  { %v1587_v59 = vrot.slane %v1586_v57, 1  ;;  %v1594_v60 = vadd.f32 %v1593_v58, %v1592_v55  ;;  %v1117_v3 = vadd.f32 %v1116_v61, %v1115_v53 }
 0x2e1   :  { %v1588_v63 = vadd.f32 %v1587_v59, %v1586_v57  ;;  %v1595_v0 = vrot.slane %v1594_v60, 1 }
 0x2e3   :  { %v1589_v2 = vadd.f32 %v1588_v63, %v1109_v62  ;;  %v1596_v4 = vadd.f32 %v1595_v0, %v1594_v60 }
 0x2e5   :  { %2734 = vmatmul.mubr.f32.vlgmr.msra.gmra.mrb[4].mxu0 %v1589_v2  ;;  %v1597_v5 = vadd.f32 %v1596_v4, %v1117_v3 }
 0x2e6   :  { %2775 = vmatprep.mubr.msk.f32.mxu0 %vm2985_vm10, %v2983_v1  ;;  %2835 = vmatpush3.bf16.msra.mxu0 %v2834_v8 }
 0x2e7   :  { %2769 = vmatmul.mubr.f32.vlgmr.msra.gmra.mrb[4].mxu1 %v1597_v5 }
 0x2e8   :  { %2782 = vmatprep.mubr.msk.f32.mxu1 %vm2985_vm10, %v2983_v1  ;;  %2838 = vmatpush3.bf16.msra.mxu1 %v2834_v8 }
 0x3b8   :  { %v1680_v9 = vpop.f32.mrb[4].mxu0 }
 0x3b9   :  { %v1754_v10 = vmul.f32 0.0078125, %v1680_v9  ;;  %v2735_v11 = vpop.f32.mrb[5].mxu0 }
 0x3ba   :  { %v1750_v12 = vpop.f32.mrb[4].mxu1 }
 0x3bb   :  { %v1756_v13 = vmul.f32 %v1754_v10, %v1754_v10  ;;  %v1755_v14 = vmul.f32 0.0078125, %v1750_v12  ;;  %v2770_v15 = vpop.f32.mrb[5].mxu1 }
 0x3bd   :  { %v1757_v16 = vsub.f32 %v1755_v14, %v1756_v13 }
 0x3bf   :  { %v1758_v1 = vmax.f32 %v1757_v16, 0.0 }
 0x3c1   :  { %v1760_v17 = vadd.f32 1e-05, %v1758_v1 }
 0x3c3   :  { %2981 = vrsqrt.f32 %v1760_v17 }
 0x3cd   :  { %v2982_v20 = vpop.eup %2981 }
 0x3ce   :  { %v1762_v21 = vmul.f32 %v2982_v20, %v1759_v18 }
 0x3d0   :  { %2776 = vmatmul.mubr.msk.f32.vlgmr.msra.gmra.mrb[6].mxu0 %vm1768_vm13, %v1762_v21  ;;  %v1764_v23 = vmul.f32 %v1762_v21, %v1754_v10 }
 0x3d2   :  { %v1765_v25 = vsub.f32 %v1763_v22, %v1764_v23 }
 0x3d4   :  { %2783 = vmatmul.mubr.msk.f32.vlgmr.msra.gmra.mrb[6].mxu1 %vm1768_vm13, %v1765_v25 }
 0x4a3   :  { %v1838_v24 = vpop.f32.mrb[6].mxu0 }
 0x4a4   :  { %v1918_v29 = vrot.slane %v1838_v24, %v1917_v28  ;;  %v2777_v19 = vpop.f32.mrb[7].mxu0 }
 0x4a6   :  { %v1919_v30 = vmul.f32 %v1918_v29, %v3545_v33  ;;  %v1928_v31 = vmul.f32 %v1918_v29, %v3551_v41 }
 0x4a7   :  { %v1911_v32 = vpop.f32.mrb[6].mxu1 }
 0x4a8   :  { %v1923_v34 = vrot.slane %v1911_v32, %v1917_v28  ;;  %v2784_v35 = vpop.f32.mrb[7].mxu1 }
 0x4aa   :  { %v1924_v36 = vadd.f32 %v1923_v34, %v1919_v30  ;;  %v1929_v37 = vadd.f32 %v1928_v31, %v1923_v34 }
 0x4ac   :  { %v1925_v38 = vmax.f32 %v1924_v36, 0.0  ;;  %v1930_v39 = vmax.f32 %v1929_v37, 0.0 }
 0x4ae   :  { %v1926_v40 = vpack.c.bf16 %v1925_v38, %v1925_v38  ;;  %v1931_v42 = vpack.c.bf16 %v1930_v39, %v1930_v39 }
 0x4b0   :  { %1927 = vst [vmem:[%s3587_s6] sm:$0xf] %v1926_v40  ;;  %1932 = vst [vmem:[%s3587_s6 + $0x4] sm:$0xf] %v1931_v42 }

// kernel: classifier_forward.11
= control target key start
LH: loop header
LB: loop body
LE: loop exit
PB: predicated region body
PF: predicated region fallthrough
CT: control target
= control target key end

     0   :  { %vm24_vm0 = vcmask 785408   ;;  %vm26_vm1 = vcmask 781312   ;;  %v2289_v2 = vmov 0.0   ;;  %s2290_s25 = smov 16   ;;  %vm2291_vm2 = vmmov 0   ;;  %s2292_s9 = smov 112   ;;  %s2704_s0 = inlined_call_operand.vmem [shape: bf16[8,64], index: 0, kind: input, shape index: {}]   ;;  %s2705_s1 = inlined_call_operand.vmem [shape: bf16[9,64,128], index: 1, kind: input, shape index: {}]   ;;  %s2706_s2 = inlined_call_operand.vmem [shape: f32[128,32], index: 2, kind: input, shape index: {}]   ;;  %s2707_s3 = inlined_call_operand.vmem [shape: f32[32,128], index: 3, kind: input, shape index: {}]   ;;  %s2708_s4 = inlined_call_operand.vmem [shape: f32[1,32], index: 4, kind: input, shape index: {}]   ;;  %s2709_s5 = inlined_call_operand.vmem [shape: f32[1,32], index: 5, kind: input, shape index: {}]   ;;  %s2710_s6 = inlined_call_operand.vmem [shape: bf16[8,128], index: 6, kind: output, shape index: {}]  }
   0x1   :  { %v28_v0 = vld [vmem:[%s2704_s0] sm:$0x3]  ;;  %v36_v1 = vld [vmem:[%s2704_s0] sm:$0xc]  ;;  %25 = vst.msk [vmem:[#allocation2] sm:$0xff] %vm24_vm0, %v2289_v2  ;;  %1808 = vmatprep.subr.bf16.mxu0 %v2289_v2  ;;  %1916 = vmatprep.subr.bf16.mxu1 %v2289_v2  ;;  %v2252_v7 = vld [vmem:[%s2705_s1 + $0x28] sm:$0xff]  }
   0x2   :  { %27 = vst.msk [vmem:[#allocation2 + $0x8] sm:$0xf] %vm26_vm1, %v2289_v2  ;;  %v29_v3 = vunpack.c.l.bf16 %v28_v0  ;;  %v37_v4 = vunpack.c.l.bf16 %v36_v1  ;;  %v2251_v6 = vld [vmem:[%s2705_s1 + $0x20] sm:$0xff]   ;;  %1816 = vmatprep.mubr.msk.bf16.mxu0 %vm2291_vm2, %v2289_v2  ;;  %1924 = vmatprep.mubr.msk.bf16.mxu1 %vm2291_vm2, %v2289_v2  ;;  %v2253_v8 = vld [vmem:[%s2705_s1 + $0x30] sm:$0xff]   ;;  %v2254_v9 = vld [vmem:[%s2705_s1 + $0x38] sm:$0xff]   ;;  %vm34_vm3 = vcmask 650368  }
   0x3   :  { %1809 = vmatpush3.bf16.msra.mxu0 %v2251_v6  ;;  %1917 = vmatpush3.bf16.msra.mxu1 %v2251_v6  ;;  %vm42_vm4 = vcmask 654468   ;;  %s2293_s10 = smov 96   ;;  %vm90_vm5 = vcmask 523264   ;;  %v2255_v25 = vld [vmem:[%s2705_s1] sm:$0xff]   ;;  %v2256_v28 = vld [vmem:[%s2705_s1 + $0x8] sm:$0xff]   ;;  %v2257_v29 = vld [vmem:[%s2705_s1 + $0x10] sm:$0xff]  }
   0x4   :  { %v2246_v5 = vpack.i.bf16 %v37_v4, %v29_v3  ;;  %1810 = vmatprep.subr.bf16.mxu0 %v2289_v2  ;;  %1918 = vmatprep.subr.bf16.mxu1 %v2289_v2  ;;  %v2258_v30 = vld [vmem:[%s2705_s1 + $0x18] sm:$0xff]   ;;  %v2259_v31 = vld [vmem:[%s2705_s1 + $0x40] sm:$0xff]   ;;  %v2260_v32 = vld [vmem:[%s2705_s1 + $0x48] sm:$0xff]   ;;  %vm756_vm6 = vcmask 1043456   ;;  %vm1378_vm7 = vcmask 261120  }
   0x5   :  { %v2261_v33 = vld [vmem:[%s2705_s1 + $0x50] sm:$0xff]   ;;  %v2262_v34 = vld [vmem:[%s2705_s1 + $0x58] sm:$0xff]   ;;  %v2263_v35 = vld [vmem:[%s2705_s1 + $0x60] sm:$0xff]  }
   0x6   :  { %2247 = vrot.lane.b32.xlu0 %v2246_v5, %s2290_s25  ;;  %v2264_v38 = vld [vmem:[%s2705_s1 + $0x68] sm:$0xff]   ;;  %v2265_v39 = vld [vmem:[%s2705_s1 + $0x70] sm:$0xff]   ;;  %v2266_v40 = vld [vmem:[%s2705_s1 + $0x78] sm:$0xff]  }
   0x7   :  { %1811 = vmatpush3.bf16.msra.mxu0 %v2252_v7  ;;  %1919 = vmatpush3.bf16.msra.mxu1 %v2252_v7  ;;  %v2267_v41 = vld [vmem:[%s2705_s1 + $0x80] sm:$0xff]   ;;  %v2268_v42 = vld [vmem:[%s2705_s1 + $0x88] sm:$0xff]   ;;  %v2269_v43 = vld [vmem:[%s2705_s1 + $0x90] sm:$0xff]   ;;  %v2294_v7 = vmov 0.0|0.0  }
   0x8   :  { %1812 = vmatprep.subr.bf16.mxu0 %v2289_v2  ;;  %1920 = vmatprep.subr.bf16.mxu1 %v2289_v2  ;;  %v2270_v44 = vld [vmem:[%s2705_s1 + $0x98] sm:$0xff]   ;;  %v2271_v45 = vld [vmem:[%s2705_s1 + $0xa0] sm:$0xff]   ;;  %v2272_v48 = vld [vmem:[%s2705_s1 + $0xa8] sm:$0xff]  }
   0x9   :  { %v2273_v49 = vld [vmem:[%s2705_s1 + $0xb0] sm:$0xff]   ;;  %v2274_v50 = vld [vmem:[%s2705_s1 + $0xb8] sm:$0xff]   ;;  %v2275_v51 = vld [vmem:[%s2705_s1 + $0xc0] sm:$0xff]  }
   0xa   :  { %v2276_v54 = vld [vmem:[%s2705_s1 + $0xc8] sm:$0xff]   ;;  %v2277_v55 = vld [vmem:[%s2705_s1 + $0xd0] sm:$0xff]   ;;  %v2278_v56 = vld [vmem:[%s2705_s1 + $0xd8] sm:$0xff]  }
   0xb   :  { %1813 = vmatpush3.bf16.msra.mxu0 %v2253_v8  ;;  %1921 = vmatpush3.bf16.msra.mxu1 %v2253_v8  ;;  %v2279_v57 = vld [vmem:[%s2705_s1 + $0xe0] sm:$0xff]   ;;  %v2280_v58 = vld [vmem:[%s2705_s1 + $0xe8] sm:$0xff]   ;;  %v2281_v59 = vld [vmem:[%s2705_s1 + $0xf0] sm:$0xff]  }
   0xc   :  { %1814 = vmatprep.subr.bf16.mxu0 %v2289_v2  ;;  %1922 = vmatprep.subr.bf16.mxu1 %v2289_v2  ;;  %v2282_v60 = vld [vmem:[%s2705_s1 + $0xf8] sm:$0xff]   ;;  %v2283_v61 = vld [vmem:[%s2705_s1 + $0x100] sm:$0xff]   ;;  %v2284_v0 = vld [vmem:[%s2705_s1 + $0x108] sm:$0xff]  }
   0xd   :  { %v2285_v1 = vld [vmem:[%s2705_s1 + $0x110] sm:$0xff]   ;;  %v2286_v3 = vld [vmem:[%s2705_s1 + $0x118] sm:$0xff]   ;;  %v1206_v4 = vld [vmem:[%s2706_s2] sm:$0xff] }
   0xe   :  { %v1207_v5 = vld [vmem:[%s2706_s2 + $0x8] sm:$0xff]  ;;  %v1208_v8 = vld [vmem:[%s2706_s2 + $0x10] sm:$0xff] }
   0xf   :  { %1815 = vmatpush3.bf16.msra.mxu0 %v2254_v9  ;;  %1923 = vmatpush3.bf16.msra.mxu1 %v2254_v9  ;;  %v2117_v6 = vpack.c.bf16 %v1207_v5, %v1206_v4  ;;  %v1209_v9 = vld [vmem:[%s2706_s2 + $0x18] sm:$0xff] }
  0x10   :  { %1820 = vmatprep.subr.bf16.mxu0 %v2289_v2  ;;  %1928 = vmatprep.subr.bf16.mxu1 %v2289_v2 }
  0x78   :  { %v2248_v10 = vpop.permute.xlu0 %2247 }
  0x79   :  { %v2250_v11 = vunpack.i.h.bf16 %v2248_v10  ;;  %v2249_v12 = vunpack.i.l.bf16 %v2248_v10 }
  0x7b   :  { %43 = vst.msk [vmem:[#allocation2 + $0x3] sm:$0xf0] %vm42_vm4, %v2250_v11 }
  0x7c   :  { %35 = vst.msk [vmem:[#allocation2 + $0x1] sm:$0xf] %vm34_vm3, %v2249_v12  ;;  %v2120_v12 = vpack.c.bf16 %v1209_v9, %v1208_v8  ;;  %v1374_v9 = vld [vmem:[%s2707_s3] sm:$0xff] }
  0x82   :  { %v774_v13 = vld [vmem:[#allocation2 + $0x6] sm:$0xf] }
  0x83   :  { %v44_v14 = vld [vmem:[#allocation2] sm:$0xf]  ;;  %v775_v15 = vpack.c.bf16 %v774_v13, %v774_v13  ;;  %v911_v18 = vld [vmem:[#allocation2 + $0x7] sm:$0xf] }
  0x84   :  { %v45_v16 = vpack.c.bf16 %v44_v14, %v44_v14  ;;  %v280_v17 = vld [vmem:[#allocation2 + $0x1] sm:$0xf]  ;;  %v2366_v20 = vpack.c.bf16 %v911_v18, %v911_v18  ;;  %v1050_v22 = vld [vmem:[#allocation2 + $0x8] sm:$0xf] }
  0x85   :  { %777 = vrot.lane.b32.xlu1 %v775_v15, %s2292_s9  ;;  %v2364_v19 = vpack.c.bf16 %v280_v17, %v280_v17  ;;  %v518_v21 = vld [vmem:[#allocation2 + $0x2] sm:$0xf]  ;;  %v2374_v24 = vpack.c.bf16 %v1050_v22, %v1050_v22  ;;  %v1211_v14 = vld [vmem:[%s2706_s2 + $0x28] sm:$0xff]  ;;  %v1213_v17 = vld [vmem:[%s2706_s2 + $0x38] sm:$0xff] }
  0x86   :  { %64 = vrot.lane.b32.xlu0 %v45_v16, %s2292_s9  ;;  %v2372_v23 = vpack.c.bf16 %v518_v21, %v518_v21  ;;  %v1210_v13 = vld [vmem:[%s2706_s2 + $0x20] sm:$0xff]  ;;  %v1216_v22 = vld [vmem:[%s2706_s2 + $0x50] sm:$0xff] }
  0x89   :  { %210 = vrot.lane.b32.xlu1 %v45_v16, %s2293_s10 }
  0x8a   :  { %865 = vrot.lane.b32.xlu0 %v775_v15, %s2293_s10 }
  0x8d   :  { %369 = vrot.lane.b32.xlu1 %v2364_v19, %s2292_s9 }
  0x8e   :  { %958 = vrot.lane.b32.xlu0 %v2366_v20, %s2292_s9 }
  0x91   :  { %448 = vrot.lane.b32.xlu1 %v2364_v19, %s2293_s10 }
  0x92   :  { %1004 = vrot.lane.b32.xlu0 %v2366_v20, %s2293_s10 }
  0x95   :  { %607 = vrot.lane.b32.xlu1 %v2372_v23, %s2292_s9 }
  0x96   :  { %1097 = vrot.lane.b32.xlu0 %v2374_v24, %s2292_s9 }
  0x99   :  { %686 = vrot.lane.b32.xlu1 %v2372_v23, %s2293_s10 }
  0x9a   :  { %1143 = vrot.lane.b32.xlu0 %v2374_v24, %s2293_s10 }
  0xf7   :  { %v778_v26 = vpop.permute.xlu1 %777 }
  0xf8   :  { %v65_v27 = vpop.permute.xlu0 %64  ;;  %1925 = vmatmul.mubr.msk.bf16.vlgmr.msra.gmra.mrb[0].mxu1 %vm90_vm5, %v778_v26  ;;  %v1219_v26 = vld [vmem:[%s2706_s2 + $0x68] sm:$0xff] }
  0xf9   :  { %1817 = vmatmul.mubr.msk.bf16.vlgmr.msra.gmra.mrb[0].mxu0 %vm90_vm5, %v65_v27  ;;  %1929 = vmatpush3.bf16.msra.mxu1 %v2255_v25 }
  0xfa   :  { %1821 = vmatpush3.bf16.msra.mxu0 %v2255_v25  ;;  %1930 = vmatprep.subr.bf16.mxu1 %v2289_v2  ;;  %v1218_v25 = vld [vmem:[%s2706_s2 + $0x60] sm:$0xff] }
  0xfb   :  { %1822 = vmatprep.subr.bf16.mxu0 %v2289_v2  ;;  %1828 = vmatprep.mubr.msk.bf16.mxu0 %vm2291_vm2, %v2289_v2  ;;  %v211_v36 = vpop.permute.xlu1 %210  ;;  %v2135_v27 = vpack.c.bf16 %v1219_v26, %v1218_v25  ;;  %v1371_v26 = vld [vmem:[%s2709_s5] sm:$0x1] }
  0xfc   :  { %1936 = vmatprep.mubr.msk.bf16.mxu1 %vm2291_vm2, %v2289_v2  ;;  %v866_v37 = vpop.permute.xlu0 %865 }
  0xfd   :  { %1931 = vmatpush3.bf16.msra.mxu1 %v2256_v28 }
  0xfe   :  { %1823 = vmatpush3.bf16.msra.mxu0 %v2256_v28  ;;  %1932 = vmatprep.subr.bf16.mxu1 %v2289_v2  ;;  %v1220_v28 = vld [vmem:[%s2706_s2 + $0x70] sm:$0xff] }
  0xff   :  { %1824 = vmatprep.subr.bf16.mxu0 %v2289_v2  ;;  %v370_v46 = vpop.permute.xlu1 %369 }
 0x100   :  { %v959_v47 = vpop.permute.xlu0 %958 }
 0x101   :  { %1933 = vmatpush3.bf16.msra.mxu1 %v2257_v29 }
 0x102   :  { %1825 = vmatpush3.bf16.msra.mxu0 %v2257_v29  ;;  %1934 = vmatprep.subr.bf16.mxu1 %v2289_v2  ;;  %v1221_v29 = vld [vmem:[%s2706_s2 + $0x78] sm:$0xff] }
 0x103   :  { %1826 = vmatprep.subr.bf16.mxu0 %v2289_v2  ;;  %v449_v52 = vpop.permute.xlu1 %448 }
 0x104   :  { %v1005_v53 = vpop.permute.xlu0 %1004 }
 0x105   :  { %1935 = vmatpush3.bf16.msra.mxu1 %v2258_v30 }
 0x106   :  { %1827 = vmatpush3.bf16.msra.mxu0 %v2258_v30  ;;  %1940 = vmatprep.subr.bf16.mxu1 %v2289_v2  ;;  %v2138_v30 = vpack.c.bf16 %v1221_v29, %v1220_v28  ;;  %v1525_v29 = vlaneseq }
 0x107   :  { %1832 = vmatprep.subr.bf16.mxu0 %v2289_v2  ;;  %v608_v62 = vpop.permute.xlu1 %607 }
 0x108   :  { %1937 = vmatmul.mubr.msk.bf16.vlgmr.msra.gmra.mrb[0].mxu1 %vm90_vm5, %v775_v15  ;;  %v1098_v63 = vpop.permute.xlu0 %1097  ;;  %v2123_v15 = vpack.c.bf16 %v1211_v14, %v1210_v13  ;;  %v1377_v13 = vld [vmem:[%s2707_s3 + $0x18] sm:$0xff] }
 0x109   :  { %1829 = vmatmul.mubr.msk.bf16.vlgmr.msra.gmra.mrb[0].mxu0 %vm90_vm5, %v45_v16  ;;  %1941 = vmatpush3.bf16.msra.mxu1 %v2259_v31  ;;  %v1212_v16 = vld [vmem:[%s2706_s2 + $0x30] sm:$0xff] }
 0x10a   :  { %1833 = vmatpush3.bf16.msra.mxu0 %v2259_v31  ;;  %1942 = vmatprep.subr.bf16.mxu1 %v2289_v2  ;;  %v2126_v18 = vpack.c.bf16 %v1213_v17, %v1212_v16 }
 0x10b   :  { %1834 = vmatprep.subr.bf16.mxu0 %v2289_v2  ;;  %1840 = vmatprep.mubr.msk.bf16.mxu0 %vm2291_vm2, %v2289_v2  ;;  %v687_v10 = vpop.permute.xlu1 %686 }
 0x10c   :  { %1948 = vmatprep.mubr.msk.bf16.mxu1 %vm2291_vm2, %v2289_v2  ;;  %v1144_v11 = vpop.permute.xlu0 %1143 }
 0x10d   :  { %1943 = vmatpush3.bf16.msra.mxu1 %v2260_v32 }
 0x10e   :  { %1835 = vmatpush3.bf16.msra.mxu0 %v2260_v32  ;;  %1944 = vmatprep.subr.bf16.mxu1 %v2289_v2 }
 0x10f   :  { %1836 = vmatprep.subr.bf16.mxu0 %v2289_v2 }
 0x111   :  { %1945 = vmatpush3.bf16.msra.mxu1 %v2261_v33 }
 0x112   :  { %1837 = vmatpush3.bf16.msra.mxu0 %v2261_v33  ;;  %1946 = vmatprep.subr.bf16.mxu1 %v2289_v2 }
 0x113   :  { %1838 = vmatprep.subr.bf16.mxu0 %v2289_v2 }
 0x115   :  { %1947 = vmatpush3.bf16.msra.mxu1 %v2262_v34 }
 0x116   :  { %1839 = vmatpush3.bf16.msra.mxu0 %v2262_v34  ;;  %1952 = vmatprep.subr.bf16.mxu1 %v2289_v2 }
 0x117   :  { %1844 = vmatprep.subr.bf16.mxu0 %v2289_v2 }
 0x118   :  { %1949 = vmatmul.mubr.msk.bf16.vlgmr.msra.gmra.mrb[0].mxu1 %vm90_vm5, %v866_v37 }
 0x119   :  { %1841 = vmatmul.mubr.msk.bf16.vlgmr.msra.gmra.mrb[0].mxu0 %vm90_vm5, %v211_v36  ;;  %1953 = vmatpush3.bf16.msra.mxu1 %v2263_v35 }
 0x11a   :  { %1845 = vmatpush3.bf16.msra.mxu0 %v2263_v35  ;;  %1954 = vmatprep.subr.bf16.mxu1 %v2289_v2 }
 0x11b   :  { %1846 = vmatprep.subr.bf16.mxu0 %v2289_v2  ;;  %1852 = vmatprep.mubr.msk.bf16.mxu0 %vm2291_vm2, %v2289_v2 }
 0x11c   :  { %1960 = vmatprep.mubr.msk.bf16.mxu1 %vm2291_vm2, %v2289_v2 }
 0x11d   :  { %1955 = vmatpush3.bf16.msra.mxu1 %v2264_v38 }
 0x11e   :  { %1847 = vmatpush3.bf16.msra.mxu0 %v2264_v38  ;;  %1956 = vmatprep.subr.bf16.mxu1 %v2289_v2 }
 0x11f   :  { %1848 = vmatprep.subr.bf16.mxu0 %v2289_v2 }
 0x121   :  { %1957 = vmatpush3.bf16.msra.mxu1 %v2265_v39 }
 0x122   :  { %1849 = vmatpush3.bf16.msra.mxu0 %v2265_v39  ;;  %1958 = vmatprep.subr.bf16.mxu1 %v2289_v2 }
 0x123   :  { %1850 = vmatprep.subr.bf16.mxu0 %v2289_v2 }
 0x125   :  { %1959 = vmatpush3.bf16.msra.mxu1 %v2266_v40 }
 0x126   :  { %1851 = vmatpush3.bf16.msra.mxu0 %v2266_v40  ;;  %1964 = vmatprep.subr.bf16.mxu1 %v2289_v2 }
 0x127   :  { %1856 = vmatprep.subr.bf16.mxu0 %v2289_v2 }
 0x128   :  { %1961 = vmatmul.mubr.msk.bf16.vlgmr.msra.gmra.mrb[0].mxu1 %vm90_vm5, %v2366_v20  ;;  %v1215_v20 = vld [vmem:[%s2706_s2 + $0x48] sm:$0xff] }
 0x129   :  { %1853 = vmatmul.mubr.msk.bf16.vlgmr.msra.gmra.mrb[0].mxu0 %vm90_vm5, %v2364_v19  ;;  %1965 = vmatpush3.bf16.msra.mxu1 %v2267_v41  ;;  %v1214_v19 = vld [vmem:[%s2706_s2 + $0x40] sm:$0xff] }
 0x12a   :  { %1857 = vmatpush3.bf16.msra.mxu0 %v2267_v41  ;;  %1966 = vmatprep.subr.bf16.mxu1 %v2289_v2  ;;  %v2129_v21 = vpack.c.bf16 %v1215_v20, %v1214_v19 }
 0x12b   :  { %1858 = vmatprep.subr.bf16.mxu0 %v2289_v2  ;;  %1864 = vmatprep.mubr.msk.bf16.mxu0 %vm2291_vm2, %v2289_v2 }
 0x12c   :  { %1972 = vmatprep.mubr.msk.bf16.mxu1 %vm2291_vm2, %v2289_v2 }
 0x12d   :  { %1967 = vmatpush3.bf16.msra.mxu1 %v2268_v42 }
 0x12e   :  { %1859 = vmatpush3.bf16.msra.mxu0 %v2268_v42  ;;  %1968 = vmatprep.subr.bf16.mxu1 %v2289_v2 }
 0x12f   :  { %1860 = vmatprep.subr.bf16.mxu0 %v2289_v2 }
 0x131   :  { %1969 = vmatpush3.bf16.msra.mxu1 %v2269_v43 }
 0x132   :  { %1861 = vmatpush3.bf16.msra.mxu0 %v2269_v43  ;;  %1970 = vmatprep.subr.bf16.mxu1 %v2289_v2 }
 0x133   :  { %1862 = vmatprep.subr.bf16.mxu0 %v2289_v2 }
 0x135   :  { %1971 = vmatpush3.bf16.msra.mxu1 %v2270_v44 }
 0x136   :  { %1863 = vmatpush3.bf16.msra.mxu0 %v2270_v44  ;;  %1976 = vmatprep.subr.bf16.mxu1 %v2289_v2 }
 0x137   :  { %1868 = vmatprep.subr.bf16.mxu0 %v2289_v2 }
 0x138   :  { %1973 = vmatmul.mubr.msk.bf16.vlgmr.msra.gmra.mrb[0].mxu1 %vm90_vm5, %v959_v47 }
 0x139   :  { %1865 = vmatmul.mubr.msk.bf16.vlgmr.msra.gmra.mrb[0].mxu0 %vm90_vm5, %v370_v46  ;;  %1977 = vmatpush3.bf16.msra.mxu1 %v2271_v45 }
 0x13a   :  { %1869 = vmatpush3.bf16.msra.mxu0 %v2271_v45  ;;  %1978 = vmatprep.subr.bf16.mxu1 %v2289_v2 }
 0x13b   :  { %1870 = vmatprep.subr.bf16.mxu0 %v2289_v2  ;;  %1876 = vmatprep.mubr.msk.bf16.mxu0 %vm2291_vm2, %v2289_v2 }
 0x13c   :  { %1984 = vmatprep.mubr.msk.bf16.mxu1 %vm2291_vm2, %v2289_v2 }
 0x13d   :  { %1979 = vmatpush3.bf16.msra.mxu1 %v2272_v48 }
 0x13e   :  { %1871 = vmatpush3.bf16.msra.mxu0 %v2272_v48  ;;  %1980 = vmatprep.subr.bf16.mxu1 %v2289_v2 }
 0x13f   :  { %1872 = vmatprep.subr.bf16.mxu0 %v2289_v2 }
 0x141   :  { %1981 = vmatpush3.bf16.msra.mxu1 %v2273_v49 }
 0x142   :  { %1873 = vmatpush3.bf16.msra.mxu0 %v2273_v49  ;;  %1982 = vmatprep.subr.bf16.mxu1 %v2289_v2 }
 0x143   :  { %1874 = vmatprep.subr.bf16.mxu0 %v2289_v2 }
 0x145   :  { %1983 = vmatpush3.bf16.msra.mxu1 %v2274_v50 }
 0x146   :  { %1875 = vmatpush3.bf16.msra.mxu0 %v2274_v50  ;;  %1988 = vmatprep.subr.bf16.mxu1 %v2289_v2 }
 0x147   :  { %1880 = vmatprep.subr.bf16.mxu0 %v2289_v2 }
 0x148   :  { %1985 = vmatmul.mubr.msk.bf16.vlgmr.msra.gmra.mrb[0].mxu1 %vm90_vm5, %v1005_v53 }
 0x149   :  { %1877 = vmatmul.mubr.msk.bf16.vlgmr.msra.gmra.mrb[0].mxu0 %vm90_vm5, %v449_v52  ;;  %1989 = vmatpush3.bf16.msra.mxu1 %v2275_v51 }
 0x14a   :  { %1881 = vmatpush3.bf16.msra.mxu0 %v2275_v51  ;;  %1990 = vmatprep.subr.bf16.mxu1 %v2289_v2 }
 0x14b   :  { %1882 = vmatprep.subr.bf16.mxu0 %v2289_v2  ;;  %1888 = vmatprep.mubr.msk.bf16.mxu0 %vm2291_vm2, %v2289_v2 }
 0x14c   :  { %1996 = vmatprep.mubr.msk.bf16.mxu1 %vm2291_vm2, %v2289_v2 }
 0x14d   :  { %1991 = vmatpush3.bf16.msra.mxu1 %v2276_v54 }
 0x14e   :  { %1883 = vmatpush3.bf16.msra.mxu0 %v2276_v54  ;;  %1992 = vmatprep.subr.bf16.mxu1 %v2289_v2 }
 0x14f   :  { %1884 = vmatprep.subr.bf16.mxu0 %v2289_v2 }
 0x151   :  { %1993 = vmatpush3.bf16.msra.mxu1 %v2277_v55 }
 0x152   :  { %1885 = vmatpush3.bf16.msra.mxu0 %v2277_v55  ;;  %1994 = vmatprep.subr.bf16.mxu1 %v2289_v2 }
 0x153   :  { %1886 = vmatprep.subr.bf16.mxu0 %v2289_v2 }
 0x155   :  { %1995 = vmatpush3.bf16.msra.mxu1 %v2278_v56 }
 0x156   :  { %1887 = vmatpush3.bf16.msra.mxu0 %v2278_v56  ;;  %2000 = vmatprep.subr.bf16.mxu1 %v2289_v2 }
 0x157   :  { %1892 = vmatprep.subr.bf16.mxu0 %v2289_v2 }
 0x158   :  { %1997 = vmatmul.mubr.msk.bf16.vlgmr.msra.gmra.mrb[0].mxu1 %vm90_vm5, %v2374_v24 }
 0x159   :  { %1889 = vmatmul.mubr.msk.bf16.vlgmr.msra.gmra.mrb[0].mxu0 %vm90_vm5, %v2372_v23  ;;  %2001 = vmatpush3.bf16.msra.mxu1 %v2279_v57  ;;  %v1217_v23 = vld [vmem:[%s2706_s2 + $0x58] sm:$0xff] }
 0x15a   :  { %1893 = vmatpush3.bf16.msra.mxu0 %v2279_v57  ;;  %2002 = vmatprep.subr.bf16.mxu1 %v2289_v2  ;;  %v2132_v24 = vpack.c.bf16 %v1217_v23, %v1216_v22 }
 0x15b   :  { %1894 = vmatprep.subr.bf16.mxu0 %v2289_v2  ;;  %1900 = vmatprep.mubr.msk.bf16.mxu0 %vm2291_vm2, %v2289_v2 }
 0x15c   :  { %2008 = vmatprep.mubr.msk.bf16.mxu1 %vm2291_vm2, %v2289_v2 }
 0x15d   :  { %2003 = vmatpush3.bf16.msra.mxu1 %v2280_v58 }
 0x15e   :  { %1895 = vmatpush3.bf16.msra.mxu0 %v2280_v58  ;;  %2004 = vmatprep.subr.bf16.mxu1 %v2289_v2 }
 0x15f   :  { %1896 = vmatprep.subr.bf16.mxu0 %v2289_v2 }
 0x161   :  { %2005 = vmatpush3.bf16.msra.mxu1 %v2281_v59 }
 0x162   :  { %1897 = vmatpush3.bf16.msra.mxu0 %v2281_v59  ;;  %2006 = vmatprep.subr.bf16.mxu1 %v2289_v2 }
 0x163   :  { %1898 = vmatprep.subr.bf16.mxu0 %v2289_v2 }
 0x165   :  { %2007 = vmatpush3.bf16.msra.mxu1 %v2282_v60 }
 0x166   :  { %1899 = vmatpush3.bf16.msra.mxu0 %v2282_v60  ;;  %2012 = vmatprep.subr.bf16.mxu1 %v2289_v2 }
 0x167   :  { %1904 = vmatprep.subr.bf16.mxu0 %v2289_v2 }
 0x168   :  { %2009 = vmatmul.mubr.msk.bf16.vlgmr.msra.gmra.mrb[0].mxu1 %vm90_vm5, %v1098_v63 }
 0x169   :  { %1901 = vmatmul.mubr.msk.bf16.vlgmr.msra.gmra.mrb[0].mxu0 %vm90_vm5, %v608_v62  ;;  %2013 = vmatpush3.bf16.msra.mxu1 %v2283_v61 }
 0x16a   :  { %1905 = vmatpush3.bf16.msra.mxu0 %v2283_v61  ;;  %2014 = vmatprep.subr.bf16.mxu1 %v2289_v2 }
 0x16b   :  { %1906 = vmatprep.subr.bf16.mxu0 %v2289_v2  ;;  %1912 = vmatprep.mubr.msk.bf16.mxu0 %vm2291_vm2, %v2289_v2 }
 0x16c   :  { %2020 = vmatprep.mubr.msk.bf16.mxu1 %vm2291_vm2, %v2289_v2 }
 0x16d   :  { %2015 = vmatpush3.bf16.msra.mxu1 %v2284_v0 }
 0x16e   :  { %1907 = vmatpush3.bf16.msra.mxu0 %v2284_v0  ;;  %2016 = vmatprep.subr.bf16.mxu1 %v2289_v2 }
 0x16f   :  { %1908 = vmatprep.subr.bf16.mxu0 %v2289_v2 }
 0x171   :  { %2017 = vmatpush3.bf16.msra.mxu1 %v2285_v1 }
 0x172   :  { %1909 = vmatpush3.bf16.msra.mxu0 %v2285_v1  ;;  %2018 = vmatprep.subr.bf16.mxu1 %v2289_v2 }
 0x173   :  { %1910 = vmatprep.subr.bf16.mxu0 %v2289_v2 }
 0x175   :  { %2019 = vmatpush3.bf16.msra.mxu1 %v2286_v3 }
 0x176   :  { %1911 = vmatpush3.bf16.msra.mxu0 %v2286_v3  ;;  %2140 = vmatprep.subr.bf16.mxu1 %v2294_v7 }
 0x177   :  { %2116 = vmatprep.subr.bf16.mxu0 %v2294_v7 }
 0x178   :  { %2021 = vmatmul.mubr.msk.bf16.vlgmr.msra.gmra.mrb[0].mxu1 %vm90_vm5, %v1144_v11  ;;  %v1376_v11 = vld [vmem:[%s2707_s3 + $0x10] sm:$0xff] }
 0x179   :  { %1913 = vmatmul.mubr.msk.bf16.vlgmr.msra.gmra.mrb[0].mxu0 %vm90_vm5, %v687_v10  ;;  %2142 = vmatpush3.bf16.msra.mxu1 %v2117_v6  ;;  %v1375_v10 = vld [vmem:[%s2707_s3 + $0x8] sm:$0xff]  ;;  %v2168_v14 = vpack.c.bf16 %v1377_v13, %v1376_v11 }
 0x17a   :  { %2118 = vmatpush3.bf16.msra.mxu0 %v2117_v6  ;;  %2143 = vmatprep.subr.bf16.mxu1 %v2294_v7 }
 0x17b   :  { %2119 = vmatprep.subr.bf16.mxu0 %v2294_v7  ;;  %2056 = vmatprep.mubr.msk.f32.mxu0 %vm2291_vm2, %v2289_v2 }
 0x17c   :  { %2091 = vmatprep.mubr.msk.f32.mxu1 %vm2291_vm2, %v2289_v2 }
 0x17d   :  { %2145 = vmatpush3.bf16.msra.mxu1 %v2120_v12 }
 0x17e   :  { %2121 = vmatpush3.bf16.msra.mxu0 %v2120_v12  ;;  %2146 = vmatprep.subr.bf16.mxu1 %v2294_v7  ;;  %v2165_v12 = vpack.c.bf16 %v1375_v10, %v1374_v9 }
 0x17f   :  { %2122 = vmatprep.subr.bf16.mxu0 %v2294_v7 }
 0x181   :  { %2148 = vmatpush3.bf16.msra.mxu1 %v2123_v15 }
 0x182   :  { %2124 = vmatpush3.bf16.msra.mxu0 %v2123_v15  ;;  %2149 = vmatprep.subr.bf16.mxu1 %v2294_v7 }
 0x183   :  { %2125 = vmatprep.subr.bf16.mxu0 %v2294_v7 }
 0x185   :  { %2151 = vmatpush3.bf16.msra.mxu1 %v2126_v18 }
 0x186   :  { %2127 = vmatpush3.bf16.msra.mxu0 %v2126_v18  ;;  %2152 = vmatprep.subr.bf16.mxu1 %v2294_v7 }
 0x187   :  { %2128 = vmatprep.subr.bf16.mxu0 %v2294_v7 }
 0x189   :  { %2154 = vmatpush3.bf16.msra.mxu1 %v2129_v21 }
 0x18a   :  { %2130 = vmatpush3.bf16.msra.mxu0 %v2129_v21  ;;  %2155 = vmatprep.subr.bf16.mxu1 %v2294_v7 }
 0x18b   :  { %2131 = vmatprep.subr.bf16.mxu0 %v2294_v7 }
 0x18d   :  { %2157 = vmatpush3.bf16.msra.mxu1 %v2132_v24 }
 0x18e   :  { %2133 = vmatpush3.bf16.msra.mxu0 %v2132_v24  ;;  %2158 = vmatprep.subr.bf16.mxu1 %v2294_v7  ;;  %v1367_v24 = vld [vmem:[%s2708_s4] sm:$0x1] }
 0x18f   :  { %2134 = vmatprep.subr.bf16.mxu0 %v2294_v7 }
 0x191   :  { %2160 = vmatpush3.bf16.msra.mxu1 %v2135_v27 }
 0x192   :  { %2136 = vmatpush3.bf16.msra.mxu0 %v2135_v27  ;;  %2161 = vmatprep.subr.bf16.mxu1 %v2294_v7 }
 0x193   :  { %2137 = vmatprep.subr.bf16.mxu0 %v2294_v7 }
 0x195   :  { %2163 = vmatpush3.bf16.msra.mxu1 %v2138_v30 }
 0x196   :  { %2139 = vmatpush3.bf16.msra.mxu0 %v2138_v30  ;;  %2170 = vmatprep.subr.bf16.mxu1 %v2294_v7  ;;  %v1526_v30 = vshrl.u32 %v1525_v29, 7 }
 0x197   :  { %2164 = vmatprep.subr.bf16.mxu0 %v2294_v7 }
 0x24b   :  { %v2664_v32 = vpop.f32.mrb[0].mxu1 }
 0x24c   :  { %v2662_v31 = vpop.f32.mrb[0].mxu0  ;;  %v1189_v35 = vsel %vm756_vm6, %v2664_v32, 0.0  ;;  %v1197_v36 = vmul.f32 %v2664_v32, %v2664_v32  ;;  %v2022_v38 = vpop.f32.mrb[1].mxu1 }
 0x24d   :  { %v757_v33 = vsel %vm756_vm6, %v2662_v31, 0.0  ;;  %v765_v34 = vmul.f32 %v2662_v31, %v2662_v31  ;;  %v1914_v37 = vpop.f32.mrb[1].mxu0  ;;  %v1190_v40 = vrot.slane %v1189_v35, 4  ;;  %v1185_v42 = vpop.f32.mrb[2].mxu1 }
 0x24e   :  { %v758_v39 = vrot.slane %v757_v33, 4  ;;  %v752_v41 = vpop.f32.mrb[2].mxu0  ;;  %v1198_v44 = vsel %vm756_vm6, %v1197_v36, 0.0  ;;  %v2023_v46 = vpop.f32.mrb[3].mxu1 }
 0x24f   :  { %v766_v43 = vsel %vm756_vm6, %v765_v34, 0.0  ;;  %v1915_v45 = vpop.f32.mrb[3].mxu0  ;;  %v1191_v49 = vadd.f32 %v1190_v40, %v1189_v35  ;;  %v1199_v50 = vrot.slane %v1198_v44, 4 }
 0x250   :  { %v759_v47 = vadd.f32 %v758_v39, %v757_v33  ;;  %v767_v48 = vrot.slane %v766_v43, 4  ;;  %v1527_v33 = vsub.s32 0, %v1526_v30 }
 0x251   :  { %v1192_v53 = vrot.slane %v1191_v49, 2  ;;  %v1200_v54 = vadd.f32 %v1199_v50, %v1198_v44 }
 0x252   :  { %v760_v51 = vrot.slane %v759_v47, 2  ;;  %v768_v52 = vadd.f32 %v767_v48, %v766_v43 }
 0x253   :  { %v1193_v57 = vadd.f32 %v1192_v53, %v1191_v49  ;;  %v1201_v58 = vrot.slane %v1200_v54, 2 }
 0x254   :  { %v761_v55 = vadd.f32 %v760_v51, %v759_v47  ;;  %v769_v56 = vrot.slane %v768_v52, 2 }
 0x255   :  { %v1194_v61 = vrot.slane %v1193_v57, 1  ;;  %v1202_v62 = vadd.f32 %v1201_v58, %v1200_v54 }
 0x256   :  { %v762_v59 = vrot.slane %v761_v55, 1  ;;  %v770_v60 = vadd.f32 %v769_v56, %v768_v52 }
 0x257   :  { %v1195_v1 = vadd.f32 %v1194_v61, %v1193_v57  ;;  %v1203_v3 = vrot.slane %v1202_v62, 1 }
 0x258   :  { %v763_v63 = vadd.f32 %v762_v59, %v761_v55  ;;  %v771_v0 = vrot.slane %v770_v60, 1 }
 0x259   :  { %v1204_v6 = vadd.f32 %v1203_v3, %v1202_v62 }
 0x25a   :  { %v1196_v4 = vadd.f32 %v1195_v1, %v763_v63  ;;  %v772_v5 = vadd.f32 %v771_v0, %v770_v60 }
 0x25c   :  { %2057 = vmatmul.mubr.f32.vlgmr.msra.gmra.mrb[4].mxu0 %v1196_v4  ;;  %v1205_v8 = vadd.f32 %v1204_v6, %v772_v5 }
 0x25d   :  { %2102 = vmatprep.mubr.msk.f32.mxu0 %vm2291_vm2, %v2289_v2  ;;  %2166 = vmatpush3.bf16.msra.mxu0 %v2165_v12 }
 0x25e   :  { %2092 = vmatmul.mubr.f32.vlgmr.msra.gmra.mrb[4].mxu1 %v1205_v8  ;;  %2167 = vmatprep.subr.bf16.mxu0 %v2294_v7 }
 0x25f   :  { %2113 = vmatprep.mubr.msk.f32.mxu1 %vm2291_vm2, %v2289_v2  ;;  %2172 = vmatpush3.bf16.msra.mxu1 %v2165_v12 }
 0x260   :  { %2173 = vmatprep.subr.bf16.mxu1 %v2294_v7 }
 0x261   :  { %2169 = vmatpush3.bf16.msra.mxu0 %v2168_v14 }
 0x263   :  { %2175 = vmatpush3.bf16.msra.mxu1 %v2168_v14 }
 0x32f   :  { %v1288_v2 = vpop.f32.mrb[4].mxu0 }
 0x330   :  { %v1362_v15 = vmul.f32 0.03125, %v1288_v2  ;;  %v2058_v16 = vpop.f32.mrb[5].mxu0 }
 0x331   :  { %v1358_v17 = vpop.f32.mrb[4].mxu1 }
 0x332   :  { %v1364_v18 = vmul.f32 %v1362_v15, %v1362_v15  ;;  %v1363_v19 = vmul.f32 0.03125, %v1358_v17  ;;  %v2093_v20 = vpop.f32.mrb[5].mxu1 }
 0x334   :  { %v1365_v21 = vsub.f32 %v1363_v19, %v1364_v18 }
 0x336   :  { %v1366_v22 = vmax.f32 %v1365_v21, 0.0 }
 0x338   :  { %v1368_v23 = vadd.f32 1e-05, %v1366_v22 }
 0x33a   :  { %2287 = vrsqrt.f32 %v1368_v23 }
 0x344   :  { %v2288_v25 = vpop.eup %2287 }
 0x345   :  { %v1370_v7 = vmul.f32 %v2288_v25, %v1367_v24 }
 0x347   :  { %2103 = vmatmul.mubr.msk.f32.vlgmr.msra.gmra.mrb[6].mxu0 %vm1378_vm7, %v1370_v7  ;;  %v1372_v27 = vmul.f32 %v1370_v7, %v1362_v15 }
 0x349   :  { %v1373_v28 = vsub.f32 %v1371_v26, %v1372_v27 }
 0x34b   :  { %2114 = vmatmul.mubr.msk.f32.vlgmr.msra.gmra.mrb[6].mxu1 %vm1378_vm7, %v1373_v28 }
 0x41a   :  { %v1448_v34 = vpop.f32.mrb[6].mxu0 }
 0x41b   :  { %v1528_v35 = vrot.slane %v1448_v34, %v1527_v33  ;;  %v2104_v36 = vpop.f32.mrb[7].mxu0 }
 0x41d   :  { %v1529_v37 = vmul.f32 %v1528_v35, %v2662_v31  ;;  %v1538_v38 = vmul.f32 %v1528_v35, %v2664_v32 }
 0x41e   :  { %v1521_v39 = vpop.f32.mrb[6].mxu1 }
 0x41f   :  { %v1533_v40 = vrot.slane %v1521_v39, %v1527_v33  ;;  %v2115_v41 = vpop.f32.mrb[7].mxu1 }
 0x421   :  { %v1534_v42 = vadd.f32 %v1533_v40, %v1529_v37  ;;  %v1539_v43 = vadd.f32 %v1538_v38, %v1533_v40 }
 0x423   :  { %v1535_v44 = vmax.f32 %v1534_v42, 0.0  ;;  %v1540_v45 = vmax.f32 %v1539_v43, 0.0 }
 0x425   :  { %v1536_v46 = vpack.c.bf16 %v1535_v44, %v1535_v44  ;;  %v1673_v47 = vpack.c.bf16 %v1540_v45, %v1540_v45 }
 0x427   :  { %1537 = vst [vmem:[%s2710_s6] sm:$0x3] %v1536_v46  ;;  %v1545_v48 = vrot.slane %v1673_v47, 6 }
 0x429   :  { %1547 = vst [vmem:[%s2710_s6] sm:$0xc] %v1545_v48 }

// kernel: classifier_forward.12
= control target key start
LH: loop header
LB: loop body
LE: loop exit
PB: predicated region body
PF: predicated region fallthrough
CT: control target
= control target key end

     0   :  { %vm25_vm0 = vcmask 523264   ;;  %vm28_vm1 = vcmask 519168   ;;  %v2995_v2 = vmov 0.0   ;;  %s2996_s25 = smov 32   ;;  %vm48_vm2 = vcmask 1047815   ;;  %s2998_s17 = smov 96   ;;  %s3605_s0 = inlined_call_operand.vmem [shape: bf16[8,128], index: 0, kind: input, shape index: {}]   ;;  %s3606_s1 = inlined_call_operand.vmem [shape: bf16[9,128,128], index: 1, kind: input, shape index: {}]   ;;  %s3607_s2 = inlined_call_operand.vmem [shape: f32[128,32], index: 2, kind: input, shape index: {}]   ;;  %s3608_s3 = inlined_call_operand.vmem [shape: f32[32,128], index: 3, kind: input, shape index: {}]   ;;  %s3609_s4 = inlined_call_operand.vmem [shape: f32[1,32], index: 4, kind: input, shape index: {}]   ;;  %s3610_s5 = inlined_call_operand.vmem [shape: f32[1,32], index: 5, kind: input, shape index: {}]   ;;  %s3611_s6 = inlined_call_operand.vmem [shape: bf16[8,128], index: 6, kind: output, shape index: {}]  }
   0x1   :  { %v41_v0 = vld [vmem:[%s3605_s0] sm:$0xc]  ;;  %v30_v1 = vld [vmem:[%s3605_s0] sm:$0x3]  ;;  %24 = vst [vmem:[#allocation2] sm:$0xff] %v2995_v2  ;;  %26 = vst.msk [vmem:[#allocation2 + $0x8] sm:$0xff] %vm25_vm0, %v2995_v2  ;;  %2339 = vmatprep.subr.bf16.mxu0 %v2995_v2  ;;  %2519 = vmatprep.subr.bf16.mxu1 %v2995_v2 }
   0x2   :  { %27 = vst [vmem:[#allocation2 + $0x10] sm:$0xf] %v2995_v2  ;;  %29 = vst.msk [vmem:[#allocation2 + $0x18] sm:$0xf] %vm28_vm1, %v2995_v2  ;;  %v42_v3 = vunpack.c.l.bf16 %v41_v0  ;;  %v31_v4 = vunpack.c.l.bf16 %v30_v1  ;;  %v2921_v7 = vld [vmem:[%s3606_s1 + $0x40] sm:$0xff]   ;;  %v2922_v8 = vld [vmem:[%s3606_s1 + $0x48] sm:$0xff]  }
   0x3   :  { %2340 = vmatpush3.bf16.msra.mxu0 %v2921_v7  ;;  %2520 = vmatpush3.bf16.msra.mxu1 %v2921_v7  ;;  %v2923_v9 = vld [vmem:[%s3606_s1 + $0x50] sm:$0xff]   ;;  %v2924_v10 = vld [vmem:[%s3606_s1 + $0x58] sm:$0xff]   ;;  %v2925_v11 = vld [vmem:[%s3606_s1 + $0x60] sm:$0xff]   ;;  %vm50_vm3 = vcmask 261127   ;;  %vm52_vm4 = vcmask 1042688   ;;  %vm54_vm5 = vcmask 256000  }
   0x4   :  { %v44_v5 = vrot.slane %v42_v3, 5  ;;  %v33_v6 = vrot.slane %v31_v4, 7  ;;  %2341 = vmatprep.subr.bf16.mxu0 %v2995_v2  ;;  %2521 = vmatprep.subr.bf16.mxu1 %v2995_v2  ;;  %v2926_v12 = vld [vmem:[%s3606_s1 + $0x68] sm:$0xff]   ;;  %v2927_v13 = vld [vmem:[%s3606_s1 + $0x70] sm:$0xff]   ;;  %v2928_v15 = vld [vmem:[%s3606_s1 + $0x78] sm:$0xff]   ;;  %vm37_vm6 = vcmask 1044737  }
   0x5   :  { %vm39_vm7 = vcmask 258049   ;;  %vm2997_vm8 = vmmov 0   ;;  %s2999_s18 = smov 64   ;;  %vm99_vm9 = vcmask 785408   ;;  %vm1092_vm10 = vcmask 1043456  }
   0x6   :  { %45 = vrot.lane.b32.xlu0 %v44_v5, %s2996_s25  ;;  %2355 = vmatprep.mubr.msk.bf16.mxu0 %vm2997_vm8, %v2995_v2  ;;  %v2929_v5 = vld [vmem:[%s3606_s1] sm:$0xff]   ;;  %vm1755_vm11 = vcmask 261120  }
   0x7   :  { %2342 = vmatpush3.bf16.msra.mxu0 %v2922_v8  ;;  %2522 = vmatpush3.bf16.msra.mxu1 %v2922_v8  ;;  %v2930_v8 = vld [vmem:[%s3606_s1 + $0x8] sm:$0xff]  }
   0x8   :  { %2343 = vmatprep.subr.bf16.mxu0 %v2995_v2  ;;  %2523 = vmatprep.subr.bf16.mxu1 %v2995_v2 }
   0x9   :  { %2535 = vmatprep.mubr.msk.bf16.mxu1 %vm2997_vm8, %v2995_v2 }
   0xa   :  { %34 = vrot.lane.b32.xlu0 %v33_v6, %s2996_s25 }
   0xb   :  { %2344 = vmatpush3.bf16.msra.mxu0 %v2923_v9  ;;  %2524 = vmatpush3.bf16.msra.mxu1 %v2923_v9 }
   0xc   :  { %2345 = vmatprep.subr.bf16.mxu0 %v2995_v2  ;;  %2525 = vmatprep.subr.bf16.mxu1 %v2995_v2 }
   0xf   :  { %2346 = vmatpush3.bf16.msra.mxu0 %v2924_v10  ;;  %2526 = vmatpush3.bf16.msra.mxu1 %v2924_v10 }
  0x10   :  { %2347 = vmatprep.subr.bf16.mxu0 %v2995_v2  ;;  %2527 = vmatprep.subr.bf16.mxu1 %v2995_v2 }
  0x13   :  { %2348 = vmatpush3.bf16.msra.mxu0 %v2925_v11  ;;  %2528 = vmatpush3.bf16.msra.mxu1 %v2925_v11 }
  0x14   :  { %2349 = vmatprep.subr.bf16.mxu0 %v2995_v2  ;;  %2529 = vmatprep.subr.bf16.mxu1 %v2995_v2 }
  0x17   :  { %2350 = vmatpush3.bf16.msra.mxu0 %v2926_v12  ;;  %2530 = vmatpush3.bf16.msra.mxu1 %v2926_v12  ;;  %v2931_v12 = vld [vmem:[%s3606_s1 + $0x10] sm:$0xff]  }
  0x18   :  { %2351 = vmatprep.subr.bf16.mxu0 %v2995_v2  ;;  %2531 = vmatprep.subr.bf16.mxu1 %v2995_v2 }
  0x1b   :  { %2352 = vmatpush3.bf16.msra.mxu0 %v2927_v13  ;;  %2532 = vmatpush3.bf16.msra.mxu1 %v2927_v13  ;;  %v2932_v13 = vld [vmem:[%s3606_s1 + $0x18] sm:$0xff]  }
  0x1c   :  { %2353 = vmatprep.subr.bf16.mxu0 %v2995_v2  ;;  %2533 = vmatprep.subr.bf16.mxu1 %v2995_v2 }
  0x1f   :  { %2354 = vmatpush3.bf16.msra.mxu0 %v2928_v15  ;;  %2534 = vmatpush3.bf16.msra.mxu1 %v2928_v15  ;;  %v2934_v15 = vld [vmem:[%s3606_s1 + $0x28] sm:$0xff]  }
  0x20   :  { %2359 = vmatprep.subr.bf16.mxu0 %v2995_v2  ;;  %2539 = vmatprep.subr.bf16.mxu1 %v2995_v2 }
  0x78   :  { %v46_v14 = vpop.permute.xlu0 %45 }
  0x79   :  { %49 = vst.msk [vmem:[#allocation2] sm:$0x80] %vm48_vm2, %v46_v14 }
  0x7a   :  { %51 = vst.msk [vmem:[#allocation2 + $0x8] sm:$0x80] %vm50_vm3, %v46_v14 }
  0x7b   :  { %53 = vst.msk [vmem:[#allocation2 + $0x10] sm:$0x7] %vm52_vm4, %v46_v14 }
  0x7c   :  { %55 = vst.msk [vmem:[#allocation2 + $0x18] sm:$0x7] %vm54_vm5, %v46_v14  ;;  %v35_v16 = vpop.permute.xlu0 %34  ;;  %v2933_v14 = vld [vmem:[%s3606_s1 + $0x20] sm:$0xff]  }
  0x7d   :  { %38 = vst.msk [vmem:[#allocation2] sm:$0x1e] %vm37_vm6, %v35_v16 }
  0x7e   :  { %40 = vst.msk [vmem:[#allocation2 + $0x8] sm:$0x1e] %vm39_vm7, %v35_v16  ;;  %v2935_v16 = vld [vmem:[%s3606_s1 + $0x30] sm:$0xff]  }
  0x80   :  { %v1110_v17 = vld [vmem:[#allocation2] sm:$0xc0] }
  0x81   :  { %v1307_v22 = vld [vmem:[#allocation2] sm:$0x80]  ;;  %v1113_v27 = vld [vmem:[#allocation2 + $0x8] sm:$0xc0] }
  0x82   :  { %v1111_v18 = vld [vmem:[#allocation2 + $0x10] sm:$0x3]  ;;  %v1308_v41 = vld [vmem:[#allocation2 + $0x8] sm:$0x80] }
  0x83   :  { %v1112_v19 = vpack.c.bf16 %v1111_v18, %v1110_v17  ;;  %v1309_v23 = vld [vmem:[#allocation2 + $0x10] sm:$0x7]  ;;  %v1114_v28 = vld [vmem:[#allocation2 + $0x18] sm:$0x3]  ;;  %v2937_v18 = vld [vmem:[%s3606_s1 + $0x80] sm:$0xff]  }
  0x84   :  { %v56_v21 = vld [vmem:[#allocation2] sm:$0xf]  ;;  %v1311_v30 = vpack.c.bf16 %v1309_v23, %v1307_v22  ;;  %v1115_v33 = vpack.c.bf16 %v1114_v28, %v1113_v27  ;;  %v1310_v42 = vld [vmem:[#allocation2 + $0x18] sm:$0x7]  ;;  %v1466_v60 = vld [vmem:[#allocation2 + $0x10] sm:$0xf] }
  0x85   :  { %v3093_v20 = vrot.slane %v1112_v19, 3  ;;  %v3097_v24 = vpack.c.bf16 %v56_v21, %v56_v21  ;;  %v507_v25 = vld [vmem:[#allocation2] sm:$0x1e]  ;;  %v74_v26 = vld [vmem:[#allocation2 + $0x8] sm:$0xf]  ;;  %v1312_v47 = vpack.c.bf16 %v1310_v42, %v1308_v41  ;;  %v1468_v62 = vpack.c.bf16 %v1466_v60, %v1466_v60  ;;  %v2936_v17 = vld [vmem:[%s3606_s1 + $0x38] sm:$0xff]  }
  0x86   :  { %v509_v29 = vpack.c.bf16 %v507_v25, %v507_v25  ;;  %v75_v32 = vpack.c.bf16 %v74_v26, %v74_v26  ;;  %v508_v34 = vld [vmem:[#allocation2 + $0x8] sm:$0x1e]  ;;  %v1314_v36 = vshrl.u32 %v1311_v30, 16  ;;  %v1317_v37 = vshll.u32 %v1311_v30, 16  ;;  %v860_v53 = vld [vmem:[#allocation2] sm:$0x3c] }
  0x87   :  { %1120 = vrot.lane.b32.xlu0 %v3093_v20, %s2998_s17  ;;  %95 = vrot.lane.b32.xlu1 %v3097_v24, %s2998_s17  ;;  %v1119_v38 = vrot.slane %v1115_v33, 3  ;;  %v510_v40 = vpack.c.bf16 %v508_v34, %v508_v34  ;;  %v1322_v50 = vshrl.u32 %v1312_v47, 16  ;;  %v1325_v51 = vshll.u32 %v1312_v47, 16  ;;  %v861_v61 = vld [vmem:[#allocation2 + $0x8] sm:$0x3c]  ;;  %v2939_v21 = vld [vmem:[%s3606_s1 + $0x90] sm:$0xff]  }
  0x88   :  { %v531_v31 = vshll.u32 %v509_v29, 16  ;;  %v529_v39 = vshrl.u32 %v509_v29, 16  ;;  %v1316_v44 = vrot.slane %v1314_v36, 3  ;;  %v1319_v45 = vrot.slane %v1317_v37, 4  ;;  %v1467_v1 = vld [vmem:[#allocation2 + $0x18] sm:$0xf] }
  0x89   :  { %v538_v46 = vshll.u32 %v510_v40, 16  ;;  %v536_v52 = vshrl.u32 %v510_v40, 16  ;;  %v1324_v55 = vrot.slane %v1322_v50, 3  ;;  %v1327_v56 = vrot.slane %v1325_v51, 4  ;;  %v2938_v19 = vld [vmem:[%s3606_s1 + $0x88] sm:$0xff]   ;;  %v2940_v22 = vld [vmem:[%s3606_s1 + $0x98] sm:$0xff]  }
  0x8a   :  { %v533_v35 = vrot.slane %v531_v31, 1  ;;  %v1320_v48 = vor.u32 %v1319_v45, %v1316_v44  ;;  %v862_v57 = vpack.c.bf16 %v860_v53, %v860_v53  ;;  %v863_v63 = vpack.c.bf16 %v861_v61, %v861_v61  ;;  %v2942_v23 = vld [vmem:[%s3606_s1 + $0xa8] sm:$0xff]   ;;  %v2944_v25 = vld [vmem:[%s3606_s1 + $0xb8] sm:$0xff]   ;;  %v2945_v28 = vld [vmem:[%s3606_s1 + $0xc0] sm:$0xff]  }
  0x8b   :  { %295 = vrot.lane.b32.xlu0 %v3097_v24, %s2999_s18  ;;  %97 = vrot.lane.b32.xlu1 %v75_v32, %s2998_s17  ;;  %v540_v49 = vrot.slane %v538_v46, 1  ;;  %v1328_v58 = vor.u32 %v1327_v56, %v1324_v55  ;;  %v1469_v3 = vpack.c.bf16 %v1467_v1, %v1467_v1  ;;  %v2946_v31 = vld [vmem:[%s3606_s1 + $0xc8] sm:$0xff]   ;;  %v2947_v34 = vld [vmem:[%s3606_s1 + $0xd0] sm:$0xff]   ;;  %v391_v37 = vld [vmem:[#allocation2] sm:$0x1e] }
  0x8c   :  { %v534_v43 = vor.u32 %v533_v35, %v529_v39  ;;  %v883_v59 = vrot.slane %v862_v57, 1  ;;  %v884_v0 = vrot.slane %v863_v63, 1  ;;  %v2948_v35 = vld [vmem:[%s3606_s1 + $0xd8] sm:$0xff]   ;;  %v2949_v36 = vld [vmem:[%s3606_s1 + $0xe0] sm:$0xff]   ;;  %v392_v39 = vpack.c.bf16 %v391_v37, %v391_v37  ;;  %v1255_v41 = vld [vmem:[#allocation2 + $0x10] sm:$0x7] }
  0x8d   :  { %v541_v54 = vor.u32 %v540_v49, %v536_v52  ;;  %v1254_v40 = vld [vmem:[#allocation2] sm:$0x80]  ;;  %v2951_v42 = vld [vmem:[%s3606_s1 + $0xf0] sm:$0xff]   ;;  %v2952_v45 = vld [vmem:[%s3606_s1 + $0xf8] sm:$0xff]  }
  0x8e   :  { %v1256_v44 = vpack.c.bf16 %v1255_v41, %v1254_v40  ;;  %v411_v49 = vshrl.u32 %v392_v39, 16  ;;  %v2953_v50 = vld [vmem:[%s3606_s1 + $0x100] sm:$0xff]   ;;  %v2955_v56 = vld [vmem:[%s3606_s1 + $0x110] sm:$0xff]   ;;  %v2956_v57 = vld [vmem:[%s3606_s1 + $0x118] sm:$0xff]  }
  0x8f   :  { %1207 = vrot.lane.b32.xlu0 %v3093_v20, %s2999_s18  ;;  %1122 = vrot.lane.b32.xlu1 %v1119_v38, %s2998_s17  ;;  %v2959_v60 = vld [vmem:[%s3606_s1 + $0x130] sm:$0xff]   ;;  %v2960_v61 = vld [vmem:[%s3606_s1 + $0x138] sm:$0xff]  }
  0x90   :  { %v1258_v47 = vshrl.u32 %v1256_v44, 16  ;;  %v2982_v37 = vld [vmem:[%s3606_s1 + $0x1e8] sm:$0xff]  }
  0x92   :  { %v1260_v52 = vrot.slane %v1258_v47, 3 }
  0x93   :  { %542 = vrot.lane.b32.xlu0 %v534_v43, %s2998_s17  ;;  %297 = vrot.lane.b32.xlu1 %v75_v32, %s2999_s18 }
  0x97   :  { %1329 = vrot.lane.b32.xlu0 %v1320_v48, %s2998_s17  ;;  %1209 = vrot.lane.b32.xlu1 %v1119_v38, %s2999_s18  ;;  %v2950_v38 = vld [vmem:[%s3606_s1 + $0xe8] sm:$0xff]  }
  0x9b   :  { %654 = vrot.lane.b32.xlu0 %v534_v43, %s2999_s18  ;;  %544 = vrot.lane.b32.xlu1 %v541_v54, %s2998_s17  ;;  %v413_v43 = vshll.u32 %v392_v39, 16  ;;  %v2984_v39 = vld [vmem:[%s3606_s1 + $0x1f8] sm:$0xff]  }
  0x9d   :  { %v415_v46 = vrot.slane %v413_v43, 1 }
  0x9f   :  { %1376 = vrot.lane.b32.xlu0 %v1320_v48, %s2999_s18  ;;  %1331 = vrot.lane.b32.xlu1 %v1328_v58, %s2998_s17  ;;  %v1261_v48 = vshll.u32 %v1256_v44, 16  ;;  %v416_v51 = vor.u32 %v415_v46, %v411_v49  ;;  %v2988_v49 = vld [vmem:[%s3606_s1 + $0x218] sm:$0xff]  }
  0xa1   :  { %v1263_v53 = vrot.slane %v1261_v48, 4  ;;  %v2987_v48 = vld [vmem:[%s3606_s1 + $0x210] sm:$0xff]  }
  0xa3   :  { %885 = vrot.lane.b32.xlu0 %v883_v59, %s2998_s17  ;;  %656 = vrot.lane.b32.xlu1 %v541_v54, %s2999_s18  ;;  %v2954_v54 = vld [vmem:[%s3606_s1 + $0x108] sm:$0xff]   ;;  %v1264_v55 = vor.u32 %v1263_v53, %v1260_v52  ;;  %v2991_v52 = vld [vmem:[%s3606_s1 + $0x230] sm:$0xff]  }
  0xa4   :  { %v2992_v53 = vld [vmem:[%s3606_s1 + $0x238] sm:$0xff]  }
  0xa7   :  { %1472 = vrot.lane.b32.xlu0 %v1468_v62, %s2998_s17  ;;  %1378 = vrot.lane.b32.xlu1 %v1328_v58, %s2999_s18  ;;  %v2957_v58 = vld [vmem:[%s3606_s1 + $0x120] sm:$0xff]  }
  0xab   :  { %997 = vrot.lane.b32.xlu0 %v883_v59, %s2999_s18  ;;  %887 = vrot.lane.b32.xlu1 %v884_v0, %s2998_s17  ;;  %v2958_v59 = vld [vmem:[%s3606_s1 + $0x128] sm:$0xff]  }
  0xaf   :  { %1519 = vrot.lane.b32.xlu0 %v1468_v62, %s2999_s18  ;;  %1474 = vrot.lane.b32.xlu1 %v1469_v3, %s2998_s17 }
  0xb3   :  { %999 = vrot.lane.b32.xlu1 %v884_v0, %s2999_s18  ;;  %v2961_v0 = vld [vmem:[%s3606_s1 + $0x140] sm:$0xff]  }
  0xb7   :  { %1521 = vrot.lane.b32.xlu1 %v1469_v3, %s2999_s18 }
  0xf9   :  { %v96_v4 = vpop.permute.xlu1 %95  ;;  %v1121_v9 = vpop.permute.xlu0 %1120 }
  0xfd   :  { %v98_v6 = vpop.permute.xlu1 %97  ;;  %v296_v27 = vpop.permute.xlu0 %295 }
  0xfe   :  { %v100_v7 = vsel %vm99_vm9, %v96_v4, %v98_v6  ;;  %v2962_v4 = vld [vmem:[%s3606_s1 + $0x148] sm:$0xff]  }
  0xff   :  { %2356 = vmatmul.mubr.bf16.vlgmr.msra.gmra.mrb[0].mxu0 %v100_v7  ;;  %v2963_v7 = vld [vmem:[%s3606_s1 + $0x150] sm:$0xff]  }
 0x100   :  { %2360 = vmatpush3.bf16.msra.mxu0 %v2929_v5  ;;  %2375 = vmatprep.mubr.msk.bf16.mxu0 %vm2997_vm8, %v2995_v2 }
 0x101   :  { %v1123_v10 = vpop.permute.xlu1 %1122  ;;  %2361 = vmatprep.subr.bf16.mxu0 %v2995_v2  ;;  %v1208_v32 = vpop.permute.xlu0 %1207 }
 0x102   :  { %v1124_v11 = vsel %vm99_vm9, %v1121_v9, %v1123_v10  ;;  %v2965_v9 = vld [vmem:[%s3606_s1 + $0x160] sm:$0xff]   ;;  %v2966_v10 = vld [vmem:[%s3606_s1 + $0x168] sm:$0xff]  }
 0x103   :  { %2536 = vmatmul.mubr.bf16.vlgmr.msra.gmra.mrb[0].mxu1 %v1124_v11  ;;  %v2967_v11 = vld [vmem:[%s3606_s1 + $0x170] sm:$0xff]  }
 0x104   :  { %2362 = vmatpush3.bf16.msra.mxu0 %v2930_v8  ;;  %2540 = vmatpush3.bf16.msra.mxu1 %v2929_v5 }
 0x105   :  { %2363 = vmatprep.subr.bf16.mxu0 %v2995_v2  ;;  %2541 = vmatprep.subr.bf16.mxu1 %v2995_v2  ;;  %v298_v26 = vpop.permute.xlu1 %297  ;;  %v543_v63 = vpop.permute.xlu0 %542 }
 0x106   :  { %2555 = vmatprep.mubr.msk.bf16.mxu1 %vm2997_vm8, %v2995_v2  ;;  %v300_v29 = vsel %vm25_vm0, %v296_v27, %v298_v26  ;;  %v749_v26 = vld [vmem:[#allocation2] sm:$0x3c]  ;;  %v2976_v27 = vld [vmem:[%s3606_s1 + $0x1b8] sm:$0xff]  }
 0x108   :  { %2364 = vmatpush3.bf16.msra.mxu0 %v2931_v12  ;;  %2542 = vmatpush3.bf16.msra.mxu1 %v2930_v8  ;;  %v2964_v8 = vld [vmem:[%s3606_s1 + $0x158] sm:$0xff]  }
 0x109   :  { %2365 = vmatprep.subr.bf16.mxu0 %v2995_v2  ;;  %2543 = vmatprep.subr.bf16.mxu1 %v2995_v2  ;;  %v1210_v30 = vpop.permute.xlu1 %1209  ;;  %v1330_v5 = vpop.permute.xlu0 %1329 }
 0x10a   :  { %v1211_v33 = vsel %vm25_vm0, %v1208_v32, %v1210_v30  ;;  %v2978_v32 = vld [vmem:[%s3606_s1 + $0x1c8] sm:$0xff]  }
 0x10c   :  { %2366 = vmatpush3.bf16.msra.mxu0 %v2932_v13  ;;  %2544 = vmatpush3.bf16.msra.mxu1 %v2931_v12  ;;  %v2968_v12 = vld [vmem:[%s3606_s1 + $0x178] sm:$0xff]  }
 0x10d   :  { %2367 = vmatprep.subr.bf16.mxu0 %v2995_v2  ;;  %2545 = vmatprep.subr.bf16.mxu1 %v2995_v2  ;;  %v545_v62 = vpop.permute.xlu1 %544 }
 0x10e   :  { %v546_v1 = vsel %vm99_vm9, %v543_v63, %v545_v62 }
 0x110   :  { %2368 = vmatpush3.bf16.msra.mxu0 %v2933_v14  ;;  %2546 = vmatpush3.bf16.msra.mxu1 %v2932_v13 }
 0x111   :  { %2369 = vmatprep.subr.bf16.mxu0 %v2995_v2  ;;  %2547 = vmatprep.subr.bf16.mxu1 %v2995_v2  ;;  %v1332_v3 = vpop.permute.xlu1 %1331 }
 0x112   :  { %v1333_v6 = vsel %vm99_vm9, %v1330_v5, %v1332_v3  ;;  %v1587_v3 = vld [vmem:[%s3607_s2 + $0x20] sm:$0xff] }
 0x114   :  { %2370 = vmatpush3.bf16.msra.mxu0 %v2934_v15  ;;  %2548 = vmatpush3.bf16.msra.mxu1 %v2933_v14  ;;  %v655_v14 = vpop.permute.xlu0 %654 }
 0x115   :  { %2371 = vmatprep.subr.bf16.mxu0 %v2995_v2  ;;  %2549 = vmatprep.subr.bf16.mxu1 %v2995_v2  ;;  %v657_v13 = vpop.permute.xlu1 %656 }
 0x118   :  { %2372 = vmatpush3.bf16.msra.mxu0 %v2935_v16  ;;  %2550 = vmatpush3.bf16.msra.mxu1 %v2934_v15  ;;  %v2969_v15 = vld [vmem:[%s3606_s1 + $0x180] sm:$0xff]  }
 0x119   :  { %2373 = vmatprep.subr.bf16.mxu0 %v2995_v2  ;;  %2551 = vmatprep.subr.bf16.mxu1 %v2995_v2 }
 0x11c   :  { %2374 = vmatpush3.bf16.msra.mxu0 %v2936_v17  ;;  %2552 = vmatpush3.bf16.msra.mxu1 %v2935_v16  ;;  %v658_v16 = vsel %vm25_vm0, %v655_v14, %v657_v13  ;;  %v1593_v13 = vld [vmem:[%s3607_s2 + $0x50] sm:$0xff]  ;;  %v1594_v14 = vld [vmem:[%s3607_s2 + $0x58] sm:$0xff] }
 0x11d   :  { %2379 = vmatprep.subr.bf16.mxu0 %v2995_v2  ;;  %2553 = vmatprep.subr.bf16.mxu1 %v2995_v2 }
 0x11f   :  { %2376 = vmatmul.mubr.bf16.vlgmr.msra.gmra.mrb[0].mxu0 %v3097_v24  ;;  %v2943_v24 = vld [vmem:[%s3606_s1 + $0xb0] sm:$0xff]  }
 0x120   :  { %2380 = vmatpush3.bf16.msra.mxu0 %v2937_v18  ;;  %2554 = vmatpush3.bf16.msra.mxu1 %v2936_v17  ;;  %v1379_v17 = vpop.permute.xlu1 %1378 }
 0x121   :  { %2381 = vmatprep.subr.bf16.mxu0 %v2995_v2  ;;  %2559 = vmatprep.subr.bf16.mxu1 %v2995_v2 }
 0x122   :  { %2395 = vmatprep.mubr.msk.bf16.mxu0 %vm2997_vm8, %v2995_v2 }
 0x123   :  { %2556 = vmatmul.mubr.bf16.vlgmr.msra.gmra.mrb[0].mxu1 %v3093_v20  ;;  %v2941_v20 = vld [vmem:[%s3606_s1 + $0xa0] sm:$0xff]  }
 0x124   :  { %2382 = vmatpush3.bf16.msra.mxu0 %v2938_v19  ;;  %2560 = vmatpush3.bf16.msra.mxu1 %v2937_v18  ;;  %v2970_v18 = vld [vmem:[%s3606_s1 + $0x188] sm:$0xff]   ;;  %v888_v40 = vpop.permute.xlu1 %887 }
 0x125   :  { %2383 = vmatprep.subr.bf16.mxu0 %v2995_v2  ;;  %2561 = vmatprep.subr.bf16.mxu1 %v2995_v2 }
 0x126   :  { %2575 = vmatprep.mubr.msk.bf16.mxu1 %vm2997_vm8, %v2995_v2 }
 0x128   :  { %2384 = vmatpush3.bf16.msra.mxu0 %v2939_v21  ;;  %2562 = vmatpush3.bf16.msra.mxu1 %v2938_v19  ;;  %v1377_v19 = vpop.permute.xlu0 %1376  ;;  %v1475_v44 = vpop.permute.xlu1 %1474 }
 0x129   :  { %2385 = vmatprep.subr.bf16.mxu0 %v2995_v2  ;;  %2563 = vmatprep.subr.bf16.mxu1 %v2995_v2 }
 0x12c   :  { %2386 = vmatpush3.bf16.msra.mxu0 %v2940_v22  ;;  %2564 = vmatpush3.bf16.msra.mxu1 %v2939_v21  ;;  %v1380_v21 = vsel %vm25_vm0, %v1377_v19, %v1379_v17  ;;  %v886_v41 = vpop.permute.xlu0 %885  ;;  %v1596_v17 = vld [vmem:[%s3607_s2 + $0x68] sm:$0xff]  ;;  %v1597_v19 = vld [vmem:[%s3607_s2 + $0x70] sm:$0xff] }
 0x12d   :  { %2387 = vmatprep.subr.bf16.mxu0 %v2995_v2  ;;  %2565 = vmatprep.subr.bf16.mxu1 %v2995_v2  ;;  %v889_v43 = vsel %vm99_vm9, %v886_v41, %v888_v40 }
 0x130   :  { %2388 = vmatpush3.bf16.msra.mxu0 %v2941_v20  ;;  %2566 = vmatpush3.bf16.msra.mxu1 %v2940_v22  ;;  %v2971_v22 = vld [vmem:[%s3606_s1 + $0x190] sm:$0xff]   ;;  %v1473_v46 = vpop.permute.xlu0 %1472 }
 0x131   :  { %2389 = vmatprep.subr.bf16.mxu0 %v2995_v2  ;;  %2567 = vmatprep.subr.bf16.mxu1 %v2995_v2  ;;  %v1476_v47 = vsel %vm99_vm9, %v1473_v46, %v1475_v44 }
 0x134   :  { %2390 = vmatpush3.bf16.msra.mxu0 %v2942_v23  ;;  %2568 = vmatpush3.bf16.msra.mxu1 %v2941_v20  ;;  %v2972_v20 = vld [vmem:[%s3606_s1 + $0x198] sm:$0xff]  }
 0x135   :  { %2391 = vmatprep.subr.bf16.mxu0 %v2995_v2  ;;  %2569 = vmatprep.subr.bf16.mxu1 %v2995_v2 }
 0x138   :  { %2392 = vmatpush3.bf16.msra.mxu0 %v2943_v24  ;;  %2570 = vmatpush3.bf16.msra.mxu1 %v2942_v23  ;;  %v2973_v23 = vld [vmem:[%s3606_s1 + $0x1a0] sm:$0xff]  }
 0x139   :  { %2393 = vmatprep.subr.bf16.mxu0 %v2995_v2  ;;  %2571 = vmatprep.subr.bf16.mxu1 %v2995_v2 }
 0x13c   :  { %2394 = vmatpush3.bf16.msra.mxu0 %v2944_v25  ;;  %2572 = vmatpush3.bf16.msra.mxu1 %v2943_v24  ;;  %v2974_v24 = vld [vmem:[%s3606_s1 + $0x1a8] sm:$0xff]  }
 0x13d   :  { %2399 = vmatprep.subr.bf16.mxu0 %v2995_v2  ;;  %2573 = vmatprep.subr.bf16.mxu1 %v2995_v2 }
 0x13f   :  { %2396 = vmatmul.mubr.bf16.vlgmr.msra.gmra.mrb[0].mxu0 %v300_v29  ;;  %v2977_v29 = vld [vmem:[%s3606_s1 + $0x1c0] sm:$0xff]  }
 0x140   :  { %2400 = vmatpush3.bf16.msra.mxu0 %v2945_v28  ;;  %2574 = vmatpush3.bf16.msra.mxu1 %v2944_v25  ;;  %v2975_v25 = vld [vmem:[%s3606_s1 + $0x1b0] sm:$0xff]  }
 0x141   :  { %2401 = vmatprep.subr.bf16.mxu0 %v2995_v2  ;;  %2579 = vmatprep.subr.bf16.mxu1 %v2995_v2 }
 0x142   :  { %2415 = vmatprep.mubr.msk.bf16.mxu0 %vm2997_vm8, %v2995_v2 }
 0x143   :  { %2576 = vmatmul.mubr.bf16.vlgmr.msra.gmra.mrb[0].mxu1 %v1211_v33 }
 0x144   :  { %2402 = vmatpush3.bf16.msra.mxu0 %v2946_v31  ;;  %2580 = vmatpush3.bf16.msra.mxu1 %v2945_v28  ;;  %v750_v28 = vpack.c.bf16 %v749_v26, %v749_v26 }
 0x145   :  { %2403 = vmatprep.subr.bf16.mxu0 %v2995_v2  ;;  %2581 = vmatprep.subr.bf16.mxu1 %v2995_v2 }
 0x146   :  { %2595 = vmatprep.mubr.msk.bf16.mxu1 %vm2997_vm8, %v2995_v2  ;;  %v769_v30 = vrot.slane %v750_v28, 1 }
 0x148   :  { %2404 = vmatpush3.bf16.msra.mxu0 %v2947_v34  ;;  %2582 = vmatpush3.bf16.msra.mxu1 %v2946_v31  ;;  %v1423_v31 = vld [vmem:[#allocation2 + $0x10] sm:$0xf] }
 0x149   :  { %2405 = vmatprep.subr.bf16.mxu0 %v2995_v2  ;;  %2583 = vmatprep.subr.bf16.mxu1 %v2995_v2  ;;  %v1424_v33 = vpack.c.bf16 %v1423_v31, %v1423_v31 }
 0x14c   :  { %2406 = vmatpush3.bf16.msra.mxu0 %v2948_v35  ;;  %2584 = vmatpush3.bf16.msra.mxu1 %v2947_v34  ;;  %v2979_v34 = vld [vmem:[%s3606_s1 + $0x1d0] sm:$0xff]  }
 0x14d   :  { %2407 = vmatprep.subr.bf16.mxu0 %v2995_v2  ;;  %2585 = vmatprep.subr.bf16.mxu1 %v2995_v2 }
 0x150   :  { %2408 = vmatpush3.bf16.msra.mxu0 %v2949_v36  ;;  %2586 = vmatpush3.bf16.msra.mxu1 %v2948_v35  ;;  %v2980_v35 = vld [vmem:[%s3606_s1 + $0x1d8] sm:$0xff]  }
 0x151   :  { %2409 = vmatprep.subr.bf16.mxu0 %v2995_v2  ;;  %2587 = vmatprep.subr.bf16.mxu1 %v2995_v2 }
 0x154   :  { %2410 = vmatpush3.bf16.msra.mxu0 %v2950_v38  ;;  %2588 = vmatpush3.bf16.msra.mxu1 %v2949_v36  ;;  %v2981_v36 = vld [vmem:[%s3606_s1 + $0x1e0] sm:$0xff]  }
 0x155   :  { %2411 = vmatprep.subr.bf16.mxu0 %v2995_v2  ;;  %2589 = vmatprep.subr.bf16.mxu1 %v2995_v2 }
 0x158   :  { %2412 = vmatpush3.bf16.msra.mxu0 %v2951_v42  ;;  %2590 = vmatpush3.bf16.msra.mxu1 %v2950_v38  ;;  %v2983_v38 = vld [vmem:[%s3606_s1 + $0x1f0] sm:$0xff]  }
 0x159   :  { %2413 = vmatprep.subr.bf16.mxu0 %v2995_v2  ;;  %2591 = vmatprep.subr.bf16.mxu1 %v2995_v2 }
 0x15c   :  { %2414 = vmatpush3.bf16.msra.mxu0 %v2952_v45  ;;  %2592 = vmatpush3.bf16.msra.mxu1 %v2951_v42  ;;  %v2985_v42 = vld [vmem:[%s3606_s1 + $0x200] sm:$0xff]  }
 0x15d   :  { %2419 = vmatprep.subr.bf16.mxu0 %v2995_v2  ;;  %2593 = vmatprep.subr.bf16.mxu1 %v2995_v2 }
 0x15f   :  { %2416 = vmatmul.mubr.bf16.vlgmr.msra.gmra.mrb[0].mxu0 %v416_v51  ;;  %v2990_v51 = vld [vmem:[%s3606_s1 + $0x228] sm:$0xff]  }
 0x160   :  { %2420 = vmatpush3.bf16.msra.mxu0 %v2953_v50  ;;  %2594 = vmatpush3.bf16.msra.mxu1 %v2952_v45  ;;  %v2986_v45 = vld [vmem:[%s3606_s1 + $0x208] sm:$0xff]  }
 0x161   :  { %2421 = vmatprep.subr.bf16.mxu0 %v2995_v2  ;;  %2599 = vmatprep.subr.bf16.mxu1 %v2995_v2 }
 0x162   :  { %2435 = vmatprep.mubr.msk.bf16.mxu0 %vm2997_vm8, %v2995_v2 }
 0x163   :  { %2596 = vmatmul.mubr.bf16.vlgmr.msra.gmra.mrb[0].mxu1 %v1264_v55  ;;  %v1583_v55 = vld [vmem:[%s3607_s2] sm:$0xff] }
 0x164   :  { %2422 = vmatpush3.bf16.msra.mxu0 %v2954_v54  ;;  %2600 = vmatpush3.bf16.msra.mxu1 %v2953_v50  ;;  %v2989_v50 = vld [vmem:[%s3606_s1 + $0x220] sm:$0xff]  }
 0x165   :  { %2423 = vmatprep.subr.bf16.mxu0 %v2995_v2  ;;  %2601 = vmatprep.subr.bf16.mxu1 %v2995_v2 }
 0x166   :  { %2615 = vmatprep.mubr.msk.bf16.mxu1 %vm2997_vm8, %v2995_v2 }
 0x168   :  { %2424 = vmatpush3.bf16.msra.mxu0 %v2955_v56  ;;  %2602 = vmatpush3.bf16.msra.mxu1 %v2954_v54  ;;  %v1000_v54 = vpop.permute.xlu1 %999 }
 0x169   :  { %2425 = vmatprep.subr.bf16.mxu0 %v2995_v2  ;;  %2603 = vmatprep.subr.bf16.mxu1 %v2995_v2 }
 0x16c   :  { %2426 = vmatpush3.bf16.msra.mxu0 %v2956_v57  ;;  %2604 = vmatpush3.bf16.msra.mxu1 %v2955_v56  ;;  %v1584_v56 = vld [vmem:[%s3607_s2 + $0x8] sm:$0xff]  ;;  %v1522_v63 = vpop.permute.xlu1 %1521 }
 0x16d   :  { %2427 = vmatprep.subr.bf16.mxu0 %v2995_v2  ;;  %2605 = vmatprep.subr.bf16.mxu1 %v2995_v2 }
 0x170   :  { %2428 = vmatpush3.bf16.msra.mxu0 %v2957_v58  ;;  %2606 = vmatpush3.bf16.msra.mxu1 %v2956_v57  ;;  %v998_v57 = vpop.permute.xlu0 %997 }
 0x171   :  { %2429 = vmatprep.subr.bf16.mxu0 %v2995_v2  ;;  %2607 = vmatprep.subr.bf16.mxu1 %v2995_v2  ;;  %v1001_v62 = vsel %vm25_vm0, %v998_v57, %v1000_v54 }
 0x174   :  { %2430 = vmatpush3.bf16.msra.mxu0 %v2958_v59  ;;  %2608 = vmatpush3.bf16.msra.mxu1 %v2957_v58  ;;  %v2792_v58 = vpack.c.bf16 %v1584_v56, %v1583_v55 }
 0x175   :  { %2431 = vmatprep.subr.bf16.mxu0 %v2995_v2  ;;  %2609 = vmatprep.subr.bf16.mxu1 %v2995_v2 }
 0x178   :  { %2432 = vmatpush3.bf16.msra.mxu0 %v2959_v60  ;;  %2610 = vmatpush3.bf16.msra.mxu1 %v2958_v59  ;;  %v3000_v59 = vmov 0.0|0.0  }
 0x179   :  { %2433 = vmatprep.subr.bf16.mxu0 %v2995_v2  ;;  %2611 = vmatprep.subr.bf16.mxu1 %v2995_v2 }
 0x17c   :  { %2434 = vmatpush3.bf16.msra.mxu0 %v2960_v61  ;;  %2612 = vmatpush3.bf16.msra.mxu1 %v2959_v60  ;;  %v1585_v60 = vld [vmem:[%s3607_s2 + $0x10] sm:$0xff] }
 0x17d   :  { %2439 = vmatprep.subr.bf16.mxu0 %v2995_v2  ;;  %2613 = vmatprep.subr.bf16.mxu1 %v2995_v2 }
 0x17f   :  { %2436 = vmatmul.mubr.bf16.vlgmr.msra.gmra.mrb[0].mxu0 %v546_v1  ;;  %v1520_v1 = vpop.permute.xlu0 %1519 }
 0x180   :  { %2440 = vmatpush3.bf16.msra.mxu0 %v2961_v0  ;;  %2614 = vmatpush3.bf16.msra.mxu1 %v2960_v61  ;;  %v1586_v61 = vld [vmem:[%s3607_s2 + $0x18] sm:$0xff]  ;;  %v1523_v5 = vsel %vm25_vm0, %v1520_v1, %v1522_v63  ;;  %v1751_v63 = vld [vmem:[%s3608_s3] sm:$0xff]  ;;  %v1753_v1 = vld [vmem:[%s3608_s3 + $0x10] sm:$0xff] }
 0x181   :  { %2441 = vmatprep.subr.bf16.mxu0 %v2995_v2  ;;  %2619 = vmatprep.subr.bf16.mxu1 %v2995_v2 }
 0x182   :  { %2455 = vmatprep.mubr.msk.bf16.mxu0 %vm2997_vm8, %v2995_v2 }
 0x183   :  { %2616 = vmatmul.mubr.bf16.vlgmr.msra.gmra.mrb[0].mxu1 %v1333_v6 }
 0x184   :  { %2442 = vmatpush3.bf16.msra.mxu0 %v2962_v4  ;;  %2620 = vmatpush3.bf16.msra.mxu1 %v2961_v0  ;;  %v2795_v0 = vpack.c.bf16 %v1586_v61, %v1585_v60 }
 0x185   :  { %2443 = vmatprep.subr.bf16.mxu0 %v2995_v2  ;;  %2621 = vmatprep.subr.bf16.mxu1 %v2995_v2 }
 0x186   :  { %2635 = vmatprep.mubr.msk.bf16.mxu1 %vm2997_vm8, %v2995_v2 }
 0x188   :  { %2444 = vmatpush3.bf16.msra.mxu0 %v2963_v7  ;;  %2622 = vmatpush3.bf16.msra.mxu1 %v2962_v4  ;;  %v1588_v4 = vld [vmem:[%s3607_s2 + $0x28] sm:$0xff] }
 0x189   :  { %2445 = vmatprep.subr.bf16.mxu0 %v2995_v2  ;;  %2623 = vmatprep.subr.bf16.mxu1 %v2995_v2  ;;  %v2798_v6 = vpack.c.bf16 %v1588_v4, %v1587_v3  ;;  %v1754_v4 = vld [vmem:[%s3608_s3 + $0x18] sm:$0xff] }
 0x18c   :  { %2446 = vmatpush3.bf16.msra.mxu0 %v2964_v8  ;;  %2624 = vmatpush3.bf16.msra.mxu1 %v2963_v7  ;;  %v1589_v7 = vld [vmem:[%s3607_s2 + $0x30] sm:$0xff] }
 0x18d   :  { %2447 = vmatprep.subr.bf16.mxu0 %v2995_v2  ;;  %2625 = vmatprep.subr.bf16.mxu1 %v2995_v2 }
 0x190   :  { %2448 = vmatpush3.bf16.msra.mxu0 %v2965_v9  ;;  %2626 = vmatpush3.bf16.msra.mxu1 %v2964_v8  ;;  %v1590_v8 = vld [vmem:[%s3607_s2 + $0x38] sm:$0xff] }
 0x191   :  { %2449 = vmatprep.subr.bf16.mxu0 %v2995_v2  ;;  %2627 = vmatprep.subr.bf16.mxu1 %v2995_v2 }
 0x194   :  { %2450 = vmatpush3.bf16.msra.mxu0 %v2966_v10  ;;  %2628 = vmatpush3.bf16.msra.mxu1 %v2965_v9  ;;  %v2801_v9 = vpack.c.bf16 %v1590_v8, %v1589_v7 }
 0x195   :  { %2451 = vmatprep.subr.bf16.mxu0 %v2995_v2  ;;  %2629 = vmatprep.subr.bf16.mxu1 %v2995_v2 }
 0x198   :  { %2452 = vmatpush3.bf16.msra.mxu0 %v2967_v11  ;;  %2630 = vmatpush3.bf16.msra.mxu1 %v2966_v10  ;;  %v1591_v10 = vld [vmem:[%s3607_s2 + $0x40] sm:$0xff] }
 0x199   :  { %2453 = vmatprep.subr.bf16.mxu0 %v2995_v2  ;;  %2631 = vmatprep.subr.bf16.mxu1 %v2995_v2 }
 0x19c   :  { %2454 = vmatpush3.bf16.msra.mxu0 %v2968_v12  ;;  %2632 = vmatpush3.bf16.msra.mxu1 %v2967_v11  ;;  %v1592_v11 = vld [vmem:[%s3607_s2 + $0x48] sm:$0xff] }
 0x19d   :  { %2459 = vmatprep.subr.bf16.mxu0 %v2995_v2  ;;  %2633 = vmatprep.subr.bf16.mxu1 %v2995_v2 }
 0x19f   :  { %2456 = vmatmul.mubr.bf16.vlgmr.msra.gmra.mrb[0].mxu0 %v658_v16  ;;  %v1595_v16 = vld [vmem:[%s3607_s2 + $0x60] sm:$0xff] }
 0x1a0   :  { %2460 = vmatpush3.bf16.msra.mxu0 %v2969_v15  ;;  %2634 = vmatpush3.bf16.msra.mxu1 %v2968_v12  ;;  %v2804_v12 = vpack.c.bf16 %v1592_v11, %v1591_v10 }
 0x1a1   :  { %2461 = vmatprep.subr.bf16.mxu0 %v2995_v2  ;;  %2639 = vmatprep.subr.bf16.mxu1 %v2995_v2 }
 0x1a2   :  { %2475 = vmatprep.mubr.msk.bf16.mxu0 %vm2997_vm8, %v2995_v2 }
 0x1a3   :  { %2636 = vmatmul.mubr.bf16.vlgmr.msra.gmra.mrb[0].mxu1 %v1380_v21  ;;  %v1598_v21 = vld [vmem:[%s3607_s2 + $0x78] sm:$0xff] }
 0x1a4   :  { %2462 = vmatpush3.bf16.msra.mxu0 %v2970_v18  ;;  %2640 = vmatpush3.bf16.msra.mxu1 %v2969_v15  ;;  %v2807_v15 = vpack.c.bf16 %v1594_v14, %v1593_v13 }
 0x1a5   :  { %2463 = vmatprep.subr.bf16.mxu0 %v2995_v2  ;;  %2641 = vmatprep.subr.bf16.mxu1 %v2995_v2 }
 0x1a6   :  { %2655 = vmatprep.mubr.msk.bf16.mxu1 %vm2997_vm8, %v2995_v2 }
 0x1a8   :  { %2464 = vmatpush3.bf16.msra.mxu0 %v2971_v22  ;;  %2642 = vmatpush3.bf16.msra.mxu1 %v2970_v18  ;;  %v2810_v18 = vpack.c.bf16 %v1596_v17, %v1595_v16  ;;  %v1748_v17 = vld [vmem:[%s3610_s5] sm:$0x1] }
 0x1a9   :  { %2465 = vmatprep.subr.bf16.mxu0 %v2995_v2  ;;  %2643 = vmatprep.subr.bf16.mxu1 %v2995_v2 }
 0x1ac   :  { %2466 = vmatpush3.bf16.msra.mxu0 %v2972_v20  ;;  %2644 = vmatpush3.bf16.msra.mxu1 %v2971_v22  ;;  %v2813_v22 = vpack.c.bf16 %v1598_v21, %v1597_v19  ;;  %v1902_v21 = vlaneseq }
 0x1ad   :  { %2467 = vmatprep.subr.bf16.mxu0 %v2995_v2  ;;  %2645 = vmatprep.subr.bf16.mxu1 %v2995_v2 }
 0x1b0   :  { %2468 = vmatpush3.bf16.msra.mxu0 %v2973_v23  ;;  %2646 = vmatpush3.bf16.msra.mxu1 %v2972_v20 }
 0x1b1   :  { %2469 = vmatprep.subr.bf16.mxu0 %v2995_v2  ;;  %2647 = vmatprep.subr.bf16.mxu1 %v2995_v2 }
 0x1b4   :  { %2470 = vmatpush3.bf16.msra.mxu0 %v2974_v24  ;;  %2648 = vmatpush3.bf16.msra.mxu1 %v2973_v23 }
 0x1b5   :  { %2471 = vmatprep.subr.bf16.mxu0 %v2995_v2  ;;  %2649 = vmatprep.subr.bf16.mxu1 %v2995_v2 }
 0x1b8   :  { %2472 = vmatpush3.bf16.msra.mxu0 %v2975_v25  ;;  %2650 = vmatpush3.bf16.msra.mxu1 %v2974_v24 }
 0x1b9   :  { %2473 = vmatprep.subr.bf16.mxu0 %v2995_v2  ;;  %2651 = vmatprep.subr.bf16.mxu1 %v2995_v2 }
 0x1bc   :  { %2474 = vmatpush3.bf16.msra.mxu0 %v2976_v27  ;;  %2652 = vmatpush3.bf16.msra.mxu1 %v2975_v25 }
 0x1bd   :  { %2479 = vmatprep.subr.bf16.mxu0 %v2995_v2  ;;  %2653 = vmatprep.subr.bf16.mxu1 %v2995_v2 }
 0x1bf   :  { %2476 = vmatmul.mubr.bf16.vlgmr.msra.gmra.mrb[0].mxu0 %v769_v30 }
 0x1c0   :  { %2480 = vmatpush3.bf16.msra.mxu0 %v2977_v29  ;;  %2654 = vmatpush3.bf16.msra.mxu1 %v2976_v27 }
 0x1c1   :  { %2481 = vmatprep.subr.bf16.mxu0 %v2995_v2  ;;  %2659 = vmatprep.subr.bf16.mxu1 %v2995_v2 }
 0x1c2   :  { %2495 = vmatprep.mubr.msk.bf16.mxu0 %vm2997_vm8, %v2995_v2 }
 0x1c3   :  { %2656 = vmatmul.mubr.bf16.vlgmr.msra.gmra.mrb[0].mxu1 %v1424_v33 }
 0x1c4   :  { %2482 = vmatpush3.bf16.msra.mxu0 %v2978_v32  ;;  %2660 = vmatpush3.bf16.msra.mxu1 %v2977_v29 }
 0x1c5   :  { %2483 = vmatprep.subr.bf16.mxu0 %v2995_v2  ;;  %2661 = vmatprep.subr.bf16.mxu1 %v2995_v2 }
 0x1c6   :  { %2675 = vmatprep.mubr.msk.bf16.mxu1 %vm2997_vm8, %v2995_v2 }
 0x1c8   :  { %2484 = vmatpush3.bf16.msra.mxu0 %v2979_v34  ;;  %2662 = vmatpush3.bf16.msra.mxu1 %v2978_v32 }
 0x1c9   :  { %2485 = vmatprep.subr.bf16.mxu0 %v2995_v2  ;;  %2663 = vmatprep.subr.bf16.mxu1 %v2995_v2 }
 0x1cc   :  { %2486 = vmatpush3.bf16.msra.mxu0 %v2980_v35  ;;  %2664 = vmatpush3.bf16.msra.mxu1 %v2979_v34 }
 0x1cd   :  { %2487 = vmatprep.subr.bf16.mxu0 %v2995_v2  ;;  %2665 = vmatprep.subr.bf16.mxu1 %v2995_v2 }
 0x1d0   :  { %2488 = vmatpush3.bf16.msra.mxu0 %v2981_v36  ;;  %2666 = vmatpush3.bf16.msra.mxu1 %v2980_v35 }
 0x1d1   :  { %2489 = vmatprep.subr.bf16.mxu0 %v2995_v2  ;;  %2667 = vmatprep.subr.bf16.mxu1 %v2995_v2 }
 0x1d4   :  { %2490 = vmatpush3.bf16.msra.mxu0 %v2982_v37  ;;  %2668 = vmatpush3.bf16.msra.mxu1 %v2981_v36 }
 0x1d5   :  { %2491 = vmatprep.subr.bf16.mxu0 %v2995_v2  ;;  %2669 = vmatprep.subr.bf16.mxu1 %v2995_v2 }
 0x1d8   :  { %2492 = vmatpush3.bf16.msra.mxu0 %v2983_v38  ;;  %2670 = vmatpush3.bf16.msra.mxu1 %v2982_v37 }
 0x1d9   :  { %2493 = vmatprep.subr.bf16.mxu0 %v2995_v2  ;;  %2671 = vmatprep.subr.bf16.mxu1 %v2995_v2 }
 0x1dc   :  { %2494 = vmatpush3.bf16.msra.mxu0 %v2984_v39  ;;  %2672 = vmatpush3.bf16.msra.mxu1 %v2983_v38 }
 0x1dd   :  { %2499 = vmatprep.subr.bf16.mxu0 %v2995_v2  ;;  %2673 = vmatprep.subr.bf16.mxu1 %v2995_v2 }
 0x1df   :  { %2496 = vmatmul.mubr.bf16.vlgmr.msra.gmra.mrb[0].mxu0 %v889_v43 }
 0x1e0   :  { %2500 = vmatpush3.bf16.msra.mxu0 %v2985_v42  ;;  %2674 = vmatpush3.bf16.msra.mxu1 %v2984_v39 }
 0x1e1   :  { %2501 = vmatprep.subr.bf16.mxu0 %v2995_v2  ;;  %2679 = vmatprep.subr.bf16.mxu1 %v2995_v2 }
 0x1e2   :  { %2515 = vmatprep.mubr.msk.bf16.mxu0 %vm2997_vm8, %v2995_v2 }
 0x1e3   :  { %2676 = vmatmul.mubr.bf16.vlgmr.msra.gmra.mrb[0].mxu1 %v1476_v47 }
 0x1e4   :  { %2502 = vmatpush3.bf16.msra.mxu0 %v2986_v45  ;;  %2680 = vmatpush3.bf16.msra.mxu1 %v2985_v42 }
 0x1e5   :  { %2503 = vmatprep.subr.bf16.mxu0 %v2995_v2  ;;  %2681 = vmatprep.subr.bf16.mxu1 %v2995_v2 }
 0x1e6   :  { %2695 = vmatprep.mubr.msk.bf16.mxu1 %vm2997_vm8, %v2995_v2 }
 0x1e8   :  { %2504 = vmatpush3.bf16.msra.mxu0 %v2987_v48  ;;  %2682 = vmatpush3.bf16.msra.mxu1 %v2986_v45 }
 0x1e9   :  { %2505 = vmatprep.subr.bf16.mxu0 %v2995_v2  ;;  %2683 = vmatprep.subr.bf16.mxu1 %v2995_v2 }
 0x1ec   :  { %2506 = vmatpush3.bf16.msra.mxu0 %v2988_v49  ;;  %2684 = vmatpush3.bf16.msra.mxu1 %v2987_v48 }
 0x1ed   :  { %2507 = vmatprep.subr.bf16.mxu0 %v2995_v2  ;;  %2685 = vmatprep.subr.bf16.mxu1 %v2995_v2 }
 0x1f0   :  { %2508 = vmatpush3.bf16.msra.mxu0 %v2989_v50  ;;  %2686 = vmatpush3.bf16.msra.mxu1 %v2988_v49 }
 0x1f1   :  { %2509 = vmatprep.subr.bf16.mxu0 %v2995_v2  ;;  %2687 = vmatprep.subr.bf16.mxu1 %v2995_v2 }
 0x1f4   :  { %2510 = vmatpush3.bf16.msra.mxu0 %v2990_v51  ;;  %2688 = vmatpush3.bf16.msra.mxu1 %v2989_v50 }
 0x1f5   :  { %2511 = vmatprep.subr.bf16.mxu0 %v2995_v2  ;;  %2689 = vmatprep.subr.bf16.mxu1 %v2995_v2 }
 0x1f8   :  { %2512 = vmatpush3.bf16.msra.mxu0 %v2991_v52  ;;  %2690 = vmatpush3.bf16.msra.mxu1 %v2990_v51 }
 0x1f9   :  { %2513 = vmatprep.subr.bf16.mxu0 %v2995_v2  ;;  %2691 = vmatprep.subr.bf16.mxu1 %v2995_v2 }
 0x1fc   :  { %2514 = vmatpush3.bf16.msra.mxu0 %v2992_v53  ;;  %2692 = vmatpush3.bf16.msra.mxu1 %v2991_v52 }
 0x1fd   :  { %2693 = vmatprep.subr.bf16.mxu1 %v2995_v2  ;;  %2791 = vmatprep.subr.bf16.mxu0 %v3000_v59 }
 0x1ff   :  { %2516 = vmatmul.mubr.bf16.vlgmr.msra.gmra.mrb[0].mxu0 %v1001_v62 }
 0x200   :  { %2694 = vmatpush3.bf16.msra.mxu1 %v2992_v53  ;;  %2793 = vmatpush3.bf16.msra.mxu0 %v2792_v58 }
 0x201   :  { %2815 = vmatprep.subr.bf16.mxu1 %v3000_v59  ;;  %2794 = vmatprep.subr.bf16.mxu0 %v3000_v59 }
 0x202   :  { %2731 = vmatprep.mubr.msk.f32.mxu0 %vm2997_vm8, %v2995_v2 }
 0x203   :  { %2696 = vmatmul.mubr.bf16.vlgmr.msra.gmra.mrb[0].mxu1 %v1523_v5  ;;  %v2843_v5 = vpack.c.bf16 %v1754_v4, %v1753_v1 }
 0x204   :  { %2817 = vmatpush3.bf16.msra.mxu1 %v2792_v58  ;;  %2796 = vmatpush3.bf16.msra.mxu0 %v2795_v0 }
 0x205   :  { %2818 = vmatprep.subr.bf16.mxu1 %v3000_v59  ;;  %2797 = vmatprep.subr.bf16.mxu0 %v3000_v59 }
 0x206   :  { %2766 = vmatprep.mubr.msk.f32.mxu1 %vm2997_vm8, %v2995_v2 }
 0x208   :  { %2820 = vmatpush3.bf16.msra.mxu1 %v2795_v0  ;;  %2799 = vmatpush3.bf16.msra.mxu0 %v2798_v6  ;;  %v1752_v0 = vld [vmem:[%s3608_s3 + $0x8] sm:$0xff] }
 0x209   :  { %2821 = vmatprep.subr.bf16.mxu1 %v3000_v59  ;;  %2800 = vmatprep.subr.bf16.mxu0 %v3000_v59  ;;  %v2840_v3 = vpack.c.bf16 %v1752_v0, %v1751_v63 }
 0x20c   :  { %2823 = vmatpush3.bf16.msra.mxu1 %v2798_v6  ;;  %2802 = vmatpush3.bf16.msra.mxu0 %v2801_v9 }
 0x20d   :  { %2824 = vmatprep.subr.bf16.mxu1 %v3000_v59  ;;  %2803 = vmatprep.subr.bf16.mxu0 %v3000_v59 }
 0x210   :  { %2826 = vmatpush3.bf16.msra.mxu1 %v2801_v9  ;;  %2805 = vmatpush3.bf16.msra.mxu0 %v2804_v12 }
 0x211   :  { %2827 = vmatprep.subr.bf16.mxu1 %v3000_v59  ;;  %2806 = vmatprep.subr.bf16.mxu0 %v3000_v59 }
 0x214   :  { %2829 = vmatpush3.bf16.msra.mxu1 %v2804_v12  ;;  %2808 = vmatpush3.bf16.msra.mxu0 %v2807_v15 }
 0x215   :  { %2830 = vmatprep.subr.bf16.mxu1 %v3000_v59  ;;  %2809 = vmatprep.subr.bf16.mxu0 %v3000_v59 }
 0x218   :  { %2832 = vmatpush3.bf16.msra.mxu1 %v2807_v15  ;;  %2811 = vmatpush3.bf16.msra.mxu0 %v2810_v18  ;;  %v1744_v15 = vld [vmem:[%s3609_s4] sm:$0x1] }
 0x219   :  { %2833 = vmatprep.subr.bf16.mxu1 %v3000_v59  ;;  %2812 = vmatprep.subr.bf16.mxu0 %v3000_v59 }
 0x21c   :  { %2835 = vmatpush3.bf16.msra.mxu1 %v2810_v18  ;;  %2814 = vmatpush3.bf16.msra.mxu0 %v2813_v22 }
 0x21d   :  { %2836 = vmatprep.subr.bf16.mxu1 %v3000_v59  ;;  %2839 = vmatprep.subr.bf16.mxu0 %v3000_v59 }
 0x220   :  { %2838 = vmatpush3.bf16.msra.mxu1 %v2813_v22  ;;  %v1903_v22 = vshrl.u32 %v1902_v21, 7 }
 0x221   :  { %2845 = vmatprep.subr.bf16.mxu1 %v3000_v59 }
 0x2d2   :  { %v3559_v20 = vpop.f32.mrb[0].mxu0 }
 0x2d3   :  { %v1093_v23 = vsel %vm1092_vm10, %v3559_v20, 0.0  ;;  %v1101_v24 = vmul.f32 %v3559_v20, %v3559_v20  ;;  %v2517_v25 = vpop.f32.mrb[1].mxu0 }
 0x2d4   :  { %v1094_v26 = vrot.slane %v1093_v23, 4  ;;  %v1088_v27 = vpop.f32.mrb[2].mxu0 }
 0x2d5   :  { %v1102_v28 = vsel %vm1092_vm10, %v1101_v24, 0.0  ;;  %v2518_v29 = vpop.f32.mrb[3].mxu0 }
 0x2d6   :  { %v1095_v30 = vadd.f32 %v1094_v26, %v1093_v23  ;;  %v1103_v31 = vrot.slane %v1102_v28, 4  ;;  %v3566_v32 = vpop.f32.mrb[0].mxu1  ;;  %v1904_v23 = vsub.s32 0, %v1903_v22 }
 0x2d7   :  { %v1566_v33 = vsel %vm1092_vm10, %v3566_v32, 0.0  ;;  %v1574_v34 = vmul.f32 %v3566_v32, %v3566_v32  ;;  %v2697_v35 = vpop.f32.mrb[1].mxu1 }
 0x2d8   :  { %v1096_v36 = vrot.slane %v1095_v30, 2  ;;  %v1104_v37 = vadd.f32 %v1103_v31, %v1102_v28  ;;  %v1567_v38 = vrot.slane %v1566_v33, 4  ;;  %v1562_v39 = vpop.f32.mrb[2].mxu1 }
 0x2d9   :  { %v1575_v40 = vsel %vm1092_vm10, %v1574_v34, 0.0  ;;  %v2698_v41 = vpop.f32.mrb[3].mxu1 }
 0x2da   :  { %v1097_v42 = vadd.f32 %v1096_v36, %v1095_v30  ;;  %v1105_v43 = vrot.slane %v1104_v37, 2  ;;  %v1568_v44 = vadd.f32 %v1567_v38, %v1566_v33  ;;  %v1576_v45 = vrot.slane %v1575_v40, 4 }
 0x2dc   :  { %v1106_v46 = vadd.f32 %v1105_v43, %v1104_v37  ;;  %v1569_v47 = vrot.slane %v1568_v44, 2  ;;  %v1577_v48 = vadd.f32 %v1576_v45, %v1575_v40  ;;  %v1098_v49 = vrot.slane %v1097_v42, 1 }
 0x2de   :  { %v1570_v50 = vadd.f32 %v1569_v47, %v1568_v44  ;;  %v1578_v51 = vrot.slane %v1577_v48, 2  ;;  %v1107_v52 = vrot.slane %v1106_v46, 1  ;;  %v1099_v55 = vadd.f32 %v1098_v49, %v1097_v42 }
 0x2e0   :  { %v1571_v53 = vrot.slane %v1570_v50, 1  ;;  %v1579_v54 = vadd.f32 %v1578_v51, %v1577_v48  ;;  %v1108_v60 = vadd.f32 %v1107_v52, %v1106_v46 }
 0x2e2   :  { %v1572_v56 = vadd.f32 %v1571_v53, %v1570_v50  ;;  %v1580_v57 = vrot.slane %v1579_v54, 1 }
 0x2e4   :  { %v1573_v58 = vadd.f32 %v1572_v56, %v1099_v55  ;;  %v1581_v61 = vadd.f32 %v1580_v57, %v1579_v54 }
 0x2e6   :  { %2732 = vmatmul.mubr.f32.vlgmr.msra.gmra.mrb[4].mxu0 %v1573_v58  ;;  %v1582_v62 = vadd.f32 %v1581_v61, %v1108_v60 }
 0x2e7   :  { %2777 = vmatprep.mubr.msk.f32.mxu0 %vm2997_vm8, %v2995_v2  ;;  %2841 = vmatpush3.bf16.msra.mxu0 %v2840_v3 }
 0x2e8   :  { %2767 = vmatmul.mubr.f32.vlgmr.msra.gmra.mrb[4].mxu1 %v1582_v62  ;;  %2842 = vmatprep.subr.bf16.mxu0 %v3000_v59 }
 0x2e9   :  { %2788 = vmatprep.mubr.msk.f32.mxu1 %vm2997_vm8, %v2995_v2  ;;  %2847 = vmatpush3.bf16.msra.mxu1 %v2840_v3 }
 0x2ea   :  { %2848 = vmatprep.subr.bf16.mxu1 %v3000_v59 }
 0x2eb   :  { %2844 = vmatpush3.bf16.msra.mxu0 %v2843_v5 }
 0x2ed   :  { %2850 = vmatpush3.bf16.msra.mxu1 %v2843_v5 }
 0x3b9   :  { %v1665_v2 = vpop.f32.mrb[4].mxu0 }
 0x3ba   :  { %v1739_v6 = vmul.f32 0.03125, %v1665_v2  ;;  %v2733_v7 = vpop.f32.mrb[5].mxu0 }
 0x3bb   :  { %v1735_v8 = vpop.f32.mrb[4].mxu1 }
 0x3bc   :  { %v1741_v9 = vmul.f32 %v1739_v6, %v1739_v6  ;;  %v1740_v10 = vmul.f32 0.03125, %v1735_v8  ;;  %v2768_v11 = vpop.f32.mrb[5].mxu1 }
 0x3be   :  { %v1742_v12 = vsub.f32 %v1740_v10, %v1741_v9 }
 0x3c0   :  { %v1743_v13 = vmax.f32 %v1742_v12, 0.0 }
 0x3c2   :  { %v1745_v14 = vadd.f32 1e-05, %v1743_v13 }
 0x3c4   :  { %2993 = vrsqrt.f32 %v1745_v14 }
 0x3ce   :  { %v2994_v16 = vpop.eup %2993 }
 0x3cf   :  { %v1747_v59 = vmul.f32 %v2994_v16, %v1744_v15 }
 0x3d1   :  { %2778 = vmatmul.mubr.msk.f32.vlgmr.msra.gmra.mrb[6].mxu0 %vm1755_vm11, %v1747_v59  ;;  %v1749_v18 = vmul.f32 %v1747_v59, %v1739_v6 }
 0x3d3   :  { %v1750_v19 = vsub.f32 %v1748_v17, %v1749_v18 }
 0x3d5   :  { %2789 = vmatmul.mubr.msk.f32.vlgmr.msra.gmra.mrb[6].mxu1 %vm1755_vm11, %v1750_v19 }
 0x4a4   :  { %v1825_v24 = vpop.f32.mrb[6].mxu0 }
 0x4a5   :  { %v1905_v25 = vrot.slane %v1825_v24, %v1904_v23  ;;  %v2779_v26 = vpop.f32.mrb[7].mxu0 }
 0x4a7   :  { %v1906_v27 = vmul.f32 %v1905_v25, %v3559_v20  ;;  %v1915_v28 = vmul.f32 %v1905_v25, %v3566_v32 }
 0x4a8   :  { %v1898_v29 = vpop.f32.mrb[6].mxu1 }
 0x4a9   :  { %v1910_v30 = vrot.slane %v1898_v29, %v1904_v23  ;;  %v2790_v31 = vpop.f32.mrb[7].mxu1 }
 0x4ab   :  { %v1911_v33 = vadd.f32 %v1910_v30, %v1906_v27  ;;  %v1916_v34 = vadd.f32 %v1915_v28, %v1910_v30 }
 0x4ad   :  { %v1912_v35 = vmax.f32 %v1911_v33, 0.0  ;;  %v1917_v36 = vmax.f32 %v1916_v34, 0.0 }
 0x4af   :  { %v1913_v37 = vpack.c.bf16 %v1912_v35, %v1912_v35  ;;  %v2132_v38 = vpack.c.bf16 %v1917_v36, %v1917_v36 }
 0x4b1   :  { %1914 = vst [vmem:[%s3611_s6] sm:$0x3] %v1913_v37  ;;  %v1922_v39 = vrot.slane %v2132_v38, 6 }
 0x4b3   :  { %1924 = vst [vmem:[%s3611_s6] sm:$0xc] %v1922_v39 }

// kernel: classifier_forward.13
= control target key start
LH: loop header
LB: loop body
LE: loop exit
PB: predicated region body
PF: predicated region fallthrough
CT: control target
= control target key end

     0   :  { %v1402_v2 = vmov 0   ;;  %s1826_s0 = inlined_call_operand.vmem [shape: bf16[2,128], index: 0, kind: input, shape index: {}]   ;;  %s1827_s1 = inlined_call_operand.vmem [shape: bf16[128,512], index: 1, kind: input, shape index: {}]   ;;  %s1828_s2 = inlined_call_operand.vmem [shape: f32[1,512], index: 2, kind: input, shape index: {}]   ;;  %s1829_s3 = inlined_call_operand.vmem [shape: bf16[512,256], index: 3, kind: input, shape index: {}]   ;;  %s1830_s4 = inlined_call_operand.vmem [shape: f32[1,256], index: 4, kind: input, shape index: {}]   ;;  %s1831_s5 = inlined_call_operand.vmem [shape: bf16[256,5], index: 5, kind: input, shape index: {}]   ;;  %s1832_s6 = inlined_call_operand.vmem [shape: f32[1,5], index: 6, kind: input, shape index: {}]   ;;  %s1833_s7 = inlined_call_operand.hbm [shape: f32[2,5], index: 7, kind: output, shape index: {}]  }
   0x1   :  { %v1218_v0 = vld [vmem:[%s1827_s1 + $0x4] ss:$16 sps:$4 sm:$0xff]   ;;  %v1220_v1 = vld [vmem:[%s1827_s1] ss:$16 sps:$4 sm:$0xff]   ;;  %259 = vmatprep.mubr.bf16.mxu1 %v1402_v2  ;;  %v1244_v21 = vld [vmem:[%s1827_s1 + $0xc] ss:$16 sps:$4 sm:$0xff]  }
   0x2   :  { %227 = vmatprep.subr.bf16.mxu1 %v1218_v0  ;;  %v1221_v3 = vld [vmem:[%s1827_s1 + $0x24] ss:$16 sps:$4 sm:$0xff]   ;;  %v1223_v4 = vld [vmem:[%s1827_s1 + $0x20] ss:$16 sps:$4 sm:$0xff]   ;;  %v1242_v26 = vld [vmem:[%s1827_s1 + $0x8] ss:$16 sps:$4 sm:$0xff]  }
   0x3   :  { %228 = vmatpush1.bf16.msra.mxu1 %v1220_v1  ;;  %v1224_v5 = vld [vmem:[%s1827_s1 + $0x44] ss:$16 sps:$4 sm:$0xff]   ;;  %v1226_v6 = vld [vmem:[%s1827_s1 + $0x40] ss:$16 sps:$4 sm:$0xff]   ;;  %v1247_v27 = vld [vmem:[%s1827_s1 + $0x2c] ss:$16 sps:$4 sm:$0xff]  }
   0x4   :  { %229 = vmatprep.subr.bf16.mxu1 %v1221_v3  ;;  %v1227_v7 = vld [vmem:[%s1827_s1 + $0x64] ss:$16 sps:$4 sm:$0xff]   ;;  %v1229_v8 = vld [vmem:[%s1827_s1 + $0x60] ss:$16 sps:$4 sm:$0xff]   ;;  %v1245_v29 = vld [vmem:[%s1827_s1 + $0x28] ss:$16 sps:$4 sm:$0xff]  }
   0x5   :  { %v1230_v9 = vld [vmem:[%s1827_s1 + $0x84] ss:$16 sps:$4 sm:$0xff]   ;;  %v1232_v10 = vld [vmem:[%s1827_s1 + $0x80] ss:$16 sps:$4 sm:$0xff]   ;;  %v1250_v30 = vld [vmem:[%s1827_s1 + $0x4c] ss:$16 sps:$4 sm:$0xff]  }
   0x6   :  { %v1233_v11 = vld [vmem:[%s1827_s1 + $0xa4] ss:$16 sps:$4 sm:$0xff]   ;;  %v1235_v12 = vld [vmem:[%s1827_s1 + $0xa0] ss:$16 sps:$4 sm:$0xff]   ;;  %v1248_v31 = vld [vmem:[%s1827_s1 + $0x48] ss:$16 sps:$4 sm:$0xff]  }
   0x7   :  { %230 = vmatpush1.bf16.msra.mxu1 %v1223_v4  ;;  %v1236_v13 = vld [vmem:[%s1827_s1 + $0xc4] ss:$16 sps:$4 sm:$0xff]   ;;  %v1238_v14 = vld [vmem:[%s1827_s1 + $0xc0] ss:$16 sps:$4 sm:$0xff]   ;;  %v1253_v32 = vld [vmem:[%s1827_s1 + $0x6c] ss:$16 sps:$4 sm:$0xff]  }
   0x8   :  { %231 = vmatprep.subr.bf16.mxu1 %v1224_v5  ;;  %v1266_v15 = vld [vmem:[%s1829_s3 + $0x4] ss:$8 sps:$4 sm:$0xff]   ;;  %v1268_v16 = vld [vmem:[%s1829_s3] ss:$8 sps:$4 sm:$0xff]   ;;  %v1269_v17 = vld [vmem:[%s1829_s3 + $0x14] ss:$8 sps:$4 sm:$0xff]  }
   0x9   :  { %v1239_v18 = vld [vmem:[%s1827_s1 + $0xe4] ss:$16 sps:$4 sm:$0xff]   ;;  %797 = vmatprep.subr.bf16.mxu0 %v1266_v15  ;;  %v1241_v19 = vld [vmem:[%s1827_s1 + $0xe0] ss:$16 sps:$4 sm:$0xff]   ;;  %v1251_v33 = vld [vmem:[%s1827_s1 + $0x68] ss:$16 sps:$4 sm:$0xff]  }
   0xa   :  { %798 = vmatpush1.bf16.msra.mxu0 %v1268_v16  ;;  %v1271_v20 = vld [vmem:[%s1829_s3 + $0x10] ss:$8 sps:$4 sm:$0xff]   ;;  %v1272_v22 = vld [vmem:[%s1829_s3 + $0x24] ss:$8 sps:$4 sm:$0xff]   ;;  %v1274_v23 = vld [vmem:[%s1829_s3 + $0x20] ss:$8 sps:$4 sm:$0xff]  }
   0xb   :  { %232 = vmatpush1.bf16.msra.mxu1 %v1226_v6  ;;  %799 = vmatprep.subr.bf16.mxu0 %v1269_v17  ;;  %v1275_v24 = vld [vmem:[%s1829_s3 + $0x34] ss:$8 sps:$4 sm:$0xff]   ;;  %v34_v25 = vld [vmem:[%s1826_s0] sm:$0x1]  ;;  %v1277_v28 = vld [vmem:[%s1829_s3 + $0x30] ss:$8 sps:$4 sm:$0xff]  }
   0xc   :  { %233 = vmatprep.subr.bf16.mxu1 %v1227_v7  ;;  %v1256_v34 = vld [vmem:[%s1827_s1 + $0x8c] ss:$16 sps:$4 sm:$0xff]   ;;  %v1254_v35 = vld [vmem:[%s1827_s1 + $0x88] ss:$16 sps:$4 sm:$0xff]  }
   0xd   :  { %v1259_v36 = vld [vmem:[%s1827_s1 + $0xac] ss:$16 sps:$4 sm:$0xff]   ;;  %v1257_v37 = vld [vmem:[%s1827_s1 + $0xa8] ss:$16 sps:$4 sm:$0xff]  }
   0xe   :  { %800 = vmatpush1.bf16.msra.mxu0 %v1271_v20  ;;  %v1262_v38 = vld [vmem:[%s1827_s1 + $0xcc] ss:$16 sps:$4 sm:$0xff]   ;;  %v1260_v39 = vld [vmem:[%s1827_s1 + $0xc8] ss:$16 sps:$4 sm:$0xff]  }
   0xf   :  { %234 = vmatpush1.bf16.msra.mxu1 %v1229_v8  ;;  %801 = vmatprep.subr.bf16.mxu0 %v1272_v22  ;;  %v1265_v40 = vld [vmem:[%s1827_s1 + $0xec] ss:$16 sps:$4 sm:$0xff]  }
  0x10   :  { %235 = vmatprep.subr.bf16.mxu1 %v1230_v9 }
  0x12   :  { %802 = vmatpush1.bf16.msra.mxu0 %v1274_v23 }
  0x13   :  { %236 = vmatpush1.bf16.msra.mxu1 %v1232_v10  ;;  %803 = vmatprep.subr.bf16.mxu0 %v1275_v24 }
  0x14   :  { %237 = vmatprep.subr.bf16.mxu1 %v1233_v11 }
  0x16   :  { %804 = vmatpush1.bf16.msra.mxu0 %v1277_v28 }
  0x17   :  { %238 = vmatpush1.bf16.msra.mxu1 %v1235_v12 }
  0x18   :  { %239 = vmatprep.subr.bf16.mxu1 %v1236_v13 }
  0x1b   :  { %240 = vmatpush1.bf16.msra.mxu1 %v1238_v14 }
  0x1c   :  { %241 = vmatprep.subr.bf16.mxu1 %v1239_v18 }
  0x1f   :  { %242 = vmatpush1.bf16.msra.mxu1 %v1241_v19 }
  0x20   :  { %268 = vmatprep.subr.bf16.mxu1 %v1244_v21 }
  0x22   :  { %260 = vmatmul.mubr.bf16.vlgmr.msra.gmra.mrb[0].mxu1 %v34_v25 }
  0x23   :  { %269 = vmatpush1.bf16.msra.mxu1 %v1242_v26  ;;  %300 = vmatprep.mubr.bf16.mxu1 %v1402_v2 }
  0x24   :  { %270 = vmatprep.subr.bf16.mxu1 %v1247_v27 }
  0x27   :  { %271 = vmatpush1.bf16.msra.mxu1 %v1245_v29 }
  0x28   :  { %272 = vmatprep.subr.bf16.mxu1 %v1250_v30 }
  0x2b   :  { %273 = vmatpush1.bf16.msra.mxu1 %v1248_v31 }
  0x2c   :  { %274 = vmatprep.subr.bf16.mxu1 %v1253_v32 }
  0x2f   :  { %275 = vmatpush1.bf16.msra.mxu1 %v1251_v33 }
  0x30   :  { %276 = vmatprep.subr.bf16.mxu1 %v1256_v34 }
  0x33   :  { %277 = vmatpush1.bf16.msra.mxu1 %v1254_v35 }
  0x34   :  { %278 = vmatprep.subr.bf16.mxu1 %v1259_v36 }
  0x37   :  { %279 = vmatpush1.bf16.msra.mxu1 %v1257_v37 }
  0x38   :  { %280 = vmatprep.subr.bf16.mxu1 %v1262_v38 }
  0x39   :  { %12 = vsyncpa [#allocation4], 0  ;;  %v1263_v41 = vld [vmem:[%s1827_s1 + $0xe8] ss:$16 sps:$4 sm:$0xff]   ;;  %v1278_v42 = vld [vmem:[%s1829_s3 + $0x44] ss:$8 sps:$4 sm:$0xff]   ;;  %v318_v20 = vlaneseq }
  0x3a   :  { %v1280_v43 = vld [vmem:[%s1829_s3 + $0x40] ss:$8 sps:$4 sm:$0xff]   ;;  %805 = vmatprep.subr.bf16.mxu0 %v1278_v42  ;;  %v1281_v44 = vld [vmem:[%s1829_s3 + $0x54] ss:$8 sps:$4 sm:$0xff]   ;;  %v1283_v45 = vld [vmem:[%s1829_s3 + $0x50] ss:$8 sps:$4 sm:$0xff]  }
  0x3b   :  { %281 = vmatpush1.bf16.msra.mxu1 %v1260_v39  ;;  %806 = vmatpush1.bf16.msra.mxu0 %v1280_v43  ;;  %v1284_v46 = vld [vmem:[%s1829_s3 + $0x64] ss:$8 sps:$4 sm:$0xff]   ;;  %v1286_v47 = vld [vmem:[%s1829_s3 + $0x60] ss:$8 sps:$4 sm:$0xff]   ;;  %v1287_v48 = vld [vmem:[%s1829_s3 + $0x74] ss:$8 sps:$4 sm:$0xff]  }
  0x3c   :  { %282 = vmatprep.subr.bf16.mxu1 %v1265_v40  ;;  %807 = vmatprep.subr.bf16.mxu0 %v1281_v44  ;;  %v1289_v49 = vld [vmem:[%s1829_s3 + $0x70] ss:$8 sps:$4 sm:$0xff]   ;;  %v1290_v50 = vld [vmem:[%s1829_s3 + $0x84] ss:$8 sps:$4 sm:$0xff]   ;;  %v1292_v51 = vld [vmem:[%s1829_s3 + $0x80] ss:$8 sps:$4 sm:$0xff]  }
  0x3d   :  { %v1293_v52 = vld [vmem:[%s1829_s3 + $0x94] ss:$8 sps:$4 sm:$0xff]   ;;  %v1295_v53 = vld [vmem:[%s1829_s3 + $0x90] ss:$8 sps:$4 sm:$0xff]   ;;  %v1296_v54 = vld [vmem:[%s1829_s3 + $0xa4] ss:$8 sps:$4 sm:$0xff]  }
  0x3e   :  { %v1298_v55 = vld [vmem:[%s1829_s3 + $0xa0] ss:$8 sps:$4 sm:$0xff]   ;;  %v1299_v56 = vld [vmem:[%s1829_s3 + $0xb4] ss:$8 sps:$4 sm:$0xff]   ;;  %v1301_v57 = vld [vmem:[%s1829_s3 + $0xb0] ss:$8 sps:$4 sm:$0xff]  }
  0x3f   :  { %283 = vmatpush1.bf16.msra.mxu1 %v1263_v41  ;;  %808 = vmatpush1.bf16.msra.mxu0 %v1283_v45  ;;  %v1302_v58 = vld [vmem:[%s1829_s3 + $0xc4] ss:$8 sps:$4 sm:$0xff]   ;;  %v1304_v59 = vld [vmem:[%s1829_s3 + $0xc0] ss:$8 sps:$4 sm:$0xff]   ;;  %v1305_v60 = vld [vmem:[%s1829_s3 + $0xd4] ss:$8 sps:$4 sm:$0xff]  }
  0x40   :  { %809 = vmatprep.subr.bf16.mxu0 %v1284_v46  ;;  %v1307_v61 = vld [vmem:[%s1829_s3 + $0xd0] ss:$8 sps:$4 sm:$0xff]   ;;  %v1308_v62 = vld [vmem:[%s1829_s3 + $0xe4] ss:$8 sps:$4 sm:$0xff]   ;;  %v1310_v63 = vld [vmem:[%s1829_s3 + $0xe0] ss:$8 sps:$4 sm:$0xff]  }
  0x41   :  { %v1311_v0 = vld [vmem:[%s1829_s3 + $0xf4] ss:$8 sps:$4 sm:$0xff]   ;;  %v1313_v1 = vld [vmem:[%s1829_s3 + $0xf0] ss:$8 sps:$4 sm:$0xff]   ;;  %v1316_v2 = vld [vmem:[%s1829_s3 + $0x104] ss:$8 sps:$4 sm:$0xff]  }
  0x42   :  { %301 = vmatmul.mubr.bf16.vlgmr.msra.gmra.mrb[4].mxu1 %v34_v25  ;;  %v1362_v3 = vld [vmem:[%s1831_s5 + $0x40] sm:$0xff]   ;;  %v1364_v5 = vld [vmem:[%s1831_s5 + $0x48] sm:$0xff]   ;;  %v1366_v7 = vld [vmem:[%s1831_s5 + $0x50] sm:$0xff]   ;;  %v1679_v21 = vshrl.u32 %v318_v20, 7  ;;  %v1403_v27 = vmov 1983009808  }
  0x43   :  { %810 = vmatpush1.bf16.msra.mxu0 %v1286_v47  ;;  %v1363_v4 = vld [vmem:[%s1831_s5] sm:$0xff]   ;;  %1187 = vmatprep.subr.bf16.mxu1 %v1362_v3  ;;  %v1365_v6 = vld [vmem:[%s1831_s5 + $0x8] sm:$0xff]   ;;  %v1367_v8 = vld [vmem:[%s1831_s5 + $0x10] sm:$0xff]   ;;  %v316_v28 = vunpack.c.l.s4 %v1403_v27  ;;  %s1404_s30 = smov [#allocation3]   ;;  %vm1058_vm0 = vcmask 33792  }
  0x44   :  { %811 = vmatprep.subr.bf16.mxu0 %v1287_v48  ;;  %1188 = vmatpush3.bf16.msra.mxu1 %v1363_v4  ;;  %v1368_v9 = vld [vmem:[%s1831_s5 + $0x58] sm:$0xff]   ;;  %v1370_v11 = vld [vmem:[%s1831_s5 + $0x60] sm:$0xff]   ;;  %v1372_v18 = vld [vmem:[%s1831_s5 + $0x68] sm:$0xff]   ;;  %v341_v22 = vsub.s32 0, %v1679_v21  ;;  %v345_v23 = vsub.s32 1, %v1679_v21  ;;  %v349_v24 = vsub.s32 2, %v1679_v21 }
  0x45   :  { %1189 = vmatprep.subr.bf16.mxu1 %v1364_v5  ;;  %v1369_v10 = vld [vmem:[%s1831_s5 + $0x18] sm:$0xff]   ;;  %v1371_v16 = vld [vmem:[%s1831_s5 + $0x20] sm:$0xff]   ;;  %v1373_v19 = vld [vmem:[%s1831_s5 + $0x28] sm:$0xff]   ;;  %v353_v25 = vsub.s32 3, %v1679_v21  ;;  %v317_v33 = vunpack.c.0.s8 %v316_v28  ;;  %s1066_s8 = sshll.u32 %s1404_s30, 4  ;;  %s1067_s8 = int_to_ptr.vmem [resolvable:$true] %s1066_s8 }
  0x46   :  { %v337_v26 = vld [vmem:[%s1828_s2] sm:$0xf]  ;;  %v1331_v3 = vld [vmem:[%s1829_s3 + $0x154] ss:$8 sps:$4 sm:$0xff]   ;;  %v1329_v4 = vld [vmem:[%s1829_s3 + $0x150] ss:$8 sps:$4 sm:$0xff]   ;;  %p1383_p1 = scmp.lt.s32.totalorder %s1067_s8, %s1067_s8 }
  0x47   :  { %812 = vmatpush1.bf16.msra.mxu0 %v1289_v49  ;;  %v342_v29 = vrot.slane %v337_v26, %v341_v22  ;;  %v346_v30 = vrot.slane %v337_v26, %v345_v23  ;;  %v350_v31 = vrot.slane %v337_v26, %v349_v24  ;;  %v354_v32 = vrot.slane %v337_v26, %v353_v25  ;;  %v1334_v5 = vld [vmem:[%s1829_s3 + $0x164] ss:$8 sps:$4 sm:$0xff]   ;;  %v1353_v20 = vld [vmem:[%s1829_s3 + $0x1d0] ss:$8 sps:$4 sm:$0xff]   ;;  %v1356_v25 = vld [vmem:[%s1829_s3 + $0x1e0] ss:$8 sps:$4 sm:$0xff]  }
  0x48   :  { %813 = vmatprep.subr.bf16.mxu0 %v1290_v50  ;;  %1190 = vmatpush3.bf16.msra.mxu1 %v1365_v6  ;;  %v320_v36 = vsub.s32 %v317_v33, %v1679_v21  ;;  %v1332_v6 = vld [vmem:[%s1829_s3 + $0x160] ss:$8 sps:$4 sm:$0xff]   ;;  %v1358_v24 = vld [vmem:[%s1829_s3 + $0x1e4] ss:$8 sps:$4 sm:$0xff]   ;;  %v1361_v26 = vld [vmem:[%s1829_s3 + $0x1f4] ss:$8 sps:$4 sm:$0xff]  }
  0x49   :  { %1191 = vmatprep.subr.bf16.mxu1 %v1366_v7  ;;  %v355_v34 = vcombine.low %v342_v29, %v346_v30  ;;  %v356_v35 = vcombine.low %v350_v31, %v354_v32  ;;  %v1337_v7 = vld [vmem:[%s1829_s3 + $0x174] ss:$8 sps:$4 sm:$0xff]   ;;  %v1359_v27 = vld [vmem:[%s1829_s3 + $0x1f0] ss:$8 sps:$4 sm:$0xff]   ;;  %v465_v33 = vld [vmem:[%s1830_s4] sm:$0x3] }
  0x4a   :  { %v1374_v29 = vld [vmem:[%s1831_s5 + $0x70] sm:$0xff]   ;;  %v1376_v31 = vld [vmem:[%s1831_s5 + $0x78] sm:$0xff]   ;;  %s1378_s9 = scalar_lea.vmem %s1067_s8, 32 }
  0x4b   :  { %814 = vmatpush1.bf16.msra.mxu0 %v1292_v51  ;;  %v363_v38 = vrot.slane %v355_v34, %v320_v36  ;;  %v370_v39 = vrot.slane %v356_v35, %v320_v36  ;;  %v1375_v30 = vld [vmem:[%s1831_s5 + $0x30] sm:$0xff]   ;;  %v1377_v32 = vld [vmem:[%s1831_s5 + $0x38] sm:$0xff]   ;;  %v470_v34 = vrot.slane %v465_v33, %v341_v22  ;;  %v474_v35 = vrot.slane %v465_v33, %v345_v23  ;;  %v1170_v22 = vld [vmem:[%s1832_s6] ss:$0 sm:$0xff]  ;;  %p1379_p0 = scmp.ne.s32.totalorder %s1067_s8, %s1378_s9  ;;  %p1384_p2 = scmp.lt.s32.totalorder %s1378_s9, %s1378_s9 }
  0x4c   :  { %815 = vmatprep.subr.bf16.mxu0 %v1293_v52  ;;  %1192 = vmatpush3.bf16.msra.mxu1 %v1367_v8  ;;  %v1335_v8 = vld [vmem:[%s1829_s3 + $0x170] ss:$8 sps:$4 sm:$0xff]  }
  0x4d   :  { %1193 = vmatprep.subr.bf16.mxu1 %v1368_v9  ;;  %v371_v46 = vcombine.low %v363_v38, %v370_v39  ;;  %v1340_v9 = vld [vmem:[%s1829_s3 + $0x184] ss:$8 sps:$4 sm:$0xff]   ;;  %p1385_p3 = por %p1384_p2, %p1383_p1 }
  0x4f   :  { %816 = vmatpush1.bf16.msra.mxu0 %v1295_v53  ;;  %p1386_p4 = pnand %p1385_p3, %p1379_p0 }
  0x50   :  { %817 = vmatprep.subr.bf16.mxu0 %v1296_v54  ;;  %1194 = vmatpush3.bf16.msra.mxu1 %v1369_v10  ;;  %v1338_v10 = vld [vmem:[%s1829_s3 + $0x180] ss:$8 sps:$4 sm:$0xff]  }
  0x51   :  { %1195 = vmatprep.subr.bf16.mxu1 %v1370_v11  ;;  %v1343_v11 = vld [vmem:[%s1829_s3 + $0x194] ss:$8 sps:$4 sm:$0xff]  }
  0x53   :  { %818 = vmatpush1.bf16.msra.mxu0 %v1298_v55  ;;  %v1314_v55 = vld [vmem:[%s1829_s3 + $0x100] ss:$8 sps:$4 sm:$0xff]  }
  0x54   :  { %819 = vmatprep.subr.bf16.mxu0 %v1299_v56  ;;  %1196 = vmatpush3.bf16.msra.mxu1 %v1371_v16  ;;  %v1347_v16 = vld [vmem:[%s1829_s3 + $0x1b0] ss:$8 sps:$4 sm:$0xff]  }
  0x55   :  { %1197 = vmatprep.subr.bf16.mxu1 %v1372_v18  ;;  %v1350_v18 = vld [vmem:[%s1829_s3 + $0x1c0] ss:$8 sps:$4 sm:$0xff]  }
  0x57   :  { %820 = vmatpush1.bf16.msra.mxu0 %v1301_v57 }
  0x58   :  { %821 = vmatprep.subr.bf16.mxu0 %v1302_v58  ;;  %1198 = vmatpush3.bf16.msra.mxu1 %v1373_v19  ;;  %v1319_v58 = vld [vmem:[%s1829_s3 + $0x114] ss:$8 sps:$4 sm:$0xff]  }
  0x59   :  { %v1355_v19 = vld [vmem:[%s1829_s3 + $0x1d4] ss:$8 sps:$4 sm:$0xff]   ;;  %1199 = vmatprep.subr.bf16.mxu1 %v1374_v29 }
  0x5b   :  { %822 = vmatpush1.bf16.msra.mxu0 %v1304_v59 }
  0x5c   :  { %823 = vmatprep.subr.bf16.mxu0 %v1305_v60  ;;  %v1317_v60 = vld [vmem:[%s1829_s3 + $0x110] ss:$8 sps:$4 sm:$0xff]   ;;  %1200 = vmatpush3.bf16.msra.mxu1 %v1375_v30 }
  0x5d   :  { %1201 = vmatprep.subr.bf16.mxu1 %v1376_v31 }
  0x5f   :  { %824 = vmatpush1.bf16.msra.mxu0 %v1307_v61  ;;  %v1322_v61 = vld [vmem:[%s1829_s3 + $0x124] ss:$8 sps:$4 sm:$0xff]  }
  0x60   :  { %825 = vmatprep.subr.bf16.mxu0 %v1308_v62  ;;  %v1320_v62 = vld [vmem:[%s1829_s3 + $0x120] ss:$8 sps:$4 sm:$0xff]   ;;  %1202 = vmatpush3.bf16.msra.mxu1 %v1377_v32 }
  0x63   :  { %826 = vmatpush1.bf16.msra.mxu0 %v1310_v63  ;;  %v1325_v63 = vld [vmem:[%s1829_s3 + $0x134] ss:$8 sps:$4 sm:$0xff]  }
  0x64   :  { %827 = vmatprep.subr.bf16.mxu0 %v1311_v0  ;;  %v1323_v0 = vld [vmem:[%s1829_s3 + $0x130] ss:$8 sps:$4 sm:$0xff]  }
  0x67   :  { %828 = vmatpush1.bf16.msra.mxu0 %v1313_v1  ;;  %v1328_v1 = vld [vmem:[%s1829_s3 + $0x144] ss:$8 sps:$4 sm:$0xff]  }
  0x68   :  { %838 = vmatprep.subr.bf16.mxu0 %v1316_v2  ;;  %v1326_v2 = vld [vmem:[%s1829_s3 + $0x140] ss:$8 sps:$4 sm:$0xff]  }
  0xf5   :  { %v261_v12 = vpop.f32.mrb[0].mxu1 }
  0xf6   :  { %v263_v13 = vpop.f32.mrb[1].mxu1 }
  0xf7   :  { %v313_v14 = vcombine.low %v261_v12, %v263_v13  ;;  %v265_v15 = vpop.f32.mrb[2].mxu1  ;;  %v1341_v12 = vld [vmem:[%s1829_s3 + $0x190] ss:$8 sps:$4 sm:$0xff]   ;;  %v1346_v13 = vld [vmem:[%s1829_s3 + $0x1a4] ss:$8 sps:$4 sm:$0xff]  }
  0xf8   :  { %v266_v17 = vpop.f32.mrb[3].mxu1  ;;  %v1349_v15 = vld [vmem:[%s1829_s3 + $0x1b4] ss:$8 sps:$4 sm:$0xff]  }
  0xf9   :  { %v321_v44 = vrot.slane %v313_v14, %v320_v36  ;;  %v1344_v14 = vld [vmem:[%s1829_s3 + $0x1a0] ss:$8 sps:$4 sm:$0xff]   ;;  %v1352_v17 = vld [vmem:[%s1829_s3 + $0x1c4] ss:$8 sps:$4 sm:$0xff]  }
 0x115   :  { %v302_v37 = vpop.f32.mrb[4].mxu1 }
 0x116   :  { %v304_v40 = vpop.f32.mrb[5].mxu1 }
 0x117   :  { %v314_v41 = vcombine.low %v302_v37, %v304_v40  ;;  %v306_v42 = vpop.f32.mrb[6].mxu1 }
 0x118   :  { %v307_v43 = vpop.f32.mrb[7].mxu1 }
 0x119   :  { %v328_v45 = vrot.slane %v314_v41, %v320_v36 }
 0x11b   :  { %v329_v47 = vcombine.low %v321_v44, %v328_v45 }
 0x11d   :  { %v373_v48 = vadd.f32 %v371_v46, %v329_v47 }
 0x11f   :  { %v374_v49 = vmax.f32 %v373_v48, 0.0 }
 0x121   :  { %v376_v50 = vcombine.high %v374_v49, %v374_v49  ;;  %v383_v51 = vrot.slane %v374_v49, %v320_v36 }
 0x123   :  { %v391_v52 = vcombine.high %v383_v51, %v383_v51  ;;  %v1693_v53 = vrot.slane %v376_v50, %v320_v36  ;;  %v397_v57 = vpack.c.bf16 %v383_v51, %v383_v51 }
 0x125   :  { %v398_v54 = vpack.c.bf16 %v391_v52, %v391_v52  ;;  %v392_v56 = vcombine.high %v1693_v53, %v1693_v53  ;;  %v399_v28 = vpack.c.bf16 %v1693_v53, %v1693_v53 }
 0x127   :  { %829 = vmatprep.mubr.bf16.mxu0 %v398_v54  ;;  %v400_v59 = vpack.c.bf16 %v392_v56, %v392_v56 }
 0x128   :  { %830 = vmatmul.mubr.bf16.vlgmr.msra.gmra.mrb[0].mxu0 %v397_v57 }
 0x129   :  { %839 = vmatpush1.bf16.msra.mxu0 %v1314_v55  ;;  %870 = vmatprep.mubr.bf16.mxu0 %v400_v59 }
 0x12a   :  { %840 = vmatprep.subr.bf16.mxu0 %v1319_v58 }
 0x12d   :  { %841 = vmatpush1.bf16.msra.mxu0 %v1317_v60 }
 0x12e   :  { %842 = vmatprep.subr.bf16.mxu0 %v1322_v61 }
 0x131   :  { %843 = vmatpush1.bf16.msra.mxu0 %v1320_v62 }
 0x132   :  { %844 = vmatprep.subr.bf16.mxu0 %v1325_v63 }
 0x135   :  { %845 = vmatpush1.bf16.msra.mxu0 %v1323_v0 }
 0x136   :  { %846 = vmatprep.subr.bf16.mxu0 %v1328_v1 }
 0x139   :  { %847 = vmatpush1.bf16.msra.mxu0 %v1326_v2 }
 0x13a   :  { %848 = vmatprep.subr.bf16.mxu0 %v1331_v3 }
 0x13d   :  { %849 = vmatpush1.bf16.msra.mxu0 %v1329_v4 }
 0x13e   :  { %850 = vmatprep.subr.bf16.mxu0 %v1334_v5 }
 0x141   :  { %851 = vmatpush1.bf16.msra.mxu0 %v1332_v6 }
 0x142   :  { %852 = vmatprep.subr.bf16.mxu0 %v1337_v7 }
 0x145   :  { %853 = vmatpush1.bf16.msra.mxu0 %v1335_v8 }
 0x146   :  { %854 = vmatprep.subr.bf16.mxu0 %v1340_v9 }
 0x149   :  { %855 = vmatpush1.bf16.msra.mxu0 %v1338_v10 }
 0x14a   :  { %856 = vmatprep.subr.bf16.mxu0 %v1343_v11 }
 0x14d   :  { %857 = vmatpush1.bf16.msra.mxu0 %v1341_v12 }
 0x14e   :  { %858 = vmatprep.subr.bf16.mxu0 %v1346_v13 }
 0x151   :  { %859 = vmatpush1.bf16.msra.mxu0 %v1344_v14 }
 0x152   :  { %860 = vmatprep.subr.bf16.mxu0 %v1349_v15 }
 0x155   :  { %861 = vmatpush1.bf16.msra.mxu0 %v1347_v16 }
 0x156   :  { %862 = vmatprep.subr.bf16.mxu0 %v1352_v17 }
 0x159   :  { %863 = vmatpush1.bf16.msra.mxu0 %v1350_v18 }
 0x15a   :  { %864 = vmatprep.subr.bf16.mxu0 %v1355_v19 }
 0x15d   :  { %865 = vmatpush1.bf16.msra.mxu0 %v1353_v20 }
 0x15e   :  { %866 = vmatprep.subr.bf16.mxu0 %v1358_v24 }
 0x161   :  { %867 = vmatpush1.bf16.msra.mxu0 %v1356_v25 }
 0x162   :  { %868 = vmatprep.subr.bf16.mxu0 %v1361_v26 }
 0x165   :  { %869 = vmatpush1.bf16.msra.mxu0 %v1359_v27 }
 0x168   :  { %871 = vmatmul.mubr.bf16.vlgmr.msra.gmra.mrb[0].mxu0 %v399_v28 }
 0x23b   :  { %v872_v36 = vpop.f32.mrb[0].mxu0 }
 0x23c   :  { %v1209_v37 = vadd.f32 %v872_v36, %v470_v34  ;;  %v874_v38 = vpop.f32.mrb[1].mxu0 }
 0x23d   :  { %v1210_v39 = vadd.f32 %v874_v38, %v474_v35  ;;  %v876_v40 = vpop.f32.mrb[2].mxu0 }
 0x23e   :  { %v879_v41 = vmax.f32 %v1209_v37, 0.0  ;;  %v877_v42 = vpop.f32.mrb[3].mxu0 }
 0x23f   :  { %v880_v43 = vmax.f32 %v1210_v39, 0.0 }
 0x240   :  { %v881_v45 = vpack.c.bf16 %v879_v41, %v879_v41 }
 0x241   :  { %v882_v44 = vpack.c.bf16 %v880_v43, %v880_v43 }
 0x243   :  { %1050 = vmatprep.mubr.bf16.mxu1 %v882_v44 }
 0x244   :  { %1051 = vmatmul.mubr.bf16.vlgmr.msra.gmra.mrb[8].mxu1 %v881_v45 }
 0x317   :  { %v1203_v46 = vpop.f32.mrb[8].mxu1 }
 0x318   :  { %v1204_v47 = vpop.f32.mrb[9].mxu1 }
 0x319   :  { %v1205_v21 = vadd.f32 %v1204_v47, %v1203_v46  ;;  %v1206_v23 = vpop.f32.mrb[10].mxu1 }
 0x31a   :  { %v1207_v48 = vpop.f32.mrb[11].mxu1 }
 0x31b   :  { %v1053_v49 = vadd.f32 %v1205_v21, %v1170_v22 }
 0x31d   :  { %1059 = vst.msk [vmem:[#allocation3] sm:$0x3] %vm1058_vm0, %v1053_v49 }
 0x31e   :  { %1389 = shalt.err (!%p1386_p4)
}
 0x31f   :  { %s1390_s6 = scalar_lea.hbm %s1833_s7, 32 }
 0x320   :  { %p1391_p5 = scmp.ne.s32.totalorder %s1833_s7, %s1390_s6  ;;  %p1394_p6 = scmp.lt.u32.totalorder %s1390_s6, %s1833_s7 }
 0x322   :  { %p1396_p7 = pnand %p1394_p6, %p1391_p5 }
 0x324   :  { %1399 = shalt.err (!%p1396_p7)
}
 0x325   :  { %1069 = dma.vmem_to_hbm [thread:$0]  %s1067_s8, 32, %s1833_s7, [#allocation4]  }
 0x326   :  { %1400 = dma.done.wait [#allocation4], 32  }
 0x327   :  { %1401 = vsyncadd [#allocation4], 4294967264 }
 0x328   :  { %1073 = vsyncpa [#allocation4], 1 }

</bundles_post_ra>
